<compile_context>
chip_gen: v7x
topology: tpu7x:2x2x1
jax: 0.10.0
libtpu: 0.0.40
codegen_flags: <defaults>
</compile_context>

<pallas_src>
import jax
import jax.numpy as jnp
from jax.experimental import pallas as pl
from jax.experimental.pallas import tpu as pltpu


_T_CHUNK = 16   # timesteps per sequential grid step (amortizes ~0.35us/step)
_SUBLANE = 8    # sublane alignment for the batch dim


def _round_up(n, m):
    return (n + m - 1) // m * m


def _pick_tile(n, candidates):
    """Largest candidate that evenly divides n (n must be pre-padded to 128)."""
    for c in candidates:
        if n % c == 0:
            return c
    raise ValueError(f"no tile in {candidates} divides {n}; pad the dim first")


def _pick_batch_block(bp):
    """Prefer >=2 batch blocks (so the parallel batch axis can be megacore-
    sharded on v7x's two TensorCores) while keeping blocks sublane-aligned."""
    for c in (256, 128, 64, 32, 16, 8):
        if bp % c == 0 and bp // c >= 2:
            return c
    return bp


# --------------------------------------------------------------------------- #
# Kernel 1: recurrent LSTM over a chunk of timesteps                           #
# --------------------------------------------------------------------------- #
def _lstm_chunk_kernel(x_ref, wx_ref, wh_ref, b_ref, h_out_ref, h_scr, c_scr):
    """grid = (batch_block [parallel], time_chunk [arbitrary/sequential]).

    The time axis MUST stay sequential (it carries the recurrence via VMEM
    scratch); the batch axis is embarrassingly parallel across the recurrence.
    """
    @pl.when(pl.program_id(1) == 0)
    def _():
        h_scr[...] = jnp.zeros_like(h_scr)
        c_scr[...] = jnp.zeros_like(c_scr)

    n_b, t_chunk, e = x_ref.shape
    H = h_scr.shape[-1]

    # ---- hoisted, h-independent work (off the serial critical path) ----------
    # (n_b, T, E) -> (n_b*T, E) is layout-preserving because T_CHUNK % 8 == 0.
    # One well-shaped (n_b*T_CHUNK, E) x (E, 4H) MXU matmul replaces T_CHUNK
    # skinny matmuls + per-step lane concats on the serial path.
    x_all = x_ref[...].reshape(n_b * t_chunk, e)
    gates_x = jnp.dot(x_all, wx_ref[...], preferred_element_type=jnp.float32)
    gates_x = gates_x.reshape(n_b, t_chunk, 4 * H) + b_ref[...]   # bias added once

    w_h = wh_ref[...]                                             # (H, 4H) bf16

    # ---- serial recurrence: h/c live in vregs across the unrolled steps ------
    h = h_scr[...]                                                # (n_b, H) f32
    c = c_scr[...]
    for s in range(t_chunk):                                      # static unroll
        gates = gates_x[:, s, :] + jnp.dot(
            h.astype(w_h.dtype), w_h, preferred_element_type=jnp.float32)
        # PyTorch LSTM gate order [i, f, g, o]; gate math in f32 (v5e has no
        # bf16 VPU/EUP). For production sizes make H a multiple of 128 so these
        # slices are lane-aligned vreg selects.
        i_g = jax.nn.sigmoid(gates[:, 0 * H:1 * H])
        f_g = jax.nn.sigmoid(gates[:, 1 * H:2 * H])
        g_g = jnp.tanh(gates[:, 2 * H:3 * H])
        o_g = jax.nn.sigmoid(gates[:, 3 * H:4 * H])
        c = f_g * c + i_g * g_g
        h = o_g * jnp.tanh(c)
        h_out_ref[:, s, :] = h.astype(h_out_ref.dtype)
    h_scr[...] = h                                                # one store/chunk
    c_scr[...] = c


# --------------------------------------------------------------------------- #
# Kernel 2: vocab projection (hoisted out of the recurrence)                   #
# --------------------------------------------------------------------------- #
def _proj_kernel(h_ref, w_ref, b_ref, out_ref):
    """(m_tile, H) @ (H, v_tile) + bias — fully parallel over (vocab, rows)."""
    out_ref[...] = (
        jnp.dot(h_ref[...], w_ref[...], preferred_element_type=jnp.float32)
        + b_ref[...]
    ).astype(out_ref.dtype)


# --------------------------------------------------------------------------- #
# Wrapper mirroring DecoderRNN.forward(features, captions)                     #
# --------------------------------------------------------------------------- #
@jax.jit
def decoder_rnn_forward(features, captions, params):
    emb = params["embedding"]      # (V, E)  f32
    w_x = params["w_x"]            # (E, 4H) bf16  == W_ih^T
    w_h = params["w_h"]            # (H, 4H) bf16  == W_hh^T
    b = params["b"]                # (1, 4H) f32   == b_ih + b_hh
    w_out_t = params["w_out_t"]    # (H, V)  bf16
    b_out = params["b_out"]        # (1, V)  f32

    B, E = features.shape
    H = w_h.shape[0]
    V = w_out_t.shape[1]

    # ---- plain-JAX glue: embedding gather + sequence assembly (stays (B,T,E)) -
    caps = captions[:, :-1]
    embeds = jnp.take(emb, caps, axis=0)                               # (B, L-1, E)
    inputs = jnp.concatenate([features[:, None, :], embeds], axis=1)   # (B, T, E)
    inputs = inputs.astype(jnp.bfloat16)            # bf16 activations, f32 accum
    T = inputs.shape[1]

    # Pad batch to a sublane multiple and time to a chunk multiple; padding is
    # appended so it never influences valid rows/timesteps and is sliced off.
    # NOTE: padded batch rows compute sigmoid/tanh(bias) junk h/c — harmless
    # because rows are independent; never reduce over batch inside the kernel.
    Bp = _round_up(B, _SUBLANE)
    Tp = _round_up(T, _T_CHUNK)
    x = jnp.pad(inputs, ((0, Bp - B), (0, Tp - T), (0, 0)))            # (Bp, Tp, E)
    n_chunks = Tp // _T_CHUNK
    b_block = _pick_batch_block(Bp)

    # ---- kernel 1: recurrent LSTM, emits hidden states only --------------------
    hidden = pl.pallas_call(
        _lstm_chunk_kernel,
        out_shape=jax.ShapeDtypeStruct((Bp, Tp, H), jnp.bfloat16),
        grid_spec=pltpu.PrefetchScalarGridSpec(
            num_scalar_prefetch=0,
            grid=(Bp // b_block, n_chunks),        # (batch parallel, time serial)
            in_specs=[
                pl.BlockSpec((b_block, _T_CHUNK, E), lambda bb, t: (bb, t, 0)),
                # Constant-index operands: single-buffered (double buffer buys
                # nothing and doubles VMEM — matters on v7x's 64 MiB).
                pl.BlockSpec((E, 4 * H), lambda bb, t: (0, 0),
                             pipeline_mode=pl.Buffered(1)),
                pl.BlockSpec((H, 4 * H), lambda bb, t: (0, 0),
                             pipeline_mode=pl.Buffered(1)),
                pl.BlockSpec((1, 4 * H), lambda bb, t: (0, 0),
                             pipeline_mode=pl.Buffered(1)),
            ],
            out_specs=pl.BlockSpec((b_block, _T_CHUNK, H), lambda bb, t: (bb, t, 0)),
            scratch_shapes=[
                pltpu.VMEM((b_block, H), jnp.float32),   # h carry
                pltpu.VMEM((b_block, H), jnp.float32),   # c carry
            ],
        ),
        # Recurrence requires a sequential time axis; batch axis is parallel.
        compiler_params=pltpu.CompilerParams(
            dimension_semantics=("parallel", "arbitrary"),
            vmem_limit_bytes=64 * 1024 * 1024,
        ),
    )(x, w_x, w_h, b)

    # ---- kernel 2: vocab projection as one big parallel tiled matmul -----------
    M = Bp * Tp                                   # multiple of 128 by construction
    hidden2 = hidden.reshape(M, H)                # free row-major reshape

    Vp = _round_up(V, 128)                        # lane-dense output, no full-dim tile
    w_out_p = jnp.pad(w_out_t, ((0, 0), (0, Vp - V)))
    b_out_p = jnp.pad(b_out, ((0, 0), (0, Vp - V)))

    m_tile = _pick_tile(M, (1024, 512, 256, 128))
    v_tile = _pick_tile(Vp, (2048, 1024, 512, 256, 128))

    logits2 = pl.pallas_call(
        _proj_kernel,
        out_shape=jax.ShapeDtypeStruct((M, Vp), jnp.float32),
        grid_spec=pltpu.PrefetchScalarGridSpec(
            num_scalar_prefetch=0,
            # Vocab OUTER, rows INNER: the (H, V) weight is streamed from HBM
            # only once; only the much smaller (M, H) hidden is re-streamed.
            grid=(Vp // v_tile, M // m_tile),
            in_specs=[
                pl.BlockSpec((m_tile, H), lambda v, m: (m, 0)),
                pl.BlockSpec((H, v_tile), lambda v, m: (0, v)),
                pl.BlockSpec((1, v_tile), lambda v, m: (0, v)),
            ],
            out_specs=pl.BlockSpec((m_tile, v_tile), lambda v, m: (m, v)),
        ),
        compiler_params=pltpu.CompilerParams(
            dimension_semantics=("parallel", "parallel"),
            # Big tiles amortize per-step overhead; on v7x keep total
            # double-buffered tile bytes well under the 64 MiB physical VMEM.
            vmem_limit_bytes=64 * 1024 * 1024,
        ),
    )(hidden2, w_out_p, b_out_p)

    logits = logits2.reshape(Bp, Tp, Vp)          # free reshape; (B, T, V) layout
    return logits[:B, :T, :V]


# --------------------------------------------------------------------------- #
# Pure-JAX reference (lax.scan LSTM) for correctness checking                  #
# --------------------------------------------------------------------------- #
def _reference_forward(features, captions, params):
    emb = params["embedding"]
    w_x = params["w_x"].astype(jnp.float32)
    w_h = params["w_h"].astype(jnp.float32)
    b = params["b"]
    w_out = params["w_out_t"].astype(jnp.float32)
    b_out = params["b_out"]

    caps = captions[:, :-1]
    embeds = jnp.take(emb, caps, axis=0)
    inputs = jnp.concatenate([features[:, None, :], embeds], axis=1)
    x_tm = jnp.transpose(inputs, (1, 0, 2)).astype(jnp.float32)
    B = features.shape[0]
    H = w_h.shape[0]

    def step(carry, x_t):
        h, c = carry
        gates = x_t @ w_x + h @ w_h + b
        i_g = jax.nn.sigmoid(gates[:, 0 * H:1 * H])
        f_g = jax.nn.sigmoid(gates[:, 1 * H:2 * H])
        g_g = jnp.tanh(gates[:, 2 * H:3 * H])
        o_g = jax.nn.sigmoid(gates[:, 3 * H:4 * H])
        c_n = f_g * c + i_g * g_g
        h_n = o_g * jnp.tanh(c_n)
        return (h_n, c_n), h_n @ w_out + b_out

    init = (jnp.zeros((B, H), jnp.float32), jnp.zeros((B, H), jnp.float32))
    _, logits_tm = jax.lax.scan(step, init, x_tm)
    return jnp.transpose(logits_tm, (1, 0, 2))


def init_params(key, embed_size, hidden_size, vocab_size):
    ks = jax.random.split(key, 7)
    s = 0.1
    E, H, V = embed_size, hidden_size, vocab_size
    emb = s * jax.random.normal(ks[0], (V, E), jnp.float32)
    w_ih = s * jax.random.normal(ks[1], (4 * H, E), jnp.float32)
    w_hh = s * jax.random.normal(ks[2], (4 * H, H), jnp.float32)
    b_ih = s * jax.random.normal(ks[3], (4 * H,), jnp.float32)
    b_hh = s * jax.random.normal(ks[4], (4 * H,), jnp.float32)
    w_out = s * jax.random.normal(ks[5], (V, H), jnp.float32)
    b_out = s * jax.random.normal(ks[6], (V,), jnp.float32)
    # Split recurrent weights (PyTorch gate order [i, f, g, o]), bf16 operands
    # (native MXU dtype: 2x throughput, half the DMA/VMEM), f32 accumulation
    # inside the kernels; biases stay f32.
    return {
        "embedding": emb,
        "w_x": w_ih.T.astype(jnp.bfloat16),        # (E, 4H)
        "w_h": w_hh.T.astype(jnp.bfloat16),        # (H, 4H)
        "b": (b_ih + b_hh)[None, :],               # (1, 4H) f32
        "w_out_t": w_out.T.astype(jnp.bfloat16),   # (H, V)
        "b_out": b_out[None, :],                   # (1, V) f32
    }


if __name__ == "__main__":
    # small shapes consistent with DecoderRNN.forward
    B, E, H, V, L = 2, 32, 32, 128, 8     # batch, embed, hidden, vocab, caption len
    key = jax.random.PRNGKey(0)
    k_feat, k_cap, k_par = jax.random.split(key, 3)

    features = jax.random.normal(k_feat, (B, E), jnp.float32)
    captions = jax.random.randint(k_cap, (B, L), 0, V, jnp.int32)
    params = init_params(k_par, E, H, V)

    out = decoder_rnn_forward(features, captions, params)
    out = jax.block_until_ready(out)

    ref = _reference_forward(features, captions, params)
    assert out.shape == (B, L, V), out.shape
    # bf16 operands/activations vs f32 reference => loosened tolerance (expected).
    max_err = float(jnp.max(jnp.abs(out - ref)))
    assert jnp.allclose(out, ref, rtol=3e-2, atol=3e-2), f"mismatch, max_err={max_err}"

    # TODO(synk): sample() greedy decode is host-side control flow (argmax +
    # re-embedding per step) and is not part of forward(); not implemented as a
    # kernel.
    print("KERNEL_OK")
</pallas_src>

<mosaic_0001>
module attributes {stable_mosaic.version = 11 : i64} {
  func.func @_lstm_chunk_kernel(%arg0: i32, %arg1: i32, %arg2: memref<8x16x32xbf16, #tpu.memory_space<vmem>>, %arg3: memref<32x128xbf16, #tpu.memory_space<vmem>>, %arg4: memref<32x128xbf16, #tpu.memory_space<vmem>>, %arg5: memref<1x128xf32, #tpu.memory_space<vmem>>, %arg6: memref<8x16x32xbf16, #tpu.memory_space<vmem>>, %arg7: memref<8x32xf32, #tpu.memory_space<vmem>>, %arg8: memref<8x32xf32, #tpu.memory_space<vmem>>) attributes {dimension_semantics = [#tpu.dimension_semantics<parallel>, #tpu.dimension_semantics<arbitrary>], iteration_bounds = array<i64: 1, 1>, scalar_prefetch = 0 : i64, scratch_operands = 2 : i64, tpu.core_type = #tpu.core_type<tc>, window_params = [{transform_indices = @transform_0, window_bounds = array<i64: 8, 16, 32>}, {pipeline_mode = #tpu.pipeline_mode<synchronous>, transform_indices = @transform_1, window_bounds = array<i64: 32, 128>}, {pipeline_mode = #tpu.pipeline_mode<synchronous>, transform_indices = @transform_2, window_bounds = array<i64: 32, 128>}, {pipeline_mode = #tpu.pipeline_mode<synchronous>, transform_indices = @transform_3, window_bounds = array<i64: 1, 128>}, {transform_indices = @transform_4, window_bounds = array<i64: 8, 16, 32>}]} {
    %c0_i32 = arith.constant 0 : i32
    %0 = arith.cmpi eq, %arg1, %c0_i32 : i32
    %1 = arith.extui %0 : i1 to i32
    %c0_i32_0 = arith.constant 0 : i32
    %2 = arith.cmpi ne, %1, %c0_i32_0 : i32
    scf.if %2 {
      %cst_114 = arith.constant 0.000000e+00 : f32
      %561 = vector.broadcast %cst_114 : f32 to vector<8x32xf32>
      %c0_115 = arith.constant 0 : index
      %c0_116 = arith.constant 0 : index
      %562 = vector.load %arg7[%c0_115, %c0_116] : memref<8x32xf32, #tpu.memory_space<vmem>>, vector<8x32xf32>
      tpu.vector_store %arg7[%c0_115, %c0_116], %561 {strides = array<i32>} : memref<8x32xf32, #tpu.memory_space<vmem>>, vector<8x32xf32>,
      %cst_117 = arith.constant 0.000000e+00 : f32
      %563 = vector.broadcast %cst_117 : f32 to vector<8x32xf32>
      %c0_118 = arith.constant 0 : index
      %c0_119 = arith.constant 0 : index
      %564 = vector.load %arg8[%c0_118, %c0_119] : memref<8x32xf32, #tpu.memory_space<vmem>>, vector<8x32xf32>
      tpu.vector_store %arg8[%c0_118, %c0_119], %563 {strides = array<i32>} : memref<8x32xf32, #tpu.memory_space<vmem>>, vector<8x32xf32>,
    } else {
    }
    %c0 = arith.constant 0 : index
    %c0_1 = arith.constant 0 : index
    %c0_2 = arith.constant 0 : index
    %3 = vector.load %arg2[%c0, %c0_1, %c0_2] : memref<8x16x32xbf16, #tpu.memory_space<vmem>>, vector<8x16x32xbf16>
    %4 = vector.shape_cast %3 : vector<8x16x32xbf16> to vector<128x32xbf16>
    %c0_3 = arith.constant 0 : index
    %c0_4 = arith.constant 0 : index
    %5 = vector.load %arg3[%c0_3, %c0_4] : memref<32x128xbf16, #tpu.memory_space<vmem>>, vector<32x128xbf16>
    %cst = arith.constant dense<0.000000e+00> : vector<128x128xf32>
    %6 = tpu.matmul %4, %5, %cst {dimension_numbers = #tpu.dot_dimension_numbers<[1], [0], [0], [1], [0, 0, 1, 1], [], []>} : vector<128x32xbf16>, vector<32x128xbf16>, vector<128x128xf32> -> vector<128x128xf32>
    %7 = vector.shape_cast %6 : vector<128x128xf32> to vector<8x16x128xf32>
    %c0_5 = arith.constant 0 : index
    %c0_6 = arith.constant 0 : index
    %8 = vector.load %arg5[%c0_5, %c0_6] : memref<1x128xf32, #tpu.memory_space<vmem>>, vector<1x128xf32>
    %9 = vector.shape_cast %8 : vector<1x128xf32> to vector<1x1x128xf32>
    %10 = vector.broadcast %9 : vector<1x1x128xf32> to vector<8x16x128xf32>
    %11 = arith.addf %7, %10 : vector<8x16x128xf32>
    %c0_7 = arith.constant 0 : index
    %c0_8 = arith.constant 0 : index
    %12 = vector.load %arg4[%c0_7, %c0_8] : memref<32x128xbf16, #tpu.memory_space<vmem>>, vector<32x128xbf16>
    %c0_9 = arith.constant 0 : index
    %c0_10 = arith.constant 0 : index
    %13 = vector.load %arg7[%c0_9, %c0_10] : memref<8x32xf32, #tpu.memory_space<vmem>>, vector<8x32xf32>
    %c0_11 = arith.constant 0 : index
    %c0_12 = arith.constant 0 : index
    %14 = vector.load %arg8[%c0_11, %c0_12] : memref<8x32xf32, #tpu.memory_space<vmem>>, vector<8x32xf32>
    %15 = vector.extract_strided_slice %11 {offsets = [0, 0, 0], sizes = [8, 1, 128], strides = [1, 1, 1]} : vector<8x16x128xf32> to vector<8x1x128xf32>
    %16 = vector.shape_cast %15 : vector<8x1x128xf32> to vector<8x128xf32>
    %17 = arith.truncf %13 : vector<8x32xf32> to vector<8x32xbf16>
    %cst_13 = arith.constant dense<0.000000e+00> : vector<8x128xf32>
    %18 = tpu.matmul %17, %12, %cst_13 {dimension_numbers = #tpu.dot_dimension_numbers<[1], [0], [0], [1], [0, 0, 1, 1], [], []>} : vector<8x32xbf16>, vector<32x128xbf16>, vector<8x128xf32> -> vector<8x128xf32>
    %19 = arith.addf %16, %18 : vector<8x128xf32>
    %20 = vector.extract_strided_slice %19 {offsets = [0, 0], sizes = [8, 32], strides = [1, 1]} : vector<8x128xf32> to vector<8x32xf32>
    %21 = arith.negf %20 : vector<8x32xf32>
    %22 = math.exp %21 : vector<8x32xf32>
    %cst_14 = arith.constant 1.000000e+00 : f32
    %23 = vector.broadcast %cst_14 : f32 to vector<8x32xf32>
    %24 = arith.addf %23, %22 : vector<8x32xf32>
    %25 = arith.divf %23, %24 : vector<8x32xf32>
    %26 = vector.extract_strided_slice %19 {offsets = [0, 32], sizes = [8, 32], strides = [1, 1]} : vector<8x128xf32> to vector<8x32xf32>
    %27 = arith.negf %26 : vector<8x32xf32>
    %28 = math.exp %27 : vector<8x32xf32>
    %cst_15 = arith.constant 1.000000e+00 : f32
    %29 = vector.broadcast %cst_15 : f32 to vector<8x32xf32>
    %30 = arith.addf %29, %28 : vector<8x32xf32>
    %31 = arith.divf %29, %30 : vector<8x32xf32>
    %32 = vector.extract_strided_slice %19 {offsets = [0, 64], sizes = [8, 32], strides = [1, 1]} : vector<8x128xf32> to vector<8x32xf32>
    %33 = math.tanh %32 : vector<8x32xf32>
    %34 = vector.extract_strided_slice %19 {offsets = [0, 96], sizes = [8, 32], strides = [1, 1]} : vector<8x128xf32> to vector<8x32xf32>
    %35 = arith.negf %34 : vector<8x32xf32>
    %36 = math.exp %35 : vector<8x32xf32>
    %cst_16 = arith.constant 1.000000e+00 : f32
    %37 = vector.broadcast %cst_16 : f32 to vector<8x32xf32>
    %38 = arith.addf %37, %36 : vector<8x32xf32>
    %39 = arith.divf %37, %38 : vector<8x32xf32>
    %40 = arith.mulf %31, %14 : vector<8x32xf32>
    %41 = arith.mulf %25, %33 : vector<8x32xf32>
    %42 = arith.addf %40, %41 : vector<8x32xf32>
    %43 = math.tanh %42 : vector<8x32xf32>
    %44 = arith.mulf %39, %43 : vector<8x32xf32>
    %45 = arith.truncf %44 : vector<8x32xf32> to vector<8x32xbf16>
    %c0_17 = arith.constant 0 : index
    %c0_18 = arith.constant 0 : index
    %c0_19 = arith.constant 0 : index
    %46 = vector.load %arg6[%c0_17, %c0_18, %c0_19] : memref<8x16x32xbf16, #tpu.memory_space<vmem>>, vector<8x1x32xbf16>
    %47 = vector.shape_cast %46 : vector<8x1x32xbf16> to vector<8x32xbf16>
    %48 = vector.shape_cast %45 : vector<8x32xbf16> to vector<8x1x32xbf16>
    tpu.vector_store %arg6[%c0_17, %c0_18, %c0_19], %48 {strides = array<i32>} : memref<8x16x32xbf16, #tpu.memory_space<vmem>>, vector<8x1x32xbf16>,
    %49 = vector.extract_strided_slice %11 {offsets = [0, 1, 0], sizes = [8, 1, 128], strides = [1, 1, 1]} : vector<8x16x128xf32> to vector<8x1x128xf32>
    %50 = vector.shape_cast %49 : vector<8x1x128xf32> to vector<8x128xf32>
    %51 = arith.truncf %44 : vector<8x32xf32> to vector<8x32xbf16>
    %cst_20 = arith.constant dense<0.000000e+00> : vector<8x128xf32>
    %52 = tpu.matmul %51, %12, %cst_20 {dimension_numbers = #tpu.dot_dimension_numbers<[1], [0], [0], [1], [0, 0, 1, 1], [], []>} : vector<8x32xbf16>, vector<32x128xbf16>, vector<8x128xf32> -> vector<8x128xf32>
    %53 = arith.addf %50, %52 : vector<8x128xf32>
    %54 = vector.extract_strided_slice %53 {offsets = [0, 0], sizes = [8, 32], strides = [1, 1]} : vector<8x128xf32> to vector<8x32xf32>
    %55 = arith.negf %54 : vector<8x32xf32>
    %56 = math.exp %55 : vector<8x32xf32>
    %cst_21 = arith.constant 1.000000e+00 : f32
    %57 = vector.broadcast %cst_21 : f32 to vector<8x32xf32>
    %58 = arith.addf %57, %56 : vector<8x32xf32>
    %59 = arith.divf %57, %58 : vector<8x32xf32>
    %60 = vector.extract_strided_slice %53 {offsets = [0, 32], sizes = [8, 32], strides = [1, 1]} : vector<8x128xf32> to vector<8x32xf32>
    %61 = arith.negf %60 : vector<8x32xf32>
    %62 = math.exp %61 : vector<8x32xf32>
    %cst_22 = arith.constant 1.000000e+00 : f32
    %63 = vector.broadcast %cst_22 : f32 to vector<8x32xf32>
    %64 = arith.addf %63, %62 : vector<8x32xf32>
    %65 = arith.divf %63, %64 : vector<8x32xf32>
    %66 = vector.extract_strided_slice %53 {offsets = [0, 64], sizes = [8, 32], strides = [1, 1]} : vector<8x128xf32> to vector<8x32xf32>
    %67 = math.tanh %66 : vector<8x32xf32>
    %68 = vector.extract_strided_slice %53 {offsets = [0, 96], sizes = [8, 32], strides = [1, 1]} : vector<8x128xf32> to vector<8x32xf32>
    %69 = arith.negf %68 : vector<8x32xf32>
    %70 = math.exp %69 : vector<8x32xf32>
    %cst_23 = arith.constant 1.000000e+00 : f32
    %71 = vector.broadcast %cst_23 : f32 to vector<8x32xf32>
    %72 = arith.addf %71, %70 : vector<8x32xf32>
    %73 = arith.divf %71, %72 : vector<8x32xf32>
    %74 = arith.mulf %65, %42 : vector<8x32xf32>
    %75 = arith.mulf %59, %67 : vector<8x32xf32>
    %76 = arith.addf %74, %75 : vector<8x32xf32>
    %77 = math.tanh %76 : vector<8x32xf32>
    %78 = arith.mulf %73, %77 : vector<8x32xf32>
    %79 = arith.truncf %78 : vector<8x32xf32> to vector<8x32xbf16>
    %c0_24 = arith.constant 0 : index
    %c1 = arith.constant 1 : index
    %c0_25 = arith.constant 0 : index
    %80 = vector.load %arg6[%c0_24, %c1, %c0_25] : memref<8x16x32xbf16, #tpu.memory_space<vmem>>, vector<8x1x32xbf16>
    %81 = vector.shape_cast %80 : vector<8x1x32xbf16> to vector<8x32xbf16>
    %82 = vector.shape_cast %79 : vector<8x32xbf16> to vector<8x1x32xbf16>
    tpu.vector_store %arg6[%c0_24, %c1, %c0_25], %82 {strides = array<i32>} : memref<8x16x32xbf16, #tpu.memory_space<vmem>>, vector<8x1x32xbf16>,
    %83 = vector.extract_strided_slice %11 {offsets = [0, 2, 0], sizes = [8, 1, 128], strides = [1, 1, 1]} : vector<8x16x128xf32> to vector<8x1x128xf32>
    %84 = vector.shape_cast %83 : vector<8x1x128xf32> to vector<8x128xf32>
    %85 = arith.truncf %78 : vector<8x32xf32> to vector<8x32xbf16>
    %cst_26 = arith.constant dense<0.000000e+00> : vector<8x128xf32>
    %86 = tpu.matmul %85, %12, %cst_26 {dimension_numbers = #tpu.dot_dimension_numbers<[1], [0], [0], [1], [0, 0, 1, 1], [], []>} : vector<8x32xbf16>, vector<32x128xbf16>, vector<8x128xf32> -> vector<8x128xf32>
    %87 = arith.addf %84, %86 : vector<8x128xf32>
    %88 = vector.extract_strided_slice %87 {offsets = [0, 0], sizes = [8, 32], strides = [1, 1]} : vector<8x128xf32> to vector<8x32xf32>
    %89 = arith.negf %88 : vector<8x32xf32>
    %90 = math.exp %89 : vector<8x32xf32>
    %cst_27 = arith.constant 1.000000e+00 : f32
    %91 = vector.broadcast %cst_27 : f32 to vector<8x32xf32>
    %92 = arith.addf %91, %90 : vector<8x32xf32>
    %93 = arith.divf %91, %92 : vector<8x32xf32>
    %94 = vector.extract_strided_slice %87 {offsets = [0, 32], sizes = [8, 32], strides = [1, 1]} : vector<8x128xf32> to vector<8x32xf32>
    %95 = arith.negf %94 : vector<8x32xf32>
    %96 = math.exp %95 : vector<8x32xf32>
    %cst_28 = arith.constant 1.000000e+00 : f32
    %97 = vector.broadcast %cst_28 : f32 to vector<8x32xf32>
    %98 = arith.addf %97, %96 : vector<8x32xf32>
    %99 = arith.divf %97, %98 : vector<8x32xf32>
    %100 = vector.extract_strided_slice %87 {offsets = [0, 64], sizes = [8, 32], strides = [1, 1]} : vector<8x128xf32> to vector<8x32xf32>
    %101 = math.tanh %100 : vector<8x32xf32>
    %102 = vector.extract_strided_slice %87 {offsets = [0, 96], sizes = [8, 32], strides = [1, 1]} : vector<8x128xf32> to vector<8x32xf32>
    %103 = arith.negf %102 : vector<8x32xf32>
    %104 = math.exp %103 : vector<8x32xf32>
    %cst_29 = arith.constant 1.000000e+00 : f32
    %105 = vector.broadcast %cst_29 : f32 to vector<8x32xf32>
    %106 = arith.addf %105, %104 : vector<8x32xf32>
    %107 = arith.divf %105, %106 : vector<8x32xf32>
    %108 = arith.mulf %99, %76 : vector<8x32xf32>
    %109 = arith.mulf %93, %101 : vector<8x32xf32>
    %110 = arith.addf %108, %109 : vector<8x32xf32>
    %111 = math.tanh %110 : vector<8x32xf32>
    %112 = arith.mulf %107, %111 : vector<8x32xf32>
    %113 = arith.truncf %112 : vector<8x32xf32> to vector<8x32xbf16>
    %c0_30 = arith.constant 0 : index
    %c2 = arith.constant 2 : index
    %c0_31 = arith.constant 0 : index
    %114 = vector.load %arg6[%c0_30, %c2, %c0_31] : memref<8x16x32xbf16, #tpu.memory_space<vmem>>, vector<8x1x32xbf16>
    %115 = vector.shape_cast %114 : vector<8x1x32xbf16> to vector<8x32xbf16>
    %116 = vector.shape_cast %113 : vector<8x32xbf16> to vector<8x1x32xbf16>
    tpu.vector_store %arg6[%c0_30, %c2, %c0_31], %116 {strides = array<i32>} : memref<8x16x32xbf16, #tpu.memory_space<vmem>>, vector<8x1x32xbf16>,
    %117 = vector.extract_strided_slice %11 {offsets = [0, 3, 0], sizes = [8, 1, 128], strides = [1, 1, 1]} : vector<8x16x128xf32> to vector<8x1x128xf32>
    %118 = vector.shape_cast %117 : vector<8x1x128xf32> to vector<8x128xf32>
    %119 = arith.truncf %112 : vector<8x32xf32> to vector<8x32xbf16>
    %cst_32 = arith.constant dense<0.000000e+00> : vector<8x128xf32>
    %120 = tpu.matmul %119, %12, %cst_32 {dimension_numbers = #tpu.dot_dimension_numbers<[1], [0], [0], [1], [0, 0, 1, 1], [], []>} : vector<8x32xbf16>, vector<32x128xbf16>, vector<8x128xf32> -> vector<8x128xf32>
    %121 = arith.addf %118, %120 : vector<8x128xf32>
    %122 = vector.extract_strided_slice %121 {offsets = [0, 0], sizes = [8, 32], strides = [1, 1]} : vector<8x128xf32> to vector<8x32xf32>
    %123 = arith.negf %122 : vector<8x32xf32>
    %124 = math.exp %123 : vector<8x32xf32>
    %cst_33 = arith.constant 1.000000e+00 : f32
    %125 = vector.broadcast %cst_33 : f32 to vector<8x32xf32>
    %126 = arith.addf %125, %124 : vector<8x32xf32>
    %127 = arith.divf %125, %126 : vector<8x32xf32>
    %128 = vector.extract_strided_slice %121 {offsets = [0, 32], sizes = [8, 32], strides = [1, 1]} : vector<8x128xf32> to vector<8x32xf32>
    %129 = arith.negf %128 : vector<8x32xf32>
    %130 = math.exp %129 : vector<8x32xf32>
    %cst_34 = arith.constant 1.000000e+00 : f32
    %131 = vector.broadcast %cst_34 : f32 to vector<8x32xf32>
    %132 = arith.addf %131, %130 : vector<8x32xf32>
    %133 = arith.divf %131, %132 : vector<8x32xf32>
    %134 = vector.extract_strided_slice %121 {offsets = [0, 64], sizes = [8, 32], strides = [1, 1]} : vector<8x128xf32> to vector<8x32xf32>
    %135 = math.tanh %134 : vector<8x32xf32>
    %136 = vector.extract_strided_slice %121 {offsets = [0, 96], sizes = [8, 32], strides = [1, 1]} : vector<8x128xf32> to vector<8x32xf32>
    %137 = arith.negf %136 : vector<8x32xf32>
    %138 = math.exp %137 : vector<8x32xf32>
    %cst_35 = arith.constant 1.000000e+00 : f32
    %139 = vector.broadcast %cst_35 : f32 to vector<8x32xf32>
    %140 = arith.addf %139, %138 : vector<8x32xf32>
    %141 = arith.divf %139, %140 : vector<8x32xf32>
    %142 = arith.mulf %133, %110 : vector<8x32xf32>
    %143 = arith.mulf %127, %135 : vector<8x32xf32>
    %144 = arith.addf %142, %143 : vector<8x32xf32>
    %145 = math.tanh %144 : vector<8x32xf32>
    %146 = arith.mulf %141, %145 : vector<8x32xf32>
    %147 = arith.truncf %146 : vector<8x32xf32> to vector<8x32xbf16>
    %c0_36 = arith.constant 0 : index
    %c3 = arith.constant 3 : index
    %c0_37 = arith.constant 0 : index
    %148 = vector.load %arg6[%c0_36, %c3, %c0_37] : memref<8x16x32xbf16, #tpu.memory_space<vmem>>, vector<8x1x32xbf16>
    %149 = vector.shape_cast %148 : vector<8x1x32xbf16> to vector<8x32xbf16>
    %150 = vector.shape_cast %147 : vector<8x32xbf16> to vector<8x1x32xbf16>
    tpu.vector_store %arg6[%c0_36, %c3, %c0_37], %150 {strides = array<i32>} : memref<8x16x32xbf16, #tpu.memory_space<vmem>>, vector<8x1x32xbf16>,
    %151 = vector.extract_strided_slice %11 {offsets = [0, 4, 0], sizes = [8, 1, 128], strides = [1, 1, 1]} : vector<8x16x128xf32> to vector<8x1x128xf32>
    %152 = vector.shape_cast %151 : vector<8x1x128xf32> to vector<8x128xf32>
    %153 = arith.truncf %146 : vector<8x32xf32> to vector<8x32xbf16>
    %cst_38 = arith.constant dense<0.000000e+00> : vector<8x128xf32>
    %154 = tpu.matmul %153, %12, %cst_38 {dimension_numbers = #tpu.dot_dimension_numbers<[1], [0], [0], [1], [0, 0, 1, 1], [], []>} : vector<8x32xbf16>, vector<32x128xbf16>, vector<8x128xf32> -> vector<8x128xf32>
    %155 = arith.addf %152, %154 : vector<8x128xf32>
    %156 = vector.extract_strided_slice %155 {offsets = [0, 0], sizes = [8, 32], strides = [1, 1]} : vector<8x128xf32> to vector<8x32xf32>
    %157 = arith.negf %156 : vector<8x32xf32>
    %158 = math.exp %157 : vector<8x32xf32>
    %cst_39 = arith.constant 1.000000e+00 : f32
    %159 = vector.broadcast %cst_39 : f32 to vector<8x32xf32>
    %160 = arith.addf %159, %158 : vector<8x32xf32>
    %161 = arith.divf %159, %160 : vector<8x32xf32>
    %162 = vector.extract_strided_slice %155 {offsets = [0, 32], sizes = [8, 32], strides = [1, 1]} : vector<8x128xf32> to vector<8x32xf32>
    %163 = arith.negf %162 : vector<8x32xf32>
    %164 = math.exp %163 : vector<8x32xf32>
    %cst_40 = arith.constant 1.000000e+00 : f32
    %165 = vector.broadcast %cst_40 : f32 to vector<8x32xf32>
    %166 = arith.addf %165, %164 : vector<8x32xf32>
    %167 = arith.divf %165, %166 : vector<8x32xf32>
    %168 = vector.extract_strided_slice %155 {offsets = [0, 64], sizes = [8, 32], strides = [1, 1]} : vector<8x128xf32> to vector<8x32xf32>
    %169 = math.tanh %168 : vector<8x32xf32>
    %170 = vector.extract_strided_slice %155 {offsets = [0, 96], sizes = [8, 32], strides = [1, 1]} : vector<8x128xf32> to vector<8x32xf32>
    %171 = arith.negf %170 : vector<8x32xf32>
    %172 = math.exp %171 : vector<8x32xf32>
    %cst_41 = arith.constant 1.000000e+00 : f32
    %173 = vector.broadcast %cst_41 : f32 to vector<8x32xf32>
    %174 = arith.addf %173, %172 : vector<8x32xf32>
    %175 = arith.divf %173, %174 : vector<8x32xf32>
    %176 = arith.mulf %167, %144 : vector<8x32xf32>
    %177 = arith.mulf %161, %169 : vector<8x32xf32>
    %178 = arith.addf %176, %177 : vector<8x32xf32>
    %179 = math.tanh %178 : vector<8x32xf32>
    %180 = arith.mulf %175, %179 : vector<8x32xf32>
    %181 = arith.truncf %180 : vector<8x32xf32> to vector<8x32xbf16>
    %c0_42 = arith.constant 0 : index
    %c4 = arith.constant 4 : index
    %c0_43 = arith.constant 0 : index
    %182 = vector.load %arg6[%c0_42, %c4, %c0_43] : memref<8x16x32xbf16, #tpu.memory_space<vmem>>, vector<8x1x32xbf16>
    %183 = vector.shape_cast %182 : vector<8x1x32xbf16> to vector<8x32xbf16>
    %184 = vector.shape_cast %181 : vector<8x32xbf16> to vector<8x1x32xbf16>
    tpu.vector_store %arg6[%c0_42, %c4, %c0_43], %184 {strides = array<i32>} : memref<8x16x32xbf16, #tpu.memory_space<vmem>>, vector<8x1x32xbf16>,
    %185 = vector.extract_strided_slice %11 {offsets = [0, 5, 0], sizes = [8, 1, 128], strides = [1, 1, 1]} : vector<8x16x128xf32> to vector<8x1x128xf32>
    %186 = vector.shape_cast %185 : vector<8x1x128xf32> to vector<8x128xf32>
    %187 = arith.truncf %180 : vector<8x32xf32> to vector<8x32xbf16>
    %cst_44 = arith.constant dense<0.000000e+00> : vector<8x128xf32>
    %188 = tpu.matmul %187, %12, %cst_44 {dimension_numbers = #tpu.dot_dimension_numbers<[1], [0], [0], [1], [0, 0, 1, 1], [], []>} : vector<8x32xbf16>, vector<32x128xbf16>, vector<8x128xf32> -> vector<8x128xf32>
    %189 = arith.addf %186, %188 : vector<8x128xf32>
    %190 = vector.extract_strided_slice %189 {offsets = [0, 0], sizes = [8, 32], strides = [1, 1]} : vector<8x128xf32> to vector<8x32xf32>
    %191 = arith.negf %190 : vector<8x32xf32>
    %192 = math.exp %191 : vector<8x32xf32>
    %cst_45 = arith.constant 1.000000e+00 : f32
    %193 = vector.broadcast %cst_45 : f32 to vector<8x32xf32>
    %194 = arith.addf %193, %192 : vector<8x32xf32>
    %195 = arith.divf %193, %194 : vector<8x32xf32>
    %196 = vector.extract_strided_slice %189 {offsets = [0, 32], sizes = [8, 32], strides = [1, 1]} : vector<8x128xf32> to vector<8x32xf32>
    %197 = arith.negf %196 : vector<8x32xf32>
    %198 = math.exp %197 : vector<8x32xf32>
    %cst_46 = arith.constant 1.000000e+00 : f32
    %199 = vector.broadcast %cst_46 : f32 to vector<8x32xf32>
    %200 = arith.addf %199, %198 : vector<8x32xf32>
    %201 = arith.divf %199, %200 : vector<8x32xf32>
    %202 = vector.extract_strided_slice %189 {offsets = [0, 64], sizes = [8, 32], strides = [1, 1]} : vector<8x128xf32> to vector<8x32xf32>
    %203 = math.tanh %202 : vector<8x32xf32>
    %204 = vector.extract_strided_slice %189 {offsets = [0, 96], sizes = [8, 32], strides = [1, 1]} : vector<8x128xf32> to vector<8x32xf32>
    %205 = arith.negf %204 : vector<8x32xf32>
    %206 = math.exp %205 : vector<8x32xf32>
    %cst_47 = arith.constant 1.000000e+00 : f32
    %207 = vector.broadcast %cst_47 : f32 to vector<8x32xf32>
    %208 = arith.addf %207, %206 : vector<8x32xf32>
    %209 = arith.divf %207, %208 : vector<8x32xf32>
    %210 = arith.mulf %201, %178 : vector<8x32xf32>
    %211 = arith.mulf %195, %203 : vector<8x32xf32>
    %212 = arith.addf %210, %211 : vector<8x32xf32>
    %213 = math.tanh %212 : vector<8x32xf32>
    %214 = arith.mulf %209, %213 : vector<8x32xf32>
    %215 = arith.truncf %214 : vector<8x32xf32> to vector<8x32xbf16>
    %c0_48 = arith.constant 0 : index
    %c5 = arith.constant 5 : index
    %c0_49 = arith.constant 0 : index
    %216 = vector.load %arg6[%c0_48, %c5, %c0_49] : memref<8x16x32xbf16, #tpu.memory_space<vmem>>, vector<8x1x32xbf16>
    %217 = vector.shape_cast %216 : vector<8x1x32xbf16> to vector<8x32xbf16>
    %218 = vector.shape_cast %215 : vector<8x32xbf16> to vector<8x1x32xbf16>
    tpu.vector_store %arg6[%c0_48, %c5, %c0_49], %218 {strides = array<i32>} : memref<8x16x32xbf16, #tpu.memory_space<vmem>>, vector<8x1x32xbf16>,
    %219 = vector.extract_strided_slice %11 {offsets = [0, 6, 0], sizes = [8, 1, 128], strides = [1, 1, 1]} : vector<8x16x128xf32> to vector<8x1x128xf32>
    %220 = vector.shape_cast %219 : vector<8x1x128xf32> to vector<8x128xf32>
    %221 = arith.truncf %214 : vector<8x32xf32> to vector<8x32xbf16>
    %cst_50 = arith.constant dense<0.000000e+00> : vector<8x128xf32>
    %222 = tpu.matmul %221, %12, %cst_50 {dimension_numbers = #tpu.dot_dimension_numbers<[1], [0], [0], [1], [0, 0, 1, 1], [], []>} : vector<8x32xbf16>, vector<32x128xbf16>, vector<8x128xf32> -> vector<8x128xf32>
    %223 = arith.addf %220, %222 : vector<8x128xf32>
    %224 = vector.extract_strided_slice %223 {offsets = [0, 0], sizes = [8, 32], strides = [1, 1]} : vector<8x128xf32> to vector<8x32xf32>
    %225 = arith.negf %224 : vector<8x32xf32>
    %226 = math.exp %225 : vector<8x32xf32>
    %cst_51 = arith.constant 1.000000e+00 : f32
    %227 = vector.broadcast %cst_51 : f32 to vector<8x32xf32>
    %228 = arith.addf %227, %226 : vector<8x32xf32>
    %229 = arith.divf %227, %228 : vector<8x32xf32>
    %230 = vector.extract_strided_slice %223 {offsets = [0, 32], sizes = [8, 32], strides = [1, 1]} : vector<8x128xf32> to vector<8x32xf32>
    %231 = arith.negf %230 : vector<8x32xf32>
    %232 = math.exp %231 : vector<8x32xf32>
    %cst_52 = arith.constant 1.000000e+00 : f32
    %233 = vector.broadcast %cst_52 : f32 to vector<8x32xf32>
    %234 = arith.addf %233, %232 : vector<8x32xf32>
    %235 = arith.divf %233, %234 : vector<8x32xf32>
    %236 = vector.extract_strided_slice %223 {offsets = [0, 64], sizes = [8, 32], strides = [1, 1]} : vector<8x128xf32> to vector<8x32xf32>
    %237 = math.tanh %236 : vector<8x32xf32>
    %238 = vector.extract_strided_slice %223 {offsets = [0, 96], sizes = [8, 32], strides = [1, 1]} : vector<8x128xf32> to vector<8x32xf32>
    %239 = arith.negf %238 : vector<8x32xf32>
    %240 = math.exp %239 : vector<8x32xf32>
    %cst_53 = arith.constant 1.000000e+00 : f32
    %241 = vector.broadcast %cst_53 : f32 to vector<8x32xf32>
    %242 = arith.addf %241, %240 : vector<8x32xf32>
    %243 = arith.divf %241, %242 : vector<8x32xf32>
    %244 = arith.mulf %235, %212 : vector<8x32xf32>
    %245 = arith.mulf %229, %237 : vector<8x32xf32>
    %246 = arith.addf %244, %245 : vector<8x32xf32>
    %247 = math.tanh %246 : vector<8x32xf32>
    %248 = arith.mulf %243, %247 : vector<8x32xf32>
    %249 = arith.truncf %248 : vector<8x32xf32> to vector<8x32xbf16>
    %c0_54 = arith.constant 0 : index
    %c6 = arith.constant 6 : index
    %c0_55 = arith.constant 0 : index
    %250 = vector.load %arg6[%c0_54, %c6, %c0_55] : memref<8x16x32xbf16, #tpu.memory_space<vmem>>, vector<8x1x32xbf16>
    %251 = vector.shape_cast %250 : vector<8x1x32xbf16> to vector<8x32xbf16>
    %252 = vector.shape_cast %249 : vector<8x32xbf16> to vector<8x1x32xbf16>
    tpu.vector_store %arg6[%c0_54, %c6, %c0_55], %252 {strides = array<i32>} : memref<8x16x32xbf16, #tpu.memory_space<vmem>>, vector<8x1x32xbf16>,
    %253 = vector.extract_strided_slice %11 {offsets = [0, 7, 0], sizes = [8, 1, 128], strides = [1, 1, 1]} : vector<8x16x128xf32> to vector<8x1x128xf32>
    %254 = vector.shape_cast %253 : vector<8x1x128xf32> to vector<8x128xf32>
    %255 = arith.truncf %248 : vector<8x32xf32> to vector<8x32xbf16>
    %cst_56 = arith.constant dense<0.000000e+00> : vector<8x128xf32>
    %256 = tpu.matmul %255, %12, %cst_56 {dimension_numbers = #tpu.dot_dimension_numbers<[1], [0], [0], [1], [0, 0, 1, 1], [], []>} : vector<8x32xbf16>, vector<32x128xbf16>, vector<8x128xf32> -> vector<8x128xf32>
    %257 = arith.addf %254, %256 : vector<8x128xf32>
    %258 = vector.extract_strided_slice %257 {offsets = [0, 0], sizes = [8, 32], strides = [1, 1]} : vector<8x128xf32> to vector<8x32xf32>
    %259 = arith.negf %258 : vector<8x32xf32>
    %260 = math.exp %259 : vector<8x32xf32>
    %cst_57 = arith.constant 1.000000e+00 : f32
    %261 = vector.broadcast %cst_57 : f32 to vector<8x32xf32>
    %262 = arith.addf %261, %260 : vector<8x32xf32>
    %263 = arith.divf %261, %262 : vector<8x32xf32>
    %264 = vector.extract_strided_slice %257 {offsets = [0, 32], sizes = [8, 32], strides = [1, 1]} : vector<8x128xf32> to vector<8x32xf32>
    %265 = arith.negf %264 : vector<8x32xf32>
    %266 = math.exp %265 : vector<8x32xf32>
    %cst_58 = arith.constant 1.000000e+00 : f32
    %267 = vector.broadcast %cst_58 : f32 to vector<8x32xf32>
    %268 = arith.addf %267, %266 : vector<8x32xf32>
    %269 = arith.divf %267, %268 : vector<8x32xf32>
    %270 = vector.extract_strided_slice %257 {offsets = [0, 64], sizes = [8, 32], strides = [1, 1]} : vector<8x128xf32> to vector<8x32xf32>
    %271 = math.tanh %270 : vector<8x32xf32>
    %272 = vector.extract_strided_slice %257 {offsets = [0, 96], sizes = [8, 32], strides = [1, 1]} : vector<8x128xf32> to vector<8x32xf32>
    %273 = arith.negf %272 : vector<8x32xf32>
    %274 = math.exp %273 : vector<8x32xf32>
    %cst_59 = arith.constant 1.000000e+00 : f32
    %275 = vector.broadcast %cst_59 : f32 to vector<8x32xf32>
    %276 = arith.addf %275, %274 : vector<8x32xf32>
    %277 = arith.divf %275, %276 : vector<8x32xf32>
    %278 = arith.mulf %269, %246 : vector<8x32xf32>
    %279 = arith.mulf %263, %271 : vector<8x32xf32>
    %280 = arith.addf %278, %279 : vector<8x32xf32>
    %281 = math.tanh %280 : vector<8x32xf32>
    %282 = arith.mulf %277, %281 : vector<8x32xf32>
    %283 = arith.truncf %282 : vector<8x32xf32> to vector<8x32xbf16>
    %c0_60 = arith.constant 0 : index
    %c7 = arith.constant 7 : index
    %c0_61 = arith.constant 0 : index
    %284 = vector.load %arg6[%c0_60, %c7, %c0_61] : memref<8x16x32xbf16, #tpu.memory_space<vmem>>, vector<8x1x32xbf16>
    %285 = vector.shape_cast %284 : vector<8x1x32xbf16> to vector<8x32xbf16>
    %286 = vector.shape_cast %283 : vector<8x32xbf16> to vector<8x1x32xbf16>
    tpu.vector_store %arg6[%c0_60, %c7, %c0_61], %286 {strides = array<i32>} : memref<8x16x32xbf16, #tpu.memory_space<vmem>>, vector<8x1x32xbf16>,
    %287 = vector.extract_strided_slice %11 {offsets = [0, 8, 0], sizes = [8, 1, 128], strides = [1, 1, 1]} : vector<8x16x128xf32> to vector<8x1x128xf32>
    %288 = vector.shape_cast %287 : vector<8x1x128xf32> to vector<8x128xf32>
    %289 = arith.truncf %282 : vector<8x32xf32> to vector<8x32xbf16>
    %cst_62 = arith.constant dense<0.000000e+00> : vector<8x128xf32>
    %290 = tpu.matmul %289, %12, %cst_62 {dimension_numbers = #tpu.dot_dimension_numbers<[1], [0], [0], [1], [0, 0, 1, 1], [], []>} : vector<8x32xbf16>, vector<32x128xbf16>, vector<8x128xf32> -> vector<8x128xf32>
    %291 = arith.addf %288, %290 : vector<8x128xf32>
    %292 = vector.extract_strided_slice %291 {offsets = [0, 0], sizes = [8, 32], strides = [1, 1]} : vector<8x128xf32> to vector<8x32xf32>
    %293 = arith.negf %292 : vector<8x32xf32>
    %294 = math.exp %293 : vector<8x32xf32>
    %cst_63 = arith.constant 1.000000e+00 : f32
    %295 = vector.broadcast %cst_63 : f32 to vector<8x32xf32>
    %296 = arith.addf %295, %294 : vector<8x32xf32>
    %297 = arith.divf %295, %296 : vector<8x32xf32>
    %298 = vector.extract_strided_slice %291 {offsets = [0, 32], sizes = [8, 32], strides = [1, 1]} : vector<8x128xf32> to vector<8x32xf32>
    %299 = arith.negf %298 : vector<8x32xf32>
    %300 = math.exp %299 : vector<8x32xf32>
    %cst_64 = arith.constant 1.000000e+00 : f32
    %301 = vector.broadcast %cst_64 : f32 to vector<8x32xf32>
    %302 = arith.addf %301, %300 : vector<8x32xf32>
    %303 = arith.divf %301, %302 : vector<8x32xf32>
    %304 = vector.extract_strided_slice %291 {offsets = [0, 64], sizes = [8, 32], strides = [1, 1]} : vector<8x128xf32> to vector<8x32xf32>
    %305 = math.tanh %304 : vector<8x32xf32>
    %306 = vector.extract_strided_slice %291 {offsets = [0, 96], sizes = [8, 32], strides = [1, 1]} : vector<8x128xf32> to vector<8x32xf32>
    %307 = arith.negf %306 : vector<8x32xf32>
    %308 = math.exp %307 : vector<8x32xf32>
    %cst_65 = arith.constant 1.000000e+00 : f32
    %309 = vector.broadcast %cst_65 : f32 to vector<8x32xf32>
    %310 = arith.addf %309, %308 : vector<8x32xf32>
    %311 = arith.divf %309, %310 : vector<8x32xf32>
    %312 = arith.mulf %303, %280 : vector<8x32xf32>
    %313 = arith.mulf %297, %305 : vector<8x32xf32>
    %314 = arith.addf %312, %313 : vector<8x32xf32>
    %315 = math.tanh %314 : vector<8x32xf32>
    %316 = arith.mulf %311, %315 : vector<8x32xf32>
    %317 = arith.truncf %316 : vector<8x32xf32> to vector<8x32xbf16>
    %c0_66 = arith.constant 0 : index
    %c8 = arith.constant 8 : index
    %c0_67 = arith.constant 0 : index
    %318 = vector.load %arg6[%c0_66, %c8, %c0_67] : memref<8x16x32xbf16, #tpu.memory_space<vmem>>, vector<8x1x32xbf16>
    %319 = vector.shape_cast %318 : vector<8x1x32xbf16> to vector<8x32xbf16>
    %320 = vector.shape_cast %317 : vector<8x32xbf16> to vector<8x1x32xbf16>
    tpu.vector_store %arg6[%c0_66, %c8, %c0_67], %320 {strides = array<i32>} : memref<8x16x32xbf16, #tpu.memory_space<vmem>>, vector<8x1x32xbf16>,
    %321 = vector.extract_strided_slice %11 {offsets = [0, 9, 0], sizes = [8, 1, 128], strides = [1, 1, 1]} : vector<8x16x128xf32> to vector<8x1x128xf32>
    %322 = vector.shape_cast %321 : vector<8x1x128xf32> to vector<8x128xf32>
    %323 = arith.truncf %316 : vector<8x32xf32> to vector<8x32xbf16>
    %cst_68 = arith.constant dense<0.000000e+00> : vector<8x128xf32>
    %324 = tpu.matmul %323, %12, %cst_68 {dimension_numbers = #tpu.dot_dimension_numbers<[1], [0], [0], [1], [0, 0, 1, 1], [], []>} : vector<8x32xbf16>, vector<32x128xbf16>, vector<8x128xf32> -> vector<8x128xf32>
    %325 = arith.addf %322, %324 : vector<8x128xf32>
    %326 = vector.extract_strided_slice %325 {offsets = [0, 0], sizes = [8, 32], strides = [1, 1]} : vector<8x128xf32> to vector<8x32xf32>
    %327 = arith.negf %326 : vector<8x32xf32>
    %328 = math.exp %327 : vector<8x32xf32>
    %cst_69 = arith.constant 1.000000e+00 : f32
    %329 = vector.broadcast %cst_69 : f32 to vector<8x32xf32>
    %330 = arith.addf %329, %328 : vector<8x32xf32>
    %331 = arith.divf %329, %330 : vector<8x32xf32>
    %332 = vector.extract_strided_slice %325 {offsets = [0, 32], sizes = [8, 32], strides = [1, 1]} : vector<8x128xf32> to vector<8x32xf32>
    %333 = arith.negf %332 : vector<8x32xf32>
    %334 = math.exp %333 : vector<8x32xf32>
    %cst_70 = arith.constant 1.000000e+00 : f32
    %335 = vector.broadcast %cst_70 : f32 to vector<8x32xf32>
    %336 = arith.addf %335, %334 : vector<8x32xf32>
    %337 = arith.divf %335, %336 : vector<8x32xf32>
    %338 = vector.extract_strided_slice %325 {offsets = [0, 64], sizes = [8, 32], strides = [1, 1]} : vector<8x128xf32> to vector<8x32xf32>
    %339 = math.tanh %338 : vector<8x32xf32>
    %340 = vector.extract_strided_slice %325 {offsets = [0, 96], sizes = [8, 32], strides = [1, 1]} : vector<8x128xf32> to vector<8x32xf32>
    %341 = arith.negf %340 : vector<8x32xf32>
    %342 = math.exp %341 : vector<8x32xf32>
    %cst_71 = arith.constant 1.000000e+00 : f32
    %343 = vector.broadcast %cst_71 : f32 to vector<8x32xf32>
    %344 = arith.addf %343, %342 : vector<8x32xf32>
    %345 = arith.divf %343, %344 : vector<8x32xf32>
    %346 = arith.mulf %337, %314 : vector<8x32xf32>
    %347 = arith.mulf %331, %339 : vector<8x32xf32>
    %348 = arith.addf %346, %347 : vector<8x32xf32>
    %349 = math.tanh %348 : vector<8x32xf32>
    %350 = arith.mulf %345, %349 : vector<8x32xf32>
    %351 = arith.truncf %350 : vector<8x32xf32> to vector<8x32xbf16>
    %c0_72 = arith.constant 0 : index
    %c9 = arith.constant 9 : index
    %c0_73 = arith.constant 0 : index
    %352 = vector.load %arg6[%c0_72, %c9, %c0_73] : memref<8x16x32xbf16, #tpu.memory_space<vmem>>, vector<8x1x32xbf16>
    %353 = vector.shape_cast %352 : vector<8x1x32xbf16> to vector<8x32xbf16>
    %354 = vector.shape_cast %351 : vector<8x32xbf16> to vector<8x1x32xbf16>
    tpu.vector_store %arg6[%c0_72, %c9, %c0_73], %354 {strides = array<i32>} : memref<8x16x32xbf16, #tpu.memory_space<vmem>>, vector<8x1x32xbf16>,
    %355 = vector.extract_strided_slice %11 {offsets = [0, 10, 0], sizes = [8, 1, 128], strides = [1, 1, 1]} : vector<8x16x128xf32> to vector<8x1x128xf32>
    %356 = vector.shape_cast %355 : vector<8x1x128xf32> to vector<8x128xf32>
    %357 = arith.truncf %350 : vector<8x32xf32> to vector<8x32xbf16>
    %cst_74 = arith.constant dense<0.000000e+00> : vector<8x128xf32>
    %358 = tpu.matmul %357, %12, %cst_74 {dimension_numbers = #tpu.dot_dimension_numbers<[1], [0], [0], [1], [0, 0, 1, 1], [], []>} : vector<8x32xbf16>, vector<32x128xbf16>, vector<8x128xf32> -> vector<8x128xf32>
    %359 = arith.addf %356, %358 : vector<8x128xf32>
    %360 = vector.extract_strided_slice %359 {offsets = [0, 0], sizes = [8, 32], strides = [1, 1]} : vector<8x128xf32> to vector<8x32xf32>
    %361 = arith.negf %360 : vector<8x32xf32>
    %362 = math.exp %361 : vector<8x32xf32>
    %cst_75 = arith.constant 1.000000e+00 : f32
    %363 = vector.broadcast %cst_75 : f32 to vector<8x32xf32>
    %364 = arith.addf %363, %362 : vector<8x32xf32>
    %365 = arith.divf %363, %364 : vector<8x32xf32>
    %366 = vector.extract_strided_slice %359 {offsets = [0, 32], sizes = [8, 32], strides = [1, 1]} : vector<8x128xf32> to vector<8x32xf32>
    %367 = arith.negf %366 : vector<8x32xf32>
    %368 = math.exp %367 : vector<8x32xf32>
    %cst_76 = arith.constant 1.000000e+00 : f32
    %369 = vector.broadcast %cst_76 : f32 to vector<8x32xf32>
    %370 = arith.addf %369, %368 : vector<8x32xf32>
    %371 = arith.divf %369, %370 : vector<8x32xf32>
    %372 = vector.extract_strided_slice %359 {offsets = [0, 64], sizes = [8, 32], strides = [1, 1]} : vector<8x128xf32> to vector<8x32xf32>
    %373 = math.tanh %372 : vector<8x32xf32>
    %374 = vector.extract_strided_slice %359 {offsets = [0, 96], sizes = [8, 32], strides = [1, 1]} : vector<8x128xf32> to vector<8x32xf32>
    %375 = arith.negf %374 : vector<8x32xf32>
    %376 = math.exp %375 : vector<8x32xf32>
    %cst_77 = arith.constant 1.000000e+00 : f32
    %377 = vector.broadcast %cst_77 : f32 to vector<8x32xf32>
    %378 = arith.addf %377, %376 : vector<8x32xf32>
    %379 = arith.divf %377, %378 : vector<8x32xf32>
    %380 = arith.mulf %371, %348 : vector<8x32xf32>
    %381 = arith.mulf %365, %373 : vector<8x32xf32>
    %382 = arith.addf %380, %381 : vector<8x32xf32>
    %383 = math.tanh %382 : vector<8x32xf32>
    %384 = arith.mulf %379, %383 : vector<8x32xf32>
    %385 = arith.truncf %384 : vector<8x32xf32> to vector<8x32xbf16>
    %c0_78 = arith.constant 0 : index
    %c10 = arith.constant 10 : index
    %c0_79 = arith.constant 0 : index
    %386 = vector.load %arg6[%c0_78, %c10, %c0_79] : memref<8x16x32xbf16, #tpu.memory_space<vmem>>, vector<8x1x32xbf16>
    %387 = vector.shape_cast %386 : vector<8x1x32xbf16> to vector<8x32xbf16>
    %388 = vector.shape_cast %385 : vector<8x32xbf16> to vector<8x1x32xbf16>
    tpu.vector_store %arg6[%c0_78, %c10, %c0_79], %388 {strides = array<i32>} : memref<8x16x32xbf16, #tpu.memory_space<vmem>>, vector<8x1x32xbf16>,
    %389 = vector.extract_strided_slice %11 {offsets = [0, 11, 0], sizes = [8, 1, 128], strides = [1, 1, 1]} : vector<8x16x128xf32> to vector<8x1x128xf32>
    %390 = vector.shape_cast %389 : vector<8x1x128xf32> to vector<8x128xf32>
    %391 = arith.truncf %384 : vector<8x32xf32> to vector<8x32xbf16>
    %cst_80 = arith.constant dense<0.000000e+00> : vector<8x128xf32>
    %392 = tpu.matmul %391, %12, %cst_80 {dimension_numbers = #tpu.dot_dimension_numbers<[1], [0], [0], [1], [0, 0, 1, 1], [], []>} : vector<8x32xbf16>, vector<32x128xbf16>, vector<8x128xf32> -> vector<8x128xf32>
    %393 = arith.addf %390, %392 : vector<8x128xf32>
    %394 = vector.extract_strided_slice %393 {offsets = [0, 0], sizes = [8, 32], strides = [1, 1]} : vector<8x128xf32> to vector<8x32xf32>
    %395 = arith.negf %394 : vector<8x32xf32>
    %396 = math.exp %395 : vector<8x32xf32>
    %cst_81 = arith.constant 1.000000e+00 : f32
    %397 = vector.broadcast %cst_81 : f32 to vector<8x32xf32>
    %398 = arith.addf %397, %396 : vector<8x32xf32>
    %399 = arith.divf %397, %398 : vector<8x32xf32>
    %400 = vector.extract_strided_slice %393 {offsets = [0, 32], sizes = [8, 32], strides = [1, 1]} : vector<8x128xf32> to vector<8x32xf32>
    %401 = arith.negf %400 : vector<8x32xf32>
    %402 = math.exp %401 : vector<8x32xf32>
    %cst_82 = arith.constant 1.000000e+00 : f32
    %403 = vector.broadcast %cst_82 : f32 to vector<8x32xf32>
    %404 = arith.addf %403, %402 : vector<8x32xf32>
    %405 = arith.divf %403, %404 : vector<8x32xf32>
    %406 = vector.extract_strided_slice %393 {offsets = [0, 64], sizes = [8, 32], strides = [1, 1]} : vector<8x128xf32> to vector<8x32xf32>
    %407 = math.tanh %406 : vector<8x32xf32>
    %408 = vector.extract_strided_slice %393 {offsets = [0, 96], sizes = [8, 32], strides = [1, 1]} : vector<8x128xf32> to vector<8x32xf32>
    %409 = arith.negf %408 : vector<8x32xf32>
    %410 = math.exp %409 : vector<8x32xf32>
    %cst_83 = arith.constant 1.000000e+00 : f32
    %411 = vector.broadcast %cst_83 : f32 to vector<8x32xf32>
    %412 = arith.addf %411, %410 : vector<8x32xf32>
    %413 = arith.divf %411, %412 : vector<8x32xf32>
    %414 = arith.mulf %405, %382 : vector<8x32xf32>
    %415 = arith.mulf %399, %407 : vector<8x32xf32>
    %416 = arith.addf %414, %415 : vector<8x32xf32>
    %417 = math.tanh %416 : vector<8x32xf32>
    %418 = arith.mulf %413, %417 : vector<8x32xf32>
    %419 = arith.truncf %418 : vector<8x32xf32> to vector<8x32xbf16>
    %c0_84 = arith.constant 0 : index
    %c11 = arith.constant 11 : index
    %c0_85 = arith.constant 0 : index
    %420 = vector.load %arg6[%c0_84, %c11, %c0_85] : memref<8x16x32xbf16, #tpu.memory_space<vmem>>, vector<8x1x32xbf16>
    %421 = vector.shape_cast %420 : vector<8x1x32xbf16> to vector<8x32xbf16>
    %422 = vector.shape_cast %419 : vector<8x32xbf16> to vector<8x1x32xbf16>
    tpu.vector_store %arg6[%c0_84, %c11, %c0_85], %422 {strides = array<i32>} : memref<8x16x32xbf16, #tpu.memory_space<vmem>>, vector<8x1x32xbf16>,
    %423 = vector.extract_strided_slice %11 {offsets = [0, 12, 0], sizes = [8, 1, 128], strides = [1, 1, 1]} : vector<8x16x128xf32> to vector<8x1x128xf32>
    %424 = vector.shape_cast %423 : vector<8x1x128xf32> to vector<8x128xf32>
    %425 = arith.truncf %418 : vector<8x32xf32> to vector<8x32xbf16>
    %cst_86 = arith.constant dense<0.000000e+00> : vector<8x128xf32>
    %426 = tpu.matmul %425, %12, %cst_86 {dimension_numbers = #tpu.dot_dimension_numbers<[1], [0], [0], [1], [0, 0, 1, 1], [], []>} : vector<8x32xbf16>, vector<32x128xbf16>, vector<8x128xf32> -> vector<8x128xf32>
    %427 = arith.addf %424, %426 : vector<8x128xf32>
    %428 = vector.extract_strided_slice %427 {offsets = [0, 0], sizes = [8, 32], strides = [1, 1]} : vector<8x128xf32> to vector<8x32xf32>
    %429 = arith.negf %428 : vector<8x32xf32>
    %430 = math.exp %429 : vector<8x32xf32>
    %cst_87 = arith.constant 1.000000e+00 : f32
    %431 = vector.broadcast %cst_87 : f32 to vector<8x32xf32>
    %432 = arith.addf %431, %430 : vector<8x32xf32>
    %433 = arith.divf %431, %432 : vector<8x32xf32>
    %434 = vector.extract_strided_slice %427 {offsets = [0, 32], sizes = [8, 32], strides = [1, 1]} : vector<8x128xf32> to vector<8x32xf32>
    %435 = arith.negf %434 : vector<8x32xf32>
    %436 = math.exp %435 : vector<8x32xf32>
    %cst_88 = arith.constant 1.000000e+00 : f32
    %437 = vector.broadcast %cst_88 : f32 to vector<8x32xf32>
    %438 = arith.addf %437, %436 : vector<8x32xf32>
    %439 = arith.divf %437, %438 : vector<8x32xf32>
    %440 = vector.extract_strided_slice %427 {offsets = [0, 64], sizes = [8, 32], strides = [1, 1]} : vector<8x128xf32> to vector<8x32xf32>
    %441 = math.tanh %440 : vector<8x32xf32>
    %442 = vector.extract_strided_slice %427 {offsets = [0, 96], sizes = [8, 32], strides = [1, 1]} : vector<8x128xf32> to vector<8x32xf32>
    %443 = arith.negf %442 : vector<8x32xf32>
    %444 = math.exp %443 : vector<8x32xf32>
    %cst_89 = arith.constant 1.000000e+00 : f32
    %445 = vector.broadcast %cst_89 : f32 to vector<8x32xf32>
    %446 = arith.addf %445, %444 : vector<8x32xf32>
    %447 = arith.divf %445, %446 : vector<8x32xf32>
    %448 = arith.mulf %439, %416 : vector<8x32xf32>
    %449 = arith.mulf %433, %441 : vector<8x32xf32>
    %450 = arith.addf %448, %449 : vector<8x32xf32>
    %451 = math.tanh %450 : vector<8x32xf32>
    %452 = arith.mulf %447, %451 : vector<8x32xf32>
    %453 = arith.truncf %452 : vector<8x32xf32> to vector<8x32xbf16>
    %c0_90 = arith.constant 0 : index
    %c12 = arith.constant 12 : index
    %c0_91 = arith.constant 0 : index
    %454 = vector.load %arg6[%c0_90, %c12, %c0_91] : memref<8x16x32xbf16, #tpu.memory_space<vmem>>, vector<8x1x32xbf16>
    %455 = vector.shape_cast %454 : vector<8x1x32xbf16> to vector<8x32xbf16>
    %456 = vector.shape_cast %453 : vector<8x32xbf16> to vector<8x1x32xbf16>
    tpu.vector_store %arg6[%c0_90, %c12, %c0_91], %456 {strides = array<i32>} : memref<8x16x32xbf16, #tpu.memory_space<vmem>>, vector<8x1x32xbf16>,
    %457 = vector.extract_strided_slice %11 {offsets = [0, 13, 0], sizes = [8, 1, 128], strides = [1, 1, 1]} : vector<8x16x128xf32> to vector<8x1x128xf32>
    %458 = vector.shape_cast %457 : vector<8x1x128xf32> to vector<8x128xf32>
    %459 = arith.truncf %452 : vector<8x32xf32> to vector<8x32xbf16>
    %cst_92 = arith.constant dense<0.000000e+00> : vector<8x128xf32>
    %460 = tpu.matmul %459, %12, %cst_92 {dimension_numbers = #tpu.dot_dimension_numbers<[1], [0], [0], [1], [0, 0, 1, 1], [], []>} : vector<8x32xbf16>, vector<32x128xbf16>, vector<8x128xf32> -> vector<8x128xf32>
    %461 = arith.addf %458, %460 : vector<8x128xf32>
    %462 = vector.extract_strided_slice %461 {offsets = [0, 0], sizes = [8, 32], strides = [1, 1]} : vector<8x128xf32> to vector<8x32xf32>
    %463 = arith.negf %462 : vector<8x32xf32>
    %464 = math.exp %463 : vector<8x32xf32>
    %cst_93 = arith.constant 1.000000e+00 : f32
    %465 = vector.broadcast %cst_93 : f32 to vector<8x32xf32>
    %466 = arith.addf %465, %464 : vector<8x32xf32>
    %467 = arith.divf %465, %466 : vector<8x32xf32>
    %468 = vector.extract_strided_slice %461 {offsets = [0, 32], sizes = [8, 32], strides = [1, 1]} : vector<8x128xf32> to vector<8x32xf32>
    %469 = arith.negf %468 : vector<8x32xf32>
    %470 = math.exp %469 : vector<8x32xf32>
    %cst_94 = arith.constant 1.000000e+00 : f32
    %471 = vector.broadcast %cst_94 : f32 to vector<8x32xf32>
    %472 = arith.addf %471, %470 : vector<8x32xf32>
    %473 = arith.divf %471, %472 : vector<8x32xf32>
    %474 = vector.extract_strided_slice %461 {offsets = [0, 64], sizes = [8, 32], strides = [1, 1]} : vector<8x128xf32> to vector<8x32xf32>
    %475 = math.tanh %474 : vector<8x32xf32>
    %476 = vector.extract_strided_slice %461 {offsets = [0, 96], sizes = [8, 32], strides = [1, 1]} : vector<8x128xf32> to vector<8x32xf32>
    %477 = arith.negf %476 : vector<8x32xf32>
    %478 = math.exp %477 : vector<8x32xf32>
    %cst_95 = arith.constant 1.000000e+00 : f32
    %479 = vector.broadcast %cst_95 : f32 to vector<8x32xf32>
    %480 = arith.addf %479, %478 : vector<8x32xf32>
    %481 = arith.divf %479, %480 : vector<8x32xf32>
    %482 = arith.mulf %473, %450 : vector<8x32xf32>
    %483 = arith.mulf %467, %475 : vector<8x32xf32>
    %484 = arith.addf %482, %483 : vector<8x32xf32>
    %485 = math.tanh %484 : vector<8x32xf32>
    %486 = arith.mulf %481, %485 : vector<8x32xf32>
    %487 = arith.truncf %486 : vector<8x32xf32> to vector<8x32xbf16>
    %c0_96 = arith.constant 0 : index
    %c13 = arith.constant 13 : index
    %c0_97 = arith.constant 0 : index
    %488 = vector.load %arg6[%c0_96, %c13, %c0_97] : memref<8x16x32xbf16, #tpu.memory_space<vmem>>, vector<8x1x32xbf16>
    %489 = vector.shape_cast %488 : vector<8x1x32xbf16> to vector<8x32xbf16>
    %490 = vector.shape_cast %487 : vector<8x32xbf16> to vector<8x1x32xbf16>
    tpu.vector_store %arg6[%c0_96, %c13, %c0_97], %490 {strides = array<i32>} : memref<8x16x32xbf16, #tpu.memory_space<vmem>>, vector<8x1x32xbf16>,
    %491 = vector.extract_strided_slice %11 {offsets = [0, 14, 0], sizes = [8, 1, 128], strides = [1, 1, 1]} : vector<8x16x128xf32> to vector<8x1x128xf32>
    %492 = vector.shape_cast %491 : vector<8x1x128xf32> to vector<8x128xf32>
    %493 = arith.truncf %486 : vector<8x32xf32> to vector<8x32xbf16>
    %cst_98 = arith.constant dense<0.000000e+00> : vector<8x128xf32>
    %494 = tpu.matmul %493, %12, %cst_98 {dimension_numbers = #tpu.dot_dimension_numbers<[1], [0], [0], [1], [0, 0, 1, 1], [], []>} : vector<8x32xbf16>, vector<32x128xbf16>, vector<8x128xf32> -> vector<8x128xf32>
    %495 = arith.addf %492, %494 : vector<8x128xf32>
    %496 = vector.extract_strided_slice %495 {offsets = [0, 0], sizes = [8, 32], strides = [1, 1]} : vector<8x128xf32> to vector<8x32xf32>
    %497 = arith.negf %496 : vector<8x32xf32>
    %498 = math.exp %497 : vector<8x32xf32>
    %cst_99 = arith.constant 1.000000e+00 : f32
    %499 = vector.broadcast %cst_99 : f32 to vector<8x32xf32>
    %500 = arith.addf %499, %498 : vector<8x32xf32>
    %501 = arith.divf %499, %500 : vector<8x32xf32>
    %502 = vector.extract_strided_slice %495 {offsets = [0, 32], sizes = [8, 32], strides = [1, 1]} : vector<8x128xf32> to vector<8x32xf32>
    %503 = arith.negf %502 : vector<8x32xf32>
    %504 = math.exp %503 : vector<8x32xf32>
    %cst_100 = arith.constant 1.000000e+00 : f32
    %505 = vector.broadcast %cst_100 : f32 to vector<8x32xf32>
    %506 = arith.addf %505, %504 : vector<8x32xf32>
    %507 = arith.divf %505, %506 : vector<8x32xf32>
    %508 = vector.extract_strided_slice %495 {offsets = [0, 64], sizes = [8, 32], strides = [1, 1]} : vector<8x128xf32> to vector<8x32xf32>
    %509 = math.tanh %508 : vector<8x32xf32>
    %510 = vector.extract_strided_slice %495 {offsets = [0, 96], sizes = [8, 32], strides = [1, 1]} : vector<8x128xf32> to vector<8x32xf32>
    %511 = arith.negf %510 : vector<8x32xf32>
    %512 = math.exp %511 : vector<8x32xf32>
    %cst_101 = arith.constant 1.000000e+00 : f32
    %513 = vector.broadcast %cst_101 : f32 to vector<8x32xf32>
    %514 = arith.addf %513, %512 : vector<8x32xf32>
    %515 = arith.divf %513, %514 : vector<8x32xf32>
    %516 = arith.mulf %507, %484 : vector<8x32xf32>
    %517 = arith.mulf %501, %509 : vector<8x32xf32>
    %518 = arith.addf %516, %517 : vector<8x32xf32>
    %519 = math.tanh %518 : vector<8x32xf32>
    %520 = arith.mulf %515, %519 : vector<8x32xf32>
    %521 = arith.truncf %520 : vector<8x32xf32> to vector<8x32xbf16>
    %c0_102 = arith.constant 0 : index
    %c14 = arith.constant 14 : index
    %c0_103 = arith.constant 0 : index
    %522 = vector.load %arg6[%c0_102, %c14, %c0_103] : memref<8x16x32xbf16, #tpu.memory_space<vmem>>, vector<8x1x32xbf16>
    %523 = vector.shape_cast %522 : vector<8x1x32xbf16> to vector<8x32xbf16>
    %524 = vector.shape_cast %521 : vector<8x32xbf16> to vector<8x1x32xbf16>
    tpu.vector_store %arg6[%c0_102, %c14, %c0_103], %524 {strides = array<i32>} : memref<8x16x32xbf16, #tpu.memory_space<vmem>>, vector<8x1x32xbf16>,
    %525 = vector.extract_strided_slice %11 {offsets = [0, 15, 0], sizes = [8, 1, 128], strides = [1, 1, 1]} : vector<8x16x128xf32> to vector<8x1x128xf32>
    %526 = vector.shape_cast %525 : vector<8x1x128xf32> to vector<8x128xf32>
    %527 = arith.truncf %520 : vector<8x32xf32> to vector<8x32xbf16>
    %cst_104 = arith.constant dense<0.000000e+00> : vector<8x128xf32>
    %528 = tpu.matmul %527, %12, %cst_104 {dimension_numbers = #tpu.dot_dimension_numbers<[1], [0], [0], [1], [0, 0, 1, 1], [], []>} : vector<8x32xbf16>, vector<32x128xbf16>, vector<8x128xf32> -> vector<8x128xf32>
    %529 = arith.addf %526, %528 : vector<8x128xf32>
    %530 = vector.extract_strided_slice %529 {offsets = [0, 0], sizes = [8, 32], strides = [1, 1]} : vector<8x128xf32> to vector<8x32xf32>
    %531 = arith.negf %530 : vector<8x32xf32>
    %532 = math.exp %531 : vector<8x32xf32>
    %cst_105 = arith.constant 1.000000e+00 : f32
    %533 = vector.broadcast %cst_105 : f32 to vector<8x32xf32>
    %534 = arith.addf %533, %532 : vector<8x32xf32>
    %535 = arith.divf %533, %534 : vector<8x32xf32>
    %536 = vector.extract_strided_slice %529 {offsets = [0, 32], sizes = [8, 32], strides = [1, 1]} : vector<8x128xf32> to vector<8x32xf32>
    %537 = arith.negf %536 : vector<8x32xf32>
    %538 = math.exp %537 : vector<8x32xf32>
    %cst_106 = arith.constant 1.000000e+00 : f32
    %539 = vector.broadcast %cst_106 : f32 to vector<8x32xf32>
    %540 = arith.addf %539, %538 : vector<8x32xf32>
    %541 = arith.divf %539, %540 : vector<8x32xf32>
    %542 = vector.extract_strided_slice %529 {offsets = [0, 64], sizes = [8, 32], strides = [1, 1]} : vector<8x128xf32> to vector<8x32xf32>
    %543 = math.tanh %542 : vector<8x32xf32>
    %544 = vector.extract_strided_slice %529 {offsets = [0, 96], sizes = [8, 32], strides = [1, 1]} : vector<8x128xf32> to vector<8x32xf32>
    %545 = arith.negf %544 : vector<8x32xf32>
    %546 = math.exp %545 : vector<8x32xf32>
    %cst_107 = arith.constant 1.000000e+00 : f32
    %547 = vector.broadcast %cst_107 : f32 to vector<8x32xf32>
    %548 = arith.addf %547, %546 : vector<8x32xf32>
    %549 = arith.divf %547, %548 : vector<8x32xf32>
    %550 = arith.mulf %541, %518 : vector<8x32xf32>
    %551 = arith.mulf %535, %543 : vector<8x32xf32>
    %552 = arith.addf %550, %551 : vector<8x32xf32>
    %553 = math.tanh %552 : vector<8x32xf32>
    %554 = arith.mulf %549, %553 : vector<8x32xf32>
    %555 = arith.truncf %554 : vector<8x32xf32> to vector<8x32xbf16>
    %c0_108 = arith.constant 0 : index
    %c15 = arith.constant 15 : index
    %c0_109 = arith.constant 0 : index
    %556 = vector.load %arg6[%c0_108, %c15, %c0_109] : memref<8x16x32xbf16, #tpu.memory_space<vmem>>, vector<8x1x32xbf16>
    %557 = vector.shape_cast %556 : vector<8x1x32xbf16> to vector<8x32xbf16>
    %558 = vector.shape_cast %555 : vector<8x32xbf16> to vector<8x1x32xbf16>
    tpu.vector_store %arg6[%c0_108, %c15, %c0_109], %558 {strides = array<i32>} : memref<8x16x32xbf16, #tpu.memory_space<vmem>>, vector<8x1x32xbf16>,
    %c0_110 = arith.constant 0 : index
    %c0_111 = arith.constant 0 : index
    %559 = vector.load %arg7[%c0_110, %c0_111] : memref<8x32xf32, #tpu.memory_space<vmem>>, vector<8x32xf32>
    tpu.vector_store %arg7[%c0_110, %c0_111], %554 {strides = array<i32>} : memref<8x32xf32, #tpu.memory_space<vmem>>, vector<8x32xf32>,
    %c0_112 = arith.constant 0 : index
    %c0_113 = arith.constant 0 : index
    %560 = vector.load %arg8[%c0_112, %c0_113] : memref<8x32xf32, #tpu.memory_space<vmem>>, vector<8x32xf32>
    tpu.vector_store %arg8[%c0_112, %c0_113], %552 {strides = array<i32>} : memref<8x32xf32, #tpu.memory_space<vmem>>, vector<8x32xf32>,
    return
  }
  func.func @transform_0(%arg0: i32, %arg1: i32) -> (i32, i32, i32) {
    %c0_i32 = arith.constant 0 : i32
    %c0_i32_0 = arith.constant 0 : i32
    return %arg0, %arg1, %c0_i32 : i32, i32, i32
  }
  func.func @transform_1(%arg0: i32, %arg1: i32) -> (i32, i32) {
    %c0_i32 = arith.constant 0 : i32
    %c0_i32_0 = arith.constant 0 : i32
    %c0_i32_1 = arith.constant 0 : i32
    return %c0_i32, %c0_i32_0 : i32, i32
  }
  func.func @transform_2(%arg0: i32, %arg1: i32) -> (i32, i32) {
    %c0_i32 = arith.constant 0 : i32
    %c0_i32_0 = arith.constant 0 : i32
    %c0_i32_1 = arith.constant 0 : i32
    return %c0_i32, %c0_i32_0 : i32, i32
  }
  func.func @transform_3(%arg0: i32, %arg1: i32) -> (i32, i32) {
    %c0_i32 = arith.constant 0 : i32
    %c0_i32_0 = arith.constant 0 : i32
    %c0_i32_1 = arith.constant 0 : i32
    return %c0_i32, %c0_i32_0 : i32, i32
  }
  func.func @transform_4(%arg0: i32, %arg1: i32) -> (i32, i32, i32) {
    %c0_i32 = arith.constant 0 : i32
    %c0_i32_0 = arith.constant 0 : i32
    return %arg0, %arg1, %c0_i32 : i32, i32, i32
  }
}

module attributes {stable_mosaic.version = 11 : i64} {
  func.func @_proj_kernel(%arg0: i32, %arg1: i32, %arg2: memref<128x32xbf16, #tpu.memory_space<vmem>>, %arg3: memref<32x128xbf16, #tpu.memory_space<vmem>>, %arg4: memref<1x128xf32, #tpu.memory_space<vmem>>, %arg5: memref<128x128xf32, #tpu.memory_space<vmem>>) attributes {dimension_semantics = [#tpu.dimension_semantics<parallel>, #tpu.dimension_semantics<parallel>], iteration_bounds = array<i64: 1, 1>, scalar_prefetch = 0 : i64, scratch_operands = 0 : i64, tpu.core_type = #tpu.core_type<tc>, window_params = [{transform_indices = @transform_0, window_bounds = array<i64: 128, 32>}, {transform_indices = @transform_1, window_bounds = array<i64: 32, 128>}, {transform_indices = @transform_2, window_bounds = array<i64: 1, 128>}, {transform_indices = @transform_3, window_bounds = array<i64: 128, 128>}]} {
    %c0 = arith.constant 0 : index
    %c0_0 = arith.constant 0 : index
    %0 = vector.load %arg2[%c0, %c0_0] : memref<128x32xbf16, #tpu.memory_space<vmem>>, vector<128x32xbf16>
    %c0_1 = arith.constant 0 : index
    %c0_2 = arith.constant 0 : index
    %1 = vector.load %arg3[%c0_1, %c0_2] : memref<32x128xbf16, #tpu.memory_space<vmem>>, vector<32x128xbf16>
    %cst = arith.constant dense<0.000000e+00> : vector<128x128xf32>
    %2 = tpu.matmul %0, %1, %cst {dimension_numbers = #tpu.dot_dimension_numbers<[1], [0], [0], [1], [0, 0, 1, 1], [], []>} : vector<128x32xbf16>, vector<32x128xbf16>, vector<128x128xf32> -> vector<128x128xf32>
    %c0_3 = arith.constant 0 : index
    %c0_4 = arith.constant 0 : index
    %3 = vector.load %arg4[%c0_3, %c0_4] : memref<1x128xf32, #tpu.memory_space<vmem>>, vector<1x128xf32>
    %4 = vector.broadcast %3 : vector<1x128xf32> to vector<128x128xf32>
    %5 = arith.addf %2, %4 : vector<128x128xf32>
    %c0_5 = arith.constant 0 : index
    %c0_6 = arith.constant 0 : index
    %6 = vector.load %arg5[%c0_5, %c0_6] : memref<128x128xf32, #tpu.memory_space<vmem>>, vector<128x128xf32>
    tpu.vector_store %arg5[%c0_5, %c0_6], %5 {strides = array<i32>} : memref<128x128xf32, #tpu.memory_space<vmem>>, vector<128x128xf32>,
    return
  }
  func.func @transform_0(%arg0: i32, %arg1: i32) -> (i32, i32) {
    %c0_i32 = arith.constant 0 : i32
    %c0_i32_0 = arith.constant 0 : i32
    return %arg1, %c0_i32 : i32, i32
  }
  func.func @transform_1(%arg0: i32, %arg1: i32) -> (i32, i32) {
    %c0_i32 = arith.constant 0 : i32
    %c0_i32_0 = arith.constant 0 : i32
    return %c0_i32, %arg0 : i32, i32
  }
  func.func @transform_2(%arg0: i32, %arg1: i32) -> (i32, i32) {
    %c0_i32 = arith.constant 0 : i32
    %c0_i32_0 = arith.constant 0 : i32
    return %c0_i32, %arg0 : i32, i32
  }
  func.func @transform_3(%arg0: i32, %arg1: i32) -> (i32, i32) {
    %c0_i32 = arith.constant 0 : i32
    return %arg1, %arg0 : i32, i32
  }
}

</mosaic_0001>

<bundles_post_ra>
// kernel: decoder_rnn_forward.3
= control target key start
LH: loop header
LB: loop body
LE: loop exit
PB: predicated region body
PF: predicated region fallthrough
CT: control target
= control target key end

     0   :  { %8 = vsyncpa [#allocation3], 0  ;;  %s546_s0 = inlined_call_operand.hbm [shape: bf16[128,32], index: 0, kind: input, shape index: {}]   ;;  %s547_s1 = inlined_call_operand.hbm [shape: bf16[32,128], index: 1, kind: input, shape index: {}]   ;;  %s548_s2 = inlined_call_operand.hbm [shape: f32[1,128], index: 2, kind: input, shape index: {}]   ;;  %s549_s3 = inlined_call_operand.hbm [shape: f32[128,128], index: 3, kind: output, shape index: {}]  }
   0x1   :  { %9 = vsyncpa [#allocation6], 0 }
   0x2   :  { %10 = vsyncpa [#allocation4], 0  ;;  %s455_s12 = smov [#allocation5]   ;;  %s456_s14 = smov [#allocation2]  }
   0x3   :  { %s28_s13 = sshll.u32 %s455_s12, 4  ;;  %s16_s15 = sshll.u32 %s456_s14, 4  ;;  %s29_s13 = int_to_ptr.vmem [resolvable:$true] %s28_s13  ;;  %s483_s15 = int_to_ptr.vmem [resolvable:$true] %s16_s15 }
   0x4   :  { %s361_s18 = scalar_lea.hbm %s547_s1, 256 }
   0x5   :  { %p362_p0 = scmp.ne.s32.totalorder %s547_s1, %s361_s18  ;;  %p365_p1 = scmp.lt.u32.totalorder %s361_s18, %s547_s1 }
   0x7   :  { %p367_p2 = pnand %p365_p1, %p362_p0 }
   0x9   :  { %370 = shalt.err (!%p367_p2)
}
   0xa   :  { %s371_s23 = scalar_lea.vmem %s29_s13, 256  ;;  %p376_p4 = scmp.lt.s32.totalorder %s29_s13, %s29_s13 }
   0xb   :  { %p372_p3 = scmp.ne.s32.totalorder %s29_s13, %s371_s23  ;;  %p377_p5 = scmp.lt.s32.totalorder %s371_s23, %s371_s23 }
   0xd   :  { %p378_p6 = por %p377_p5, %p376_p4 }
   0xf   :  { %p379_p7 = pnand %p378_p6, %p372_p3 }
  0x11   :  { %382 = shalt.err (!%p379_p7)
}
  0x12   :  { %s457_s24 = smov 64   ;;  %s458_s25 = smov 4  }
  0x13   :  { %34 = dma.hbm_to_vmem [thread:$0]  %s547_s1, 256, %s29_s13, [#allocation6], %s457_s24, %s457_s24, %s458_s25  }
  0x14   :  { %s383_s30 = scalar_lea.hbm %s546_s0, 1024 }
  0x15   :  { %p384_p8 = scmp.ne.s32.totalorder %s546_s0, %s383_s30  ;;  %p387_p9 = scmp.lt.u32.totalorder %s383_s30, %s546_s0 }
  0x17   :  { %p389_p10 = pnand %p387_p9, %p384_p8 }
  0x19   :  { %392 = shalt.err (!%p389_p10)
}
  0x1a   :  { %s393_s8 = scalar_lea.vmem %s483_s15, 1024  ;;  %p398_p12 = scmp.lt.s32.totalorder %s483_s15, %s483_s15 }
  0x1b   :  { %p394_p11 = scmp.ne.s32.totalorder %s483_s15, %s393_s8  ;;  %p399_p13 = scmp.lt.s32.totalorder %s393_s8, %s393_s8 }
  0x1d   :  { %p400_p0 = por %p399_p13, %p398_p12 }
  0x1f   :  { %p401_p1 = pnand %p400_p0, %p394_p11 }
  0x21   :  { %404 = shalt.err (!%p401_p1)
}
  0x22   :  { %22 = dma.hbm_to_vmem [thread:$0]  %s546_s0, 1024, %s483_s15, [#allocation3], %s457_s24, %s457_s24, %s458_s25  }
  0x23   :  { %s459_s10 = smov [#allocation7]   ;;  %s405_s14 = scalar_lea.hbm %s548_s2, 16 }
  0x24   :  { %s41_s11 = sshll.u32 %s459_s10, 4  ;;  %p406_p2 = scmp.ne.s32.totalorder %s548_s2, %s405_s14  ;;  %s42_s11 = int_to_ptr.vmem [resolvable:$true] %s41_s11 }
  0x25   :  { %p409_p3 = scmp.lt.u32.totalorder %s405_s14, %s548_s2 }
  0x27   :  { %p411_p4 = pnand %p409_p3, %p406_p2 }
  0x29   :  { %414 = shalt.err (!%p411_p4)
}
  0x2a   :  { %s415_s20 = scalar_lea.vmem %s42_s11, 16  ;;  %s419_s0 = scalar_lea.vmem %s42_s11, 32 }
  0x2b   :  { %p416_p5 = scmp.ne.s32.totalorder %s42_s11, %s415_s20  ;;  %p420_p6 = scmp.lt.s32.totalorder %s42_s11, %s42_s11 }
  0x2c   :  { %p421_p7 = scmp.lt.s32.totalorder %s419_s0, %s415_s20 }
  0x2e   :  { %p422_p8 = por %p421_p7, %p420_p6 }
  0x30   :  { %p423_p9 = pnand %p422_p8, %p416_p5 }
  0x32   :  { %426 = shalt.err (!%p423_p9)
}
  0x33   :  { %44 = dma.hbm_to_vmem [thread:$0]  %s548_s2, 16, %s42_s11, [#allocation6]  }
  0x34   :  { %449 = dma.done.wait [#allocation3], 1024  }
  0x35   :  { %450 = vsyncadd [#allocation3], 4294966272 }
  0x36   :  { %451 = dma.done.wait [#allocation6], 272  }
  0x37   :  { %452 = vsyncadd [#allocation6], 4294967024  ;;  %v351_v0 = vld [vmem:[#allocation5] sm:$0xff]   ;;  %v352_v1 = vld [vmem:[#allocation5 + $0x8] sm:$0xff]   ;;  %vm134_vm0 = vcmask 261120   ;;  %s460_s2 = smov [#allocation8]  }
  0x38   :  { %319 = vmatprep.subr.bf16.mxu0 %v351_v0  ;;  %339 = vmatprep.subr.bf16.mxu1 %v351_v0  ;;  %v353_v2 = vld [vmem:[#allocation2] sm:$0xff]   ;;  %v355_v4 = vld [vmem:[#allocation2 + $0x8] sm:$0xff]   ;;  %v357_v6 = vld [vmem:[#allocation2 + $0x10] sm:$0xff]   ;;  %s277_s22 = sshll.u32 %s460_s2, 4  ;;  %s278_s22 = int_to_ptr.vmem [resolvable:$true] %s277_s22 }
  0x39   :  { %320 = vmatpush3.bf16.msra.mxu0 %v351_v0  ;;  %341 = vmatpush3.bf16.msra.mxu1 %v351_v0  ;;  %v354_v3 = vld [vmem:[#allocation2 + $0x20] sm:$0xff]   ;;  %v356_v5 = vld [vmem:[#allocation2 + $0x28] sm:$0xff]   ;;  %v358_v7 = vld [vmem:[#allocation2 + $0x30] sm:$0xff]   ;;  %s427_s23 = scalar_lea.vmem %s278_s22, 2048  ;;  %p432_p11 = scmp.lt.s32.totalorder %s278_s22, %s278_s22 }
  0x3a   :  { %321 = vmatprep.subr.bf16.mxu0 %v352_v1  ;;  %340 = vmatprep.subr.bf16.mxu1 %v352_v1  ;;  %v359_v8 = vld [vmem:[#allocation2 + $0x18] sm:$0xff]   ;;  %v290_v10 = vld [vmem:[#allocation7] ss:$0 sm:$0xff]  ;;  %p428_p10 = scmp.ne.s32.totalorder %s278_s22, %s427_s23  ;;  %p433_p12 = scmp.lt.s32.totalorder %s427_s23, %s427_s23 }
  0x3b   :  { %323 = vmatprep.mubr.msk.bf16.mxu0 %vm134_vm0, %v353_v2  ;;  %331 = vmatprep.mubr.msk.bf16.mxu1 %vm134_vm0, %v354_v3  ;;  %v360_v9 = vld [vmem:[#allocation2 + $0x38] sm:$0xff]  }
  0x3c   :  { %p434_p13 = por %p433_p12, %p432_p11 }
  0x3d   :  { %322 = vmatpush3.bf16.msra.mxu0 %v352_v1  ;;  %342 = vmatpush3.bf16.msra.mxu1 %v352_v1 }
  0x3e   :  { %p435_p0 = pnand %p434_p13, %p428_p10 }
  0x40   :  { %324 = vmatmul.mubr.msk.bf16.vlgmr.msra.gmra.mrb[0].mxu0 %vm134_vm0, %v355_v4  ;;  %332 = vmatmul.mubr.msk.bf16.vlgmr.msra.gmra.mrb[0].mxu1 %vm134_vm0, %v356_v5 }
  0x41   :  { %327 = vmatprep.mubr.msk.bf16.mxu0 %vm134_vm0, %v357_v6  ;;  %335 = vmatprep.mubr.msk.bf16.mxu1 %vm134_vm0, %v358_v7 }
  0x48   :  { %328 = vmatmul.mubr.msk.bf16.gmra.mrb[4].mxu0 %vm134_vm0, %v359_v8  ;;  %336 = vmatmul.mubr.msk.bf16.gmra.mrb[4].mxu1 %vm134_vm0, %v360_v9 }
 0x113   :  { %v325_v11 = vpop.f32.mrb[0].mxu0  ;;  %v333_v12 = vpop.f32.mrb[0].mxu1 }
 0x114   :  { %v202_v13 = vadd.f32 %v325_v11, %v290_v10  ;;  %v234_v14 = vadd.f32 %v333_v12, %v290_v10  ;;  %v193_v15 = vpop.f32.mrb[1].mxu0  ;;  %v225_v16 = vpop.f32.mrb[1].mxu1 }
 0x115   :  { %v194_v17 = vadd.f32 %v290_v10, %v193_v15  ;;  %v226_v18 = vadd.f32 %v290_v10, %v225_v16  ;;  %v326_v19 = vpop.f32.mrb[2].mxu0  ;;  %v334_v20 = vpop.f32.mrb[2].mxu1 }
 0x116   :  { %258 = vst [vmem:[#allocation8 + $0x10] sm:$0xff] %v202_v13  ;;  %266 = vst [vmem:[#allocation8 + $0x50] sm:$0xff] %v234_v14  ;;  %v205_v21 = vadd.f32 %v326_v19, %v290_v10  ;;  %v237_v22 = vadd.f32 %v334_v20, %v290_v10  ;;  %v196_v23 = vpop.f32.mrb[3].mxu0  ;;  %v228_v24 = vpop.f32.mrb[3].mxu1 }
 0x117   :  { %256 = vst [vmem:[#allocation8] sm:$0xff] %v194_v17  ;;  %264 = vst [vmem:[#allocation8 + $0x40] sm:$0xff] %v226_v18  ;;  %v197_v25 = vadd.f32 %v290_v10, %v196_v23  ;;  %v229_v26 = vadd.f32 %v290_v10, %v228_v24 }
 0x118   :  { %259 = vst [vmem:[#allocation8 + $0x18] sm:$0xff] %v205_v21  ;;  %267 = vst [vmem:[#allocation8 + $0x58] sm:$0xff] %v237_v22 }
 0x119   :  { %257 = vst [vmem:[#allocation8 + $0x8] sm:$0xff] %v197_v25  ;;  %265 = vst [vmem:[#allocation8 + $0x48] sm:$0xff] %v229_v26 }
 0x11b   :  { %v329_v27 = vpop.f32.mrb[4].mxu0  ;;  %v337_v28 = vpop.f32.mrb[4].mxu1 }
 0x11c   :  { %v218_v29 = vadd.f32 %v329_v27, %v290_v10  ;;  %v250_v30 = vadd.f32 %v337_v28, %v290_v10  ;;  %v209_v31 = vpop.f32.mrb[5].mxu0  ;;  %v241_v32 = vpop.f32.mrb[5].mxu1 }
 0x11d   :  { %v210_v33 = vadd.f32 %v290_v10, %v209_v31  ;;  %v242_v34 = vadd.f32 %v290_v10, %v241_v32  ;;  %v330_v35 = vpop.f32.mrb[6].mxu0  ;;  %v338_v36 = vpop.f32.mrb[6].mxu1 }
 0x11e   :  { %262 = vst [vmem:[#allocation8 + $0x30] sm:$0xff] %v218_v29  ;;  %270 = vst [vmem:[#allocation8 + $0x70] sm:$0xff] %v250_v30  ;;  %v221_v37 = vadd.f32 %v330_v35, %v290_v10  ;;  %v253_v38 = vadd.f32 %v338_v36, %v290_v10  ;;  %v212_v39 = vpop.f32.mrb[7].mxu0  ;;  %v244_v40 = vpop.f32.mrb[7].mxu1 }
 0x11f   :  { %260 = vst [vmem:[#allocation8 + $0x20] sm:$0xff] %v210_v33  ;;  %268 = vst [vmem:[#allocation8 + $0x60] sm:$0xff] %v242_v34  ;;  %v213_v41 = vadd.f32 %v290_v10, %v212_v39  ;;  %v245_v42 = vadd.f32 %v290_v10, %v244_v40 }
 0x120   :  { %263 = vst [vmem:[#allocation8 + $0x38] sm:$0xff] %v221_v37  ;;  %271 = vst [vmem:[#allocation8 + $0x78] sm:$0xff] %v253_v38 }
 0x121   :  { %261 = vst [vmem:[#allocation8 + $0x28] sm:$0xff] %v213_v41  ;;  %269 = vst [vmem:[#allocation8 + $0x68] sm:$0xff] %v245_v42 }
 0x122   :  { %438 = shalt.err (!%p435_p0)
}
 0x123   :  { %s439_s26 = scalar_lea.hbm %s549_s3, 2048 }
 0x124   :  { %p440_p1 = scmp.ne.s32.totalorder %s549_s3, %s439_s26  ;;  %p443_p2 = scmp.lt.u32.totalorder %s439_s26, %s549_s3 }
 0x126   :  { %p445_p3 = pnand %p443_p2, %p440_p1 }
 0x128   :  { %448 = shalt.err (!%p445_p3)
}
 0x129   :  { %s461_s4 = smov 128   ;;  %s462_s5 = smov 8  }
 0x12a   :  { %283 = dma.vmem_to_hbm [thread:$0]  %s278_s22, 2048, %s549_s3, [#allocation4], %s461_s4, %s461_s4, %s462_s5  }
 0x12b   :  { %453 = dma.done.wait [#allocation4], 2048  }
 0x12c   :  { %454 = vsyncadd [#allocation4], 4294965248 }
 0x12d   :  { %287 = vsyncpa [#allocation3], 1 }
 0x12e   :  { %288 = vsyncpa [#allocation6], 1 }
 0x12f   :  { %289 = vsyncpa [#allocation4], 1 }

// kernel: decoder_rnn_forward.2
= control target key start
LH: loop header
LB: loop body
LE: loop exit
PB: predicated region body
PF: predicated region fallthrough
CT: control target
= control target key end

     0   :  { %9 = vsyncpa [#allocation5], 0  ;;  %s11319_s0 = inlined_call_operand.hbm [shape: bf16[8,16,32], index: 0, kind: input, shape index: {}]   ;;  %s11320_s1 = inlined_call_operand.hbm [shape: bf16[32,128], index: 1, kind: input, shape index: {}]   ;;  %s11321_s2 = inlined_call_operand.hbm [shape: bf16[32,128], index: 2, kind: input, shape index: {}]   ;;  %s11322_s3 = inlined_call_operand.hbm [shape: f32[1,128], index: 3, kind: input, shape index: {}]   ;;  %s11323_s4 = inlined_call_operand.hbm [shape: bf16[8,16,32], index: 4, kind: output, shape index: {}]  }
   0x1   :  { %10 = vsyncpa [#allocation8], 0 }
   0x2   :  { %11 = vsyncpa [#allocation11], 0 }
   0x3   :  { %12 = vsyncpa [#allocation6], 0  ;;  %s8292_s15 = smov [#allocation7]   ;;  %s8293_s17 = smov [#allocation4]  }
   0x4   :  { %s30_s16 = sshll.u32 %s8292_s15, 4  ;;  %s18_s18 = sshll.u32 %s8293_s17, 4  ;;  %s31_s16 = int_to_ptr.vmem [resolvable:$true] %s30_s16  ;;  %s8328_s18 = int_to_ptr.vmem [resolvable:$true] %s18_s18 }
   0x5   :  { %s8174_s21 = scalar_lea.hbm %s11320_s1, 256 }
   0x6   :  { %p8175_p0 = scmp.ne.s32.totalorder %s11320_s1, %s8174_s21  ;;  %p8178_p1 = scmp.lt.u32.totalorder %s8174_s21, %s11320_s1 }
   0x8   :  { %p8180_p2 = pnand %p8178_p1, %p8175_p0 }
   0xa   :  { %8183 = shalt.err (!%p8180_p2)
}
   0xb   :  { %s8184_s26 = scalar_lea.vmem %s31_s16, 256  ;;  %p8189_p4 = scmp.lt.s32.totalorder %s31_s16, %s31_s16 }
   0xc   :  { %p8185_p3 = scmp.ne.s32.totalorder %s31_s16, %s8184_s26  ;;  %p8190_p5 = scmp.lt.s32.totalorder %s8184_s26, %s8184_s26 }
   0xe   :  { %p8191_p6 = por %p8190_p5, %p8189_p4 }
  0x10   :  { %p8192_p7 = pnand %p8191_p6, %p8185_p3 }
  0x12   :  { %8195 = shalt.err (!%p8192_p7)
}
  0x13   :  { %s8294_s27 = smov 64   ;;  %s8295_s28 = smov 4  }
  0x14   :  { %36 = dma.hbm_to_vmem [thread:$0]  %s11320_s1, 256, %s31_s16, [#allocation8], %s8294_s27, %s8294_s27, %s8295_s28  }
  0x15   :  { %s8196_s7 = scalar_lea.hbm %s11319_s0, 1024 }
  0x16   :  { %p8197_p8 = scmp.ne.s32.totalorder %s11319_s0, %s8196_s7  ;;  %p8200_p9 = scmp.lt.u32.totalorder %s8196_s7, %s11319_s0 }
  0x18   :  { %p8202_p10 = pnand %p8200_p9, %p8197_p8 }
  0x1a   :  { %8205 = shalt.err (!%p8202_p10)
}
  0x1b   :  { %s8206_s12 = scalar_lea.vmem %s8328_s18, 1024  ;;  %p8211_p12 = scmp.lt.s32.totalorder %s8328_s18, %s8328_s18 }
  0x1c   :  { %p8207_p11 = scmp.ne.s32.totalorder %s8328_s18, %s8206_s12  ;;  %p8212_p13 = scmp.lt.s32.totalorder %s8206_s12, %s8206_s12 }
  0x1e   :  { %p8213_p0 = por %p8212_p13, %p8211_p12 }
  0x20   :  { %p8214_p1 = pnand %p8213_p0, %p8207_p11 }
  0x22   :  { %8217 = shalt.err (!%p8214_p1)
}
  0x23   :  { %24 = dma.hbm_to_vmem [thread:$0]  %s11319_s0, 1024, %s8328_s18, [#allocation5], %s8294_s27, %s8294_s27, %s8295_s28  }
  0x24   :  { %s8296_s14 = smov [#allocation9]   ;;  %s8297_s16 = smov [#allocation10]  }
  0x25   :  { %s42_s15 = sshll.u32 %s8296_s14, 4  ;;  %s55_s17 = sshll.u32 %s8297_s16, 4  ;;  %s43_s15 = int_to_ptr.vmem [resolvable:$true] %s42_s15  ;;  %s56_s17 = int_to_ptr.vmem [resolvable:$true] %s55_s17 }
  0x26   :  { %s8218_s21 = scalar_lea.hbm %s11321_s2, 256 }
  0x27   :  { %p8219_p2 = scmp.ne.s32.totalorder %s11321_s2, %s8218_s21  ;;  %p8222_p3 = scmp.lt.u32.totalorder %s8218_s21, %s11321_s2 }
  0x29   :  { %p8224_p4 = pnand %p8222_p3, %p8219_p2 }
  0x2b   :  { %8227 = shalt.err (!%p8224_p4)
}
  0x2c   :  { %s8228_s0 = scalar_lea.vmem %s43_s15, 256  ;;  %p8233_p6 = scmp.lt.s32.totalorder %s43_s15, %s43_s15 }
  0x2d   :  { %p8229_p5 = scmp.ne.s32.totalorder %s43_s15, %s8228_s0  ;;  %p8234_p7 = scmp.lt.s32.totalorder %s8228_s0, %s8228_s0 }
  0x2f   :  { %p8235_p8 = por %p8234_p7, %p8233_p6 }
  0x31   :  { %p8236_p9 = pnand %p8235_p8, %p8229_p5 }
  0x33   :  { %8239 = shalt.err (!%p8236_p9)
}
  0x34   :  { %48 = dma.hbm_to_vmem [thread:$0]  %s11321_s2, 256, %s43_s15, [#allocation8], %s8294_s27, %s8294_s27, %s8295_s28  }
  0x35   :  { %s8240_s5 = scalar_lea.hbm %s11322_s3, 16 }
  0x36   :  { %p8241_p10 = scmp.ne.s32.totalorder %s11322_s3, %s8240_s5  ;;  %p8244_p11 = scmp.lt.u32.totalorder %s8240_s5, %s11322_s3 }
  0x38   :  { %p8246_p12 = pnand %p8244_p11, %p8241_p10 }
  0x3a   :  { %8249 = shalt.err (!%p8246_p12)
}
  0x3b   :  { %s8250_s10 = scalar_lea.vmem %s56_s17, 16  ;;  %s8254_s11 = scalar_lea.vmem %s56_s17, 32 }
  0x3c   :  { %p8251_p13 = scmp.ne.s32.totalorder %s56_s17, %s8250_s10  ;;  %p8255_p0 = scmp.lt.s32.totalorder %s56_s17, %s56_s17 }
  0x3d   :  { %p8256_p1 = scmp.lt.s32.totalorder %s8254_s11, %s8250_s10 }
  0x3f   :  { %p8257_p2 = por %p8256_p1, %p8255_p0 }
  0x41   :  { %p8258_p3 = pnand %p8257_p2, %p8251_p13 }
  0x43   :  { %8261 = shalt.err (!%p8258_p3)
}
  0x44   :  { %58 = dma.hbm_to_vmem [thread:$0]  %s11322_s3, 16, %s56_s17, [#allocation11]  }
  0x45   :  { %8284 = dma.done.wait [#allocation5], 1024  }
  0x46   :  { %8285 = vsyncadd [#allocation5], 4294966272 }
  0x47   :  { %8286 = dma.done.wait [#allocation8], 512  }
  0x48   :  { %8287 = vsyncadd [#allocation8], 4294966784 }
  0x49   :  { %8288 = dma.done.wait [#allocation11], 16  }
  0x4a   :  { %8289 = vsyncadd [#allocation11], 4294967280  ;;  %vm76_vm0 = vcmask 261120   ;;  %v11324_v0 = vmov 0.0   ;;  %vm8299_vm1 = vmmov 0   ;;  %v7130_v1 = vld [vmem:[#allocation7] sm:$0xff]  }
  0x4b   :  { %6991 = vmatprep.subr.bf16.mxu1 %v11324_v0  ;;  %77 = vst.msk [vmem:[#allocation2] sm:$0xff] %vm76_vm0, %v11324_v0  ;;  %78 = vst.msk [vmem:[#allocation3] sm:$0xff] %vm76_vm0, %v11324_v0  ;;  %6995 = vmatprep.mubr.msk.bf16.mxu1 %vm8299_vm1, %v11324_v0  ;;  %v8399_v2 = vld [vmem:[#allocation9] sm:$0xff]   ;;  %v7132_v3 = vld [vmem:[#allocation7 + $0x8] sm:$0xff]   ;;  %s8300_s3 = smov 32   ;;  %vm690_vm2 = vcmask 1041409  }
  0x4c   :  { %6971 = vmatprep.subr.bf16.mxu0 %v7130_v1  ;;  %6992 = vmatpush3.bf16.msra.mxu1 %v8399_v2  ;;  %v8402_v4 = vld [vmem:[#allocation9 + $0x8] sm:$0xff]   ;;  %v7134_v5 = vld [vmem:[#allocation4] sm:$0xff]   ;;  %v7135_v6 = vld [vmem:[#allocation4 + $0x8] sm:$0xff]   ;;  %vm693_vm3 = vcmask 1042434   ;;  %vm696_vm4 = vcmask 1043459   ;;  %vm699_vm5 = vcmask 1044484  }
  0x4d   :  { %6972 = vmatpush3.bf16.msra.mxu0 %v7130_v1  ;;  %6993 = vmatprep.subr.bf16.mxu1 %v11324_v0  ;;  %v7136_v9 = vld [vmem:[#allocation4 + $0x10] sm:$0xff]   ;;  %v7137_v10 = vld [vmem:[#allocation4 + $0x18] sm:$0xff]   ;;  %v7138_v11 = vld [vmem:[#allocation4 + $0x20] sm:$0xff]   ;;  %vm702_vm6 = vcmask 1045509   ;;  %vm705_vm7 = vcmask 1046534   ;;  %vm708_vm8 = vcmask 1047559  }
  0x4e   :  { %6973 = vmatprep.subr.bf16.mxu0 %v7132_v3  ;;  %6975 = vmatprep.mubr.msk.bf16.mxu0 %vm76_vm0, %v7134_v5  ;;  %v7139_v12 = vld [vmem:[#allocation4 + $0x28] sm:$0xff]   ;;  %v7140_v13 = vld [vmem:[#allocation4 + $0x30] sm:$0xff]   ;;  %v7141_v14 = vld [vmem:[#allocation4 + $0x38] sm:$0xff]   ;;  %vm662_vm9 = vcmask 253952   ;;  %vm663_vm10 = vsmask.f32 256 }
  0x4f   :  { %v8429_v15 = vld [vmem:[#allocation10] ss:$0 sm:$0xff]  ;;  %vm10695_vm11 = vmand %vm662_vm9, %vm663_vm10  ;;  %vm1052_vm12 = vsmask.f32 7938  ;;  %vm1434_vm14 = vcmask 254977   ;;  %vm2199_vm10 = vcmask 256002  }
  0x50   :  { %6994 = vmatpush3.bf16.msra.mxu1 %v8402_v4  ;;  %vm10717_vm13 = vmand %vm662_vm9, %vm1052_vm12  ;;  %vm1435_vm15 = vsmask.f32 1280  ;;  %vm2200_vm12 = vsmask.f32 2304  ;;  %s8301_s1 = smov 96   ;;  %s8302_s13 = smov [#allocation12]  }
  0x51   :  { %6974 = vmatpush3.bf16.msra.mxu0 %v7132_v3  ;;  %6999 = vmatprep.subr.bf16.mxu1 %v11324_v0  ;;  %s6478_s14 = sshll.u32 %s8302_s13, 4  ;;  %s6479_s14 = int_to_ptr.vmem [resolvable:$true] %s6478_s14 }
  0x52   :  { %v300_v7 = vld [vmem:[#allocation2] sm:$0xff]  ;;  %7023 = vmatprep.subr.bf16.mxu0 %v11324_v0  ;;  %s8262_s15 = scalar_lea.vmem %s6479_s14, 1024  ;;  %p8267_p5 = scmp.lt.s32.totalorder %s6479_s14, %s6479_s14 }
  0x53   :  { %v302_v8 = vpack.c.bf16 %v300_v7, %v300_v7  ;;  %p8263_p4 = scmp.ne.s32.totalorder %s6479_s14, %s8262_s15  ;;  %p8268_p6 = scmp.lt.s32.totalorder %s8262_s15, %s8262_s15 }
  0x54   :  { %6976 = vmatmul.mubr.msk.bf16.vlgmr.msra.gmra.mrb[0].mxu0 %vm76_vm0, %v7135_v6 }
  0x55   :  { %6996 = vmatmul.mubr.msk.bf16.vlgmr.msra.gmra.mrb[0].mxu1 %vm76_vm0, %v302_v8  ;;  %6979 = vmatprep.mubr.msk.bf16.mxu0 %vm76_vm0, %v7136_v9  ;;  %p8269_p7 = por %p8268_p6, %p8267_p5 }
  0x56   :  { %7000 = vmatpush3.bf16.msra.mxu1 %v8399_v2  ;;  %7003 = vmatprep.mubr.msk.bf16.mxu1 %vm8299_vm1, %v11324_v0 }
  0x57   :  { %7001 = vmatprep.subr.bf16.mxu1 %v11324_v0  ;;  %7024 = vmatpush3.bf16.msra.mxu0 %v8399_v2  ;;  %p8270_p8 = pnand %p8269_p7, %p8263_p4 }
  0x58   :  { %7025 = vmatprep.subr.bf16.mxu0 %v11324_v0 }
  0x5a   :  { %7002 = vmatpush3.bf16.msra.mxu1 %v8402_v4 }
  0x5b   :  { %7007 = vmatprep.subr.bf16.mxu1 %v11324_v0  ;;  %7026 = vmatpush3.bf16.msra.mxu0 %v8402_v4 }
  0x5c   :  { %6980 = vmatmul.mubr.msk.bf16.gmra.mrb[4].mxu0 %vm76_vm0, %v7137_v10  ;;  %7039 = vmatprep.subr.bf16.mxu0 %v11324_v0 }
  0x5d   :  { %6983 = vmatprep.mubr.msk.bf16.mxu0 %vm76_vm0, %v7138_v11 }
  0x64   :  { %6984 = vmatmul.mubr.msk.bf16.gmra.mrb[8].mxu0 %vm76_vm0, %v7139_v12  ;;  %v301_v12 = vld [vmem:[#allocation3] sm:$0xff] }
  0x65   :  { %6987 = vmatprep.mubr.msk.bf16.mxu0 %vm76_vm0, %v7140_v13 }
  0x6c   :  { %6988 = vmatmul.mubr.msk.bf16.gmra.mrb[12].mxu0 %vm76_vm0, %v7141_v14  ;;  %v440_v14 = vrot.slane %v301_v12, 2 }
  0x6d   :  { %7027 = vmatprep.mubr.msk.bf16.mxu0 %vm8299_vm1, %v11324_v0 }
 0x127   :  { %v6977_v16 = vpop.f32.mrb[0].mxu0 }
 0x128   :  { %v8431_v17 = vpop.f32.mrb[0].mxu1  ;;  %v8434_v18 = vadd.f32 %v6977_v16, %v8429_v15  ;;  %v210_v19 = vpop.f32.mrb[1].mxu0 }
 0x129   :  { %v6997_v20 = vpop.f32.mrb[1].mxu1  ;;  %v359_v21 = vrot.slane %v8431_v17, 1  ;;  %v8438_v22 = vadd.f32 %v8429_v15, %v210_v19  ;;  %v6978_v23 = vpop.f32.mrb[2].mxu0  ;;  %v361_v31 = vrot.slane %v8431_v17, 3  ;;  %v360_v33 = vrot.slane %v8431_v17, 2 }
 0x12a   :  { %v355_v24 = vpop.f32.mrb[2].mxu1  ;;  %v8441_v25 = vadd.f32 %v6978_v23, %v8429_v15  ;;  %v213_v26 = vpop.f32.mrb[3].mxu0  ;;  %v363_v48 = vrot.slane %v8431_v17, 5  ;;  %v362_v54 = vrot.slane %v8431_v17, 4  ;;  %v365_v62 = vrot.slane %v8431_v17, 7 }
 0x12b   :  { %v6998_v27 = vpop.f32.mrb[3].mxu1  ;;  %v8444_v28 = vadd.f32 %v359_v21, %v8434_v18  ;;  %v8447_v29 = vadd.f32 %v8429_v15, %v213_v26  ;;  %v8451_v30 = vadd.f32 %v8431_v17, %v8438_v22  ;;  %v364_v7 = vrot.slane %v8431_v17, 6 }
 0x12c   :  { %v441_v17 = vrot.slane %v301_v12, 3  ;;  %v442_v19 = vrot.slane %v301_v12, 4  ;;  %v444_v20 = vrot.slane %v301_v12, 6  ;;  %v443_v21 = vrot.slane %v301_v12, 5 }
 0x12d   :  { %7142 = vtanh.f32 %v8444_v28  ;;  %v445_v23 = vrot.slane %v301_v12, 7  ;;  %v6515_v24 = vmul.f32 -1.442695, %v8444_v28  ;;  %v6514_v26 = vmul.f32 -1.442695, %v8451_v30 }
 0x12e   :  { %7144 = vtanh.f32 %v8451_v30 }
 0x12f   :  { %v6981_v32 = vpop.f32.mrb[4].mxu0 }
 0x130   :  { %v8458_v34 = vadd.f32 %v6981_v32, %v8429_v15  ;;  %v226_v35 = vpop.f32.mrb[5].mxu0 }
 0x131   :  { %v8461_v36 = vadd.f32 %v8429_v15, %v226_v35  ;;  %v6982_v37 = vpop.f32.mrb[6].mxu0 }
 0x132   :  { %v8464_v38 = vadd.f32 %v6982_v37, %v8429_v15  ;;  %v229_v39 = vpop.f32.mrb[7].mxu0  ;;  %v8467_v40 = vadd.f32 %v361_v31, %v8458_v34 }
 0x133   :  { %v8470_v41 = vadd.f32 %v8429_v15, %v229_v39  ;;  %v8473_v42 = vadd.f32 %v360_v33, %v8461_v36 }
 0x134   :  { %7146 = vtanh.f32 %v8467_v40  ;;  %v6517_v27 = vmul.f32 -1.442695, %v8467_v40 }
 0x135   :  { %7148 = vtanh.f32 %v8473_v42  ;;  %v6516_v31 = vmul.f32 -1.442695, %v8473_v42 }
 0x137   :  { %v7143_v43 = vpop.eup %7142  ;;  %v6985_v45 = vpop.f32.mrb[8].mxu0 }
 0x138   :  { %v7145_v44 = vpop.eup %7144  ;;  %488 = vrot.lane.b32.xlu0 %v7143_v43, %s8294_s27  ;;  %v8479_v46 = vadd.f32 %v6985_v45, %v8429_v15  ;;  %v242_v47 = vpop.f32.mrb[9].mxu0 }
 0x139   :  { %486 = vrot.lane.b32.xlu1 %v7145_v44, %s8294_s27  ;;  %v8484_v49 = vadd.f32 %v8429_v15, %v242_v47  ;;  %v6986_v50 = vpop.f32.mrb[10].mxu0 }
 0x13a   :  { %v8487_v51 = vadd.f32 %v6986_v50, %v8429_v15  ;;  %v245_v52 = vpop.f32.mrb[11].mxu0  ;;  %v379_v53 = vadd.f32 %v363_v48, %v8479_v46 }
 0x13b   :  { %v8492_v55 = vadd.f32 %v8429_v15, %v245_v52  ;;  %v378_v56 = vadd.f32 %v362_v54, %v8484_v49 }
 0x13c   :  { %7150 = vtanh.f32 %v379_v53  ;;  %v6519_v37 = vmul.f32 -1.442695, %v379_v53 }
 0x13d   :  { %7152 = vtanh.f32 %v378_v56  ;;  %v6518_v44 = vmul.f32 -1.442695, %v378_v56 }
 0x13e   :  { %v7147_v57 = vpop.eup %7146 }
 0x13f   :  { %v7149_v58 = vpop.eup %7148  ;;  %v6989_v59 = vpop.f32.mrb[12].mxu0  ;;  %492 = vrot.lane.b32.xlu1 %v7147_v57, %s8294_s27 }
 0x140   :  { %v8497_v60 = vadd.f32 %v6989_v59, %v8429_v15  ;;  %v258_v61 = vpop.f32.mrb[13].mxu0  ;;  %490 = vrot.lane.b32.xlu0 %v7149_v58, %s8294_s27 }
 0x141   :  { %v8502_v63 = vadd.f32 %v8429_v15, %v258_v61  ;;  %v6990_v1 = vpop.f32.mrb[14].mxu0 }
 0x142   :  { %v8505_v3 = vadd.f32 %v6990_v1, %v8429_v15  ;;  %v261_v5 = vpop.f32.mrb[15].mxu0  ;;  %v381_v6 = vadd.f32 %v365_v62, %v8497_v60 }
 0x143   :  { %v8510_v8 = vadd.f32 %v8429_v15, %v261_v5  ;;  %v380_v9 = vadd.f32 %v364_v7, %v8502_v63  ;;  %v439_v15 = vrot.slane %v301_v12, 1 }
 0x144   :  { %7154 = vtanh.f32 %v381_v6  ;;  %v6521_v30 = vmul.f32 -1.442695, %v381_v6 }
 0x145   :  { %7156 = vtanh.f32 %v380_v9  ;;  %v6520_v40 = vmul.f32 -1.442695, %v380_v9 }
 0x146   :  { %v7151_v10 = vpop.eup %7150  ;;  %7158 = vpow2.f32 %v6515_v24 }
 0x147   :  { %496 = vrot.lane.b32.xlu1 %v7151_v10, %s8294_s27  ;;  %v7153_v11 = vpop.eup %7152  ;;  %7160 = vpow2.f32 %v6514_v26 }
 0x148   :  { %494 = vrot.lane.b32.xlu0 %v7153_v11, %s8294_s27  ;;  %7162 = vpow2.f32 %v6517_v27 }
 0x149   :  { %7164 = vpow2.f32 %v6516_v31 }
 0x14e   :  { %v7155_v13 = vpop.eup %7154 }
 0x14f   :  { %500 = vrot.lane.b32.xlu1 %v7155_v13, %s8294_s27  ;;  %v7157_v16 = vpop.eup %7156 }
 0x150   :  { %498 = vrot.lane.b32.xlu0 %v7157_v16, %s8294_s27  ;;  %v7159_v32 = vpop.eup %7158 }
 0x151   :  { %v407_v33 = vadd.f32 1.0, %v7159_v32  ;;  %v7161_v35 = vpop.eup %7160 }
 0x152   :  { %v406_v39 = vadd.f32 1.0, %v7161_v35  ;;  %v7163_v43 = vpop.eup %7162 }
 0x153   :  { %450 = vrot.lane.b32.xlu1 %v440_v14, %s8300_s3  ;;  %7166 = vrcp.f32 %v407_v33  ;;  %v7165_v28 = vpop.eup %7164  ;;  %v409_v45 = vadd.f32 1.0, %v7163_v43 }
 0x154   :  { %448 = vrot.lane.b32.xlu0 %v439_v15, %s8300_s3  ;;  %7168 = vpow2.f32 %v6519_v37  ;;  %v408_v47 = vadd.f32 1.0, %v7165_v28 }
 0x155   :  { %7170 = vrcp.f32 %v406_v39 }
 0x156   :  { %7172 = vpow2.f32 %v6518_v44 }
 0x157   :  { %452 = vrot.lane.b32.xlu1 %v441_v17, %s8300_s3  ;;  %7174 = vrcp.f32 %v409_v45 }
 0x158   :  { %446 = vrot.lane.b32.xlu0 %v301_v12, %s8300_s3  ;;  %7176 = vpow2.f32 %v6521_v30 }
 0x159   :  { %7178 = vrcp.f32 %v408_v47 }
 0x15a   :  { %7180 = vpow2.f32 %v6520_v40 }
 0x15b   :  { %454 = vrot.lane.b32.xlu1 %v442_v19, %s8300_s3 }
 0x15c   :  { %458 = vrot.lane.b32.xlu0 %v444_v20, %s8300_s3 }
 0x15d   :  { %v8529_v42 = vpop.eup %7166 }
 0x15e   :  { %v7169_v48 = vpop.eup %7168 }
 0x15f   :  { %456 = vrot.lane.b32.xlu1 %v443_v21, %s8300_s3  ;;  %v8532_v54 = vpop.eup %7170  ;;  %v411_v56 = vadd.f32 1.0, %v7169_v48 }
 0x160   :  { %460 = vrot.lane.b32.xlu0 %v445_v23, %s8300_s3  ;;  %v7173_v57 = vpop.eup %7172 }
 0x161   :  { %v8536_v59 = vpop.eup %7174  ;;  %7182 = vrcp.f32 %v411_v56  ;;  %v410_v61 = vadd.f32 1.0, %v7173_v57 }
 0x162   :  { %v7177_v62 = vpop.eup %7176 }
 0x163   :  { %v8539_v5 = vpop.eup %7178  ;;  %7184 = vrcp.f32 %v410_v61  ;;  %v413_v11 = vadd.f32 1.0, %v7177_v62 }
 0x164   :  { %v7181_v10 = vpop.eup %7180 }
 0x165   :  { %v412_v12 = vadd.f32 1.0, %v7181_v10  ;;  %7186 = vrcp.f32 %v413_v11 }
 0x167   :  { %7188 = vrcp.f32 %v412_v12 }
 0x16b   :  { %v8545_v13 = vpop.eup %7182 }
 0x16d   :  { %v8549_v17 = vpop.eup %7184 }
 0x16f   :  { %v8553_v20 = vpop.eup %7186 }
 0x171   :  { %v8556_v24 = vpop.eup %7188 }
 0x1aa   :  { %v489_v50 = vpop.permute.xlu0 %488 }
 0x1ab   :  { %v511_v52 = vmul.f32 %v8529_v42, %v489_v50  ;;  %v487_v53 = vpop.permute.xlu1 %486 }
 0x1ac   :  { %v510_v58 = vmul.f32 %v8532_v54, %v487_v53 }
 0x1ad   :  { %528 = vrot.lane.b32.xlu0 %v511_v52, %s8300_s3 }
 0x1b1   :  { %526 = vrot.lane.b32.xlu0 %v510_v58, %s8300_s3  ;;  %v493_v1 = vpop.permute.xlu1 %492 }
 0x1b2   :  { %v513_v6 = vmul.f32 %v8536_v59, %v493_v1  ;;  %v491_v7 = vpop.permute.xlu0 %490 }
 0x1b3   :  { %v512_v9 = vmul.f32 %v8539_v5, %v491_v7 }
 0x1b4   :  { %532 = vrot.lane.b32.xlu1 %v513_v6, %s8300_s3 }
 0x1b5   :  { %530 = vrot.lane.b32.xlu0 %v512_v9, %s8300_s3 }
 0x1b9   :  { %v497_v14 = vpop.permute.xlu1 %496 }
 0x1ba   :  { %v515_v16 = vmul.f32 %v8545_v13, %v497_v14  ;;  %v495_v15 = vpop.permute.xlu0 %494 }
 0x1bb   :  { %v514_v19 = vmul.f32 %v8549_v17, %v495_v15 }
 0x1bc   :  { %536 = vrot.lane.b32.xlu1 %v515_v16, %s8300_s3 }
 0x1c0   :  { %534 = vrot.lane.b32.xlu1 %v514_v19, %s8300_s3 }
 0x1c1   :  { %v501_v21 = vpop.permute.xlu1 %500 }
 0x1c2   :  { %v517_v23 = vmul.f32 %v8553_v20, %v501_v21  ;;  %v499_v26 = vpop.permute.xlu0 %498 }
 0x1c3   :  { %v516_v27 = vmul.f32 %v8556_v24, %v499_v26 }
 0x1c4   :  { %540 = vrot.lane.b32.xlu1 %v517_v23, %s8300_s3 }
 0x1c5   :  { %538 = vrot.lane.b32.xlu0 %v516_v27, %s8300_s3  ;;  %v451_v33 = vpop.permute.xlu1 %450 }
 0x1c6   :  { %v449_v31 = vpop.permute.xlu0 %448  ;;  %v472_v53 = vmul.f32 %v8539_v5, %v451_v33 }
 0x1c7   :  { %v471_v44 = vmul.f32 %v8529_v42, %v449_v31 }
 0x1c9   :  { %v453_v37 = vpop.permute.xlu1 %452 }
 0x1ca   :  { %v447_v32 = vpop.permute.xlu0 %446  ;;  %v473_v50 = vmul.f32 %v8536_v59, %v453_v37 }
 0x1cb   :  { %v470_v30 = vmul.f32 %v8532_v54, %v447_v32 }
 0x1cd   :  { %v455_v43 = vpop.permute.xlu1 %454 }
 0x1ce   :  { %v459_v35 = vpop.permute.xlu0 %458  ;;  %v474_v9 = vmul.f32 %v8549_v17, %v455_v43 }
 0x1cf   :  { %v476_v21 = vmul.f32 %v8556_v24, %v459_v35 }
 0x1d1   :  { %v457_v47 = vpop.permute.xlu1 %456 }
 0x1d2   :  { %v461_v39 = vpop.permute.xlu0 %460  ;;  %v475_v62 = vmul.f32 %v8545_v13, %v457_v47 }
 0x1d3   :  { %v477_v14 = vmul.f32 %v8553_v20, %v461_v39 }
 0x21f   :  { %v529_v28 = vpop.permute.xlu0 %528 }
 0x220   :  { %v8562_v45 = vadd.f32 %v529_v28, %v471_v44 }
 0x222   :  { %7190 = vtanh.f32 %v8562_v45 }
 0x223   :  { %v527_v40 = vpop.permute.xlu0 %526 }
 0x224   :  { %v8566_v48 = vadd.f32 %v527_v40, %v470_v30 }
 0x226   :  { %7192 = vtanh.f32 %v8566_v48  ;;  %v533_v52 = vpop.permute.xlu1 %532 }
 0x227   :  { %v8571_v56 = vadd.f32 %v533_v52, %v473_v50  ;;  %v531_v57 = vpop.permute.xlu0 %530 }
 0x228   :  { %v8574_v58 = vadd.f32 %v531_v57, %v472_v53 }
 0x229   :  { %7194 = vtanh.f32 %v8571_v56 }
 0x22a   :  { %7196 = vtanh.f32 %v8574_v58 }
 0x22c   :  { %v7191_v61 = vpop.eup %7190 }
 0x22d   :  { %576 = vrot.lane.b32.xlu0 %v7191_v61, %s8294_s27 }
 0x22e   :  { %v537_v6 = vpop.permute.xlu1 %536 }
 0x22f   :  { %v8579_v7 = vadd.f32 %v537_v6, %v475_v62 }
 0x230   :  { %v7193_v1 = vpop.eup %7192 }
 0x231   :  { %574 = vrot.lane.b32.xlu0 %v7193_v1, %s8294_s27  ;;  %7198 = vtanh.f32 %v8579_v7 }
 0x232   :  { %v535_v11 = vpop.permute.xlu1 %534 }
 0x233   :  { %v7195_v10 = vpop.eup %7194  ;;  %v8584_v12 = vadd.f32 %v535_v11, %v474_v9 }
 0x234   :  { %580 = vrot.lane.b32.xlu1 %v7195_v10, %s8294_s27  ;;  %v7197_v16 = vpop.eup %7196 }
 0x235   :  { %7200 = vtanh.f32 %v8584_v12 }
 0x236   :  { %v541_v15 = vpop.permute.xlu1 %540 }
 0x237   :  { %v8589_v19 = vadd.f32 %v541_v15, %v477_v14  ;;  %v539_v23 = vpop.permute.xlu0 %538 }
 0x238   :  { %578 = vrot.lane.b32.xlu1 %v7197_v16, %s8294_s27  ;;  %v8594_v26 = vadd.f32 %v539_v23, %v476_v21 }
 0x239   :  { %7202 = vtanh.f32 %v8589_v19 }
 0x23a   :  { %7204 = vtanh.f32 %v8594_v26 }
 0x23b   :  { %v7199_v27 = vpop.eup %7198 }
 0x23c   :  { %584 = vrot.lane.b32.xlu1 %v7199_v27, %s8294_s27 }
 0x23f   :  { %v7201_v31 = vpop.eup %7200 }
 0x240   :  { %582 = vrot.lane.b32.xlu0 %v7201_v31, %s8294_s27 }
 0x243   :  { %v7203_v32 = vpop.eup %7202 }
 0x244   :  { %588 = vrot.lane.b32.xlu1 %v7203_v32, %s8294_s27  ;;  %v7205_v33 = vpop.eup %7204 }
 0x245   :  { %586 = vrot.lane.b32.xlu0 %v7205_v33, %s8294_s27 }
 0x29f   :  { %v577_v35 = vpop.permute.xlu0 %576 }
 0x2a0   :  { %v599_v43 = vmul.f32 %v8529_v42, %v577_v35 }
 0x2a2   :  { %v8604_v47 = vpack.c.bf16 %v599_v43, %v599_v43 }
 0x2a3   :  { %v575_v44 = vpop.permute.xlu0 %574 }
 0x2a4   :  { %v598_v30 = vmul.f32 %v8532_v54, %v575_v44  ;;  %11410 = vst [vmem:[#allocation17_spill] sm:$0xff] %v8604_v47  ;;  %v623_v57 = vunpack.c.l.b16 %v8604_v47 }
 0x2a6   :  { %v581_v37 = vpop.permute.xlu1 %580  ;;  %v8609_v53 = vpack.c.bf16 %v598_v30, %v598_v30  ;;  %v689_v9 = vrot.slane %v623_v57, 7 }
 0x2a7   :  { %v601_v50 = vmul.f32 %v8536_v59, %v581_v37 }
 0x2a8   :  { %v622_v1 = vunpack.c.l.b16 %v8609_v53 }
 0x2a9   :  { %v8613_v42 = vpack.c.bf16 %v601_v50, %v601_v50 }
 0x2aa   :  { %v579_v39 = vpop.permute.xlu1 %578 }
 0x2ab   :  { %v600_v28 = vmul.f32 %v8539_v5, %v579_v39  ;;  %11411 = vst [vmem:[#allocation18_spill] sm:$0xff] %v8613_v42  ;;  %v625_v11 = vunpack.c.l.b16 %v8613_v42 }
 0x2ad   :  { %v8606_v40 = vpack.c.bf16 %v600_v28, %v600_v28  ;;  %v695_v32 = vrot.slane %v625_v11, 5 }
 0x2ae   :  { %v585_v52 = vpop.permute.xlu1 %584 }
 0x2af   :  { %v624_v61 = vunpack.c.l.b16 %v8606_v40  ;;  %v603_v5 = vmul.f32 %v8545_v13, %v585_v52  ;;  %v691_v13 = vsel %vm690_vm2, %v689_v9, %v622_v1 }
 0x2b1   :  { %v692_v59 = vrot.slane %v624_v61, 6  ;;  %v8621_v14 = vpack.c.bf16 %v603_v5, %v603_v5 }
 0x2b2   :  { %v583_v62 = vpop.permute.xlu0 %582 }
 0x2b3   :  { %v602_v54 = vmul.f32 %v8549_v17, %v583_v62  ;;  %11412 = vst [vmem:[#allocation19_spill] sm:$0xff] %v8621_v14  ;;  %v694_v23 = vsel %vm693_vm3, %v692_v59, %v691_v13  ;;  %v627_v33 = vunpack.c.l.b16 %v8621_v14 }
 0x2b4   :  { %v697_v37 = vsel %vm696_vm4, %v695_v32, %v694_v23 }
 0x2b5   :  { %v8618_v6 = vpack.c.bf16 %v602_v54, %v602_v54  ;;  %v701_v44 = vrot.slane %v627_v33, 3 }
 0x2b6   :  { %v589_v10 = vpop.permute.xlu1 %588 }
 0x2b7   :  { %v626_v16 = vunpack.c.l.b16 %v8618_v6  ;;  %v605_v15 = vmul.f32 %v8553_v20, %v589_v10  ;;  %v587_v21 = vpop.permute.xlu0 %586 }
 0x2b8   :  { %v604_v31 = vmul.f32 %v8556_v24, %v587_v21 }
 0x2b9   :  { %v8626_v17 = vpack.c.bf16 %v605_v15, %v605_v15  ;;  %v698_v27 = vrot.slane %v626_v16, 4 }
 0x2ba   :  { %v8631_v35 = vpack.c.bf16 %v604_v31, %v604_v31 }
 0x2bb   :  { %11413 = vst [vmem:[#allocation20_spill] sm:$0xff] %v8626_v17  ;;  %v629_v20 = vunpack.c.l.b16 %v8626_v17  ;;  %v700_v39 = vsel %vm699_vm5, %v698_v27, %v697_v37 }
 0x2bc   :  { %v628_v43 = vunpack.c.l.b16 %v8631_v35  ;;  %v703_v30 = vsel %vm702_vm6, %v701_v44, %v700_v39 }
 0x2bd   :  { %v707_v24 = vrot.slane %v629_v20, 1 }
 0x2be   :  { %v704_v28 = vrot.slane %v628_v43, 2 }
 0x2c0   :  { %v706_v50 = vsel %vm705_vm7, %v704_v28, %v703_v30 }
 0x2c1   :  { %v709_v52 = vsel %vm708_vm8, %v707_v24, %v706_v50 }
 0x2c2   :  { %v710_v57 = vpack.c.b16 %v709_v52, %v709_v52 }
 0x2c4   :  { %711 = vrot.lane.b32.xlu0 %v710_v57, %s8300_s3 }
 0x336   :  { %v712_v61 = vpop.permute.xlu0 %711 }
 0x337   :  { %7004 = vmatmul.mubr.msk.bf16.vlgmr.msra.gmra.mrb[4].mxu1 %vm76_vm0, %v712_v61 }
 0x338   :  { %7008 = vmatpush3.bf16.msra.mxu1 %v8399_v2  ;;  %7011 = vmatprep.mubr.msk.bf16.mxu1 %vm8299_vm1, %v11324_v0 }
 0x339   :  { %7009 = vmatprep.subr.bf16.mxu1 %v11324_v0 }
 0x33c   :  { %7010 = vmatpush3.bf16.msra.mxu1 %v8402_v4 }
 0x33d   :  { %7015 = vmatprep.subr.bf16.mxu1 %v11324_v0 }
 0x40a   :  { %v750_v62 = vpop.f32.mrb[4].mxu1 }
 0x40b   :  { %v7005_v5 = vpop.f32.mrb[5].mxu1  ;;  %v773_v54 = vadd.f32 %v750_v62, %v8434_v18  ;;  %v758_v1 = vrot.slane %v750_v62, 1  ;;  %v757_v9 = vrot.slane %v750_v62, 7  ;;  %v759_v11 = vrot.slane %v750_v62, 2 }
 0x40c   :  { %v753_v59 = vpop.f32.mrb[6].mxu1  ;;  %v760_v15 = vrot.slane %v750_v62, 3  ;;  %v761_v13 = vrot.slane %v750_v62, 4  ;;  %v762_v23 = vrot.slane %v750_v62, 5  ;;  %v763_v33 = vrot.slane %v750_v62, 6 }
 0x40d   :  { %v7006_v10 = vpop.f32.mrb[7].mxu1  ;;  %7206 = vtanh.f32 %v773_v54  ;;  %v774_v2 = vadd.f32 %v758_v1, %v8461_v36  ;;  %v772_v16 = vadd.f32 %v757_v9, %v8438_v22  ;;  %v775_v4 = vadd.f32 %v759_v11, %v8458_v34 }
 0x40e   :  { %v776_v21 = vadd.f32 %v760_v15, %v8484_v49  ;;  %v777_v27 = vadd.f32 %v761_v13, %v8479_v46  ;;  %v778_v32 = vadd.f32 %v762_v23, %v8502_v63  ;;  %v779_v20 = vadd.f32 %v763_v33, %v8497_v60 }
 0x40f   :  { %7208 = vtanh.f32 %v774_v2  ;;  %v6532_v50 = vmul.f32 -1.442695, %v773_v54  ;;  %v6533_v52 = vmul.f32 -1.442695, %v774_v2  ;;  %v6531_v57 = vmul.f32 -1.442695, %v772_v16 }
 0x410   :  { %7210 = vtanh.f32 %v772_v16  ;;  %v6534_v61 = vmul.f32 -1.442695, %v775_v4  ;;  %v6535_v62 = vmul.f32 -1.442695, %v776_v21  ;;  %v6536_v5 = vmul.f32 -1.442695, %v777_v27 }
 0x411   :  { %7212 = vtanh.f32 %v775_v4  ;;  %v6537_v9 = vmul.f32 -1.442695, %v778_v32  ;;  %v6538_v11 = vmul.f32 -1.442695, %v779_v20 }
 0x412   :  { %7214 = vtanh.f32 %v776_v21 }
 0x413   :  { %7216 = vtanh.f32 %v777_v27 }
 0x414   :  { %7218 = vtanh.f32 %v778_v32 }
 0x415   :  { %7220 = vtanh.f32 %v779_v20 }
 0x416   :  { %7222 = vpow2.f32 %v6532_v50 }
 0x417   :  { %v7207_v31 = vpop.eup %7206  ;;  %7224 = vpow2.f32 %v6533_v52 }
 0x418   :  { %878 = vrot.lane.b32.xlu1 %v7207_v31, %s8294_s27  ;;  %7226 = vpow2.f32 %v6531_v57 }
 0x419   :  { %v7209_v37 = vpop.eup %7208  ;;  %7228 = vpow2.f32 %v6534_v61 }
 0x41a   :  { %880 = vrot.lane.b32.xlu0 %v7209_v37, %s8294_s27  ;;  %v7211_v39 = vpop.eup %7210  ;;  %7230 = vpow2.f32 %v6535_v62 }
 0x41b   :  { %v7213_v43 = vpop.eup %7212  ;;  %7232 = vpow2.f32 %v6536_v5 }
 0x41c   :  { %876 = vrot.lane.b32.xlu1 %v7211_v39, %s8294_s27  ;;  %v7215_v44 = vpop.eup %7214  ;;  %7234 = vpow2.f32 %v6537_v9 }
 0x41d   :  { %v7217_v28 = vpop.eup %7216 }
 0x41e   :  { %882 = vrot.lane.b32.xlu0 %v7213_v43, %s8294_s27  ;;  %v7219_v24 = vpop.eup %7218 }
 0x41f   :  { %v7221_v30 = vpop.eup %7220 }
 0x420   :  { %884 = vrot.lane.b32.xlu1 %v7215_v44, %s8294_s27  ;;  %v7223_v1 = vpop.eup %7222 }
 0x421   :  { %v7225_v59 = vpop.eup %7224  ;;  %v805_v10 = vadd.f32 1.0, %v7223_v1 }
 0x422   :  { %886 = vrot.lane.b32.xlu0 %v7217_v28, %s8294_s27  ;;  %v7227_v15 = vpop.eup %7226  ;;  %v806_v13 = vadd.f32 1.0, %v7225_v59 }
 0x423   :  { %7236 = vrcp.f32 %v805_v10  ;;  %v7229_v54 = vpop.eup %7228  ;;  %v804_v2 = vadd.f32 1.0, %v7227_v15 }
 0x424   :  { %888 = vrot.lane.b32.xlu1 %v7219_v24, %s8294_s27  ;;  %7238 = vpow2.f32 %v6538_v11  ;;  %v7231_v16 = vpop.eup %7230  ;;  %v807_v4 = vadd.f32 1.0, %v7229_v54 }
 0x425   :  { %7240 = vrcp.f32 %v806_v13  ;;  %v7233_v21 = vpop.eup %7232  ;;  %v808_v23 = vadd.f32 1.0, %v7231_v16 }
 0x426   :  { %890 = vrot.lane.b32.xlu0 %v7221_v30, %s8294_s27  ;;  %7242 = vrcp.f32 %v804_v2  ;;  %v7235_v27 = vpop.eup %7234  ;;  %v809_v31 = vadd.f32 1.0, %v7233_v21  ;;  %v845_v21 = vrot.slane %v8562_v45, 7  ;;  %v847_v45 = vrot.slane %v8571_v56, 7 }
 0x427   :  { %7244 = vrcp.f32 %v807_v4  ;;  %v810_v33 = vadd.f32 1.0, %v7235_v27  ;;  %v846_v27 = vrot.slane %v8574_v58, 7  ;;  %v850_v56 = vrot.slane %v8594_v26, 7 }
 0x428   :  { %7246 = vrcp.f32 %v808_v23 }
 0x429   :  { %7248 = vrcp.f32 %v809_v31 }
 0x42a   :  { %7250 = vrcp.f32 %v810_v33 }
 0x42d   :  { %v8664_v32 = vpop.eup %7236 }
 0x42e   :  { %v7239_v20 = vpop.eup %7238  ;;  %v861_v23 = vmul.f32 %v8664_v32, %v845_v21 }
 0x42f   :  { %v8667_v43 = vpop.eup %7240  ;;  %v811_v28 = vadd.f32 1.0, %v7239_v20 }
 0x430   :  { %v8671_v30 = vpop.eup %7242  ;;  %v862_v20 = vmul.f32 %v8667_v43, %v846_v27 }
 0x431   :  { %v8675_v57 = vpop.eup %7244  ;;  %7252 = vrcp.f32 %v811_v28 }
 0x432   :  { %v8679_v5 = vpop.eup %7246 }
 0x433   :  { %v8683_v59 = vpop.eup %7248 }
 0x434   :  { %v8687_v15 = vpop.eup %7250 }
 0x43b   :  { %v8692_v2 = vpop.eup %7252 }
 0x48a   :  { %v879_v37 = vpop.permute.xlu1 %878 }
 0x48b   :  { %v901_v39 = vmul.f32 %v8664_v32, %v879_v37  ;;  %v844_v37 = vrot.slane %v8566_v48, 7  ;;  %v863_v48 = vmul.f32 %v8675_v57, %v847_v45 }
 0x48c   :  { %v881_v44 = vpop.permute.xlu0 %880 }
 0x48d   :  { %918 = vrot.lane.b32.xlu1 %v901_v39, %s8300_s3  ;;  %v902_v24 = vmul.f32 %v8667_v43, %v881_v44  ;;  %v860_v28 = vmul.f32 %v8671_v30, %v844_v37 }
 0x48e   :  { %v877_v50 = vpop.permute.xlu1 %876 }
 0x48f   :  { %v900_v52 = vmul.f32 %v8671_v30, %v877_v50  ;;  %920 = vrot.lane.b32.xlu0 %v902_v24, %s8300_s3  ;;  %v848_v50 = vrot.slane %v8584_v12, 7 }
 0x490   :  { %v883_v61 = vpop.permute.xlu0 %882 }
 0x491   :  { %916 = vrot.lane.b32.xlu1 %v900_v52, %s8300_s3  ;;  %v903_v62 = vmul.f32 %v8675_v57, %v883_v61  ;;  %v849_v61 = vrot.slane %v8579_v7, 7  ;;  %v866_v7 = vmul.f32 %v8687_v15, %v850_v56 }
 0x492   :  { %v885_v1 = vpop.permute.xlu1 %884 }
 0x493   :  { %v904_v9 = vmul.f32 %v8679_v5, %v885_v1  ;;  %922 = vrot.lane.b32.xlu0 %v903_v62, %s8300_s3  ;;  %v864_v1 = vmul.f32 %v8679_v5, %v848_v50  ;;  %v865_v12 = vmul.f32 %v8683_v59, %v849_v61 }
 0x494   :  { %v887_v10 = vpop.permute.xlu0 %886 }
 0x495   :  { %v905_v11 = vmul.f32 %v8683_v59, %v887_v10  ;;  %924 = vrot.lane.b32.xlu1 %v904_v9, %s8300_s3 }
 0x496   :  { %v889_v13 = vpop.permute.xlu1 %888 }
 0x497   :  { %v906_v54 = vmul.f32 %v8687_v15, %v889_v13  ;;  %926 = vrot.lane.b32.xlu0 %v905_v11, %s8300_s3 }
 0x498   :  { %v891_v16 = vpop.permute.xlu0 %890 }
 0x499   :  { %928 = vrot.lane.b32.xlu1 %v906_v54, %s8300_s3  ;;  %v907_v4 = vmul.f32 %v8692_v2, %v891_v16 }
 0x49b   :  { %930 = vrot.lane.b32.xlu0 %v907_v4, %s8300_s3  ;;  %v851_v4 = vrot.slane %v8589_v19, 7 }
 0x4ff   :  { %v919_v31 = vpop.permute.xlu1 %918 }
 0x500   :  { %v8699_v33 = vadd.f32 %v919_v31, %v861_v23  ;;  %v867_v23 = vmul.f32 %v8692_v2, %v851_v4 }
 0x501   :  { %v921_v39 = vpop.permute.xlu0 %920 }
 0x502   :  { %7254 = vtanh.f32 %v8699_v33  ;;  %v8704_v44 = vadd.f32 %v921_v39, %v862_v20 }
 0x503   :  { %v917_v24 = vpop.permute.xlu1 %916 }
 0x504   :  { %7256 = vtanh.f32 %v8704_v44  ;;  %v8709_v58 = vadd.f32 %v917_v24, %v860_v28 }
 0x505   :  { %v923_v52 = vpop.permute.xlu0 %922 }
 0x506   :  { %7258 = vtanh.f32 %v8709_v58  ;;  %v8715_v62 = vadd.f32 %v923_v52, %v863_v48 }
 0x507   :  { %v925_v9 = vpop.permute.xlu1 %924 }
 0x508   :  { %7260 = vtanh.f32 %v8715_v62  ;;  %v8720_v10 = vadd.f32 %v925_v9, %v864_v1 }
 0x509   :  { %v927_v11 = vpop.permute.xlu0 %926 }
 0x50a   :  { %7262 = vtanh.f32 %v8720_v10  ;;  %v8724_v54 = vadd.f32 %v927_v11, %v865_v12 }
 0x50b   :  { %v929_v16 = vpop.permute.xlu1 %928 }
 0x50c   :  { %v7255_v13 = vpop.eup %7254  ;;  %7264 = vtanh.f32 %v8724_v54  ;;  %v8730_v26 = vadd.f32 %v929_v16, %v866_v7 }
 0x50d   :  { %966 = vrot.lane.b32.xlu1 %v7255_v13, %s8294_s27  ;;  %v931_v31 = vpop.permute.xlu0 %930 }
 0x50e   :  { %v7257_v21 = vpop.eup %7256  ;;  %7266 = vtanh.f32 %v8730_v26  ;;  %v8735_v37 = vadd.f32 %v931_v31, %v867_v23 }
 0x50f   :  { %968 = vrot.lane.b32.xlu0 %v7257_v21, %s8294_s27 }
 0x510   :  { %v7259_v27 = vpop.eup %7258  ;;  %7268 = vtanh.f32 %v8735_v37 }
 0x511   :  { %964 = vrot.lane.b32.xlu1 %v7259_v27, %s8294_s27 }
 0x512   :  { %v7261_v20 = vpop.eup %7260 }
 0x513   :  { %970 = vrot.lane.b32.xlu0 %v7261_v20, %s8294_s27 }
 0x514   :  { %v7263_v19 = vpop.eup %7262 }
 0x515   :  { %972 = vrot.lane.b32.xlu1 %v7263_v19, %s8294_s27 }
 0x516   :  { %v7265_v39 = vpop.eup %7264 }
 0x517   :  { %974 = vrot.lane.b32.xlu0 %v7265_v39, %s8294_s27 }
 0x518   :  { %v7267_v28 = vpop.eup %7266 }
 0x519   :  { %976 = vrot.lane.b32.xlu1 %v7267_v28, %s8294_s27 }
 0x51a   :  { %v7269_v45 = vpop.eup %7268 }
 0x51b   :  { %978 = vrot.lane.b32.xlu0 %v7269_v45, %s8294_s27 }
 0x57f   :  { %v967_v24 = vpop.permute.xlu1 %966 }
 0x580   :  { %v989_v48 = vmul.f32 %v8664_v32, %v967_v24 }
 0x581   :  { %v969_v50 = vpop.permute.xlu0 %968 }
 0x582   :  { %v990_v52 = vmul.f32 %v8667_v43, %v969_v50  ;;  %v8749_v56 = vpack.c.bf16 %v989_v48, %v989_v48 }
 0x583   :  { %v965_v61 = vpop.permute.xlu1 %964 }
 0x584   :  { %v8746_v1 = vpack.c.bf16 %v990_v52, %v990_v52  ;;  %v988_v9 = vmul.f32 %v8671_v30, %v965_v61  ;;  %11414 = vst [vmem:[#allocation21_spill] sm:$0xff] %v8749_v56  ;;  %v1013_v21 = vunpack.c.l.b16 %v8749_v56 }
 0x585   :  { %v971_v11 = vpop.permute.xlu0 %970 }
 0x586   :  { %v8751_v12 = vpack.c.bf16 %v988_v9, %v988_v9  ;;  %v1014_v13 = vunpack.c.l.b16 %v8746_v1  ;;  %v991_v7 = vmul.f32 %v8675_v57, %v971_v11 }
 0x587   :  { %v973_v4 = vpop.permute.xlu1 %972 }
 0x588   :  { %v1012_v16 = vunpack.c.l.b16 %v8751_v12  ;;  %v8756_v32 = vpack.c.bf16 %v991_v7, %v991_v7  ;;  %v992_v43 = vmul.f32 %v8679_v5, %v973_v4  ;;  %v1080_v27 = vrot.slane %v1014_v13, 7 }
 0x589   :  { %v975_v30 = vpop.permute.xlu0 %974 }
 0x58a   :  { %11415 = vst [vmem:[#allocation22_spill] sm:$0xff] %v8756_v32  ;;  %v1078_v23 = vrot.slane %v1012_v16, 1  ;;  %v1015_v31 = vunpack.c.l.b16 %v8756_v32  ;;  %v8761_v20 = vpack.c.bf16 %v992_v43, %v992_v43  ;;  %v993_v19 = vmul.f32 %v8683_v59, %v975_v30 }
 0x58b   :  { %v977_v39 = vpop.permute.xlu1 %976 }
 0x58c   :  { %v1079_v57 = vsel %vm690_vm2, %v1013_v21, %v1078_v23  ;;  %v1082_v45 = vrot.slane %v1015_v31, 6  ;;  %v1016_v24 = vunpack.c.l.b16 %v8761_v20  ;;  %v8767_v5 = vpack.c.bf16 %v993_v19, %v993_v19 }
 0x58d   :  { %v1081_v28 = vsel %vm693_vm3, %v1080_v27, %v1079_v57  ;;  %v994_v50 = vmul.f32 %v8687_v15, %v977_v39  ;;  %v979_v59 = vpop.permute.xlu0 %978  ;;  %v8791_v57 = vld [vmem:[#allocation9 + $0x8] sm:$0xff]  }
 0x58e   :  { %11416 = vst [vmem:[#allocation23_spill] sm:$0xff] %v8767_v5  ;;  %v1083_v48 = vsel %vm696_vm4, %v1082_v45, %v1081_v28  ;;  %v1084_v52 = vrot.slane %v1016_v24, 5  ;;  %v1017_v61 = vunpack.c.l.b16 %v8767_v5  ;;  %v995_v7 = vmul.f32 %v8692_v2, %v979_v59  ;;  %v8785_v2 = vld [vmem:[#allocation9] sm:$0xff]  }
 0x58f   :  { %v8772_v9 = vpack.c.bf16 %v994_v50, %v994_v50 }
 0x590   :  { %v1085_v11 = vsel %vm699_vm5, %v1084_v52, %v1083_v48  ;;  %v1086_v13 = vrot.slane %v1017_v61, 4  ;;  %v8777_v4 = vpack.c.bf16 %v995_v7, %v995_v7 }
 0x591   :  { %v1018_v16 = vunpack.c.l.b16 %v8772_v9 }
 0x592   :  { %11417 = vst [vmem:[#allocation24_spill] sm:$0xff] %v8777_v4  ;;  %v1087_v43 = vsel %vm702_vm6, %v1086_v13, %v1085_v11  ;;  %v1019_v21 = vunpack.c.l.b16 %v8777_v4 }
 0x593   :  { %v1088_v15 = vrot.slane %v1018_v16, 3 }
 0x594   :  { %v1090_v30 = vrot.slane %v1019_v21, 2 }
 0x595   :  { %v1089_v23 = vsel %vm705_vm7, %v1088_v15, %v1087_v43 }
 0x596   :  { %v1091_v27 = vsel %vm708_vm8, %v1090_v30, %v1089_v23 }
 0x597   :  { %v1092_v31 = vpack.c.b16 %v1091_v27, %v1091_v27 }
 0x599   :  { %1093 = vrot.lane.b32.xlu1 %v1092_v31, %s8300_s3 }
 0x60b   :  { %v1094_v19 = vpop.permute.xlu1 %1093 }
 0x60c   :  { %7012 = vmatmul.mubr.msk.bf16.vlgmr.msra.gmra.mrb[8].mxu1 %vm76_vm0, %v1094_v19 }
 0x60d   :  { %7016 = vmatpush3.bf16.msra.mxu1 %v8785_v2  ;;  %7019 = vmatprep.mubr.msk.bf16.mxu1 %vm8299_vm1, %v11324_v0 }
 0x60e   :  { %7017 = vmatprep.subr.bf16.mxu1 %v11324_v0 }
 0x611   :  { %7018 = vmatpush3.bf16.msra.mxu1 %v8791_v57 }
 0x612   :  { %7031 = vmatprep.subr.bf16.mxu1 %v11324_v0 }
 0x6df   :  { %v1132_v39 = vpop.f32.mrb[8].mxu1 }
 0x6e0   :  { %v7013_v28 = vpop.f32.mrb[9].mxu1  ;;  %v1156_v45 = vadd.f32 %v1132_v39, %v8461_v36  ;;  %v1139_v24 = vrot.slane %v1132_v39, 6  ;;  %v1140_v50 = vrot.slane %v1132_v39, 7  ;;  %v1141_v59 = vrot.slane %v1132_v39, 1 }
 0x6e1   :  { %v1135_v48 = vpop.f32.mrb[10].mxu1  ;;  %v1143_v13 = vrot.slane %v1132_v39, 3  ;;  %v1142_v16 = vrot.slane %v1132_v39, 2  ;;  %v1145_v15 = vrot.slane %v1132_v39, 5  ;;  %v1144_v27 = vrot.slane %v1132_v39, 4 }
 0x6e2   :  { %v7014_v52 = vpop.f32.mrb[11].mxu1  ;;  %7270 = vtanh.f32 %v1156_v45  ;;  %v1154_v61 = vadd.f32 %v1139_v24, %v8438_v22  ;;  %v1155_v11 = vadd.f32 %v1140_v50, %v8434_v18  ;;  %v1157_v7 = vadd.f32 %v1141_v59, %v8458_v34 }
 0x6e3   :  { %v1159_v43 = vadd.f32 %v1143_v13, %v8479_v46  ;;  %v1158_v21 = vadd.f32 %v1142_v16, %v8484_v49  ;;  %v1161_v30 = vadd.f32 %v1145_v15, %v8497_v60  ;;  %v1160_v19 = vadd.f32 %v1144_v27, %v8502_v63 }
 0x6e4   :  { %7272 = vtanh.f32 %v1154_v61  ;;  %v6550_v59 = vmul.f32 -1.442695, %v1156_v45  ;;  %v6548_v13 = vmul.f32 -1.442695, %v1154_v61  ;;  %v6549_v16 = vmul.f32 -1.442695, %v1155_v11 }
 0x6e5   :  { %7274 = vtanh.f32 %v1155_v11  ;;  %v6551_v15 = vmul.f32 -1.442695, %v1157_v7  ;;  %v6552_v27 = vmul.f32 -1.442695, %v1158_v21 }
 0x6e6   :  { %7276 = vtanh.f32 %v1157_v7 }
 0x6e7   :  { %7278 = vtanh.f32 %v1159_v43 }
 0x6e8   :  { %7280 = vtanh.f32 %v1158_v21 }
 0x6e9   :  { %7282 = vtanh.f32 %v1161_v30 }
 0x6ea   :  { %7284 = vtanh.f32 %v1160_v19 }
 0x6eb   :  { %7286 = vpow2.f32 %v6550_v59 }
 0x6ec   :  { %v7271_v23 = vpop.eup %7270  ;;  %7288 = vpow2.f32 %v6548_v13 }
 0x6ed   :  { %1262 = vrot.lane.b32.xlu1 %v7271_v23, %s8294_s27  ;;  %7290 = vpow2.f32 %v6549_v16  ;;  %v6553_v23 = vmul.f32 -1.442695, %v1159_v43 }
 0x6ee   :  { %v7273_v31 = vpop.eup %7272  ;;  %7292 = vpow2.f32 %v6551_v15 }
 0x6ef   :  { %1258 = vrot.lane.b32.xlu0 %v7273_v31, %s8294_s27  ;;  %v7275_v28 = vpop.eup %7274  ;;  %7294 = vpow2.f32 %v6553_v23 }
 0x6f0   :  { %v7277_v24 = vpop.eup %7276  ;;  %7296 = vpow2.f32 %v6552_v27 }
 0x6f1   :  { %1260 = vrot.lane.b32.xlu1 %v7275_v28, %s8294_s27  ;;  %v7279_v50 = vpop.eup %7278  ;;  %v6555_v28 = vmul.f32 -1.442695, %v1161_v30 }
 0x6f2   :  { %v7281_v39 = vpop.eup %7280 }
 0x6f3   :  { %1264 = vrot.lane.b32.xlu0 %v7277_v24, %s8294_s27  ;;  %v7283_v48 = vpop.eup %7282  ;;  %7298 = vpow2.f32 %v6555_v28 }
 0x6f4   :  { %v7285_v52 = vpop.eup %7284 }
 0x6f5   :  { %1268 = vrot.lane.b32.xlu1 %v7279_v50, %s8294_s27  ;;  %v7287_v31 = vpop.eup %7286 }
 0x6f6   :  { %v7289_v24 = vpop.eup %7288  ;;  %v1188_v50 = vadd.f32 1.0, %v7287_v31 }
 0x6f7   :  { %1266 = vrot.lane.b32.xlu0 %v7281_v39, %s8294_s27  ;;  %v6554_v39 = vmul.f32 -1.442695, %v1160_v19 }
 0x6f8   :  { %7300 = vrcp.f32 %v1188_v50 }
 0x6f9   :  { %1272 = vrot.lane.b32.xlu1 %v7283_v48, %s8294_s27  ;;  %v7291_v48 = vpop.eup %7290  ;;  %7302 = vpow2.f32 %v6554_v39 }
 0x6fa   :  { %v7293_v45 = vpop.eup %7292  ;;  %v1187_v61 = vadd.f32 1.0, %v7291_v48 }
 0x6fb   :  { %1270 = vrot.lane.b32.xlu0 %v7285_v52, %s8294_s27  ;;  %v1186_v52 = vadd.f32 1.0, %v7289_v24  ;;  %v7295_v11 = vpop.eup %7294  ;;  %v1189_v7 = vadd.f32 1.0, %v7293_v45 }
 0x6fc   :  { %v7297_v43 = vpop.eup %7296  ;;  %v1191_v21 = vadd.f32 1.0, %v7295_v11 }
 0x6fd   :  { %7304 = vrcp.f32 %v1186_v52  ;;  %v7299_v59 = vpop.eup %7298  ;;  %v1190_v30 = vadd.f32 1.0, %v7297_v43 }
 0x6fe   :  { %7306 = vrcp.f32 %v1187_v61  ;;  %v1193_v16 = vadd.f32 1.0, %v7299_v59 }
 0x6ff   :  { %7308 = vrcp.f32 %v1189_v7 }
 0x700   :  { %7310 = vrcp.f32 %v1191_v21 }
 0x701   :  { %7312 = vrcp.f32 %v1190_v30 }
 0x702   :  { %v8811_v13 = vpop.eup %7300  ;;  %7314 = vrcp.f32 %v1193_v16 }
 0x703   :  { %v7303_v15 = vpop.eup %7302 }
 0x704   :  { %v1192_v28 = vadd.f32 1.0, %v7303_v15 }
 0x706   :  { %7316 = vrcp.f32 %v1192_v28 }
 0x707   :  { %v8814_v27 = vpop.eup %7304 }
 0x708   :  { %v8818_v50 = vpop.eup %7306 }
 0x709   :  { %v8822_v52 = vpop.eup %7308 }
 0x70a   :  { %v8826_v11 = vpop.eup %7310 }
 0x70b   :  { %v8830_v21 = vpop.eup %7312 }
 0x70c   :  { %v8834_v16 = vpop.eup %7314 }
 0x75f   :  { %v1263_v19 = vpop.permute.xlu1 %1262 }
 0x760   :  { %v1284_v23 = vmul.f32 %v8811_v13, %v1263_v19 }
 0x761   :  { %v1259_v31 = vpop.permute.xlu0 %1258 }
 0x762   :  { %1302 = vrot.lane.b32.xlu1 %v1284_v23, %s8300_s3  ;;  %v1282_v24 = vmul.f32 %v8814_v27, %v1259_v31  ;;  %v8839_v23 = vpop.eup %7316 }
 0x763   :  { %v1261_v39 = vpop.permute.xlu1 %1260 }
 0x764   :  { %v1283_v48 = vmul.f32 %v8818_v50, %v1261_v39  ;;  %1298 = vrot.lane.b32.xlu0 %v1282_v24, %s8300_s3  ;;  %v1228_v24 = vrot.slane %v8704_v44, 7  ;;  %v1229_v44 = vrot.slane %v8715_v62, 7  ;;  %v1233_v62 = vrot.slane %v8735_v37, 7 }
 0x765   :  { %v1265_v45 = vpop.permute.xlu0 %1264 }
 0x766   :  { %1300 = vrot.lane.b32.xlu1 %v1283_v48, %s8300_s3  ;;  %v1285_v61 = vmul.f32 %v8822_v52, %v1265_v45  ;;  %v1244_v39 = vmul.f32 %v8811_v13, %v1228_v24  ;;  %v1226_v48 = vrot.slane %v8709_v58, 7  ;;  %v1230_v24 = vrot.slane %v8720_v10, 7 }
 0x767   :  { %v1269_v7 = vpop.permute.xlu1 %1268  ;;  %v1249_v10 = vmul.f32 %v8834_v16, %v1233_v62 }
 0x768   :  { %v1287_v43 = vmul.f32 %v8826_v11, %v1269_v7  ;;  %1304 = vrot.lane.b32.xlu0 %v1285_v61, %s8300_s3  ;;  %v1227_v7 = vrot.slane %v8699_v33, 7  ;;  %v1245_v33 = vmul.f32 %v8822_v52, %v1229_v44 }
 0x769   :  { %v1267_v59 = vpop.permute.xlu0 %1266 }
 0x76a   :  { %v1286_v30 = vmul.f32 %v8830_v21, %v1267_v59  ;;  %1308 = vrot.lane.b32.xlu1 %v1287_v43, %s8300_s3  ;;  %v1242_v43 = vmul.f32 %v8814_v27, %v1226_v48 }
 0x76b   :  { %v1273_v19 = vpop.permute.xlu1 %1272 }
 0x76c   :  { %v1289_v15 = vmul.f32 %v8834_v16, %v1273_v19  ;;  %1306 = vrot.lane.b32.xlu0 %v1286_v30, %s8300_s3  ;;  %v1243_v19 = vmul.f32 %v8818_v50, %v1227_v7 }
 0x76d   :  { %v1271_v31 = vpop.permute.xlu0 %1270 }
 0x76e   :  { %1312 = vrot.lane.b32.xlu1 %v1289_v15, %s8300_s3  ;;  %v1288_v28 = vmul.f32 %v8839_v23, %v1271_v31  ;;  %v1231_v31 = vrot.slane %v8724_v54, 7  ;;  %v1246_v54 = vmul.f32 %v8830_v21, %v1230_v24 }
 0x770   :  { %1310 = vrot.lane.b32.xlu0 %v1288_v28, %s8300_s3  ;;  %v1247_v48 = vmul.f32 %v8826_v11, %v1231_v31 }
 0x7d4   :  { %v1303_v45 = vpop.permute.xlu1 %1302 }
 0x7d5   :  { %v8846_v61 = vadd.f32 %v1303_v45, %v1244_v39 }
 0x7d6   :  { %v1299_v59 = vpop.permute.xlu0 %1298 }
 0x7d7   :  { %7318 = vtanh.f32 %v8846_v61  ;;  %v8851_v30 = vadd.f32 %v1299_v59, %v1242_v43 }
 0x7d8   :  { %v1301_v15 = vpop.permute.xlu1 %1300 }
 0x7d9   :  { %7320 = vtanh.f32 %v8851_v30  ;;  %v8856_v58 = vadd.f32 %v1301_v15, %v1243_v19  ;;  %v1232_v15 = vrot.slane %v8730_v26, 7 }
 0x7da   :  { %v1305_v28 = vpop.permute.xlu0 %1304 }
 0x7db   :  { %7322 = vtanh.f32 %v8856_v58  ;;  %v8862_v39 = vadd.f32 %v1305_v28, %v1245_v33  ;;  %v1248_v33 = vmul.f32 %v8839_v23, %v1232_v15 }
 0x7dc   :  { %v1309_v45 = vpop.permute.xlu1 %1308 }
 0x7dd   :  { %7324 = vtanh.f32 %v8862_v39  ;;  %v8867_v7 = vadd.f32 %v1309_v45, %v1247_v48 }
 0x7de   :  { %v1307_v43 = vpop.permute.xlu0 %1306 }
 0x7df   :  { %7326 = vtanh.f32 %v8867_v7  ;;  %v8871_v19 = vadd.f32 %v1307_v43, %v1246_v54 }
 0x7e0   :  { %v1313_v44 = vpop.permute.xlu1 %1312 }
 0x7e1   :  { %v7319_v59 = vpop.eup %7318  ;;  %7328 = vtanh.f32 %v8871_v19  ;;  %v8877_v37 = vadd.f32 %v1313_v44, %v1249_v10 }
 0x7e2   :  { %1350 = vrot.lane.b32.xlu1 %v7319_v59, %s8294_s27  ;;  %v1311_v24 = vpop.permute.xlu0 %1310 }
 0x7e3   :  { %v7321_v31 = vpop.eup %7320  ;;  %7330 = vtanh.f32 %v8877_v37  ;;  %v8882_v48 = vadd.f32 %v1311_v24, %v1248_v33 }
 0x7e4   :  { %1346 = vrot.lane.b32.xlu0 %v7321_v31, %s8294_s27 }
 0x7e5   :  { %v7323_v28 = vpop.eup %7322  ;;  %7332 = vtanh.f32 %v8882_v48 }
 0x7e6   :  { %1348 = vrot.lane.b32.xlu1 %v7323_v28, %s8294_s27 }
 0x7e7   :  { %v7325_v45 = vpop.eup %7324 }
 0x7e8   :  { %1352 = vrot.lane.b32.xlu0 %v7325_v45, %s8294_s27 }
 0x7e9   :  { %v7327_v26 = vpop.eup %7326 }
 0x7ea   :  { %1356 = vrot.lane.b32.xlu1 %v7327_v26, %s8294_s27 }
 0x7eb   :  { %v7329_v62 = vpop.eup %7328 }
 0x7ec   :  { %1354 = vrot.lane.b32.xlu0 %v7329_v62, %s8294_s27 }
 0x7ed   :  { %v7331_v54 = vpop.eup %7330 }
 0x7ee   :  { %1360 = vrot.lane.b32.xlu1 %v7331_v54, %s8294_s27 }
 0x7ef   :  { %v7333_v43 = vpop.eup %7332 }
 0x7f0   :  { %1358 = vrot.lane.b32.xlu0 %v7333_v43, %s8294_s27 }
 0x854   :  { %v1351_v59 = vpop.permute.xlu1 %1350 }
 0x855   :  { %v1372_v45 = vmul.f32 %v8811_v13, %v1351_v59 }
 0x856   :  { %v1347_v10 = vpop.permute.xlu0 %1346 }
 0x857   :  { %v1370_v44 = vmul.f32 %v8814_v27, %v1347_v10  ;;  %v8904_v4 = vpack.c.bf16 %v1372_v45, %v1372_v45 }
 0x858   :  { %v1349_v15 = vpop.permute.xlu1 %1348 }
 0x859   :  { %v8892_v31 = vpack.c.bf16 %v1370_v44, %v1370_v44  ;;  %v1371_v33 = vmul.f32 %v8818_v50, %v1349_v15 }
 0x85a   :  { %v1353_v24 = vpop.permute.xlu0 %1352 }
 0x85b   :  { %v8895_v28 = vpack.c.bf16 %v1371_v33, %v1371_v33  ;;  %v1373_v26 = vmul.f32 %v8822_v52, %v1353_v24  ;;  %v1394_v62 = vunpack.c.l.b16 %v8892_v31 }
 0x85c   :  { %v1357_v43 = vpop.permute.xlu1 %1356 }
 0x85d   :  { %11418 = vst [vmem:[#allocation25_spill] sm:$0xff] %v8895_v28  ;;  %v1395_v54 = vunpack.c.l.b16 %v8895_v28  ;;  %v8901_v0 = vpack.c.bf16 %v1373_v26, %v1373_v26  ;;  %v1375_v10 = vmul.f32 %v8826_v11, %v1357_v43  ;;  %v1461_v15 = vrot.slane %v1394_v62, 2 }
 0x85e   :  { %v1355_v44 = vpop.permute.xlu0 %1354 }
 0x85f   :  { %11419 = vst [vmem:[#allocation26_spill] sm:$0xff] %v8901_v0  ;;  %v1462_v27 = vrot.slane %v1395_v54, 1  ;;  %v1374_v50 = vmul.f32 %v8830_v21, %v1355_v44  ;;  %v1397_v13 = vunpack.c.l.b16 %v8901_v0  ;;  %v8911_v24 = vpack.c.bf16 %v1375_v10, %v1375_v10 }
 0x860   :  { %v1361_v59 = vpop.permute.xlu1 %1360  ;;  %v1396_v54 = vunpack.c.l.b16 %v8904_v4 }
 0x861   :  { %v8908_v52 = vpack.c.bf16 %v1374_v50, %v1374_v50  ;;  %v1463_v33 = vsel %vm690_vm2, %v1462_v27, %v1461_v15  ;;  %11420 = vst [vmem:[#allocation27_spill] sm:$0xff] %v8911_v24  ;;  %v1377_v26 = vmul.f32 %v8834_v16, %v1361_v59  ;;  %v1465_v45 = vrot.slane %v1397_v13, 7 }
 0x862   :  { %v1359_v21 = vpop.permute.xlu0 %1358  ;;  %v1464_v62 = vsel %vm693_vm3, %v1396_v54, %v1463_v33  ;;  %v1399_v0 = vunpack.c.l.b16 %v8911_v24 }
 0x863   :  { %v1398_v11 = vunpack.c.l.b16 %v8908_v52  ;;  %v8916_v43 = vpack.c.bf16 %v1377_v26, %v1377_v26  ;;  %v1376_v50 = vmul.f32 %v8839_v23, %v1359_v21  ;;  %v1466_v10 = vsel %vm696_vm4, %v1465_v45, %v1464_v62 }
 0x864   :  { %v1469_v59 = vrot.slane %v1399_v0, 5  ;;  %v11422_v45 = vmov 0.0  }
 0x865   :  { %11421 = vst [vmem:[#allocation28_spill] sm:$0xff] %v8916_v43  ;;  %v1467_v44 = vrot.slane %v1398_v11, 6  ;;  %v8921_v27 = vpack.c.bf16 %v1376_v50, %v1376_v50  ;;  %v1401_v16 = vunpack.c.l.b16 %v8916_v43 }
 0x867   :  { %v1468_v15 = vsel %vm699_vm5, %v1467_v44, %v1466_v10  ;;  %v1400_v13 = vunpack.c.l.b16 %v8921_v27  ;;  %v1473_v28 = vrot.slane %v1401_v16, 3 }
 0x868   :  { %v1470_v33 = vsel %vm702_vm6, %v1469_v59, %v1468_v15 }
 0x869   :  { %v1471_v26 = vrot.slane %v1400_v13, 4 }
 0x86b   :  { %v1472_v54 = vsel %vm705_vm7, %v1471_v26, %v1470_v33 }
 0x86c   :  { %v1474_v23 = vsel %vm708_vm8, %v1473_v28, %v1472_v54 }
 0x86d   :  { %v1475_v11 = vpack.c.b16 %v1474_v23, %v1474_v23 }
 0x86f   :  { %1476 = vrot.lane.b32.xlu0 %v1475_v11, %s8300_s3 }
 0x8e1   :  { %v1477_v21 = vpop.permute.xlu0 %1476 }
 0x8e2   :  { %7020 = vmatmul.mubr.msk.bf16.vlgmr.msra.gmra.mrb[12].mxu1 %vm76_vm0, %v1477_v21 }
 0x8e3   :  { %7032 = vmatpush3.bf16.msra.mxu1 %v8785_v2  ;;  %7035 = vmatprep.mubr.msk.bf16.mxu1 %vm8299_vm1, %v11422_v45 }
 0x8e4   :  { %7033 = vmatprep.subr.bf16.mxu1 %v11422_v45 }
 0x8e7   :  { %7034 = vmatpush3.bf16.msra.mxu1 %v8791_v57 }
 0x8e8   :  { %7047 = vmatprep.subr.bf16.mxu1 %v11422_v45 }
 0x9b5   :  { %v1515_v0 = vpop.f32.mrb[12].mxu1 }
 0x9b6   :  { %v7021_v62 = vpop.f32.mrb[13].mxu1  ;;  %v1540_v28 = vadd.f32 %v1515_v0, %v8458_v34  ;;  %v1523_v44 = vrot.slane %v1515_v0, 6  ;;  %v1522_v50 = vrot.slane %v1515_v0, 5  ;;  %v1525_v13 = vrot.slane %v1515_v0, 1 }
 0x9b7   :  { %v1518_v10 = vpop.f32.mrb[14].mxu1  ;;  %v1524_v26 = vrot.slane %v1515_v0, 7  ;;  %v1526_v54 = vrot.slane %v1515_v0, 2  ;;  %v1527_v11 = vrot.slane %v1515_v0, 3 }
 0x9b8   :  { %v7022_v16 = vpop.f32.mrb[15].mxu1  ;;  %7334 = vtanh.f32 %v1540_v28  ;;  %v1538_v15 = vadd.f32 %v1523_v44, %v8434_v18  ;;  %v1537_v59 = vadd.f32 %v1522_v50, %v8438_v22  ;;  %v1541_v33 = vadd.f32 %v1525_v13, %v8484_v49 }
 0x9b9   :  { %v1539_v23 = vadd.f32 %v1524_v26, %v8461_v36  ;;  %v1542_v21 = vadd.f32 %v1526_v54, %v8479_v46  ;;  %v1543_v10 = vadd.f32 %v1527_v11, %v8502_v63  ;;  %v1528_v44 = vrot.slane %v1515_v0, 4 }
 0x9ba   :  { %7336 = vtanh.f32 %v1538_v15  ;;  %v6569_v43 = vmul.f32 -1.442695, %v1541_v33 }
 0x9bb   :  { %7338 = vtanh.f32 %v1537_v59  ;;  %v1544_v16 = vadd.f32 %v1528_v44, %v8497_v60  ;;  %v6568_v44 = vmul.f32 -1.442695, %v1540_v28  ;;  %v6570_v24 = vmul.f32 -1.442695, %v1542_v21 }
 0x9bc   :  { %7340 = vtanh.f32 %v1541_v33  ;;  %v6571_v5 = vmul.f32 -1.442695, %v1543_v10 }
 0x9bd   :  { %7342 = vtanh.f32 %v1539_v23 }
 0x9be   :  { %7344 = vtanh.f32 %v1542_v21 }
 0x9bf   :  { %7346 = vtanh.f32 %v1543_v10 }
 0x9c0   :  { %7348 = vtanh.f32 %v1544_v16 }
 0x9c1   :  { %7350 = vpow2.f32 %v6568_v44 }
 0x9c2   :  { %v7335_v62 = vpop.eup %7334 }
 0x9c3   :  { %1647 = vrot.lane.b32.xlu1 %v7335_v62, %s8294_s27 }
 0x9c4   :  { %v7337_v50 = vpop.eup %7336 }
 0x9c5   :  { %1643 = vrot.lane.b32.xlu0 %v7337_v50, %s8294_s27  ;;  %v7339_v13 = vpop.eup %7338  ;;  %v6566_v50 = vmul.f32 -1.442695, %v1538_v15 }
 0x9c6   :  { %v7341_v26 = vpop.eup %7340 }
 0x9c7   :  { %1641 = vrot.lane.b32.xlu1 %v7339_v13, %s8294_s27  ;;  %v7343_v54 = vpop.eup %7342  ;;  %v6565_v13 = vmul.f32 -1.442695, %v1537_v59  ;;  %7352 = vpow2.f32 %v6566_v50 }
 0x9c8   :  { %v7345_v0 = vpop.eup %7344 }
 0x9c9   :  { %1649 = vrot.lane.b32.xlu0 %v7341_v26, %s8294_s27  ;;  %v7347_v11 = vpop.eup %7346  ;;  %7354 = vpow2.f32 %v6565_v13  ;;  %v6567_v26 = vmul.f32 -1.442695, %v1539_v23 }
 0x9ca   :  { %v7349_v62 = vpop.eup %7348  ;;  %7356 = vpow2.f32 %v6569_v43 }
 0x9cb   :  { %1645 = vrot.lane.b32.xlu1 %v7343_v54, %s8294_s27  ;;  %v7351_v54 = vpop.eup %7350  ;;  %7358 = vpow2.f32 %v6567_v26 }
 0x9cc   :  { %7360 = vpow2.f32 %v6570_v24  ;;  %v1572_v32 = vadd.f32 1.0, %v7351_v54 }
 0x9cd   :  { %1651 = vrot.lane.b32.xlu0 %v7345_v0, %s8294_s27  ;;  %7362 = vpow2.f32 %v6571_v5 }
 0x9ce   :  { %7364 = vrcp.f32 %v1572_v32 }
 0x9cf   :  { %1653 = vrot.lane.b32.xlu1 %v7347_v11, %s8294_s27  ;;  %v6572_v11 = vmul.f32 -1.442695, %v1544_v16 }
 0x9d1   :  { %1655 = vrot.lane.b32.xlu0 %v7349_v62, %s8294_s27  ;;  %v7353_v0 = vpop.eup %7352  ;;  %7366 = vpow2.f32 %v6572_v11 }
 0x9d2   :  { %v1570_v62 = vadd.f32 1.0, %v7353_v0 }
 0x9d3   :  { %v7355_v56 = vpop.eup %7354 }
 0x9d4   :  { %v7357_v28 = vpop.eup %7356  ;;  %v1569_v15 = vadd.f32 1.0, %v7355_v56  ;;  %7368 = vrcp.f32 %v1570_v62 }
 0x9d5   :  { %v7359_v59 = vpop.eup %7358  ;;  %v1573_v33 = vadd.f32 1.0, %v7357_v28 }
 0x9d6   :  { %v7361_v23 = vpop.eup %7360  ;;  %7370 = vrcp.f32 %v1569_v15  ;;  %v1571_v43 = vadd.f32 1.0, %v7359_v59 }
 0x9d7   :  { %v7363_v21 = vpop.eup %7362  ;;  %7372 = vrcp.f32 %v1573_v33  ;;  %v1574_v10 = vadd.f32 1.0, %v7361_v23 }
 0x9d8   :  { %v8954_v24 = vpop.eup %7364  ;;  %7374 = vrcp.f32 %v1571_v43  ;;  %v1575_v5 = vadd.f32 1.0, %v7363_v21 }
 0x9d9   :  { %7376 = vrcp.f32 %v1574_v10 }
 0x9da   :  { %7378 = vrcp.f32 %v1575_v5 }
 0x9db   :  { %v7367_v44 = vpop.eup %7366 }
 0x9dc   :  { %v1576_v13 = vadd.f32 1.0, %v7367_v44 }
 0x9de   :  { %v8957_v56 = vpop.eup %7368  ;;  %7380 = vrcp.f32 %v1576_v13 }
 0x9e0   :  { %v8961_v54 = vpop.eup %7370 }
 0x9e1   :  { %v8965_v62 = vpop.eup %7372 }
 0x9e2   :  { %v8969_v59 = vpop.eup %7374 }
 0x9e3   :  { %v8973_v43 = vpop.eup %7376 }
 0x9e4   :  { %v8977_v5 = vpop.eup %7378 }
 0xa35   :  { %v1648_v16 = vpop.permute.xlu1 %1647 }
 0xa36   :  { %v1668_v32 = vmul.f32 %v8954_v24, %v1648_v16 }
 0xa37   :  { %v1644_v50 = vpop.permute.xlu0 %1643 }
 0xa38   :  { %1687 = vrot.lane.b32.xlu1 %v1668_v32, %s8300_s3  ;;  %v1666_v26 = vmul.f32 %v8957_v56, %v1644_v50  ;;  %v8982_v32 = vpop.eup %7380 }
 0xa39   :  { %v1642_v0 = vpop.permute.xlu1 %1641 }
 0xa3a   :  { %v1665_v11 = vmul.f32 %v8961_v54, %v1642_v0  ;;  %1683 = vrot.lane.b32.xlu0 %v1666_v26, %s8300_s3  ;;  %v1612_v26 = vrot.slane %v8862_v39, 7  ;;  %v1613_v39 = vrot.slane %v8871_v19, 7  ;;  %v1615_v19 = vrot.slane %v8882_v48, 7 }
 0xa3b   :  { %v1650_v28 = vpop.permute.xlu0 %1649 }
 0xa3c   :  { %1681 = vrot.lane.b32.xlu1 %v1665_v11, %s8300_s3  ;;  %v1669_v15 = vmul.f32 %v8965_v62, %v1650_v28  ;;  %v1628_v0 = vmul.f32 %v8954_v24, %v1612_v26  ;;  %v1610_v11 = vrot.slane %v8856_v58, 7  ;;  %v1614_v26 = vrot.slane %v8867_v7, 7 }
 0xa3d   :  { %v1646_v33 = vpop.permute.xlu1 %1645  ;;  %v1631_v7 = vmul.f32 %v8977_v5, %v1615_v19 }
 0xa3e   :  { %v1667_v23 = vmul.f32 %v8969_v59, %v1646_v33  ;;  %1689 = vrot.lane.b32.xlu0 %v1669_v15, %s8300_s3  ;;  %v1609_v33 = vrot.slane %v8851_v30, 7  ;;  %v1629_v30 = vmul.f32 %v8965_v62, %v1613_v39 }
 0xa3f   :  { %v1652_v21 = vpop.permute.xlu0 %1651 }
 0xa40   :  { %v1670_v10 = vmul.f32 %v8973_v43, %v1652_v21  ;;  %1685 = vrot.lane.b32.xlu1 %v1667_v23, %s8300_s3  ;;  %v1626_v23 = vmul.f32 %v8957_v56, %v1610_v11 }
 0xa41   :  { %v1654_v16 = vpop.permute.xlu1 %1653 }
 0xa42   :  { %v1671_v44 = vmul.f32 %v8977_v5, %v1654_v16  ;;  %1691 = vrot.lane.b32.xlu0 %v1670_v10, %s8300_s3  ;;  %v1625_v16 = vmul.f32 %v8961_v54, %v1609_v33 }
 0xa43   :  { %v1656_v50 = vpop.permute.xlu0 %1655 }
 0xa44   :  { %1693 = vrot.lane.b32.xlu1 %v1671_v44, %s8300_s3  ;;  %v1672_v13 = vmul.f32 %v8982_v32, %v1656_v50  ;;  %v1611_v50 = vrot.slane %v8846_v61, 7  ;;  %v1630_v61 = vmul.f32 %v8973_v43, %v1614_v26 }
 0xa46   :  { %1695 = vrot.lane.b32.xlu0 %v1672_v13, %s8300_s3  ;;  %v1627_v11 = vmul.f32 %v8969_v59, %v1611_v50 }
 0xaaa   :  { %v1688_v28 = vpop.permute.xlu1 %1687 }
 0xaab   :  { %v8989_v15 = vadd.f32 %v1688_v28, %v1628_v0 }
 0xaac   :  { %v1684_v21 = vpop.permute.xlu0 %1683 }
 0xaad   :  { %7382 = vtanh.f32 %v8989_v15  ;;  %v8994_v10 = vadd.f32 %v1684_v21, %v1626_v23 }
 0xaae   :  { %v1682_v44 = vpop.permute.xlu1 %1681 }
 0xaaf   :  { %7384 = vtanh.f32 %v8994_v10  ;;  %v8999_v58 = vadd.f32 %v1682_v44, %v1625_v16  ;;  %v1616_v44 = vrot.slane %v8877_v37, 7 }
 0xab0   :  { %v1690_v13 = vpop.permute.xlu0 %1689 }
 0xab1   :  { %7386 = vtanh.f32 %v8999_v58  ;;  %v9005_v0 = vadd.f32 %v1690_v13, %v1629_v30  ;;  %v1632_v30 = vmul.f32 %v8982_v32, %v1616_v44 }
 0xab2   :  { %v1686_v28 = vpop.permute.xlu1 %1685 }
 0xab3   :  { %7388 = vtanh.f32 %v9005_v0  ;;  %v9010_v33 = vadd.f32 %v1686_v28, %v1627_v11 }
 0xab4   :  { %v1692_v23 = vpop.permute.xlu0 %1691 }
 0xab5   :  { %7390 = vtanh.f32 %v9010_v33  ;;  %v9014_v16 = vadd.f32 %v1692_v23, %v1630_v61 }
 0xab6   :  { %v1694_v39 = vpop.permute.xlu1 %1693 }
 0xab7   :  { %v7383_v21 = vpop.eup %7382  ;;  %7392 = vtanh.f32 %v9014_v16  ;;  %v9020_v48 = vadd.f32 %v1694_v39, %v1631_v7 }
 0xab8   :  { %1735 = vrot.lane.b32.xlu1 %v7383_v21, %s8294_s27  ;;  %v1696_v26 = vpop.permute.xlu0 %1695 }
 0xab9   :  { %v7385_v50 = vpop.eup %7384  ;;  %7394 = vtanh.f32 %v9020_v48  ;;  %v9025_v11 = vadd.f32 %v1696_v26, %v1632_v30 }
 0xaba   :  { %1731 = vrot.lane.b32.xlu0 %v7385_v50, %s8294_s27 }
 0xabb   :  { %v7387_v13 = vpop.eup %7386  ;;  %7396 = vtanh.f32 %v9025_v11 }
 0xabc   :  { %1729 = vrot.lane.b32.xlu1 %v7387_v13, %s8294_s27 }
 0xabd   :  { %v7389_v28 = vpop.eup %7388 }
 0xabe   :  { %1737 = vrot.lane.b32.xlu0 %v7389_v28, %s8294_s27 }
 0xabf   :  { %v7391_v37 = vpop.eup %7390 }
 0xac0   :  { %1733 = vrot.lane.b32.xlu1 %v7391_v37, %s8294_s27 }
 0xac1   :  { %v7393_v19 = vpop.eup %7392 }
 0xac2   :  { %1739 = vrot.lane.b32.xlu0 %v7393_v19, %s8294_s27 }
 0xac3   :  { %v7395_v61 = vpop.eup %7394 }
 0xac4   :  { %1741 = vrot.lane.b32.xlu1 %v7395_v61, %s8294_s27 }
 0xac5   :  { %v7397_v23 = vpop.eup %7396 }
 0xac6   :  { %1743 = vrot.lane.b32.xlu0 %v7397_v23, %s8294_s27 }
 0xb2a   :  { %v1736_v21 = vpop.permute.xlu1 %1735 }
 0xb2b   :  { %v1756_v37 = vmul.f32 %v8954_v24, %v1736_v21 }
 0xb2c   :  { %v1732_v7 = vpop.permute.xlu0 %1731 }
 0xb2d   :  { %v1754_v39 = vmul.f32 %v8957_v56, %v1732_v7 }
 0xb2e   :  { %v1730_v44 = vpop.permute.xlu1 %1729 }
 0xb2f   :  { %v1753_v50 = vmul.f32 %v8961_v54, %v1730_v44  ;;  %v9036_v30 = vpack.c.bf16 %v1754_v39, %v1754_v39  ;;  %v9050_v44 = vpack.c.bf16 %v1756_v37, %v1756_v37 }
 0xb30   :  { %v1738_v26 = vpop.permute.xlu0 %1737 }
 0xb31   :  { %11423 = vst [vmem:[#allocation29_spill] sm:$0xff] %v9036_v30  ;;  %v9038_v13 = vpack.c.bf16 %v1753_v50, %v1753_v50  ;;  %v1757_v28 = vmul.f32 %v8965_v62, %v1738_v26  ;;  %v1778_v56 = vunpack.c.l.b16 %v9036_v30  ;;  %11424 = vst [vmem:[#allocation30_spill] sm:$0xff] %v9050_v44 }
 0xb32   :  { %v1734_v61 = vpop.permute.xlu1 %1733 }
 0xb33   :  { %v1777_v19 = vunpack.c.l.b16 %v9038_v13  ;;  %v9043_v23 = vpack.c.bf16 %v1757_v28, %v1757_v28  ;;  %v1755_v17 = vmul.f32 %v8969_v59, %v1734_v61  ;;  %v1844_v59 = vrot.slane %v1778_v56, 2 }
 0xb34   :  { %v1740_v7 = vpop.permute.xlu0 %1739 }
 0xb35   :  { %v9047_v54 = vpack.c.bf16 %v1755_v17, %v1755_v17  ;;  %v1758_v39 = vmul.f32 %v8973_v43, %v1740_v7  ;;  %v1843_v50 = vrot.slane %v1777_v19, 3  ;;  %v1781_v62 = vunpack.c.l.b16 %v9043_v23 }
 0xb36   :  { %v1742_v24 = vpop.permute.xlu1 %1741  ;;  %v1780_v43 = vunpack.c.l.b16 %v9050_v44 }
 0xb37   :  { %v1779_v21 = vunpack.c.l.b16 %v9047_v54  ;;  %v9054_v26 = vpack.c.bf16 %v1758_v39, %v1758_v39  ;;  %v1759_v28 = vmul.f32 %v8977_v5, %v1742_v24  ;;  %v1845_v37 = vsel %vm690_vm2, %v1844_v59, %v1843_v50 }
 0xb38   :  { %v1849_v19 = vrot.slane %v1781_v62, 7  ;;  %v1744_v7 = vpop.permute.xlu0 %1743 }
 0xb39   :  { %11425 = vst [vmem:[#allocation31_spill] sm:$0xff] %v9054_v26  ;;  %v1846_v61 = vrot.slane %v1779_v21, 1  ;;  %v1782_v30 = vunpack.c.l.b16 %v9054_v26  ;;  %v9058_v17 = vpack.c.bf16 %v1759_v28, %v1759_v28  ;;  %v1760_v47 = vmul.f32 %v8982_v32, %v1744_v7 }
 0xb3b   :  { %11426 = vst [vmem:[#allocation32_spill] sm:$0xff] %v9058_v17  ;;  %v1847_v14 = vsel %vm693_vm3, %v1846_v61, %v1845_v37  ;;  %v1851_v42 = vrot.slane %v1782_v30, 6  ;;  %v1783_v39 = vunpack.c.l.b16 %v9058_v17  ;;  %v9067_v21 = vpack.c.bf16 %v1760_v47, %v1760_v47 }
 0xb3c   :  { %v1848_v5 = vsel %vm696_vm4, %v1780_v43, %v1847_v14 }
 0xb3d   :  { %v1850_v56 = vsel %vm699_vm5, %v1849_v19, %v1848_v5  ;;  %v1853_v24 = vrot.slane %v1783_v39, 5  ;;  %11427 = vst [vmem:[#allocation33_spill] sm:$0xff] %v9067_v21  ;;  %v1784_v50 = vunpack.c.l.b16 %v9067_v21 }
 0xb3e   :  { %v1852_v28 = vsel %vm702_vm6, %v1851_v42, %v1850_v56 }
 0xb3f   :  { %v1854_v62 = vsel %vm705_vm7, %v1853_v24, %v1852_v28  ;;  %v1855_v59 = vrot.slane %v1784_v50, 4 }
 0xb41   :  { %v1856_v30 = vsel %vm708_vm8, %v1855_v59, %v1854_v62 }
 0xb42   :  { %v1857_v61 = vpack.c.b16 %v1856_v30, %v1856_v30 }
 0xb44   :  { %1858 = vrot.lane.b32.xlu1 %v1857_v61, %s8300_s3 }
 0xbb6   :  { %v1859_v32 = vpop.permute.xlu1 %1858 }
 0xbb7   :  { %7028 = vmatmul.mubr.msk.bf16.vlgmr.msra.gmra.mrb[16].mxu0 %vm76_vm0, %v1859_v32 }
 0xbb8   :  { %7040 = vmatpush3.bf16.msra.mxu0 %v8785_v2  ;;  %7043 = vmatprep.mubr.msk.bf16.mxu0 %vm8299_vm1, %v11422_v45 }
 0xbb9   :  { %7041 = vmatprep.subr.bf16.mxu0 %v11422_v45 }
 0xbbc   :  { %7042 = vmatpush3.bf16.msra.mxu0 %v8791_v57 }
 0xbbd   :  { %7055 = vmatprep.subr.bf16.mxu0 %v11422_v45 }
 0xc8a   :  { %v1897_v47 = vpop.f32.mrb[16].mxu0 }
 0xc8b   :  { %v1904_v42 = vrot.slane %v1897_v47, 4  ;;  %v7029_v14 = vpop.f32.mrb[17].mxu0  ;;  %v1906_v7 = vrot.slane %v1897_v47, 6  ;;  %v1908_v39 = vrot.slane %v1897_v47, 1  ;;  %v1905_v5 = vrot.slane %v1897_v47, 5 }
 0xc8c   :  { %v1900_v43 = vpop.f32.mrb[18].mxu0  ;;  %v1923_v56 = vadd.f32 %v1897_v47, %v8484_v49  ;;  %v1909_v28 = vrot.slane %v1897_v47, 2  ;;  %v1907_v50 = vrot.slane %v1897_v47, 7  ;;  %v1910_v30 = vrot.slane %v1897_v47, 3 }
 0xc8d   :  { %v1919_v37 = vadd.f32 %v1904_v42, %v8438_v22  ;;  %v7030_v19 = vpop.f32.mrb[19].mxu0  ;;  %v1921_v2 = vadd.f32 %v1906_v7, %v8461_v36  ;;  %v1924_v57 = vadd.f32 %v1908_v39, %v8479_v46  ;;  %v1920_v62 = vadd.f32 %v1905_v5, %v8434_v18 }
 0xc8e   :  { %v1925_v59 = vadd.f32 %v1909_v28, %v8502_v63  ;;  %v1922_v61 = vadd.f32 %v1907_v50, %v8458_v34  ;;  %v1926_v42 = vadd.f32 %v1910_v30, %v8497_v60  ;;  %v6586_v28 = vmul.f32 -1.442695, %v1923_v56 }
 0xc8f   :  { %7398 = vtanh.f32 %v1919_v37  ;;  %v6582_v5 = vmul.f32 -1.442695, %v1919_v37  ;;  %v6587_v30 = vmul.f32 -1.442695, %v1924_v57 }
 0xc90   :  { %7400 = vtanh.f32 %v1921_v2 }
 0xc91   :  { %7402 = vtanh.f32 %v1923_v56 }
 0xc92   :  { %7404 = vtanh.f32 %v1924_v57 }
 0xc93   :  { %7406 = vtanh.f32 %v1920_v62 }
 0xc94   :  { %7408 = vtanh.f32 %v1925_v59 }
 0xc95   :  { %7410 = vtanh.f32 %v1922_v61 }
 0xc96   :  { %7412 = vtanh.f32 %v1926_v42 }
 0xc97   :  { %7414 = vpow2.f32 %v6582_v5 }
 0xc99   :  { %v7399_v24 = vpop.eup %7398 }
 0xc9a   :  { %2023 = vrot.lane.b32.xlu0 %v7399_v24, %s8294_s27  ;;  %v7401_v32 = vpop.eup %7400  ;;  %v6584_v24 = vmul.f32 -1.442695, %v1921_v2 }
 0xc9b   :  { %v7403_v14 = vpop.eup %7402 }
 0xc9c   :  { %2031 = vrot.lane.b32.xlu1 %v7403_v14, %s8294_s27  ;;  %v7405_v43 = vpop.eup %7404  ;;  %7416 = vpow2.f32 %v6584_v24 }
 0xc9d   :  { %v7407_v19 = vpop.eup %7406  ;;  %7418 = vpow2.f32 %v6586_v28 }
 0xc9e   :  { %2027 = vrot.lane.b32.xlu0 %v7401_v32, %s8294_s27  ;;  %v7409_v47 = vpop.eup %7408  ;;  %v6583_v32 = vmul.f32 -1.442695, %v1920_v62  ;;  %7420 = vpow2.f32 %v6587_v30 }
 0xc9f   :  { %v7411_v7 = vpop.eup %7410 }
 0xca0   :  { %2025 = vrot.lane.b32.xlu1 %v7407_v19, %s8294_s27  ;;  %v7413_v39 = vpop.eup %7412  ;;  %7422 = vpow2.f32 %v6583_v32  ;;  %v6585_v19 = vmul.f32 -1.442695, %v1922_v61 }
 0xca1   :  { %v7415_v50 = vpop.eup %7414 }
 0xca2   :  { %2033 = vrot.lane.b32.xlu0 %v7405_v43, %s8294_s27  ;;  %v1951_v14 = vadd.f32 1.0, %v7415_v50  ;;  %v6588_v43 = vmul.f32 -1.442695, %v1925_v59 }
 0xca4   :  { %2029 = vrot.lane.b32.xlu1 %v7411_v7, %s8294_s27  ;;  %7424 = vrcp.f32 %v1951_v14  ;;  %v6589_v7 = vmul.f32 -1.442695, %v1926_v42 }
 0xca5   :  { %7426 = vpow2.f32 %v6588_v43 }
 0xca6   :  { %2035 = vrot.lane.b32.xlu0 %v7409_v47, %s8294_s27  ;;  %v7417_v47 = vpop.eup %7416  ;;  %7428 = vpow2.f32 %v6585_v19 }
 0xca7   :  { %v1953_v37 = vadd.f32 1.0, %v7417_v47  ;;  %7430 = vpow2.f32 %v6589_v7 }
 0xca8   :  { %2037 = vrot.lane.b32.xlu1 %v7413_v39, %s8294_s27  ;;  %v7419_v39 = vpop.eup %7418 }
 0xca9   :  { %v7421_v5 = vpop.eup %7420  ;;  %v1955_v2 = vadd.f32 1.0, %v7419_v39  ;;  %7432 = vrcp.f32 %v1953_v37 }
 0xcaa   :  { %v7423_v56 = vpop.eup %7422  ;;  %v1956_v62 = vadd.f32 1.0, %v7421_v5 }
 0xcab   :  { %7434 = vrcp.f32 %v1955_v2  ;;  %v1952_v61 = vadd.f32 1.0, %v7423_v56 }
 0xcac   :  { %7436 = vrcp.f32 %v1956_v62 }
 0xcad   :  { %7438 = vrcp.f32 %v1952_v61 }
 0xcae   :  { %v9097_v24 = vpop.eup %7424 }
 0xcaf   :  { %v7427_v28 = vpop.eup %7426 }
 0xcb0   :  { %v7429_v50 = vpop.eup %7428  ;;  %v1957_v42 = vadd.f32 1.0, %v7427_v28 }
 0xcb1   :  { %v1954_v30 = vadd.f32 1.0, %v7429_v50  ;;  %v7431_v32 = vpop.eup %7430 }
 0xcb2   :  { %7440 = vrcp.f32 %v1957_v42  ;;  %v1958_v19 = vadd.f32 1.0, %v7431_v32 }
 0xcb3   :  { %v9101_v14 = vpop.eup %7432  ;;  %7442 = vrcp.f32 %v1954_v30 }
 0xcb4   :  { %7444 = vrcp.f32 %v1958_v19 }
 0xcb5   :  { %v9104_v7 = vpop.eup %7434 }
 0xcb6   :  { %v9108_v5 = vpop.eup %7436 }
 0xd0c   :  { %v2024_v57 = vpop.permute.xlu0 %2023 }
 0xd0d   :  { %v2047_v59 = vmul.f32 %v9097_v24, %v2024_v57  ;;  %v9112_v57 = vpop.eup %7438 }
 0xd0e   :  { %v2032_v39 = vpop.permute.xlu1 %2031 }
 0xd0f   :  { %2063 = vrot.lane.b32.xlu0 %v2047_v59, %s8300_s3  ;;  %v2051_v37 = vmul.f32 %v9104_v7, %v2032_v39  ;;  %v9116_v59 = vpop.eup %7440  ;;  %v1991_v39 = vrot.slane %v8999_v58, 7 }
 0xd10   :  { %v2028_v43 = vpop.permute.xlu0 %2027  ;;  %v9120_v42 = vpop.eup %7442 }
 0xd11   :  { %v2049_v47 = vmul.f32 %v9101_v14, %v2028_v43  ;;  %2071 = vrot.lane.b32.xlu1 %v2051_v37, %s8300_s3  ;;  %v9125_v43 = vpop.eup %7444  ;;  %v2007_v37 = vmul.f32 %v9097_v24, %v1991_v39  ;;  %v1992_v39 = vrot.slane %v8994_v10, 7  ;;  %v1994_v10 = vrot.slane %v8989_v15, 7 }
 0xd12   :  { %v2026_v62 = vpop.permute.xlu1 %2025 }
 0xd13   :  { %2067 = vrot.lane.b32.xlu0 %v2049_v47, %s8300_s3  ;;  %v2048_v28 = vmul.f32 %v9112_v57, %v2026_v62  ;;  %v1993_v62 = vrot.slane %v9010_v33, 7 }
 0xd14   :  { %v2034_v2 = vpop.permute.xlu0 %2033 }
 0xd15   :  { %v2052_v56 = vmul.f32 %v9108_v5, %v2034_v2  ;;  %2065 = vrot.lane.b32.xlu1 %v2048_v28, %s8300_s3  ;;  %v1995_v28 = vrot.slane %v9005_v0, 7 }
 0xd16   :  { %v2030_v30 = vpop.permute.xlu1 %2029 }
 0xd17   :  { %2073 = vrot.lane.b32.xlu0 %v2052_v56, %s8300_s3  ;;  %v2050_v32 = vmul.f32 %v9120_v42, %v2030_v30  ;;  %v1996_v30 = vrot.slane %v9014_v16, 7  ;;  %v2008_v16 = vmul.f32 %v9112_v57, %v1992_v39 }
 0xd18   :  { %v2036_v61 = vpop.permute.xlu0 %2035 }
 0xd19   :  { %v2053_v50 = vmul.f32 %v9116_v59, %v2036_v61  ;;  %2069 = vrot.lane.b32.xlu1 %v2050_v32, %s8300_s3  ;;  %v2009_v61 = vmul.f32 %v9101_v14, %v1993_v62  ;;  %v2011_v32 = vmul.f32 %v9104_v7, %v1995_v28  ;;  %v2012_v33 = vmul.f32 %v9108_v5, %v1996_v30 }
 0xd1a   :  { %v2038_v19 = vpop.permute.xlu1 %2037 }
 0xd1b   :  { %2075 = vrot.lane.b32.xlu0 %v2053_v50, %s8300_s3  ;;  %v2054_v47 = vmul.f32 %v9125_v43, %v2038_v19 }
 0xd1d   :  { %2077 = vrot.lane.b32.xlu1 %v2054_v47, %s8300_s3 }
 0xd81   :  { %v2064_v2 = vpop.permute.xlu0 %2063 }
 0xd82   :  { %v9131_v56 = vadd.f32 %v2064_v2, %v2007_v37  ;;  %v1997_v2 = vrot.slane %v9020_v48, 7  ;;  %v2010_v48 = vmul.f32 %v9120_v42, %v1994_v10 }
 0xd83   :  { %v2072_v58 = vpop.permute.xlu1 %2071 }
 0xd84   :  { %7446 = vtanh.f32 %v9131_v56  ;;  %v9142_v37 = vadd.f32 %v2072_v58, %v2011_v32 }
 0xd85   :  { %v2068_v50 = vpop.permute.xlu0 %2067 }
 0xd86   :  { %v9139_v19 = vadd.f32 %v2068_v50, %v2009_v61  ;;  %v2013_v50 = vmul.f32 %v9116_v59, %v1997_v2 }
 0xd87   :  { %v2066_v28 = vpop.permute.xlu1 %2065 }
 0xd88   :  { %7448 = vtanh.f32 %v9139_v19  ;;  %v9153_v61 = vadd.f32 %v2066_v28, %v2008_v16 }
 0xd89   :  { %v2074_v0 = vpop.permute.xlu0 %2073  ;;  %7450 = vtanh.f32 %v9142_v37 }
 0xd8a   :  { %v9150_v62 = vadd.f32 %v2074_v0, %v2012_v33 }
 0xd8b   :  { %v2070_v58 = vpop.permute.xlu1 %2069 }
 0xd8c   :  { %7452 = vtanh.f32 %v9150_v62  ;;  %v9162_v39 = vadd.f32 %v2070_v58, %v2010_v48 }
 0xd8d   :  { %v2076_v30 = vpop.permute.xlu0 %2075  ;;  %7454 = vtanh.f32 %v9153_v61 }
 0xd8e   :  { %v7447_v47 = vpop.eup %7446  ;;  %v9159_v32 = vadd.f32 %v2076_v30, %v2013_v50 }
 0xd8f   :  { %2111 = vrot.lane.b32.xlu0 %v7447_v47, %s8294_s27  ;;  %v1998_v47 = vrot.slane %v9025_v11, 7  ;;  %v2078_v0 = vpop.permute.xlu1 %2077 }
 0xd90   :  { %7456 = vtanh.f32 %v9159_v32 }
 0xd91   :  { %7458 = vtanh.f32 %v9162_v39  ;;  %v2014_v33 = vmul.f32 %v9125_v43, %v1998_v47 }
 0xd92   :  { %v7449_v15 = vpop.eup %7448 }
 0xd93   :  { %2115 = vrot.lane.b32.xlu0 %v7449_v15, %s8294_s27  ;;  %v7451_v2 = vpop.eup %7450  ;;  %v9168_v16 = vadd.f32 %v2078_v0, %v2014_v33 }
 0xd94   :  { %2119 = vrot.lane.b32.xlu1 %v7451_v2, %s8294_s27 }
 0xd95   :  { %7460 = vtanh.f32 %v9168_v16 }
 0xd96   :  { %v7453_v28 = vpop.eup %7452 }
 0xd97   :  { %2121 = vrot.lane.b32.xlu0 %v7453_v28, %s8294_s27  ;;  %v7455_v11 = vpop.eup %7454 }
 0xd98   :  { %2113 = vrot.lane.b32.xlu1 %v7455_v11, %s8294_s27 }
 0xd9a   :  { %v7457_v10 = vpop.eup %7456 }
 0xd9b   :  { %2123 = vrot.lane.b32.xlu0 %v7457_v10, %s8294_s27  ;;  %v7459_v50 = vpop.eup %7458 }
 0xd9c   :  { %2117 = vrot.lane.b32.xlu1 %v7459_v50, %s8294_s27 }
 0xd9f   :  { %v7461_v30 = vpop.eup %7460 }
 0xda0   :  { %2125 = vrot.lane.b32.xlu1 %v7461_v30, %s8294_s27 }
 0xe01   :  { %v2112_v48 = vpop.permute.xlu0 %2111 }
 0xe02   :  { %v2135_v47 = vmul.f32 %v9097_v24, %v2112_v48 }
 0xe04   :  { %v9181_v28 = vpack.c.bf16 %v2135_v47, %v2135_v47 }
 0xe05   :  { %v2116_v58 = vpop.permute.xlu0 %2115 }
 0xe06   :  { %v2137_v15 = vmul.f32 %v9101_v14, %v2116_v58  ;;  %v2120_v33 = vpop.permute.xlu1 %2119  ;;  %11429 = vst [vmem:[#allocation35_spill] sm:$0xff] %v9181_v28  ;;  %v2159_v26 = vunpack.c.l.b16 %v9181_v28 }
 0xe07   :  { %v2139_v48 = vmul.f32 %v9104_v7, %v2120_v33 }
 0xe08   :  { %v9179_v0 = vpack.c.bf16 %v2137_v15, %v2137_v15 }
 0xe09   :  { %v2122_v2 = vpop.permute.xlu0 %2121 }
 0xe0a   :  { %11428 = vst [vmem:[#allocation34_spill] sm:$0xff] %v9179_v0  ;;  %v2140_v11 = vmul.f32 %v9108_v5, %v2122_v2  ;;  %v2114_v10 = vpop.permute.xlu1 %2113  ;;  %v2161_v21 = vunpack.c.l.b16 %v9179_v0  ;;  %v2226_v2 = vrot.slane %v2159_v26, 4 }
 0xe0b   :  { %v2136_v50 = vmul.f32 %v9112_v57, %v2114_v10 }
 0xe0c   :  { %v9189_v24 = vpack.c.bf16 %v2140_v11, %v2140_v11  ;;  %v2229_v57 = vrot.slane %v2161_v21, 2  ;;  %v9200_v11 = vpack.c.bf16 %v2139_v48, %v2139_v48 }
 0xe0d   :  { %v2124_v30 = vpop.permute.xlu0 %2123  ;;  %v9187_v44 = vpack.c.bf16 %v2136_v50, %v2136_v50 }
 0xe0e   :  { %11431 = vst [vmem:[#allocation37_spill] sm:$0xff] %v9189_v24  ;;  %v2141_v14 = vmul.f32 %v9116_v59, %v2124_v30  ;;  %v2118_v58 = vpop.permute.xlu1 %2117  ;;  %v2164_v50 = vunpack.c.l.b16 %v9189_v24  ;;  %11434 = vst [vmem:[#allocation40_spill] sm:$0xff] %v9200_v11 }
 0xe0f   :  { %11430 = vst [vmem:[#allocation36_spill] sm:$0xff] %v9187_v44  ;;  %v2160_v47 = vunpack.c.l.b16 %v9187_v44  ;;  %v2138_v5 = vmul.f32 %v9120_v42, %v2118_v58  ;;  %v2163_v58 = vunpack.c.l.b16 %v9200_v11 }
 0xe10   :  { %v9195_v15 = vpack.c.bf16 %v2141_v14, %v2141_v14  ;;  %v2234_v26 = vrot.slane %v2164_v50, 7 }
 0xe11   :  { %v2227_v10 = vrot.slane %v2160_v47, 3  ;;  %v9197_v0 = vpack.c.bf16 %v2138_v5, %v2138_v5 }
 0xe12   :  { %11432 = vst [vmem:[#allocation38_spill] sm:$0xff] %v9195_v15  ;;  %v2126_v28 = vpop.permute.xlu1 %2125  ;;  %v2165_v59 = vunpack.c.l.b16 %v9195_v15 }
 0xe13   :  { %11433 = vst [vmem:[#allocation39_spill] sm:$0xff] %v9197_v0  ;;  %v2228_v7 = vsel %vm690_vm2, %v2227_v10, %v2226_v2  ;;  %v2162_v33 = vunpack.c.l.b16 %v9197_v0  ;;  %v2142_v42 = vmul.f32 %v9125_v43, %v2126_v28 }
 0xe14   :  { %v2230_v30 = vsel %vm693_vm3, %v2229_v57, %v2228_v7  ;;  %v2236_v47 = vrot.slane %v2165_v59, 6  ;;  %v9218_v59 = vld [vmem:[#allocation9] sm:$0xff]  }
 0xe15   :  { %v2231_v21 = vrot.slane %v2162_v33, 1  ;;  %v9207_v14 = vpack.c.bf16 %v2142_v42, %v2142_v42 }
 0xe17   :  { %11435 = vst [vmem:[#allocation41_spill] sm:$0xff] %v9207_v14  ;;  %v2232_v48 = vsel %vm696_vm4, %v2231_v21, %v2230_v30  ;;  %v2166_v5 = vunpack.c.l.b16 %v9207_v14 }
 0xe18   :  { %v2233_v24 = vsel %vm699_vm5, %v2163_v58, %v2232_v48 }
 0xe19   :  { %v2235_v2 = vsel %vm702_vm6, %v2234_v26, %v2233_v24  ;;  %v2238_v10 = vrot.slane %v2166_v5, 5  ;;  %v9224_v24 = vld [vmem:[#allocation9 + $0x8] sm:$0xff]  }
 0xe1a   :  { %v2237_v43 = vsel %vm705_vm7, %v2236_v47, %v2235_v2 }
 0xe1b   :  { %v2239_v28 = vsel %vm708_vm8, %v2238_v10, %v2237_v43 }
 0xe1c   :  { %v2240_v57 = vpack.c.b16 %v2239_v28, %v2239_v28 }
 0xe1e   :  { %2241 = vrot.lane.b32.xlu0 %v2240_v57, %s8300_s3 }
 0xe90   :  { %v2242_v50 = vpop.permute.xlu0 %2241 }
 0xe91   :  { %7036 = vmatmul.mubr.msk.bf16.vlgmr.msra.gmra.mrb[16].mxu1 %vm76_vm0, %v2242_v50 }
 0xe92   :  { %7048 = vmatpush3.bf16.msra.mxu1 %v9218_v59  ;;  %7051 = vmatprep.mubr.msk.bf16.mxu1 %vm8299_vm1, %v11422_v45 }
 0xe93   :  { %7049 = vmatprep.subr.bf16.mxu1 %v11422_v45 }
 0xe96   :  { %7050 = vmatpush3.bf16.msra.mxu1 %v9224_v24 }
 0xe97   :  { %7063 = vmatprep.subr.bf16.mxu1 %v11422_v45 }
 0xf64   :  { %v2280_v7 = vpop.f32.mrb[16].mxu1 }
 0xf65   :  { %v2287_v33 = vrot.slane %v2280_v7, 3  ;;  %v7037_v42 = vpop.f32.mrb[17].mxu1  ;;  %v2288_v58 = vrot.slane %v2280_v7, 4  ;;  %v2289_v47 = vrot.slane %v2280_v7, 5  ;;  %v2290_v48 = vrot.slane %v2280_v7, 6 }
 0xf66   :  { %v2283_v30 = vpop.f32.mrb[18].mxu1  ;;  %v2291_v2 = vrot.slane %v2280_v7, 7  ;;  %v2292_v43 = vrot.slane %v2280_v7, 1 }
 0xf67   :  { %v2302_v21 = vadd.f32 %v2287_v33, %v8438_v22  ;;  %v7038_v26 = vpop.f32.mrb[19].mxu1  ;;  %v2303_v5 = vadd.f32 %v2288_v58, %v8434_v18  ;;  %v2304_v10 = vadd.f32 %v2289_v47, %v8461_v36  ;;  %v2305_v28 = vadd.f32 %v2290_v48, %v8458_v34 }
 0xf68   :  { %v2306_v50 = vadd.f32 %v2291_v2, %v8484_v49  ;;  %v2293_v33 = vrot.slane %v2280_v7, 2  ;;  %v2308_v42 = vadd.f32 %v2292_v43, %v8502_v63  ;;  %v2307_v30 = vadd.f32 %v2280_v7, %v8479_v46 }
 0xf69   :  { %7462 = vtanh.f32 %v2302_v21  ;;  %v6601_v14 = vmul.f32 -1.442695, %v2304_v10 }
 0xf6a   :  { %7464 = vtanh.f32 %v2303_v5  ;;  %v2309_v26 = vadd.f32 %v2293_v33, %v8497_v60  ;;  %v6599_v33 = vmul.f32 -1.442695, %v2302_v21  ;;  %v6605_v44 = vmul.f32 -1.442695, %v2308_v42 }
 0xf6b   :  { %7466 = vtanh.f32 %v2304_v10  ;;  %v6604_v15 = vmul.f32 -1.442695, %v2307_v30 }
 0xf6c   :  { %7468 = vtanh.f32 %v2305_v28 }
 0xf6d   :  { %7470 = vtanh.f32 %v2306_v50 }
 0xf6e   :  { %7472 = vtanh.f32 %v2308_v42 }
 0xf6f   :  { %7474 = vtanh.f32 %v2307_v30 }
 0xf70   :  { %7476 = vtanh.f32 %v2309_v26 }
 0xf71   :  { %7478 = vpow2.f32 %v6599_v33 }
 0xf73   :  { %v7463_v57 = vpop.eup %7462 }
 0xf74   :  { %2406 = vrot.lane.b32.xlu1 %v7463_v57, %s8294_s27  ;;  %v7465_v58 = vpop.eup %7464 }
 0xf75   :  { %v7467_v47 = vpop.eup %7466  ;;  %2408 = vrot.lane.b32.xlu0 %v7465_v58, %s8294_s27  ;;  %v6600_v58 = vmul.f32 -1.442695, %v2303_v5 }
 0xf76   :  { %v7469_v48 = vpop.eup %7468 }
 0xf77   :  { %v7471_v2 = vpop.eup %7470  ;;  %7480 = vpow2.f32 %v6600_v58 }
 0xf78   :  { %2410 = vrot.lane.b32.xlu1 %v7467_v47, %s8294_s27  ;;  %v7473_v43 = vpop.eup %7472  ;;  %v6602_v47 = vmul.f32 -1.442695, %v2305_v28  ;;  %7482 = vpow2.f32 %v6601_v14 }
 0xf79   :  { %2412 = vrot.lane.b32.xlu0 %v7469_v48, %s8294_s27  ;;  %v7475_v7 = vpop.eup %7474  ;;  %v6603_v48 = vmul.f32 -1.442695, %v2306_v50 }
 0xf7a   :  { %v7477_v57 = vpop.eup %7476  ;;  %7484 = vpow2.f32 %v6602_v47 }
 0xf7b   :  { %v7479_v0 = vpop.eup %7478  ;;  %7486 = vpow2.f32 %v6603_v48 }
 0xf7c   :  { %2414 = vrot.lane.b32.xlu1 %v7471_v2, %s8294_s27  ;;  %v2334_v2 = vadd.f32 1.0, %v7479_v0  ;;  %7488 = vpow2.f32 %v6605_v44 }
 0xf7d   :  { %2418 = vrot.lane.b32.xlu0 %v7473_v43, %s8294_s27  ;;  %v6606_v43 = vmul.f32 -1.442695, %v2309_v26 }
 0xf7e   :  { %7490 = vrcp.f32 %v2334_v2 }
 0xf7f   :  { %7492 = vpow2.f32 %v6604_v15 }
 0xf80   :  { %2416 = vrot.lane.b32.xlu1 %v7475_v7, %s8294_s27  ;;  %7494 = vpow2.f32 %v6606_v43 }
 0xf81   :  { %2420 = vrot.lane.b32.xlu0 %v7477_v57, %s8294_s27  ;;  %v7481_v7 = vpop.eup %7480 }
 0xf82   :  { %v7483_v57 = vpop.eup %7482  ;;  %v2335_v21 = vadd.f32 1.0, %v7481_v7 }
 0xf83   :  { %v2336_v10 = vadd.f32 1.0, %v7483_v57 }
 0xf84   :  { %v7485_v5 = vpop.eup %7484  ;;  %7496 = vrcp.f32 %v2335_v21 }
 0xf85   :  { %v7487_v33 = vpop.eup %7486  ;;  %v2337_v14 = vadd.f32 1.0, %v7485_v5  ;;  %7498 = vrcp.f32 %v2336_v10 }
 0xf86   :  { %v7489_v28 = vpop.eup %7488  ;;  %v2338_v0 = vadd.f32 1.0, %v7487_v33 }
 0xf87   :  { %7500 = vrcp.f32 %v2337_v14  ;;  %v2340_v15 = vadd.f32 1.0, %v7489_v28 }
 0xf88   :  { %v9244_v50 = vpop.eup %7490  ;;  %7502 = vrcp.f32 %v2338_v0 }
 0xf89   :  { %v7493_v30 = vpop.eup %7492  ;;  %7504 = vrcp.f32 %v2340_v15 }
 0xf8a   :  { %v7495_v26 = vpop.eup %7494  ;;  %v2339_v58 = vadd.f32 1.0, %v7493_v30 }
 0xf8b   :  { %v2341_v47 = vadd.f32 1.0, %v7495_v26 }
 0xf8c   :  { %7506 = vrcp.f32 %v2339_v58 }
 0xf8d   :  { %7508 = vrcp.f32 %v2341_v47 }
 0xf8e   :  { %v9248_v48 = vpop.eup %7496 }
 0xf8f   :  { %v9250_v43 = vpop.eup %7498 }
 0xf91   :  { %v9255_v5 = vpop.eup %7500 }
 0xf92   :  { %v9258_v33 = vpop.eup %7502 }
 0xf93   :  { %v9263_v0 = vpop.eup %7504 }
 0xfe6   :  { %v2407_v42 = vpop.permute.xlu1 %2406 }
 0xfe7   :  { %v2430_v44 = vmul.f32 %v9244_v50, %v2407_v42  ;;  %v2409_v2 = vpop.permute.xlu0 %2408 }
 0xfe8   :  { %v2431_v7 = vmul.f32 %v9248_v48, %v2409_v2 }
 0xfe9   :  { %2446 = vrot.lane.b32.xlu1 %v2430_v44, %s8300_s3  ;;  %v9266_v44 = vpop.eup %7506 }
 0xfea   :  { %v2411_v57 = vpop.permute.xlu1 %2410  ;;  %2448 = vrot.lane.b32.xlu0 %v2431_v7, %s8300_s3  ;;  %v9271_v47 = vpop.eup %7508 }
 0xfeb   :  { %v2432_v21 = vmul.f32 %v9250_v43, %v2411_v57  ;;  %v2413_v10 = vpop.permute.xlu0 %2412  ;;  %v2374_v57 = vrot.slane %v9131_v56, 7 }
 0xfec   :  { %v2433_v28 = vmul.f32 %v9255_v5, %v2413_v10 }
 0xfed   :  { %2450 = vrot.lane.b32.xlu1 %v2432_v21, %s8300_s3  ;;  %v2390_v21 = vmul.f32 %v9244_v50, %v2374_v57 }
 0xfee   :  { %v2415_v14 = vpop.permute.xlu1 %2414  ;;  %2452 = vrot.lane.b32.xlu0 %v2433_v28, %s8300_s3 }
 0xfef   :  { %v2434_v42 = vmul.f32 %v9258_v33, %v2415_v14  ;;  %v2419_v30 = vpop.permute.xlu0 %2418  ;;  %v2375_v14 = vrot.slane %v9153_v61, 7 }
 0xff0   :  { %v2436_v15 = vmul.f32 %v9263_v0, %v2419_v30 }
 0xff1   :  { %2454 = vrot.lane.b32.xlu1 %v2434_v42, %s8300_s3  ;;  %v2376_v42 = vrot.slane %v9139_v19, 7  ;;  %v2391_v30 = vmul.f32 %v9248_v48, %v2375_v14  ;;  %v2380_v14 = vrot.slane %v9159_v32, 7  ;;  %v2381_v32 = vrot.slane %v9168_v16, 7 }
 0xff2   :  { %v2417_v26 = vpop.permute.xlu1 %2416  ;;  %2458 = vrot.lane.b32.xlu0 %v2436_v15, %s8300_s3 }
 0xff3   :  { %v2435_v58 = vmul.f32 %v9266_v44, %v2417_v26  ;;  %v2421_v2 = vpop.permute.xlu0 %2420  ;;  %v2392_v26 = vmul.f32 %v9250_v43, %v2376_v42 }
 0xff4   :  { %v2437_v7 = vmul.f32 %v9271_v47, %v2421_v2 }
 0xff5   :  { %2456 = vrot.lane.b32.xlu1 %v2435_v58, %s8300_s3  ;;  %v2377_v58 = vrot.slane %v9162_v39, 7 }
 0xff6   :  { %2460 = vrot.lane.b32.xlu0 %v2437_v7, %s8300_s3  ;;  %v2378_v7 = vrot.slane %v9142_v37, 7  ;;  %v2379_v37 = vrot.slane %v9150_v62, 7  ;;  %v2397_v62 = vmul.f32 %v9271_v47, %v2381_v32 }
 0xff7   :  { %v2393_v61 = vmul.f32 %v9255_v5, %v2377_v58 }
 0xff8   :  { %v2395_v58 = vmul.f32 %v9266_v44, %v2379_v37 }
0x105b   :  { %v2447_v10 = vpop.permute.xlu1 %2446 }
0x105c   :  { %v9278_v28 = vadd.f32 %v2447_v10, %v2390_v21  ;;  %v2449_v15 = vpop.permute.xlu0 %2448  ;;  %v2394_v10 = vmul.f32 %v9258_v33, %v2378_v7 }
0x105d   :  { %v9286_v2 = vadd.f32 %v2449_v15, %v2391_v30  ;;  %v2396_v15 = vmul.f32 %v9263_v0, %v2380_v14 }
0x105e   :  { %7510 = vtanh.f32 %v9278_v28 }
0x105f   :  { %v2451_v56 = vpop.permute.xlu1 %2450  ;;  %7512 = vtanh.f32 %v9286_v2 }
0x1060   :  { %v9289_v57 = vadd.f32 %v2451_v56, %v2392_v26  ;;  %v2453_v19 = vpop.permute.xlu0 %2452 }
0x1061   :  { %v9296_v39 = vadd.f32 %v2453_v19, %v2393_v61 }
0x1062   :  { %7514 = vtanh.f32 %v9289_v57 }
0x1063   :  { %v2455_v42 = vpop.permute.xlu1 %2454  ;;  %7516 = vtanh.f32 %v9296_v39 }
0x1064   :  { %v9300_v30 = vadd.f32 %v2455_v42, %v2394_v10  ;;  %v2459_v26 = vpop.permute.xlu0 %2458 }
0x1065   :  { %v9307_v56 = vadd.f32 %v2459_v26, %v2396_v15 }
0x1066   :  { %7518 = vtanh.f32 %v9300_v30 }
0x1067   :  { %v2457_v7 = vpop.permute.xlu1 %2456  ;;  %7520 = vtanh.f32 %v9307_v56 }
0x1068   :  { %v7511_v21 = vpop.eup %7510  ;;  %v9309_v61 = vadd.f32 %v2457_v7, %v2395_v58 }
0x1069   :  { %2494 = vrot.lane.b32.xlu1 %v7511_v21, %s8294_s27  ;;  %v2461_v21 = vpop.permute.xlu0 %2460  ;;  %v7513_v19 = vpop.eup %7512 }
0x106a   :  { %7522 = vtanh.f32 %v9309_v61  ;;  %v9314_v10 = vadd.f32 %v2461_v21, %v2397_v62  ;;  %2496 = vrot.lane.b32.xlu0 %v7513_v19, %s8294_s27 }
0x106c   :  { %v7515_v14 = vpop.eup %7514  ;;  %7524 = vtanh.f32 %v9314_v10 }
0x106d   :  { %2498 = vrot.lane.b32.xlu1 %v7515_v14, %s8294_s27  ;;  %v7517_v16 = vpop.eup %7516 }
0x106e   :  { %2500 = vrot.lane.b32.xlu0 %v7517_v16, %s8294_s27 }
0x1070   :  { %v7519_v42 = vpop.eup %7518 }
0x1071   :  { %2502 = vrot.lane.b32.xlu1 %v7519_v42, %s8294_s27  ;;  %v7521_v37 = vpop.eup %7520 }
0x1072   :  { %2506 = vrot.lane.b32.xlu0 %v7521_v37, %s8294_s27 }
0x1074   :  { %v7523_v15 = vpop.eup %7522 }
0x1075   :  { %2504 = vrot.lane.b32.xlu1 %v7523_v15, %s8294_s27 }
0x1076   :  { %v7525_v26 = vpop.eup %7524 }
0x1077   :  { %2508 = vrot.lane.b32.xlu0 %v7525_v26, %s8294_s27 }
0x10db   :  { %v2495_v58 = vpop.permute.xlu1 %2494 }
0x10dc   :  { %v2518_v32 = vmul.f32 %v9244_v50, %v2495_v58  ;;  %v2497_v62 = vpop.permute.xlu0 %2496 }
0x10dd   :  { %v2519_v21 = vmul.f32 %v9248_v48, %v2497_v62 }
0x10de   :  { %v9325_v7 = vpack.c.bf16 %v2518_v32, %v2518_v32 }
0x10df   :  { %v2499_v14 = vpop.permute.xlu1 %2498  ;;  %v9330_v42 = vpack.c.bf16 %v2519_v21, %v2519_v21 }
0x10e0   :  { %11436 = vst [vmem:[#allocation42_spill] sm:$0xff] %v9325_v7  ;;  %v2542_v19 = vunpack.c.l.b16 %v9325_v7  ;;  %v2520_v16 = vmul.f32 %v9250_v43, %v2499_v14  ;;  %v2501_v37 = vpop.permute.xlu0 %2500 }
0x10e1   :  { %11437 = vst [vmem:[#allocation43_spill] sm:$0xff] %v9330_v42  ;;  %v2543_v26 = vunpack.c.l.b16 %v9330_v42  ;;  %v2521_v50 = vmul.f32 %v9255_v5, %v2501_v37 }
0x10e2   :  { %v9332_v15 = vpack.c.bf16 %v2520_v16, %v2520_v16  ;;  %v2608_v11 = vrot.slane %v2542_v19, 5 }
0x10e3   :  { %v2503_v58 = vpop.permute.xlu1 %2502  ;;  %v2609_v62 = vrot.slane %v2543_v26, 4  ;;  %v9338_v7 = vpack.c.bf16 %v2521_v50, %v2521_v50 }
0x10e4   :  { %11438 = vst [vmem:[#allocation44_spill] sm:$0xff] %v9332_v15  ;;  %v2544_v32 = vunpack.c.l.b16 %v9332_v15  ;;  %v2522_v48 = vmul.f32 %v9258_v33, %v2503_v58  ;;  %v2507_v43 = vpop.permute.xlu0 %2506 }
0x10e5   :  { %11439 = vst [vmem:[#allocation45_spill] sm:$0xff] %v9338_v7  ;;  %v2610_v14 = vsel %vm690_vm2, %v2609_v62, %v2608_v11  ;;  %v2545_v16 = vunpack.c.l.b16 %v9338_v7  ;;  %v2524_v19 = vmul.f32 %v9263_v0, %v2507_v43 }
0x10e6   :  { %v2611_v17 = vrot.slane %v2544_v32, 3  ;;  %v9340_v21 = vpack.c.bf16 %v2522_v48, %v2522_v48 }
0x10e7   :  { %v2505_v42 = vpop.permute.xlu1 %2504  ;;  %v2613_v26 = vrot.slane %v2545_v16, 2  ;;  %v9348_v50 = vpack.c.bf16 %v2524_v19, %v2524_v19 }
0x10e8   :  { %11440 = vst [vmem:[#allocation46_spill] sm:$0xff] %v9340_v21  ;;  %v2612_v5 = vsel %vm693_vm3, %v2611_v17, %v2610_v14  ;;  %v2546_v37 = vunpack.c.l.b16 %v9340_v21  ;;  %v2523_v33 = vmul.f32 %v9266_v44, %v2505_v42 }
0x10e9   :  { %11441 = vst [vmem:[#allocation47_spill] sm:$0xff] %v9348_v50  ;;  %v2509_v32 = vpop.permute.xlu0 %2508  ;;  %v2548_v11 = vunpack.c.l.b16 %v9348_v50  ;;  %v2614_v62 = vsel %vm696_vm4, %v2613_v26, %v2612_v5 }
0x10ea   :  { %v2615_v58 = vrot.slane %v2546_v37, 1  ;;  %v9350_v48 = vpack.c.bf16 %v2523_v33, %v2523_v33  ;;  %v2525_v0 = vmul.f32 %v9271_v47, %v2509_v32 }
0x10eb   :  { %v2618_v44 = vrot.slane %v2548_v11, 7 }
0x10ec   :  { %11442 = vst [vmem:[#allocation48_spill] sm:$0xff] %v9350_v48  ;;  %v2616_v43 = vsel %vm699_vm5, %v2615_v58, %v2614_v62  ;;  %v2547_v17 = vunpack.c.l.b16 %v9350_v48  ;;  %v9357_v14 = vpack.c.bf16 %v2525_v0, %v2525_v0 }
0x10ee   :  { %11443 = vst [vmem:[#allocation49_spill] sm:$0xff] %v9357_v14  ;;  %v2617_v42 = vsel %vm702_vm6, %v2547_v17, %v2616_v43  ;;  %v2549_v16 = vunpack.c.l.b16 %v9357_v14 }
0x10ef   :  { %v2619_v19 = vsel %vm705_vm7, %v2618_v44, %v2617_v42 }
0x10f0   :  { %v2620_v37 = vrot.slane %v2549_v16, 6 }
0x10f2   :  { %v2621_v33 = vsel %vm708_vm8, %v2620_v37, %v2619_v19 }
0x10f3   :  { %v2622_v7 = vpack.c.b16 %v2621_v33, %v2621_v33 }
0x10f5   :  { %2623 = vrot.lane.b32.xlu1 %v2622_v7, %s8300_s3 }
0x1167   :  { %v2624_v47 = vpop.permute.xlu1 %2623 }
0x1168   :  { %7044 = vmatmul.mubr.msk.bf16.vlgmr.msra.gmra.mrb[20].mxu0 %vm76_vm0, %v2624_v47 }
0x1169   :  { %7056 = vmatpush3.bf16.msra.mxu0 %v9218_v59  ;;  %7059 = vmatprep.mubr.msk.bf16.mxu0 %vm8299_vm1, %v11422_v45 }
0x116a   :  { %7057 = vmatprep.subr.bf16.mxu0 %v11422_v45 }
0x116d   :  { %7058 = vmatpush3.bf16.msra.mxu0 %v9224_v24 }
0x116e   :  { %7071 = vmatprep.subr.bf16.mxu0 %v11422_v45 }
0x123b   :  { %v2662_v5 = vpop.f32.mrb[20].mxu0 }
0x123c   :  { %v2669_v26 = vrot.slane %v2662_v5, 2  ;;  %v7045_v58 = vpop.f32.mrb[21].mxu0  ;;  %v2670_v62 = vrot.slane %v2662_v5, 3  ;;  %v2671_v0 = vrot.slane %v2662_v5, 4  ;;  %v2672_v43 = vrot.slane %v2662_v5, 5 }
0x123d   :  { %v2665_v32 = vpop.f32.mrb[22].mxu0  ;;  %v2673_v44 = vrot.slane %v2662_v5, 6  ;;  %v2674_v16 = vrot.slane %v2662_v5, 7  ;;  %v2675_v33 = vrot.slane %v2662_v5, 1 }
0x123e   :  { %v2684_v7 = vadd.f32 %v2669_v26, %v8438_v22  ;;  %v7046_v11 = vpop.f32.mrb[23].mxu0  ;;  %v2685_v17 = vadd.f32 %v2670_v62, %v8434_v18  ;;  %v2686_v42 = vadd.f32 %v2671_v0, %v8461_v36  ;;  %v2687_v19 = vadd.f32 %v2672_v43, %v8458_v34 }
0x123f   :  { %v2688_v47 = vadd.f32 %v2673_v44, %v8484_v49  ;;  %v2689_v26 = vadd.f32 %v2674_v16, %v8479_v46  ;;  %v2691_v58 = vadd.f32 %v2675_v33, %v8497_v60  ;;  %v2690_v32 = vadd.f32 %v2662_v5, %v8502_v63 }
0x1240   :  { %7526 = vtanh.f32 %v2684_v7  ;;  %v6617_v33 = vmul.f32 -1.442695, %v2685_v17 }
0x1241   :  { %7528 = vtanh.f32 %v2685_v17  ;;  %v6621_v48 = vmul.f32 -1.442695, %v2689_v26  ;;  %v6623_v50 = vmul.f32 -1.442695, %v2691_v58 }
0x1242   :  { %7530 = vtanh.f32 %v2686_v42 }
0x1243   :  { %7532 = vtanh.f32 %v2687_v19 }
0x1244   :  { %7534 = vtanh.f32 %v2688_v47 }
0x1245   :  { %7536 = vtanh.f32 %v2689_v26 }
0x1246   :  { %7538 = vtanh.f32 %v2691_v58 }
0x1247   :  { %7540 = vtanh.f32 %v2690_v32 }
0x124a   :  { %v7527_v37 = vpop.eup %7526 }
0x124b   :  { %2788 = vrot.lane.b32.xlu0 %v7527_v37, %s8294_s27  ;;  %v7529_v11 = vpop.eup %7528  ;;  %v6616_v37 = vmul.f32 -1.442695, %v2684_v7 }
0x124c   :  { %v7531_v62 = vpop.eup %7530  ;;  %2790 = vrot.lane.b32.xlu1 %v7529_v11, %s8294_s27  ;;  %v6618_v11 = vmul.f32 -1.442695, %v2686_v42 }
0x124d   :  { %v7533_v0 = vpop.eup %7532  ;;  %7542 = vpow2.f32 %v6616_v37 }
0x124e   :  { %v7535_v43 = vpop.eup %7534  ;;  %7544 = vpow2.f32 %v6617_v33 }
0x124f   :  { %2792 = vrot.lane.b32.xlu0 %v7531_v62, %s8294_s27  ;;  %v7537_v44 = vpop.eup %7536  ;;  %v6619_v62 = vmul.f32 -1.442695, %v2687_v19  ;;  %7546 = vpow2.f32 %v6618_v11 }
0x1250   :  { %2794 = vrot.lane.b32.xlu1 %v7533_v0, %s8294_s27  ;;  %v7539_v16 = vpop.eup %7538  ;;  %v6620_v0 = vmul.f32 -1.442695, %v2688_v47 }
0x1251   :  { %v7541_v5 = vpop.eup %7540  ;;  %7548 = vpow2.f32 %v6619_v62 }
0x1252   :  { %7550 = vpow2.f32 %v6620_v0 }
0x1253   :  { %2796 = vrot.lane.b32.xlu0 %v7535_v43, %s8294_s27  ;;  %7552 = vpow2.f32 %v6621_v48 }
0x1254   :  { %2798 = vrot.lane.b32.xlu1 %v7537_v44, %s8294_s27  ;;  %v6622_v44 = vmul.f32 -1.442695, %v2690_v32 }
0x1257   :  { %2802 = vrot.lane.b32.xlu0 %v7539_v16, %s8294_s27  ;;  %v7543_v14 = vpop.eup %7542 }
0x1258   :  { %2800 = vrot.lane.b32.xlu1 %v7541_v5, %s8294_s27  ;;  %v2716_v43 = vadd.f32 1.0, %v7543_v14  ;;  %v7545_v16 = vpop.eup %7544 }
0x1259   :  { %v7547_v5 = vpop.eup %7546  ;;  %v2717_v7 = vadd.f32 1.0, %v7545_v16 }
0x125a   :  { %7554 = vrcp.f32 %v2716_v43  ;;  %v2718_v42 = vadd.f32 1.0, %v7547_v5 }
0x125b   :  { %7556 = vpow2.f32 %v6623_v50  ;;  %v7549_v17 = vpop.eup %7548 }
0x125c   :  { %7558 = vpow2.f32 %v6622_v44  ;;  %v7551_v37 = vpop.eup %7550  ;;  %v2719_v33 = vadd.f32 1.0, %v7549_v17 }
0x125d   :  { %v7553_v19 = vpop.eup %7552  ;;  %7560 = vrcp.f32 %v2717_v7  ;;  %v2720_v14 = vadd.f32 1.0, %v7551_v37 }
0x125e   :  { %7562 = vrcp.f32 %v2718_v42  ;;  %v2721_v50 = vadd.f32 1.0, %v7553_v19 }
0x125f   :  { %7564 = vrcp.f32 %v2719_v33 }
0x1260   :  { %7566 = vrcp.f32 %v2720_v14 }
0x1261   :  { %7568 = vrcp.f32 %v2721_v50 }
0x1264   :  { %v9387_v47 = vpop.eup %7554 }
0x1265   :  { %v7557_v58 = vpop.eup %7556 }
0x1266   :  { %v7559_v32 = vpop.eup %7558  ;;  %v2723_v11 = vadd.f32 1.0, %v7557_v58 }
0x1267   :  { %v2722_v62 = vadd.f32 1.0, %v7559_v32  ;;  %v9391_v0 = vpop.eup %7560 }
0x1268   :  { %7570 = vrcp.f32 %v2723_v11  ;;  %v9393_v44 = vpop.eup %7562 }
0x1269   :  { %7572 = vrcp.f32 %v2722_v62  ;;  %v9398_v17 = vpop.eup %7564 }
0x126a   :  { %v9401_v37 = vpop.eup %7566 }
0x126b   :  { %v9406_v14 = vpop.eup %7568 }
0x12bd   :  { %v2789_v26 = vpop.permute.xlu0 %2788 }
0x12be   :  { %v2812_v48 = vmul.f32 %v9387_v47, %v2789_v26  ;;  %v2791_v43 = vpop.permute.xlu1 %2790 }
0x12bf   :  { %v2813_v16 = vmul.f32 %v9391_v0, %v2791_v43 }
0x12c0   :  { %2828 = vrot.lane.b32.xlu0 %v2812_v48, %s8300_s3  ;;  %v9409_v48 = vpop.eup %7570 }
0x12c1   :  { %v2793_v5 = vpop.permute.xlu0 %2792  ;;  %2830 = vrot.lane.b32.xlu1 %v2813_v16, %s8300_s3  ;;  %v9414_v62 = vpop.eup %7572 }
0x12c2   :  { %v2814_v7 = vmul.f32 %v9393_v44, %v2793_v5  ;;  %v2795_v42 = vpop.permute.xlu1 %2794  ;;  %v2756_v5 = vrot.slane %v9278_v28, 7 }
0x12c3   :  { %v2815_v19 = vmul.f32 %v9398_v17, %v2795_v42 }
0x12c4   :  { %2832 = vrot.lane.b32.xlu0 %v2814_v7, %s8300_s3  ;;  %v2772_v7 = vmul.f32 %v9387_v47, %v2756_v5 }
0x12c5   :  { %v2797_v33 = vpop.permute.xlu0 %2796  ;;  %2834 = vrot.lane.b32.xlu1 %v2815_v19, %s8300_s3 }
0x12c6   :  { %v2816_v26 = vmul.f32 %v9401_v37, %v2797_v33  ;;  %v2799_v58 = vpop.permute.xlu1 %2798  ;;  %v2757_v33 = vrot.slane %v9286_v2, 7 }
0x12c7   :  { %v2817_v50 = vmul.f32 %v9406_v14, %v2799_v58 }
0x12c8   :  { %2836 = vrot.lane.b32.xlu0 %v2816_v26, %s8300_s3  ;;  %v2758_v26 = vrot.slane %v9289_v57, 7  ;;  %v2773_v58 = vmul.f32 %v9391_v0, %v2757_v33  ;;  %v2761_v33 = vrot.slane %v9309_v61, 7  ;;  %v2762_v61 = vrot.slane %v9307_v56, 7 }
0x12c9   :  { %v2803_v32 = vpop.permute.xlu0 %2802  ;;  %2838 = vrot.lane.b32.xlu1 %v2817_v50, %s8300_s3 }
0x12ca   :  { %v2819_v11 = vmul.f32 %v9409_v48, %v2803_v32  ;;  %v2801_v43 = vpop.permute.xlu1 %2800  ;;  %v2774_v32 = vmul.f32 %v9393_v44, %v2758_v26 }
0x12cb   :  { %v2818_v16 = vmul.f32 %v9414_v62, %v2801_v43 }
0x12cc   :  { %2842 = vrot.lane.b32.xlu0 %v2819_v11, %s8300_s3  ;;  %v2759_v11 = vrot.slane %v9296_v39, 7 }
0x12cd   :  { %2840 = vrot.lane.b32.xlu1 %v2818_v16, %s8300_s3  ;;  %v2760_v16 = vrot.slane %v9300_v30, 7  ;;  %v2763_v30 = vrot.slane %v9314_v10, 7  ;;  %v2778_v10 = vmul.f32 %v9414_v62, %v2762_v61 }
0x12ce   :  { %v2775_v2 = vmul.f32 %v9398_v17, %v2759_v11 }
0x12cf   :  { %v2779_v11 = vmul.f32 %v9409_v48, %v2763_v30 }
0x1332   :  { %v2829_v42 = vpop.permute.xlu0 %2828 }
0x1333   :  { %v9421_v19 = vadd.f32 %v2829_v42, %v2772_v7  ;;  %v2831_v50 = vpop.permute.xlu1 %2830  ;;  %v2776_v42 = vmul.f32 %v9401_v37, %v2760_v16 }
0x1334   :  { %v9429_v43 = vadd.f32 %v2831_v50, %v2773_v58  ;;  %v2777_v50 = vmul.f32 %v9406_v14, %v2761_v33 }
0x1335   :  { %7574 = vtanh.f32 %v9421_v19 }
0x1336   :  { %v2833_v28 = vpop.permute.xlu0 %2832  ;;  %7576 = vtanh.f32 %v9429_v43 }
0x1337   :  { %v9432_v5 = vadd.f32 %v2833_v28, %v2774_v32  ;;  %v2835_v57 = vpop.permute.xlu1 %2834 }
0x1338   :  { %v9439_v39 = vadd.f32 %v2835_v57, %v2775_v2 }
0x1339   :  { %7578 = vtanh.f32 %v9432_v5 }
0x133a   :  { %v2837_v26 = vpop.permute.xlu0 %2836  ;;  %7580 = vtanh.f32 %v9439_v39 }
0x133b   :  { %v9443_v58 = vadd.f32 %v2837_v26, %v2776_v42  ;;  %v2839_v32 = vpop.permute.xlu1 %2838 }
0x133c   :  { %v9450_v28 = vadd.f32 %v2839_v32, %v2777_v50 }
0x133d   :  { %7582 = vtanh.f32 %v9443_v58 }
0x133e   :  { %v2843_v16 = vpop.permute.xlu0 %2842  ;;  %7584 = vtanh.f32 %v9450_v28 }
0x133f   :  { %v7575_v7 = vpop.eup %7574  ;;  %v9452_v2 = vadd.f32 %v2843_v16, %v2779_v11 }
0x1340   :  { %2876 = vrot.lane.b32.xlu0 %v7575_v7, %s8294_s27  ;;  %v2841_v7 = vpop.permute.xlu1 %2840  ;;  %v7577_v57 = vpop.eup %7576 }
0x1341   :  { %7586 = vtanh.f32 %v9452_v2  ;;  %v9457_v42 = vadd.f32 %v2841_v7, %v2778_v10  ;;  %2878 = vrot.lane.b32.xlu1 %v7577_v57, %s8294_s27 }
0x1343   :  { %v7579_v33 = vpop.eup %7578  ;;  %7588 = vtanh.f32 %v9457_v42 }
0x1344   :  { %2880 = vrot.lane.b32.xlu0 %v7579_v33, %s8294_s27  ;;  %v7581_v56 = vpop.eup %7580 }
0x1345   :  { %2882 = vrot.lane.b32.xlu1 %v7581_v56, %s8294_s27 }
0x1347   :  { %v7583_v26 = vpop.eup %7582 }
0x1348   :  { %2884 = vrot.lane.b32.xlu0 %v7583_v26, %s8294_s27  ;;  %v7585_v30 = vpop.eup %7584 }
0x1349   :  { %2886 = vrot.lane.b32.xlu1 %v7585_v30, %s8294_s27 }
0x134b   :  { %v7587_v50 = vpop.eup %7586 }
0x134c   :  { %2890 = vrot.lane.b32.xlu0 %v7587_v50, %s8294_s27 }
0x134d   :  { %v7589_v32 = vpop.eup %7588 }
0x134e   :  { %2888 = vrot.lane.b32.xlu1 %v7589_v32, %s8294_s27 }
0x13b2   :  { %v2877_v11 = vpop.permute.xlu0 %2876 }
0x13b3   :  { %v2900_v61 = vmul.f32 %v9387_v47, %v2877_v11  ;;  %v2879_v10 = vpop.permute.xlu1 %2878 }
0x13b4   :  { %v2901_v7 = vmul.f32 %v9391_v0, %v2879_v10 }
0x13b5   :  { %v9468_v16 = vpack.c.bf16 %v2900_v61, %v2900_v61 }
0x13b6   :  { %v2881_v33 = vpop.permute.xlu0 %2880  ;;  %v9473_v26 = vpack.c.bf16 %v2901_v7, %v2901_v7 }
0x13b7   :  { %11444 = vst [vmem:[#allocation50_spill] sm:$0xff] %v9468_v16  ;;  %v2924_v57 = vunpack.c.l.b16 %v9468_v16  ;;  %v2902_v56 = vmul.f32 %v9393_v44, %v2881_v33  ;;  %v2883_v30 = vpop.permute.xlu1 %2882 }
0x13b8   :  { %11445 = vst [vmem:[#allocation51_spill] sm:$0xff] %v9473_v26  ;;  %v2925_v32 = vunpack.c.l.b16 %v9473_v26  ;;  %v2903_v47 = vmul.f32 %v9398_v17, %v2883_v30 }
0x13b9   :  { %v9475_v50 = vpack.c.bf16 %v2902_v56, %v2902_v56  ;;  %v2991_v21 = vrot.slane %v2924_v57, 6 }
0x13ba   :  { %v2885_v11 = vpop.permute.xlu0 %2884  ;;  %v2992_v10 = vrot.slane %v2925_v32, 5  ;;  %v9481_v16 = vpack.c.bf16 %v2903_v47, %v2903_v47 }
0x13bb   :  { %v2926_v61 = vunpack.c.l.b16 %v9475_v50  ;;  %v2904_v0 = vmul.f32 %v9401_v37, %v2885_v11  ;;  %v2887_v44 = vpop.permute.xlu1 %2886 }
0x13bc   :  { %11446 = vst [vmem:[#allocation52_spill] sm:$0xff] %v9481_v16  ;;  %v2993_v33 = vsel %vm690_vm2, %v2992_v10, %v2991_v21  ;;  %v2927_v56 = vunpack.c.l.b16 %v9481_v16  ;;  %v2905_v57 = vmul.f32 %v9406_v14, %v2887_v44 }
0x13bd   :  { %v2994_v15 = vrot.slane %v2926_v61, 4  ;;  %v9483_v7 = vpack.c.bf16 %v2904_v0, %v2904_v0 }
0x13be   :  { %v2891_v26 = vpop.permute.xlu0 %2890  ;;  %v2996_v32 = vrot.slane %v2927_v56, 3  ;;  %v9491_v47 = vpack.c.bf16 %v2905_v57, %v2905_v57 }
0x13bf   :  { %v2995_v17 = vsel %vm693_vm3, %v2994_v15, %v2993_v33  ;;  %v2928_v30 = vunpack.c.l.b16 %v9483_v7  ;;  %v2907_v37 = vmul.f32 %v9409_v48, %v2891_v26 }
0x13c0   :  { %v2889_v61 = vpop.permute.xlu1 %2888  ;;  %v2929_v21 = vunpack.c.l.b16 %v9491_v47  ;;  %v2997_v10 = vsel %vm696_vm4, %v2996_v32, %v2995_v17 }
0x13c1   :  { %v2998_v11 = vrot.slane %v2928_v30, 2  ;;  %v9493_v0 = vpack.c.bf16 %v2907_v37, %v2907_v37  ;;  %v2906_v14 = vmul.f32 %v9414_v62, %v2889_v61 }
0x13c2   :  { %v3000_v33 = vrot.slane %v2929_v21, 1 }
0x13c3   :  { %v2999_v44 = vsel %vm699_vm5, %v2998_v11, %v2997_v10  ;;  %v2931_v15 = vunpack.c.l.b16 %v9493_v0  ;;  %v9500_v16 = vpack.c.bf16 %v2906_v14, %v2906_v14 }
0x13c4   :  { %v3001_v56 = vsel %vm702_vm6, %v3000_v33, %v2999_v44 }
0x13c5   :  { %v3003_v48 = vrot.slane %v2931_v15, 7  ;;  %v2930_v26 = vunpack.c.l.b16 %v9500_v16 }
0x13c7   :  { %v3002_v57 = vsel %vm705_vm7, %v2930_v26, %v3001_v56 }
0x13c8   :  { %v3004_v30 = vsel %vm708_vm8, %v3003_v48, %v3002_v57 }
0x13c9   :  { %v3005_v37 = vpack.c.b16 %v3004_v30, %v3004_v30 }
0x13cb   :  { %3006 = vrot.lane.b32.xlu0 %v3005_v37, %s8300_s3 }
0x143d   :  { %v3007_v62 = vpop.permute.xlu0 %3006 }
0x143e   :  { %7052 = vmatmul.mubr.msk.bf16.vlgmr.msra.gmra.mrb[20].mxu1 %vm76_vm0, %v3007_v62 }
0x143f   :  { %7064 = vmatpush3.bf16.msra.mxu1 %v9218_v59  ;;  %7067 = vmatprep.mubr.msk.bf16.mxu1 %vm8299_vm1, %v11422_v45 }
0x1440   :  { %7065 = vmatprep.subr.bf16.mxu1 %v11422_v45 }
0x1443   :  { %7066 = vmatpush3.bf16.msra.mxu1 %v9224_v24 }
0x1444   :  { %7079 = vmatprep.subr.bf16.mxu1 %v11422_v45 }
0x1511   :  { %v3045_v17 = vpop.f32.mrb[20].mxu1 }
0x1512   :  { %v3052_v32 = vrot.slane %v3045_v17, 1  ;;  %v7053_v11 = vpop.f32.mrb[21].mxu1  ;;  %v3053_v14 = vrot.slane %v3045_v17, 2  ;;  %v3054_v44 = vrot.slane %v3045_v17, 3  ;;  %v3055_v59 = vrot.slane %v3045_v17, 4 }
0x1513   :  { %v3048_v61 = vpop.f32.mrb[22].mxu1  ;;  %v3056_v33 = vrot.slane %v3045_v17, 5  ;;  %v3057_v26 = vrot.slane %v3045_v17, 6  ;;  %v3058_v57 = vrot.slane %v3045_v17, 7 }
0x1514   :  { %v3067_v21 = vadd.f32 %v3052_v32, %v8438_v22  ;;  %v7054_v10 = vpop.f32.mrb[23].mxu1  ;;  %v3068_v15 = vadd.f32 %v3053_v14, %v8434_v18  ;;  %v3069_v48 = vadd.f32 %v3054_v44, %v8461_v36  ;;  %v3070_v24 = vadd.f32 %v3055_v59, %v8458_v34 }
0x1515   :  { %v3071_v30 = vadd.f32 %v3056_v33, %v8484_v49  ;;  %v3072_v22 = vadd.f32 %v3057_v26, %v8479_v46  ;;  %v3073_v37 = vadd.f32 %v3058_v57, %v8502_v63  ;;  %v3074_v18 = vadd.f32 %v3045_v17, %v8497_v60 }
0x1516   :  { %7590 = vtanh.f32 %v3067_v21  ;;  %v6633_v17 = vmul.f32 -1.442695, %v3067_v21  ;;  %v6634_v32 = vmul.f32 -1.442695, %v3068_v15  ;;  %v6635_v11 = vmul.f32 -1.442695, %v3069_v48 }
0x1517   :  { %7592 = vtanh.f32 %v3068_v15  ;;  %v6636_v61 = vmul.f32 -1.442695, %v3070_v24  ;;  %v6637_v14 = vmul.f32 -1.442695, %v3071_v30  ;;  %v6638_v44 = vmul.f32 -1.442695, %v3072_v22 }
0x1518   :  { %7594 = vtanh.f32 %v3069_v48  ;;  %v6639_v33 = vmul.f32 -1.442695, %v3073_v37  ;;  %v6640_v26 = vmul.f32 -1.442695, %v3074_v18 }
0x1519   :  { %7596 = vtanh.f32 %v3070_v24 }
0x151a   :  { %7598 = vtanh.f32 %v3071_v30 }
0x151b   :  { %7600 = vtanh.f32 %v3072_v22 }
0x151c   :  { %7602 = vtanh.f32 %v3073_v37 }
0x151d   :  { %7604 = vtanh.f32 %v3074_v18 }
0x151e   :  { %7606 = vpow2.f32 %v6633_v17 }
0x151f   :  { %7608 = vpow2.f32 %v6634_v32 }
0x1520   :  { %v7591_v56 = vpop.eup %7590  ;;  %7610 = vpow2.f32 %v6635_v11 }
0x1521   :  { %3171 = vrot.lane.b32.xlu1 %v7591_v56, %s8294_s27  ;;  %v7593_v36 = vpop.eup %7592  ;;  %7612 = vpow2.f32 %v6636_v61 }
0x1522   :  { %v7595_v34 = vpop.eup %7594  ;;  %3173 = vrot.lane.b32.xlu0 %v7593_v36, %s8294_s27  ;;  %7614 = vpow2.f32 %v6637_v14 }
0x1523   :  { %v7597_v49 = vpop.eup %7596  ;;  %7616 = vpow2.f32 %v6638_v44 }
0x1524   :  { %v7599_v62 = vpop.eup %7598 }
0x1525   :  { %3175 = vrot.lane.b32.xlu1 %v7595_v34, %s8294_s27  ;;  %v7601_v46 = vpop.eup %7600 }
0x1526   :  { %3177 = vrot.lane.b32.xlu0 %v7597_v49, %s8294_s27  ;;  %v7603_v63 = vpop.eup %7602 }
0x1527   :  { %v7605_v60 = vpop.eup %7604 }
0x1528   :  { %v7607_v10 = vpop.eup %7606 }
0x1529   :  { %3179 = vrot.lane.b32.xlu1 %v7599_v62, %s8294_s27  ;;  %v3099_v59 = vadd.f32 1.0, %v7607_v10  ;;  %v7609_v56 = vpop.eup %7608 }
0x152a   :  { %3181 = vrot.lane.b32.xlu0 %v7601_v46, %s8294_s27  ;;  %v7611_v57 = vpop.eup %7610  ;;  %v3100_v21 = vadd.f32 1.0, %v7609_v56 }
0x152b   :  { %7618 = vrcp.f32 %v3099_v59  ;;  %v7613_v15 = vpop.eup %7612  ;;  %v3101_v48 = vadd.f32 1.0, %v7611_v57 }
0x152c   :  { %7620 = vpow2.f32 %v6639_v33  ;;  %v7615_v36 = vpop.eup %7614  ;;  %v3102_v34 = vadd.f32 1.0, %v7613_v15 }
0x152d   :  { %3183 = vrot.lane.b32.xlu1 %v7603_v63, %s8294_s27  ;;  %7622 = vpow2.f32 %v6640_v26  ;;  %v7617_v24 = vpop.eup %7616  ;;  %v3103_v49 = vadd.f32 1.0, %v7615_v36 }
0x152e   :  { %3185 = vrot.lane.b32.xlu0 %v7605_v60, %s8294_s27  ;;  %7624 = vrcp.f32 %v3100_v21  ;;  %v3104_v62 = vadd.f32 1.0, %v7617_v24 }
0x152f   :  { %7626 = vrcp.f32 %v3101_v48 }
0x1530   :  { %7628 = vrcp.f32 %v3102_v34 }
0x1531   :  { %7630 = vrcp.f32 %v3103_v49 }
0x1532   :  { %7632 = vrcp.f32 %v3104_v62 }
0x1535   :  { %v9530_v30 = vpop.eup %7618 }
0x1536   :  { %v7621_v37 = vpop.eup %7620 }
0x1537   :  { %v7623_v46 = vpop.eup %7622  ;;  %v3105_v63 = vadd.f32 1.0, %v7621_v37 }
0x1538   :  { %v3106_v60 = vadd.f32 1.0, %v7623_v46  ;;  %v9534_v17 = vpop.eup %7624 }
0x1539   :  { %7634 = vrcp.f32 %v3105_v63  ;;  %v9536_v11 = vpop.eup %7626 }
0x153a   :  { %7636 = vrcp.f32 %v3106_v60  ;;  %v9541_v44 = vpop.eup %7628  ;;  %v3140_v60 = vrot.slane %v9429_v43, 7 }
0x153b   :  { %v9544_v33 = vpop.eup %7630 }
0x153c   :  { %v9549_v21 = vpop.eup %7632 }
0x1543   :  { %v9552_v48 = vpop.eup %7634 }
0x1593   :  { %v3172_v22 = vpop.permute.xlu1 %3171 }
0x1594   :  { %v3195_v18 = vmul.f32 %v9530_v30, %v3172_v22  ;;  %v3174_v32 = vpop.permute.xlu0 %3173  ;;  %v9557_v22 = vpop.eup %7636 }
0x1595   :  { %v3196_v61 = vmul.f32 %v9534_v17, %v3174_v32  ;;  %v3141_v32 = vrot.slane %v9432_v5, 7 }
0x1596   :  { %3211 = vrot.lane.b32.xlu1 %v3195_v18, %s8300_s3  ;;  %v3139_v18 = vrot.slane %v9421_v19, 7 }
0x1597   :  { %v3176_v10 = vpop.permute.xlu1 %3175  ;;  %3213 = vrot.lane.b32.xlu0 %v3196_v61, %s8300_s3  ;;  %v3156_v61 = vmul.f32 %v9534_v17, %v3140_v60 }
0x1598   :  { %v3197_v14 = vmul.f32 %v9536_v11, %v3176_v10  ;;  %v3178_v59 = vpop.permute.xlu0 %3177  ;;  %v3155_v62 = vmul.f32 %v9530_v30, %v3139_v18 }
0x1599   :  { %v3198_v26 = vmul.f32 %v9541_v44, %v3178_v59  ;;  %v3142_v59 = vrot.slane %v9439_v39, 7 }
0x159a   :  { %3215 = vrot.lane.b32.xlu1 %v3197_v14, %s8300_s3  ;;  %v3157_v14 = vmul.f32 %v9536_v11, %v3141_v32 }
0x159b   :  { %v3180_v56 = vpop.permute.xlu1 %3179  ;;  %3217 = vrot.lane.b32.xlu0 %v3198_v26, %s8300_s3  ;;  %v3158_v43 = vmul.f32 %v9541_v44, %v3142_v59 }
0x159c   :  { %v3199_v57 = vmul.f32 %v9544_v33, %v3180_v56  ;;  %v3182_v15 = vpop.permute.xlu0 %3181  ;;  %v3143_v56 = vrot.slane %v9443_v58, 7  ;;  %v3145_v58 = vrot.slane %v9457_v42, 7 }
0x159d   :  { %v3200_v36 = vmul.f32 %v9549_v21, %v3182_v15 }
0x159e   :  { %3219 = vrot.lane.b32.xlu1 %v3199_v57, %s8300_s3 }
0x159f   :  { %v3184_v24 = vpop.permute.xlu1 %3183  ;;  %3221 = vrot.lane.b32.xlu0 %v3200_v36, %s8300_s3  ;;  %v3159_v36 = vmul.f32 %v9544_v33, %v3143_v56 }
0x15a0   :  { %v3201_v34 = vmul.f32 %v9552_v48, %v3184_v24  ;;  %v3186_v49 = vpop.permute.xlu0 %3185  ;;  %v3144_v24 = vrot.slane %v9450_v28, 7  ;;  %v3146_v28 = vrot.slane %v9452_v2, 7 }
0x15a1   :  { %v3202_v37 = vmul.f32 %v9557_v22, %v3186_v49 }
0x15a2   :  { %3223 = vrot.lane.b32.xlu1 %v3201_v34, %s8300_s3  ;;  %v3162_v42 = vmul.f32 %v9557_v22, %v3146_v28 }
0x15a3   :  { %3225 = vrot.lane.b32.xlu0 %v3202_v37, %s8300_s3  ;;  %v3160_v37 = vmul.f32 %v9549_v21, %v3144_v24 }
0x1608   :  { %v3212_v46 = vpop.permute.xlu1 %3211 }
0x1609   :  { %v9564_v63 = vadd.f32 %v3212_v46, %v3155_v62  ;;  %v3214_v10 = vpop.permute.xlu0 %3213  ;;  %v3161_v62 = vmul.f32 %v9552_v48, %v3145_v58 }
0x160a   :  { %v9572_v26 = vadd.f32 %v3214_v10, %v3156_v61 }
0x160b   :  { %7638 = vtanh.f32 %v9564_v63 }
0x160c   :  { %v3216_v19 = vpop.permute.xlu1 %3215  ;;  %7640 = vtanh.f32 %v9572_v26 }
0x160d   :  { %v9575_v57 = vadd.f32 %v3216_v19, %v3157_v14  ;;  %v3218_v5 = vpop.permute.xlu0 %3217 }
0x160e   :  { %v9582_v39 = vadd.f32 %v3218_v5, %v3158_v43 }
0x160f   :  { %7642 = vtanh.f32 %v9575_v57 }
0x1610   :  { %v3220_v34 = vpop.permute.xlu1 %3219  ;;  %7644 = vtanh.f32 %v9582_v39 }
0x1611   :  { %v9586_v49 = vadd.f32 %v3220_v34, %v3159_v36  ;;  %v3222_v18 = vpop.permute.xlu0 %3221 }
0x1612   :  { %v9593_v46 = vadd.f32 %v3222_v18, %v3160_v37 }
0x1613   :  { %7646 = vtanh.f32 %v9586_v49 }
0x1614   :  { %v3224_v60 = vpop.permute.xlu1 %3223  ;;  %7648 = vtanh.f32 %v9593_v46 }
0x1615   :  { %v7639_v15 = vpop.eup %7638  ;;  %v9595_v32 = vadd.f32 %v3224_v60, %v3161_v62  ;;  %v3226_v61 = vpop.permute.xlu0 %3225 }
0x1616   :  { %3259 = vrot.lane.b32.xlu1 %v7639_v15, %s8294_s27  ;;  %v7641_v10 = vpop.eup %7640  ;;  %v9600_v14 = vadd.f32 %v3226_v61, %v3162_v42 }
0x1617   :  { %7650 = vtanh.f32 %v9595_v32  ;;  %3261 = vrot.lane.b32.xlu0 %v7641_v10, %s8294_s27 }
0x1618   :  { %7652 = vtanh.f32 %v9600_v14 }
0x1619   :  { %v7643_v59 = vpop.eup %7642 }
0x161a   :  { %3263 = vrot.lane.b32.xlu1 %v7643_v59, %s8294_s27  ;;  %v7645_v2 = vpop.eup %7644 }
0x161b   :  { %3265 = vrot.lane.b32.xlu0 %v7645_v2, %s8294_s27 }
0x161d   :  { %v7647_v19 = vpop.eup %7646 }
0x161e   :  { %3267 = vrot.lane.b32.xlu1 %v7647_v19, %s8294_s27  ;;  %v7649_v56 = vpop.eup %7648 }
0x161f   :  { %3269 = vrot.lane.b32.xlu0 %v7649_v56, %s8294_s27 }
0x1621   :  { %v7651_v43 = vpop.eup %7650 }
0x1622   :  { %3271 = vrot.lane.b32.xlu1 %v7651_v43, %s8294_s27  ;;  %v7653_v15 = vpop.eup %7652 }
0x1623   :  { %3273 = vrot.lane.b32.xlu0 %v7653_v15, %s8294_s27 }
0x1688   :  { %v3260_v5 = vpop.permute.xlu1 %3259 }
0x1689   :  { %v3283_v36 = vmul.f32 %v9530_v30, %v3260_v5  ;;  %v3262_v34 = vpop.permute.xlu0 %3261 }
0x168a   :  { %v3284_v58 = vmul.f32 %v9534_v17, %v3262_v34 }
0x168b   :  { %v9611_v24 = vpack.c.bf16 %v3283_v36, %v3283_v36 }
0x168c   :  { %v3264_v18 = vpop.permute.xlu1 %3263  ;;  %v9616_v28 = vpack.c.bf16 %v3284_v58, %v3284_v58 }
0x168d   :  { %v3307_v37 = vunpack.c.l.b16 %v9611_v24  ;;  %v3285_v62 = vmul.f32 %v9536_v11, %v3264_v18  ;;  %v3266_v60 = vpop.permute.xlu0 %3265 }
0x168e   :  { %11447 = vst [vmem:[#allocation53_spill] sm:$0xff] %v9616_v28  ;;  %v3308_v61 = vunpack.c.l.b16 %v9616_v28  ;;  %v3286_v30 = vmul.f32 %v9541_v44, %v3266_v60 }
0x168f   :  { %v9618_v42 = vpack.c.bf16 %v3285_v62, %v3285_v62  ;;  %v3373_v10 = vrot.slane %v3307_v37, 7 }
0x1690   :  { %v3268_v59 = vpop.permute.xlu1 %3267  ;;  %v3374_v19 = vrot.slane %v3308_v61, 6  ;;  %v9624_v56 = vpack.c.bf16 %v3286_v30, %v3286_v30 }
0x1691   :  { %v3309_v2 = vunpack.c.l.b16 %v9618_v42  ;;  %v3287_v17 = vmul.f32 %v9544_v33, %v3268_v59  ;;  %v3270_v11 = vpop.permute.xlu0 %3269 }
0x1692   :  { %11448 = vst [vmem:[#allocation54_spill] sm:$0xff] %v9624_v56  ;;  %v3375_v5 = vsel %vm690_vm2, %v3374_v19, %v3373_v10  ;;  %v3310_v36 = vunpack.c.l.b16 %v9624_v56  ;;  %v3288_v34 = vmul.f32 %v9549_v21, %v3270_v11 }
0x1693   :  { %v3376_v43 = vrot.slane %v3309_v2, 5  ;;  %v9626_v15 = vpack.c.bf16 %v3287_v17, %v3287_v17 }
0x1694   :  { %v3272_v58 = vpop.permute.xlu1 %3271  ;;  %v3378_v18 = vrot.slane %v3310_v36, 4  ;;  %v9634_v62 = vpack.c.bf16 %v3288_v34, %v3288_v34 }
0x1695   :  { %11449 = vst [vmem:[#allocation55_spill] sm:$0xff] %v9626_v15  ;;  %v3377_v44 = vsel %vm693_vm3, %v3376_v43, %v3375_v5  ;;  %v3311_v37 = vunpack.c.l.b16 %v9626_v15  ;;  %v3289_v33 = vmul.f32 %v9552_v48, %v3272_v58  ;;  %v3274_v61 = vpop.permute.xlu0 %3273 }
0x1696   :  { %11450 = vst [vmem:[#allocation56_spill] sm:$0xff] %v9634_v62  ;;  %v3312_v10 = vunpack.c.l.b16 %v9634_v62  ;;  %v3379_v59 = vsel %vm696_vm4, %v3378_v18, %v3377_v44  ;;  %v3290_v21 = vmul.f32 %v9557_v22, %v3274_v61  ;;  %v9651_v44 = vld [vmem:[#allocation9] sm:$0xff]  }
0x1697   :  { %v3380_v60 = vrot.slane %v3311_v37, 3  ;;  %v9636_v30 = vpack.c.bf16 %v3289_v33, %v3289_v33  ;;  %v9657_v37 = vld [vmem:[#allocation9 + $0x8] sm:$0xff]  }
0x1698   :  { %v3382_v19 = vrot.slane %v3312_v10, 2  ;;  %v9643_v43 = vpack.c.bf16 %v3290_v21, %v3290_v21 }
0x1699   :  { %11451 = vst [vmem:[#allocation57_spill] sm:$0xff] %v9636_v30  ;;  %v3381_v2 = vsel %vm699_vm5, %v3380_v60, %v3379_v59  ;;  %v3313_v17 = vunpack.c.l.b16 %v9636_v30 }
0x169a   :  { %11452 = vst [vmem:[#allocation58_spill] sm:$0xff] %v9643_v43  ;;  %v3314_v11 = vunpack.c.l.b16 %v9643_v43  ;;  %v3383_v5 = vsel %vm702_vm6, %v3382_v19, %v3381_v2 }
0x169b   :  { %v3384_v48 = vrot.slane %v3313_v17, 1 }
0x169d   :  { %v3385_v36 = vsel %vm705_vm7, %v3384_v48, %v3383_v5 }
0x169e   :  { %v3386_v34 = vsel %vm708_vm8, %v3314_v11, %v3385_v36 }
0x169f   :  { %v3387_v58 = vpack.c.b16 %v3386_v34, %v3386_v34 }
0x16a1   :  { %3388 = vrot.lane.b32.xlu1 %v3387_v58, %s8300_s3 }
0x1713   :  { %v3389_v22 = vpop.permute.xlu1 %3388 }
0x1714   :  { %7060 = vmatmul.mubr.msk.bf16.vlgmr.msra.gmra.mrb[24].mxu0 %vm76_vm0, %v3389_v22 }
0x1715   :  { %7072 = vmatpush3.bf16.msra.mxu0 %v9651_v44  ;;  %7075 = vmatprep.mubr.msk.bf16.mxu0 %vm8299_vm1, %v11422_v45 }
0x1716   :  { %7073 = vmatprep.subr.bf16.mxu0 %v11422_v45 }
0x1719   :  { %7074 = vmatpush3.bf16.msra.mxu0 %v9657_v37 }
0x171a   :  { %7087 = vmatprep.subr.bf16.mxu0 %v11422_v45 }
0x17e7   :  { %v3427_v33 = vpop.f32.mrb[24].mxu0 }
0x17e8   :  { %v7061_v18 = vpop.f32.mrb[25].mxu0  ;;  %v3449_v60 = vadd.f32 %v3427_v33, %v8447_v29  ;;  %v3434_v59 = vrot.slane %v3427_v33, 1  ;;  %v3435_v21 = vrot.slane %v3427_v33, 2  ;;  %v3437_v2 = vrot.slane %v3427_v33, 4 }
0x17e9   :  { %v3430_v61 = vpop.f32.mrb[26].mxu0  ;;  %v3436_v19 = vrot.slane %v3427_v33, 3  ;;  %v3439_v11 = vrot.slane %v3427_v33, 6  ;;  %v3438_v34 = vrot.slane %v3427_v33, 5  ;;  %v3440_v18 = vrot.slane %v3427_v33, 7 }
0x17ea   :  { %v7062_v10 = vpop.f32.mrb[27].mxu0  ;;  %7654 = vtanh.f32 %v3449_v60  ;;  %v3450_v17 = vadd.f32 %v3434_v59, %v8441_v25  ;;  %v3451_v48 = vadd.f32 %v3435_v21, %v8470_v41  ;;  %v3453_v5 = vadd.f32 %v3437_v2, %v8492_v55 }
0x17eb   :  { %v3452_v58 = vadd.f32 %v3436_v19, %v8464_v38  ;;  %v3455_v22 = vadd.f32 %v3439_v11, %v8510_v8  ;;  %v3454_v61 = vadd.f32 %v3438_v34, %v8487_v51  ;;  %v3456_v10 = vadd.f32 %v3440_v18, %v8505_v3 }
0x17ec   :  { %7656 = vtanh.f32 %v3450_v17  ;;  %v6650_v34 = vmul.f32 -1.442695, %v3449_v60  ;;  %v6651_v18 = vmul.f32 -1.442695, %v3450_v17 }
0x17ed   :  { %7658 = vtanh.f32 %v3451_v48  ;;  %v6656_v62 = vmul.f32 -1.442695, %v3455_v22  ;;  %v6655_v30 = vmul.f32 -1.442695, %v3454_v61 }
0x17ee   :  { %7660 = vtanh.f32 %v3453_v5 }
0x17ef   :  { %7662 = vtanh.f32 %v3452_v58 }
0x17f0   :  { %7664 = vtanh.f32 %v3455_v22 }
0x17f1   :  { %7666 = vtanh.f32 %v3454_v61 }
0x17f2   :  { %7668 = vtanh.f32 %v3456_v10 }
0x17f3   :  { %7670 = vpow2.f32 %v6650_v34 }
0x17f4   :  { %v7655_v36 = vpop.eup %7654  ;;  %7672 = vpow2.f32 %v6651_v18 }
0x17f5   :  { %3553 = vrot.lane.b32.xlu0 %v7655_v36, %s8294_s27 }
0x17f6   :  { %v7657_v59 = vpop.eup %7656 }
0x17f7   :  { %v7659_v21 = vpop.eup %7658 }
0x17f8   :  { %3557 = vrot.lane.b32.xlu1 %v7659_v21, %s8294_s27  ;;  %v7661_v2 = vpop.eup %7660  ;;  %v6654_v21 = vmul.f32 -1.442695, %v3453_v5 }
0x17f9   :  { %3555 = vrot.lane.b32.xlu0 %v7657_v59, %s8294_s27  ;;  %v7663_v19 = vpop.eup %7662  ;;  %v6652_v59 = vmul.f32 -1.442695, %v3451_v48 }
0x17fa   :  { %v7665_v33 = vpop.eup %7664 }
0x17fb   :  { %v7667_v11 = vpop.eup %7666  ;;  %7674 = vpow2.f32 %v6652_v59 }
0x17fc   :  { %3559 = vrot.lane.b32.xlu1 %v7663_v19, %s8294_s27  ;;  %v7669_v36 = vpop.eup %7668  ;;  %7676 = vpow2.f32 %v6654_v21 }
0x17fd   :  { %3561 = vrot.lane.b32.xlu0 %v7661_v2, %s8294_s27  ;;  %v7671_v43 = vpop.eup %7670  ;;  %v6653_v2 = vmul.f32 -1.442695, %v3452_v58 }
0x17fe   :  { %v3481_v19 = vadd.f32 1.0, %v7671_v43 }
0x17ff   :  { %7678 = vpow2.f32 %v6653_v2 }
0x1800   :  { %3563 = vrot.lane.b32.xlu1 %v7667_v11, %s8294_s27  ;;  %7680 = vpow2.f32 %v6656_v62  ;;  %v7673_v11 = vpop.eup %7672 }
0x1801   :  { %3565 = vrot.lane.b32.xlu0 %v7665_v33, %s8294_s27  ;;  %7682 = vrcp.f32 %v3481_v19  ;;  %v6657_v33 = vmul.f32 -1.442695, %v3456_v10  ;;  %v3482_v60 = vadd.f32 1.0, %v7673_v11 }
0x1802   :  { %7684 = vpow2.f32 %v6655_v30 }
0x1803   :  { %7686 = vpow2.f32 %v6657_v33 }
0x1804   :  { %3567 = vrot.lane.b32.xlu1 %v7669_v36, %s8294_s27  ;;  %7688 = vrcp.f32 %v3482_v60 }
0x1805   :  { %v7675_v36 = vpop.eup %7674 }
0x1806   :  { %v7677_v17 = vpop.eup %7676  ;;  %v3483_v48 = vadd.f32 1.0, %v7675_v36 }
0x1807   :  { %v3485_v18 = vadd.f32 1.0, %v7677_v17 }
0x1808   :  { %7690 = vrcp.f32 %v3483_v48 }
0x1809   :  { %v7679_v34 = vpop.eup %7678  ;;  %7692 = vrcp.f32 %v3485_v18 }
0x180a   :  { %v7681_v5 = vpop.eup %7680  ;;  %v3484_v43 = vadd.f32 1.0, %v7679_v34 }
0x180b   :  { %v9677_v58 = vpop.eup %7682  ;;  %v3487_v30 = vadd.f32 1.0, %v7681_v5 }
0x180c   :  { %v7685_v61 = vpop.eup %7684  ;;  %7694 = vrcp.f32 %v3484_v43 }
0x180d   :  { %v3486_v10 = vadd.f32 1.0, %v7685_v61  ;;  %v7687_v59 = vpop.eup %7686  ;;  %7696 = vrcp.f32 %v3487_v30 }
0x180e   :  { %v3488_v21 = vadd.f32 1.0, %v7687_v59  ;;  %v9681_v2 = vpop.eup %7688 }
0x180f   :  { %7698 = vrcp.f32 %v3486_v10 }
0x1810   :  { %7700 = vrcp.f32 %v3488_v21 }
0x1812   :  { %v9683_v33 = vpop.eup %7690 }
0x1813   :  { %v9688_v17 = vpop.eup %7692 }
0x1816   :  { %v9691_v34 = vpop.eup %7694 }
0x1817   :  { %v9696_v43 = vpop.eup %7696 }
0x1867   :  { %v3554_v22 = vpop.permute.xlu0 %3553 }
0x1868   :  { %v3577_v62 = vmul.f32 %v9677_v58, %v3554_v22 }
0x186a   :  { %3593 = vrot.lane.b32.xlu0 %v3577_v62, %s8300_s3  ;;  %v3558_v11 = vpop.permute.xlu1 %3557  ;;  %v9699_v62 = vpop.eup %7698 }
0x186b   :  { %v3556_v19 = vpop.permute.xlu0 %3555  ;;  %v3579_v60 = vmul.f32 %v9683_v33, %v3558_v11  ;;  %v9705_v21 = vpop.eup %7700 }
0x186c   :  { %v3578_v36 = vmul.f32 %v9681_v2, %v3556_v19 }
0x186d   :  { %3597 = vrot.lane.b32.xlu1 %v3579_v60, %s8300_s3 }
0x186e   :  { %3595 = vrot.lane.b32.xlu0 %v3578_v36, %s8300_s3  ;;  %v3560_v5 = vpop.permute.xlu1 %3559  ;;  %v3521_v36 = vrot.slane %v9564_v63, 7 }
0x186f   :  { %v3562_v48 = vpop.permute.xlu0 %3561  ;;  %v3580_v22 = vmul.f32 %v9691_v34, %v3560_v5 }
0x1870   :  { %v3581_v18 = vmul.f32 %v9688_v17, %v3562_v48  ;;  %v3537_v60 = vmul.f32 %v9677_v58, %v3521_v36 }
0x1871   :  { %3599 = vrot.lane.b32.xlu1 %v3580_v22, %s8300_s3  ;;  %v3523_v22 = vrot.slane %v9575_v57, 7 }
0x1872   :  { %3601 = vrot.lane.b32.xlu0 %v3581_v18, %s8300_s3  ;;  %v3564_v30 = vpop.permute.xlu1 %3563  ;;  %v3522_v18 = vrot.slane %v9572_v26, 7 }
0x1873   :  { %v3566_v61 = vpop.permute.xlu0 %3565  ;;  %v3582_v59 = vmul.f32 %v9699_v62, %v3564_v30  ;;  %v3539_v30 = vmul.f32 %v9683_v33, %v3523_v22 }
0x1874   :  { %v3583_v10 = vmul.f32 %v9696_v43, %v3566_v61  ;;  %v3538_v61 = vmul.f32 %v9681_v2, %v3522_v18  ;;  %v3527_v18 = vrot.slane %v9595_v32, 7 }
0x1875   :  { %3603 = vrot.lane.b32.xlu1 %v3582_v59, %s8300_s3  ;;  %v3525_v59 = vrot.slane %v9586_v49, 7 }
0x1876   :  { %3605 = vrot.lane.b32.xlu0 %v3583_v10, %s8300_s3  ;;  %v3568_v19 = vpop.permute.xlu1 %3567 }
0x1877   :  { %v3584_v11 = vmul.f32 %v9705_v21, %v3568_v19  ;;  %v3541_v26 = vmul.f32 %v9688_v17, %v3525_v59 }
0x1879   :  { %3607 = vrot.lane.b32.xlu1 %v3584_v11, %s8300_s3  ;;  %v3524_v11 = vrot.slane %v9582_v39, 7  ;;  %v3526_v39 = vrot.slane %v9593_v46, 7 }
0x187b   :  { %v3540_v57 = vmul.f32 %v9691_v34, %v3524_v11  ;;  %v3528_v11 = vrot.slane %v9600_v14, 7 }
0x187d   :  { %v3544_v46 = vmul.f32 %v9705_v21, %v3528_v11 }
0x18dc   :  { %v3594_v48 = vpop.permute.xlu0 %3593 }
0x18dd   :  { %v9711_v5 = vadd.f32 %v3594_v48, %v3537_v60 }
0x18df   :  { %7702 = vtanh.f32 %v9711_v5  ;;  %v3598_v19 = vpop.permute.xlu1 %3597 }
0x18e0   :  { %v3596_v10 = vpop.permute.xlu0 %3595  ;;  %v9722_v36 = vadd.f32 %v3598_v19, %v3539_v30  ;;  %v3543_v30 = vmul.f32 %v9696_v43, %v3527_v18 }
0x18e1   :  { %v9719_v63 = vadd.f32 %v3596_v10, %v3538_v61  ;;  %v3542_v10 = vmul.f32 %v9699_v62, %v3526_v39 }
0x18e3   :  { %7704 = vtanh.f32 %v9719_v63  ;;  %v3600_v49 = vpop.permute.xlu1 %3599 }
0x18e4   :  { %7706 = vtanh.f32 %v9722_v36  ;;  %v3602_v48 = vpop.permute.xlu0 %3601  ;;  %v9733_v61 = vadd.f32 %v3600_v49, %v3540_v57 }
0x18e5   :  { %v9729_v22 = vadd.f32 %v3602_v48, %v3541_v26 }
0x18e7   :  { %7708 = vtanh.f32 %v9729_v22  ;;  %v3604_v19 = vpop.permute.xlu1 %3603 }
0x18e8   :  { %7710 = vtanh.f32 %v9733_v61  ;;  %v3606_v59 = vpop.permute.xlu0 %3605  ;;  %v9742_v26 = vadd.f32 %v3604_v19, %v3542_v10 }
0x18e9   :  { %v7703_v60 = vpop.eup %7702  ;;  %v9739_v32 = vadd.f32 %v3606_v59, %v3543_v30 }
0x18ea   :  { %3641 = vrot.lane.b32.xlu0 %v7703_v60, %s8294_s27 }
0x18eb   :  { %7712 = vtanh.f32 %v9739_v32  ;;  %v3608_v57 = vpop.permute.xlu1 %3607 }
0x18ec   :  { %7714 = vtanh.f32 %v9742_v26  ;;  %v9747_v18 = vadd.f32 %v3608_v57, %v3544_v46 }
0x18ed   :  { %v7705_v60 = vpop.eup %7704 }
0x18ee   :  { %v7707_v48 = vpop.eup %7706  ;;  %3643 = vrot.lane.b32.xlu0 %v7705_v60, %s8294_s27  ;;  %7716 = vtanh.f32 %v9747_v18 }
0x18ef   :  { %3645 = vrot.lane.b32.xlu1 %v7707_v48, %s8294_s27 }
0x18f1   :  { %v7709_v14 = vpop.eup %7708 }
0x18f2   :  { %v7711_v49 = vpop.eup %7710  ;;  %3649 = vrot.lane.b32.xlu0 %v7709_v14, %s8294_s27 }
0x18f3   :  { %3647 = vrot.lane.b32.xlu1 %v7711_v49, %s8294_s27 }
0x18f5   :  { %v7713_v39 = vpop.eup %7712 }
0x18f6   :  { %v7715_v30 = vpop.eup %7714  ;;  %3653 = vrot.lane.b32.xlu0 %v7713_v39, %s8294_s27 }
0x18f7   :  { %3651 = vrot.lane.b32.xlu1 %v7715_v30, %s8294_s27 }
0x18f8   :  { %v7717_v10 = vpop.eup %7716 }
0x18fb   :  { %3655 = vrot.lane.b32.xlu1 %v7717_v10, %s8294_s27 }
0x195c   :  { %v3642_v59 = vpop.permute.xlu0 %3641 }
0x195d   :  { %v3665_v19 = vmul.f32 %v9677_v58, %v3642_v59 }
0x195f   :  { %v9760_v48 = vpack.c.bf16 %v3665_v19, %v3665_v19 }
0x1960   :  { %v3644_v11 = vpop.permute.xlu0 %3643 }
0x1961   :  { %v3646_v46 = vpop.permute.xlu1 %3645  ;;  %v3666_v60 = vmul.f32 %v9681_v2, %v3644_v11  ;;  %11453 = vst [vmem:[#allocation59_spill] sm:$0xff] %v9760_v48  ;;  %v3689_v2 = vunpack.c.l.b16 %v9760_v48 }
0x1962   :  { %v3667_v57 = vmul.f32 %v9683_v33, %v3646_v46 }
0x1963   :  { %v9762_v14 = vpack.c.bf16 %v3666_v60, %v3666_v60 }
0x1964   :  { %v9764_v49 = vpack.c.bf16 %v3667_v57, %v3667_v57  ;;  %v3650_v39 = vpop.permute.xlu0 %3649 }
0x1965   :  { %11454 = vst [vmem:[#allocation60_spill] sm:$0xff] %v9762_v14  ;;  %v3690_v30 = vunpack.c.l.b16 %v9762_v14  ;;  %v3648_v56 = vpop.permute.xlu1 %3647  ;;  %v3669_v10 = vmul.f32 %v9688_v17, %v3650_v39 }
0x1966   :  { %11455 = vst [vmem:[#allocation61_spill] sm:$0xff] %v9764_v49  ;;  %v3691_v58 = vunpack.c.l.b16 %v9764_v49  ;;  %v3668_v59 = vmul.f32 %v9691_v34, %v3648_v56 }
0x1967   :  { %v3753_v11 = vrot.slane %v3690_v30, 7  ;;  %v9771_v33 = vpack.c.bf16 %v3669_v10, %v3669_v10 }
0x1968   :  { %v9773_v19 = vpack.c.bf16 %v3668_v59, %v3668_v59  ;;  %v3654_v46 = vpop.permute.xlu0 %3653  ;;  %v3755_v60 = vrot.slane %v3691_v58, 6 }
0x1969   :  { %11456 = vst [vmem:[#allocation62_spill] sm:$0xff] %v9771_v33  ;;  %v3754_v57 = vsel %vm690_vm2, %v3753_v11, %v3689_v2  ;;  %v3693_v14 = vunpack.c.l.b16 %v9771_v33  ;;  %v3652_v15 = vpop.permute.xlu1 %3651  ;;  %v3671_v17 = vmul.f32 %v9696_v43, %v3654_v46 }
0x196a   :  { %11457 = vst [vmem:[#allocation63_spill] sm:$0xff] %v9773_v19  ;;  %v3692_v39 = vunpack.c.l.b16 %v9773_v19  ;;  %v3670_v56 = vmul.f32 %v9699_v62, %v3652_v15  ;;  %v3756_v34 = vsel %vm693_vm3, %v3755_v60, %v3754_v57 }
0x196b   :  { %v3759_v30 = vrot.slane %v3693_v14, 4  ;;  %v9781_v10 = vpack.c.bf16 %v3671_v17, %v3671_v17 }
0x196c   :  { %v3757_v59 = vrot.slane %v3692_v39, 5  ;;  %v9783_v49 = vpack.c.bf16 %v3670_v56, %v3670_v56 }
0x196d   :  { %11458 = vst [vmem:[#allocation64_spill] sm:$0xff] %v9781_v10  ;;  %v3695_v58 = vunpack.c.l.b16 %v9781_v10  ;;  %v3656_v2 = vpop.permute.xlu1 %3655 }
0x196e   :  { %11459 = vst [vmem:[#allocation65_spill] sm:$0xff] %v9783_v49  ;;  %v3758_v11 = vsel %vm696_vm4, %v3757_v59, %v3756_v34  ;;  %v3694_v33 = vunpack.c.l.b16 %v9783_v49  ;;  %v3672_v43 = vmul.f32 %v9705_v21, %v3656_v2 }
0x196f   :  { %v3760_v46 = vsel %vm699_vm5, %v3759_v30, %v3758_v11  ;;  %v3763_v15 = vrot.slane %v3695_v58, 2 }
0x1970   :  { %v3761_v62 = vrot.slane %v3694_v33, 3  ;;  %v9790_v60 = vpack.c.bf16 %v3672_v43, %v3672_v43 }
0x1972   :  { %11460 = vst [vmem:[#allocation66_spill] sm:$0xff] %v9790_v60  ;;  %v3762_v14 = vsel %vm702_vm6, %v3761_v62, %v3760_v46  ;;  %v3696_v57 = vunpack.c.l.b16 %v9790_v60 }
0x1973   :  { %v3764_v17 = vsel %vm705_vm7, %v3763_v15, %v3762_v14 }
0x1974   :  { %v3765_v39 = vrot.slane %v3696_v57, 1 }
0x1976   :  { %v3766_v56 = vsel %vm708_vm8, %v3765_v39, %v3764_v17 }
0x1977   :  { %v3767_v34 = vpack.c.b16 %v3766_v56, %v3766_v56 }
0x1979   :  { %3768 = vrot.lane.b32.xlu0 %v3767_v34, %s8300_s3 }
0x19eb   :  { %v3769_v59 = vpop.permute.xlu0 %3768 }
0x19ec   :  { %7068 = vmatmul.mubr.msk.bf16.vlgmr.msra.gmra.mrb[24].mxu1 %vm76_vm0, %v3769_v59 }
0x19ed   :  { %7080 = vmatpush3.bf16.msra.mxu1 %v9651_v44  ;;  %7083 = vmatprep.mubr.msk.bf16.mxu1 %vm8299_vm1, %v11422_v45 }
0x19ee   :  { %7081 = vmatprep.subr.bf16.mxu1 %v11422_v45 }
0x19f1   :  { %7082 = vmatpush3.bf16.msra.mxu1 %v9657_v37 }
0x19f2   :  { %7095 = vmatprep.subr.bf16.mxu1 %v11422_v45 }
0x1abf   :  { %v3807_v21 = vpop.f32.mrb[24].mxu1 }
0x1ac0   :  { %v7069_v33 = vpop.f32.mrb[25].mxu1  ;;  %v3815_v2 = vrot.slane %v3807_v21, 1  ;;  %v3814_v11 = vrot.slane %v3807_v21, 7  ;;  %v3830_v43 = vadd.f32 %v3807_v21, %v8441_v25  ;;  %v3816_v46 = vrot.slane %v3807_v21, 2 }
0x1ac1   :  { %v3810_v30 = vpop.f32.mrb[26].mxu1  ;;  %v3817_v62 = vrot.slane %v3807_v21, 3  ;;  %v3818_v57 = vrot.slane %v3807_v21, 4  ;;  %v3819_v39 = vrot.slane %v3807_v21, 5  ;;  %v3820_v34 = vrot.slane %v3807_v21, 6 }
0x1ac2   :  { %v7070_v58 = vpop.f32.mrb[27].mxu1  ;;  %v3831_v15 = vadd.f32 %v3815_v2, %v8470_v41  ;;  %v3829_v14 = vadd.f32 %v3814_v11, %v8447_v29  ;;  %7718 = vtanh.f32 %v3830_v43  ;;  %v3832_v17 = vadd.f32 %v3816_v46, %v8464_v38 }
0x1ac3   :  { %v3833_v56 = vadd.f32 %v3817_v62, %v8492_v55  ;;  %v3834_v59 = vadd.f32 %v3818_v57, %v8487_v51  ;;  %v3835_v33 = vadd.f32 %v3819_v39, %v8510_v8  ;;  %v3836_v30 = vadd.f32 %v3820_v34, %v8505_v3 }
0x1ac4   :  { %7720 = vtanh.f32 %v3831_v15  ;;  %v6668_v34 = vmul.f32 -1.442695, %v3830_v43 }
0x1ac5   :  { %7722 = vtanh.f32 %v3829_v14  ;;  %v6672_v60 = vmul.f32 -1.442695, %v3834_v59 }
0x1ac6   :  { %7724 = vtanh.f32 %v3832_v17 }
0x1ac7   :  { %7726 = vtanh.f32 %v3833_v56 }
0x1ac8   :  { %7728 = vtanh.f32 %v3834_v59 }
0x1ac9   :  { %7730 = vtanh.f32 %v3835_v33 }
0x1aca   :  { %7732 = vtanh.f32 %v3836_v30 }
0x1acb   :  { %7734 = vpow2.f32 %v6668_v34 }
0x1acc   :  { %v7719_v58 = vpop.eup %7718 }
0x1acd   :  { %3935 = vrot.lane.b32.xlu1 %v7719_v58, %s8294_s27  ;;  %v6669_v58 = vmul.f32 -1.442695, %v3831_v15 }
0x1ace   :  { %v7721_v2 = vpop.eup %7720 }
0x1acf   :  { %3937 = vrot.lane.b32.xlu0 %v7721_v2, %s8294_s27  ;;  %v7723_v11 = vpop.eup %7722  ;;  %v6667_v2 = vmul.f32 -1.442695, %v3829_v14  ;;  %7736 = vpow2.f32 %v6669_v58 }
0x1ad0   :  { %v7725_v46 = vpop.eup %7724 }
0x1ad1   :  { %3933 = vrot.lane.b32.xlu1 %v7723_v11, %s8294_s27  ;;  %v7727_v21 = vpop.eup %7726  ;;  %v6670_v11 = vmul.f32 -1.442695, %v3832_v17  ;;  %7738 = vpow2.f32 %v6667_v2 }
0x1ad2   :  { %v7729_v62 = vpop.eup %7728 }
0x1ad3   :  { %3939 = vrot.lane.b32.xlu0 %v7725_v46, %s8294_s27  ;;  %v7731_v57 = vpop.eup %7730  ;;  %v6671_v46 = vmul.f32 -1.442695, %v3833_v56  ;;  %7740 = vpow2.f32 %v6670_v11 }
0x1ad4   :  { %v7733_v39 = vpop.eup %7732 }
0x1ad5   :  { %3941 = vrot.lane.b32.xlu1 %v7727_v21, %s8294_s27  ;;  %7742 = vpow2.f32 %v6671_v46  ;;  %v6673_v21 = vmul.f32 -1.442695, %v3835_v33  ;;  %v7735_v49 = vpop.eup %7734 }
0x1ad6   :  { %7744 = vpow2.f32 %v6672_v60 }
0x1ad7   :  { %3943 = vrot.lane.b32.xlu0 %v7729_v62, %s8294_s27  ;;  %v6674_v62 = vmul.f32 -1.442695, %v3836_v30  ;;  %7746 = vpow2.f32 %v6673_v21 }
0x1ad9   :  { %3945 = vrot.lane.b32.xlu1 %v7731_v57, %s8294_s27  ;;  %v7737_v10 = vpop.eup %7736  ;;  %7748 = vpow2.f32 %v6674_v62  ;;  %v3862_v57 = vadd.f32 1.0, %v7735_v49 }
0x1ada   :  { %v3863_v43 = vadd.f32 1.0, %v7737_v10 }
0x1adb   :  { %3947 = vrot.lane.b32.xlu0 %v7733_v39, %s8294_s27  ;;  %v7739_v39 = vpop.eup %7738  ;;  %7750 = vrcp.f32 %v3862_v57 }
0x1adc   :  { %v3861_v14 = vadd.f32 1.0, %v7739_v39  ;;  %7752 = vrcp.f32 %v3863_v43 }
0x1add   :  { %v7741_v15 = vpop.eup %7740 }
0x1ade   :  { %v3864_v17 = vadd.f32 1.0, %v7741_v15  ;;  %7754 = vrcp.f32 %v3861_v14 }
0x1adf   :  { %v7743_v34 = vpop.eup %7742 }
0x1ae0   :  { %v7745_v56 = vpop.eup %7744  ;;  %v3865_v59 = vadd.f32 1.0, %v7743_v34  ;;  %7756 = vrcp.f32 %v3864_v17 }
0x1ae1   :  { %v7747_v58 = vpop.eup %7746  ;;  %v3866_v60 = vadd.f32 1.0, %v7745_v56 }
0x1ae2   :  { %7758 = vrcp.f32 %v3865_v59  ;;  %v3867_v30 = vadd.f32 1.0, %v7747_v58 }
0x1ae3   :  { %v7749_v33 = vpop.eup %7748  ;;  %7760 = vrcp.f32 %v3866_v60 }
0x1ae4   :  { %v3868_v2 = vadd.f32 1.0, %v7749_v33  ;;  %7762 = vrcp.f32 %v3867_v30 }
0x1ae5   :  { %v9820_v49 = vpop.eup %7750 }
0x1ae6   :  { %v9822_v11 = vpop.eup %7752  ;;  %7764 = vrcp.f32 %v3868_v2 }
0x1ae8   :  { %v9827_v57 = vpop.eup %7754 }
0x1aea   :  { %v9830_v43 = vpop.eup %7756 }
0x1aec   :  { %v9835_v17 = vpop.eup %7758 }
0x1aed   :  { %v9838_v59 = vpop.eup %7760 }
0x1aee   :  { %v9843_v30 = vpop.eup %7762 }
0x1b3f   :  { %v3936_v10 = vpop.permute.xlu1 %3935 }
0x1b40   :  { %v3958_v46 = vmul.f32 %v9820_v49, %v3936_v10  ;;  %v9846_v10 = vpop.eup %7764 }
0x1b41   :  { %v3938_v21 = vpop.permute.xlu0 %3937 }
0x1b42   :  { %v3959_v62 = vmul.f32 %v9822_v11, %v3938_v21  ;;  %3975 = vrot.lane.b32.xlu1 %v3958_v46, %s8300_s3 }
0x1b43   :  { %v3934_v39 = vpop.permute.xlu1 %3933 }
0x1b44   :  { %3977 = vrot.lane.b32.xlu0 %v3959_v62, %s8300_s3  ;;  %v3957_v15 = vmul.f32 %v9827_v57, %v3934_v39  ;;  %v3902_v39 = vrot.slane %v9719_v63, 7 }
0x1b45   :  { %v3940_v14 = vpop.permute.xlu0 %3939 }
0x1b46   :  { %v3960_v34 = vmul.f32 %v9830_v43, %v3940_v14  ;;  %3973 = vrot.lane.b32.xlu1 %v3957_v15, %s8300_s3  ;;  %v3903_v15 = vrot.slane %v9722_v36, 7  ;;  %v3918_v14 = vmul.f32 %v9820_v49, %v3902_v39 }
0x1b47   :  { %v3942_v56 = vpop.permute.xlu1 %3941 }
0x1b48   :  { %3979 = vrot.lane.b32.xlu0 %v3960_v34, %s8300_s3  ;;  %v3961_v58 = vmul.f32 %v9835_v17, %v3942_v56  ;;  %v3919_v56 = vmul.f32 %v9822_v11, %v3903_v15  ;;  %v3906_v15 = vrot.slane %v9742_v26, 7 }
0x1b49   :  { %v3944_v60 = vpop.permute.xlu0 %3943 }
0x1b4a   :  { %v3962_v33 = vmul.f32 %v9838_v59, %v3944_v60  ;;  %3981 = vrot.lane.b32.xlu1 %v3961_v58, %s8300_s3  ;;  %v3901_v58 = vrot.slane %v9711_v5, 7 }
0x1b4b   :  { %v3946_v2 = vpop.permute.xlu1 %3945 }
0x1b4c   :  { %3983 = vrot.lane.b32.xlu0 %v3962_v33, %s8300_s3  ;;  %v3963_v46 = vmul.f32 %v9843_v30, %v3946_v2  ;;  %v3904_v2 = vrot.slane %v9733_v61, 7  ;;  %v3917_v63 = vmul.f32 %v9827_v57, %v3901_v58  ;;  %v3907_v58 = vrot.slane %v9739_v32, 7 }
0x1b4d   :  { %v3948_v21 = vpop.permute.xlu0 %3947 }
0x1b4e   :  { %v3964_v62 = vmul.f32 %v9846_v10, %v3948_v21  ;;  %3985 = vrot.lane.b32.xlu1 %v3963_v46, %s8300_s3  ;;  %v3920_v46 = vmul.f32 %v9830_v43, %v3904_v2  ;;  %v3908_v2 = vrot.slane %v9747_v18, 7  ;;  %v3923_v26 = vmul.f32 %v9843_v30, %v3907_v58 }
0x1b50   :  { %3987 = vrot.lane.b32.xlu0 %v3964_v62, %s8300_s3  ;;  %v3905_v62 = vrot.slane %v9729_v22, 7 }
0x1b52   :  { %v3921_v61 = vmul.f32 %v9835_v17, %v3905_v62 }
0x1bb4   :  { %v3976_v34 = vpop.permute.xlu1 %3975 }
0x1bb5   :  { %v9857_v60 = vadd.f32 %v3976_v34, %v3918_v14 }
0x1bb6   :  { %v3978_v33 = vpop.permute.xlu0 %3977 }
0x1bb7   :  { %v9860_v21 = vadd.f32 %v3978_v33, %v3919_v56  ;;  %7766 = vtanh.f32 %v9857_v60  ;;  %v3922_v56 = vmul.f32 %v9838_v59, %v3906_v15 }
0x1bb8   :  { %v3974_v36 = vpop.permute.xlu1 %3973 }
0x1bb9   :  { %7768 = vtanh.f32 %v9860_v21  ;;  %v9867_v39 = vadd.f32 %v3974_v36, %v3917_v63 }
0x1bba   :  { %v3980_v5 = vpop.permute.xlu0 %3979 }
0x1bbb   :  { %v9870_v14 = vadd.f32 %v3980_v5, %v3920_v46  ;;  %7770 = vtanh.f32 %v9867_v39  ;;  %v3924_v46 = vmul.f32 %v9846_v10, %v3908_v2 }
0x1bbc   :  { %v3982_v34 = vpop.permute.xlu1 %3981 }
0x1bbd   :  { %7772 = vtanh.f32 %v9870_v14  ;;  %v9877_v33 = vadd.f32 %v3982_v34, %v3921_v61 }
0x1bbe   :  { %v3984_v22 = vpop.permute.xlu0 %3983 }
0x1bbf   :  { %v9880_v63 = vadd.f32 %v3984_v22, %v3922_v56  ;;  %7774 = vtanh.f32 %v9877_v33 }
0x1bc0   :  { %v3986_v36 = vpop.permute.xlu1 %3985 }
0x1bc1   :  { %7776 = vtanh.f32 %v9880_v63  ;;  %v7767_v62 = vpop.eup %7766  ;;  %v9886_v5 = vadd.f32 %v3986_v36, %v3923_v26 }
0x1bc2   :  { %v3988_v32 = vpop.permute.xlu0 %3987  ;;  %4023 = vrot.lane.b32.xlu1 %v7767_v62, %s8294_s27 }
0x1bc3   :  { %v7769_v15 = vpop.eup %7768  ;;  %v9888_v61 = vadd.f32 %v3988_v32, %v3924_v46  ;;  %7778 = vtanh.f32 %v9886_v5 }
0x1bc4   :  { %4025 = vrot.lane.b32.xlu0 %v7769_v15, %s8294_s27 }
0x1bc5   :  { %7780 = vtanh.f32 %v9888_v61  ;;  %v7771_v18 = vpop.eup %7770 }
0x1bc6   :  { %4021 = vrot.lane.b32.xlu1 %v7771_v18, %s8294_s27 }
0x1bc7   :  { %v7773_v34 = vpop.eup %7772 }
0x1bc8   :  { %4027 = vrot.lane.b32.xlu0 %v7773_v34, %s8294_s27 }
0x1bc9   :  { %v7775_v56 = vpop.eup %7774 }
0x1bca   :  { %4029 = vrot.lane.b32.xlu1 %v7775_v56, %s8294_s27 }
0x1bcb   :  { %v7777_v58 = vpop.eup %7776 }
0x1bcc   :  { %4031 = vrot.lane.b32.xlu0 %v7777_v58, %s8294_s27 }
0x1bcd   :  { %v7779_v22 = vpop.eup %7778 }
0x1bce   :  { %4033 = vrot.lane.b32.xlu1 %v7779_v22, %s8294_s27 }
0x1bcf   :  { %v7781_v2 = vpop.eup %7780 }
0x1bd0   :  { %4035 = vrot.lane.b32.xlu0 %v7781_v2, %s8294_s27 }
0x1c34   :  { %v4024_v26 = vpop.permute.xlu1 %4023 }
0x1c35   :  { %v4046_v62 = vmul.f32 %v9820_v49, %v4024_v26 }
0x1c36   :  { %v4026_v36 = vpop.permute.xlu0 %4025 }
0x1c37   :  { %v4047_v46 = vmul.f32 %v9822_v11, %v4026_v36  ;;  %v9906_v58 = vpack.c.bf16 %v4046_v62, %v4046_v62 }
0x1c38   :  { %v4022_v15 = vpop.permute.xlu1 %4021 }
0x1c39   :  { %v9902_v32 = vpack.c.bf16 %v4047_v46, %v4047_v46  ;;  %v4045_v18 = vmul.f32 %v9827_v57, %v4022_v15  ;;  %11462 = vst [vmem:[#allocation68_spill] sm:$0xff] %v9906_v58 }
0x1c3a   :  { %v4028_v34 = vpop.permute.xlu0 %4027 }
0x1c3b   :  { %11461 = vst [vmem:[#allocation67_spill] sm:$0xff] %v9902_v32  ;;  %v4048_v56 = vmul.f32 %v9830_v43, %v4028_v34  ;;  %v9908_v19 = vpack.c.bf16 %v4045_v18, %v4045_v18  ;;  %v4071_v22 = vunpack.c.l.b16 %v9902_v32  ;;  %v4070_v43 = vunpack.c.l.b16 %v9906_v58 }
0x1c3c   :  { %v4030_v48 = vpop.permute.xlu1 %4029 }
0x1c3d   :  { %11463 = vst [vmem:[#allocation69_spill] sm:$0xff] %v9908_v19  ;;  %v9911_v2 = vpack.c.bf16 %v4048_v56, %v4048_v56  ;;  %v4069_v11 = vunpack.c.l.b16 %v9908_v19  ;;  %v4049_v49 = vmul.f32 %v9835_v17, %v4030_v48  ;;  %v4135_v15 = vrot.slane %v4071_v22, 7 }
0x1c3e   :  { %v4032_v26 = vpop.permute.xlu0 %4031 }
0x1c3f   :  { %11464 = vst [vmem:[#allocation70_spill] sm:$0xff] %v9911_v2  ;;  %v4072_v36 = vunpack.c.l.b16 %v9911_v2  ;;  %v4050_v57 = vmul.f32 %v9838_v59, %v4032_v26  ;;  %v4133_v46 = vrot.slane %v4069_v11, 1  ;;  %v9918_v62 = vpack.c.bf16 %v4049_v49, %v4049_v49 }
0x1c40   :  { %v4034_v56 = vpop.permute.xlu1 %4033 }
0x1c41   :  { %11465 = vst [vmem:[#allocation71_spill] sm:$0xff] %v9918_v62  ;;  %v4137_v18 = vrot.slane %v4072_v36, 6  ;;  %v9920_v34 = vpack.c.bf16 %v4050_v57, %v4050_v57  ;;  %v4134_v32 = vsel %vm690_vm2, %v4070_v43, %v4133_v46  ;;  %v4073_v19 = vunpack.c.l.b16 %v9918_v62 }
0x1c42   :  { %v4051_v48 = vmul.f32 %v9843_v30, %v4034_v56  ;;  %v4036_v17 = vpop.permute.xlu0 %4035  ;;  %v4136_v2 = vsel %vm693_vm3, %v4135_v15, %v4134_v32 }
0x1c43   :  { %11466 = vst [vmem:[#allocation72_spill] sm:$0xff] %v9920_v34  ;;  %v4074_v59 = vunpack.c.l.b16 %v9920_v34  ;;  %v4052_v11 = vmul.f32 %v9846_v10, %v4036_v17  ;;  %v4138_v49 = vsel %vm696_vm4, %v4137_v18, %v4136_v2  ;;  %v4139_v22 = vrot.slane %v4073_v19, 5 }
0x1c44   :  { %v9929_v26 = vpack.c.bf16 %v4051_v48, %v4051_v48 }
0x1c45   :  { %v4141_v36 = vrot.slane %v4074_v59, 4  ;;  %v9931_v57 = vpack.c.bf16 %v4052_v11, %v4052_v11  ;;  %v4140_v43 = vsel %vm699_vm5, %v4139_v22, %v4138_v49 }
0x1c46   :  { %11467 = vst [vmem:[#allocation73_spill] sm:$0xff] %v9929_v26  ;;  %v4075_v46 = vunpack.c.l.b16 %v9929_v26 }
0x1c47   :  { %11468 = vst [vmem:[#allocation74_spill] sm:$0xff] %v9931_v57  ;;  %v4142_v30 = vsel %vm702_vm6, %v4141_v36, %v4140_v43  ;;  %v4076_v32 = vunpack.c.l.b16 %v9931_v57 }
0x1c48   :  { %v4143_v15 = vrot.slane %v4075_v46, 3 }
0x1c49   :  { %v4145_v56 = vrot.slane %v4076_v32, 2 }
0x1c4a   :  { %v4144_v10 = vsel %vm705_vm7, %v4143_v15, %v4142_v30 }
0x1c4b   :  { %v4146_v2 = vsel %vm708_vm8, %v4145_v56, %v4144_v10 }
0x1c4c   :  { %v4147_v19 = vpack.c.b16 %v4146_v2, %v4146_v2 }
0x1c4e   :  { %4148 = vrot.lane.b32.xlu1 %v4147_v19, %s8300_s3 }
0x1cc0   :  { %v4149_v18 = vpop.permute.xlu1 %4148 }
0x1cc1   :  { %7076 = vmatmul.mubr.msk.bf16.vlgmr.msra.gmra.mrb[28].mxu0 %vm76_vm0, %v4149_v18 }
0x1cc2   :  { %7088 = vmatpush3.bf16.msra.mxu0 %v9651_v44  ;;  %7091 = vmatprep.mubr.msk.bf16.mxu0 %vm8299_vm1, %v11422_v45 }
0x1cc3   :  { %7089 = vmatprep.subr.bf16.mxu0 %v11422_v45 }
0x1cc6   :  { %7090 = vmatpush3.bf16.msra.mxu0 %v9657_v37 }
0x1cc7   :  { %7103 = vmatprep.subr.bf16.mxu0 %v11422_v45 }
0x1d94   :  { %v4187_v48 = vpop.f32.mrb[28].mxu0 }
0x1d95   :  { %v4194_v17 = vrot.slane %v4187_v48, 6  ;;  %v7077_v59 = vpop.f32.mrb[29].mxu0  ;;  %v4196_v36 = vrot.slane %v4187_v48, 1  ;;  %v4195_v43 = vrot.slane %v4187_v48, 7  ;;  %v4211_v44 = vadd.f32 %v4187_v48, %v8470_v41 }
0x1d96   :  { %v4190_v11 = vpop.f32.mrb[30].mxu0  ;;  %v4197_v46 = vrot.slane %v4187_v48, 2  ;;  %v4198_v15 = vrot.slane %v4187_v48, 3  ;;  %v4199_v56 = vrot.slane %v4187_v48, 4  ;;  %v4200_v2 = vrot.slane %v4187_v48, 5 }
0x1d97   :  { %v4209_v49 = vadd.f32 %v4194_v17, %v8447_v29  ;;  %v7078_v22 = vpop.f32.mrb[31].mxu0  ;;  %v4212_v30 = vadd.f32 %v4196_v36, %v8464_v38  ;;  %v4210_v37 = vadd.f32 %v4195_v43, %v8441_v25 }
0x1d98   :  { %v4213_v10 = vadd.f32 %v4197_v46, %v8492_v55  ;;  %v4214_v19 = vadd.f32 %v4198_v15, %v8487_v51  ;;  %v4215_v18 = vadd.f32 %v4199_v56, %v8510_v8  ;;  %v4216_v17 = vadd.f32 %v4200_v2, %v8505_v3 }
0x1d99   :  { %7782 = vtanh.f32 %v4209_v49  ;;  %v6686_v15 = vmul.f32 -1.442695, %v4211_v44  ;;  %v6687_v56 = vmul.f32 -1.442695, %v4212_v30 }
0x1d9a   :  { %7784 = vtanh.f32 %v4211_v44  ;;  %v6690_v57 = vmul.f32 -1.442695, %v4215_v18 }
0x1d9b   :  { %7786 = vtanh.f32 %v4212_v30 }
0x1d9c   :  { %7788 = vtanh.f32 %v4210_v37 }
0x1d9d   :  { %7790 = vtanh.f32 %v4213_v10 }
0x1d9e   :  { %7792 = vtanh.f32 %v4214_v19 }
0x1d9f   :  { %7794 = vtanh.f32 %v4215_v18 }
0x1da0   :  { %7796 = vtanh.f32 %v4216_v17 }
0x1da3   :  { %v7783_v32 = vpop.eup %7782 }
0x1da4   :  { %4313 = vrot.lane.b32.xlu0 %v7783_v32, %s8294_s27  ;;  %v7785_v59 = vpop.eup %7784  ;;  %v6684_v32 = vmul.f32 -1.442695, %v4209_v49 }
0x1da5   :  { %v7787_v11 = vpop.eup %7786  ;;  %4317 = vrot.lane.b32.xlu1 %v7785_v59, %s8294_s27  ;;  %v6685_v59 = vmul.f32 -1.442695, %v4210_v37 }
0x1da6   :  { %v7789_v22 = vpop.eup %7788  ;;  %7798 = vpow2.f32 %v6684_v32 }
0x1da7   :  { %v7791_v36 = vpop.eup %7790  ;;  %7800 = vpow2.f32 %v6686_v15 }
0x1da8   :  { %4319 = vrot.lane.b32.xlu0 %v7787_v11, %s8294_s27  ;;  %v7793_v48 = vpop.eup %7792  ;;  %7802 = vpow2.f32 %v6687_v56  ;;  %v6688_v11 = vmul.f32 -1.442695, %v4213_v10 }
0x1da9   :  { %4315 = vrot.lane.b32.xlu1 %v7789_v22, %s8294_s27  ;;  %v7795_v43 = vpop.eup %7794  ;;  %7804 = vpow2.f32 %v6685_v59 }
0x1daa   :  { %v7797_v46 = vpop.eup %7796  ;;  %7806 = vpow2.f32 %v6688_v11 }
0x1dac   :  { %4321 = vrot.lane.b32.xlu0 %v7791_v36, %s8294_s27  ;;  %v6689_v36 = vmul.f32 -1.442695, %v4214_v19 }
0x1dad   :  { %4323 = vrot.lane.b32.xlu1 %v7793_v48, %s8294_s27  ;;  %v6691_v48 = vmul.f32 -1.442695, %v4216_v17 }
0x1db0   :  { %4325 = vrot.lane.b32.xlu0 %v7795_v43, %s8294_s27  ;;  %v7799_v2 = vpop.eup %7798 }
0x1db1   :  { %4327 = vrot.lane.b32.xlu1 %v7797_v46, %s8294_s27  ;;  %v4241_v22 = vadd.f32 1.0, %v7799_v2  ;;  %v7801_v43 = vpop.eup %7800 }
0x1db2   :  { %v7803_v46 = vpop.eup %7802  ;;  %v4243_v49 = vadd.f32 1.0, %v7801_v43 }
0x1db3   :  { %7808 = vrcp.f32 %v4241_v22  ;;  %v7805_v44 = vpop.eup %7804  ;;  %v4244_v30 = vadd.f32 1.0, %v7803_v46 }
0x1db4   :  { %7810 = vpow2.f32 %v6689_v36  ;;  %v7807_v32 = vpop.eup %7806  ;;  %v4242_v15 = vadd.f32 1.0, %v7805_v44 }
0x1db5   :  { %7812 = vpow2.f32 %v6690_v57  ;;  %v4245_v18 = vadd.f32 1.0, %v7807_v32 }
0x1db6   :  { %7814 = vpow2.f32 %v6691_v48 }
0x1db7   :  { %7816 = vrcp.f32 %v4243_v49 }
0x1db8   :  { %7818 = vrcp.f32 %v4244_v30 }
0x1db9   :  { %7820 = vrcp.f32 %v4242_v15 }
0x1dba   :  { %7822 = vrcp.f32 %v4245_v18 }
0x1dbd   :  { %v9963_v37 = vpop.eup %7808 }
0x1dbe   :  { %v7811_v56 = vpop.eup %7810 }
0x1dbf   :  { %v7813_v2 = vpop.eup %7812  ;;  %v4246_v57 = vadd.f32 1.0, %v7811_v56 }
0x1dc0   :  { %v7815_v17 = vpop.eup %7814  ;;  %v4247_v59 = vadd.f32 1.0, %v7813_v2 }
0x1dc1   :  { %7824 = vrcp.f32 %v4246_v57  ;;  %v4248_v11 = vadd.f32 1.0, %v7815_v17  ;;  %v9967_v22 = vpop.eup %7816 }
0x1dc2   :  { %7826 = vrcp.f32 %v4247_v59  ;;  %v9969_v48 = vpop.eup %7818 }
0x1dc3   :  { %7828 = vrcp.f32 %v4248_v11  ;;  %v9974_v44 = vpop.eup %7820 }
0x1dc4   :  { %v9977_v32 = vpop.eup %7822 }
0x1e16   :  { %v4314_v10 = vpop.permute.xlu0 %4313 }
0x1e17   :  { %v4337_v19 = vmul.f32 %v9963_v37, %v4314_v10  ;;  %v4318_v36 = vpop.permute.xlu1 %4317 }
0x1e18   :  { %v4339_v43 = vmul.f32 %v9967_v22, %v4318_v36 }
0x1e19   :  { %4353 = vrot.lane.b32.xlu0 %v4337_v19, %s8300_s3  ;;  %v9982_v19 = vpop.eup %7824 }
0x1e1a   :  { %v4320_v46 = vpop.permute.xlu0 %4319  ;;  %4357 = vrot.lane.b32.xlu1 %v4339_v43, %s8300_s3  ;;  %v9985_v2 = vpop.eup %7826 }
0x1e1b   :  { %v4340_v49 = vmul.f32 %v9969_v48, %v4320_v46  ;;  %v4316_v30 = vpop.permute.xlu1 %4315  ;;  %v9990_v11 = vpop.eup %7828  ;;  %v4281_v46 = vrot.slane %v9867_v39, 7 }
0x1e1c   :  { %v4338_v10 = vmul.f32 %v9974_v44, %v4316_v30 }
0x1e1d   :  { %4359 = vrot.lane.b32.xlu0 %v4340_v49, %s8300_s3  ;;  %v4297_v49 = vmul.f32 %v9963_v37, %v4281_v46 }
0x1e1e   :  { %v4322_v15 = vpop.permute.xlu0 %4321  ;;  %4355 = vrot.lane.b32.xlu1 %v4338_v10, %s8300_s3 }
0x1e1f   :  { %v4341_v56 = vmul.f32 %v9977_v32, %v4322_v15  ;;  %v4324_v18 = vpop.permute.xlu1 %4323  ;;  %v4283_v15 = vrot.slane %v9860_v21, 7 }
0x1e20   :  { %v4342_v57 = vmul.f32 %v9982_v19, %v4324_v18 }
0x1e21   :  { %4361 = vrot.lane.b32.xlu0 %v4341_v56, %s8300_s3  ;;  %v4284_v56 = vrot.slane %v9870_v14, 7  ;;  %v4299_v18 = vmul.f32 %v9967_v22, %v4283_v15 }
0x1e22   :  { %v4326_v17 = vpop.permute.xlu0 %4325  ;;  %4363 = vrot.lane.b32.xlu1 %v4342_v57, %s8300_s3 }
0x1e23   :  { %v4343_v59 = vmul.f32 %v9985_v2, %v4326_v17  ;;  %v4328_v36 = vpop.permute.xlu1 %4327  ;;  %v4300_v17 = vmul.f32 %v9969_v48, %v4284_v56 }
0x1e24   :  { %v4344_v43 = vmul.f32 %v9990_v11, %v4328_v36 }
0x1e25   :  { %4365 = vrot.lane.b32.xlu0 %v4343_v59, %s8300_s3  ;;  %v4282_v59 = vrot.slane %v9857_v60, 7  ;;  %v4286_v60 = vrot.slane %v9880_v63, 7 }
0x1e26   :  { %4367 = vrot.lane.b32.xlu1 %v4344_v43, %s8300_s3  ;;  %v4285_v43 = vrot.slane %v9877_v33, 7  ;;  %v4287_v33 = vrot.slane %v9886_v5, 7 }
0x1e27   :  { %v4298_v21 = vmul.f32 %v9974_v44, %v4282_v59 }
0x1e28   :  { %v4303_v59 = vmul.f32 %v9985_v2, %v4287_v33 }
0x1e8b   :  { %v4354_v30 = vpop.permute.xlu0 %4353 }
0x1e8c   :  { %v9997_v10 = vadd.f32 %v4354_v30, %v4297_v49  ;;  %v4358_v57 = vpop.permute.xlu1 %4357  ;;  %v4301_v30 = vmul.f32 %v9977_v32, %v4285_v43 }
0x1e8d   :  { %v10005_v36 = vadd.f32 %v4358_v57, %v4299_v18  ;;  %v4302_v57 = vmul.f32 %v9982_v19, %v4286_v60 }
0x1e8e   :  { %7830 = vtanh.f32 %v9997_v10 }
0x1e8f   :  { %v4360_v39 = vpop.permute.xlu0 %4359  ;;  %7832 = vtanh.f32 %v10005_v36 }
0x1e90   :  { %v10008_v46 = vadd.f32 %v4360_v39, %v4300_v17  ;;  %v4356_v14 = vpop.permute.xlu1 %4355  ;;  %v4288_v39 = vrot.slane %v9888_v61, 7 }
0x1e91   :  { %v10016_v15 = vadd.f32 %v4356_v14, %v4298_v21 }
0x1e92   :  { %7834 = vtanh.f32 %v10008_v46  ;;  %v4304_v5 = vmul.f32 %v9990_v11, %v4288_v39 }
0x1e93   :  { %v4362_v56 = vpop.permute.xlu0 %4361  ;;  %7836 = vtanh.f32 %v10016_v15 }
0x1e94   :  { %v10019_v18 = vadd.f32 %v4362_v56, %v4301_v30  ;;  %v4364_v17 = vpop.permute.xlu1 %4363 }
0x1e95   :  { %v10026_v43 = vadd.f32 %v4364_v17, %v4302_v57 }
0x1e96   :  { %7838 = vtanh.f32 %v10019_v18 }
0x1e97   :  { %v4366_v63 = vpop.permute.xlu0 %4365  ;;  %7840 = vtanh.f32 %v10026_v43 }
0x1e98   :  { %v7831_v49 = vpop.eup %7830  ;;  %v4368_v21 = vpop.permute.xlu1 %4367 }
0x1e99   :  { %4401 = vrot.lane.b32.xlu0 %v7831_v49, %s8294_s27  ;;  %v10028_v49 = vadd.f32 %v4366_v63, %v4303_v59  ;;  %v7833_v14 = vpop.eup %7832  ;;  %v10033_v30 = vadd.f32 %v4368_v21, %v4304_v5 }
0x1e9a   :  { %4405 = vrot.lane.b32.xlu1 %v7833_v14, %s8294_s27 }
0x1e9b   :  { %7842 = vtanh.f32 %v10028_v49 }
0x1e9c   :  { %v7835_v60 = vpop.eup %7834  ;;  %7844 = vtanh.f32 %v10033_v30 }
0x1e9d   :  { %4407 = vrot.lane.b32.xlu0 %v7835_v60, %s8294_s27  ;;  %v7837_v61 = vpop.eup %7836 }
0x1e9e   :  { %4403 = vrot.lane.b32.xlu1 %v7837_v61, %s8294_s27 }
0x1ea0   :  { %v7839_v56 = vpop.eup %7838 }
0x1ea1   :  { %4409 = vrot.lane.b32.xlu0 %v7839_v56, %s8294_s27  ;;  %v7841_v33 = vpop.eup %7840 }
0x1ea2   :  { %4411 = vrot.lane.b32.xlu1 %v7841_v33, %s8294_s27 }
0x1ea5   :  { %v7843_v57 = vpop.eup %7842 }
0x1ea6   :  { %4413 = vrot.lane.b32.xlu0 %v7843_v57, %s8294_s27  ;;  %v7845_v17 = vpop.eup %7844 }
0x1ea7   :  { %4415 = vrot.lane.b32.xlu1 %v7845_v17, %s8294_s27 }
0x1f0b   :  { %v4402_v59 = vpop.permute.xlu0 %4401 }
0x1f0c   :  { %v4425_v39 = vmul.f32 %v9963_v37, %v4402_v59  ;;  %v4406_v63 = vpop.permute.xlu1 %4405 }
0x1f0d   :  { %v4427_v60 = vmul.f32 %v9967_v22, %v4406_v63 }
0x1f0e   :  { %v10045_v14 = vpack.c.bf16 %v4425_v39, %v4425_v39 }
0x1f0f   :  { %v4408_v5 = vpop.permute.xlu0 %4407  ;;  %v10056_v59 = vpack.c.bf16 %v4427_v60, %v4427_v60 }
0x1f10   :  { %v4428_v21 = vmul.f32 %v9969_v48, %v4408_v5  ;;  %11469 = vst [vmem:[#allocation75_spill] sm:$0xff] %v10045_v14  ;;  %v4404_v61 = vpop.permute.xlu1 %4403  ;;  %v4449_v17 = vunpack.c.l.b16 %v10045_v14 }
0x1f11   :  { %v4426_v33 = vmul.f32 %v9974_v44, %v4404_v61  ;;  %11472 = vst [vmem:[#allocation78_spill] sm:$0xff] %v10056_v59  ;;  %v4451_v60 = vunpack.c.l.b16 %v10056_v59 }
0x1f12   :  { %v10048_v56 = vpack.c.bf16 %v4428_v21, %v4428_v21  ;;  %v4513_v21 = vrot.slane %v4449_v17, 2 }
0x1f13   :  { %v4410_v57 = vpop.permute.xlu0 %4409  ;;  %v10053_v26 = vpack.c.bf16 %v4426_v33, %v4426_v33 }
0x1f14   :  { %11470 = vst [vmem:[#allocation76_spill] sm:$0xff] %v10048_v56  ;;  %v4429_v34 = vmul.f32 %v9977_v32, %v4410_v57  ;;  %v4452_v37 = vunpack.c.l.b16 %v10048_v56  ;;  %v4412_v48 = vpop.permute.xlu1 %4411 }
0x1f15   :  { %11471 = vst [vmem:[#allocation77_spill] sm:$0xff] %v10053_v26  ;;  %v4450_v22 = vunpack.c.l.b16 %v10053_v26  ;;  %v4430_v63 = vmul.f32 %v9982_v19, %v4412_v48 }
0x1f16   :  { %v10058_v39 = vpack.c.bf16 %v4429_v34, %v4429_v34  ;;  %v4517_v33 = vrot.slane %v4452_v37, 7 }
0x1f17   :  { %v4514_v61 = vrot.slane %v4450_v22, 1  ;;  %v10064_v57 = vpack.c.bf16 %v4430_v63, %v4430_v63 }
0x1f18   :  { %11473 = vst [vmem:[#allocation79_spill] sm:$0xff] %v10058_v39  ;;  %v4414_v5 = vpop.permute.xlu0 %4413  ;;  %v4453_v44 = vunpack.c.l.b16 %v10058_v39 }
0x1f19   :  { %v4431_v32 = vmul.f32 %v9985_v2, %v4414_v5  ;;  %11474 = vst [vmem:[#allocation80_spill] sm:$0xff] %v10064_v57  ;;  %v4416_v14 = vpop.permute.xlu1 %4415  ;;  %v4515_v26 = vsel %vm690_vm2, %v4514_v61, %v4513_v21  ;;  %v4454_v19 = vunpack.c.l.b16 %v10064_v57 }
0x1f1a   :  { %v4519_v56 = vrot.slane %v4453_v44, 6  ;;  %v4432_v48 = vmul.f32 %v9990_v11, %v4416_v14  ;;  %v4516_v39 = vsel %vm693_vm3, %v4451_v60, %v4515_v26 }
0x1f1b   :  { %v10067_v34 = vpack.c.bf16 %v4431_v32, %v4431_v32  ;;  %v4518_v17 = vsel %vm696_vm4, %v4517_v33, %v4516_v39  ;;  %v4521_v37 = vrot.slane %v4454_v19, 5  ;;  %v10084_v39 = vld [vmem:[#allocation9] sm:$0xff]  }
0x1f1c   :  { %v10075_v22 = vpack.c.bf16 %v4432_v48, %v4432_v48  ;;  %v4520_v63 = vsel %vm699_vm5, %v4519_v56, %v4518_v17  ;;  %v10090_v56 = vld [vmem:[#allocation9 + $0x8] sm:$0xff]  }
0x1f1d   :  { %11475 = vst [vmem:[#allocation81_spill] sm:$0xff] %v10067_v34  ;;  %v4455_v2 = vunpack.c.l.b16 %v10067_v34  ;;  %v4522_v32 = vsel %vm702_vm6, %v4521_v37, %v4520_v63 }
0x1f1e   :  { %11476 = vst [vmem:[#allocation82_spill] sm:$0xff] %v10075_v22  ;;  %v4456_v44 = vunpack.c.l.b16 %v10075_v22 }
0x1f1f   :  { %v4523_v5 = vrot.slane %v4455_v2, 4 }
0x1f20   :  { %v4525_v61 = vrot.slane %v4456_v44, 3 }
0x1f21   :  { %v4524_v21 = vsel %vm705_vm7, %v4523_v5, %v4522_v32 }
0x1f22   :  { %v4526_v11 = vsel %vm708_vm8, %v4525_v61, %v4524_v21 }
0x1f23   :  { %v4527_v26 = vpack.c.b16 %v4526_v11, %v4526_v11 }
0x1f25   :  { %4528 = vrot.lane.b32.xlu0 %v4527_v26, %s8300_s3 }
0x1f97   :  { %v4529_v14 = vpop.permute.xlu0 %4528 }
0x1f98   :  { %7084 = vmatmul.mubr.msk.bf16.vlgmr.msra.gmra.mrb[28].mxu1 %vm76_vm0, %v4529_v14 }
0x1f99   :  { %7096 = vmatpush3.bf16.msra.mxu1 %v10084_v39  ;;  %7099 = vmatprep.mubr.msk.bf16.mxu1 %vm8299_vm1, %v11422_v45 }
0x1f9a   :  { %7097 = vmatprep.subr.bf16.mxu1 %v11422_v45 }
0x1f9d   :  { %7098 = vmatpush3.bf16.msra.mxu1 %v10090_v56 }
0x1f9e   :  { %7111 = vmatprep.subr.bf16.mxu1 %v11422_v45 }
0x206b   :  { %v4567_v33 = vpop.f32.mrb[28].mxu1 }
0x206c   :  { %v7085_v60 = vpop.f32.mrb[29].mxu1  ;;  %v4575_v2 = vrot.slane %v4567_v33, 6  ;;  %v4577_v17 = vrot.slane %v4567_v33, 1  ;;  %v4574_v63 = vrot.slane %v4567_v33, 5  ;;  %v4592_v5 = vadd.f32 %v4567_v33, %v8464_v38 }
0x206d   :  { %v4570_v19 = vpop.f32.mrb[30].mxu1  ;;  %v4578_v44 = vrot.slane %v4567_v33, 2  ;;  %v4576_v21 = vrot.slane %v4567_v33, 7  ;;  %v4580_v11 = vrot.slane %v4567_v33, 4  ;;  %v4579_v14 = vrot.slane %v4567_v33, 3 }
0x206e   :  { %v7086_v48 = vpop.f32.mrb[31].mxu1  ;;  %v4590_v37 = vadd.f32 %v4575_v2, %v8441_v25  ;;  %v4593_v32 = vadd.f32 %v4577_v17, %v8492_v55  ;;  %v4589_v61 = vadd.f32 %v4574_v63, %v8447_v29 }
0x206f   :  { %v4594_v26 = vadd.f32 %v4578_v44, %v8487_v51  ;;  %v4591_v60 = vadd.f32 %v4576_v21, %v8470_v41  ;;  %v4596_v19 = vadd.f32 %v4580_v11, %v8505_v3  ;;  %v4595_v2 = vadd.f32 %v4579_v14, %v8510_v8 }
0x2070   :  { %7846 = vtanh.f32 %v4590_v37  ;;  %v6705_v22 = vmul.f32 -1.442695, %v4593_v32 }
0x2071   :  { %7848 = vtanh.f32 %v4592_v5  ;;  %v6703_v57 = vmul.f32 -1.442695, %v4591_v60 }
0x2072   :  { %7850 = vtanh.f32 %v4593_v32 }
0x2073   :  { %7852 = vtanh.f32 %v4589_v61 }
0x2074   :  { %7854 = vtanh.f32 %v4594_v26 }
0x2075   :  { %7856 = vtanh.f32 %v4591_v60 }
0x2076   :  { %7858 = vtanh.f32 %v4596_v19 }
0x2077   :  { %7860 = vtanh.f32 %v4595_v2 }
0x207a   :  { %v7847_v48 = vpop.eup %7846 }
0x207b   :  { %4695 = vrot.lane.b32.xlu0 %v7847_v48, %s8294_s27  ;;  %v7849_v17 = vpop.eup %7848  ;;  %v6702_v48 = vmul.f32 -1.442695, %v4590_v37 }
0x207c   :  { %4699 = vrot.lane.b32.xlu1 %v7849_v17, %s8294_s27  ;;  %v7851_v63 = vpop.eup %7850  ;;  %v6704_v17 = vmul.f32 -1.442695, %v4592_v5 }
0x207d   :  { %v7853_v33 = vpop.eup %7852  ;;  %7862 = vpow2.f32 %v6702_v48 }
0x207e   :  { %v7855_v44 = vpop.eup %7854  ;;  %7864 = vpow2.f32 %v6704_v17 }
0x207f   :  { %4701 = vrot.lane.b32.xlu0 %v7851_v63, %s8294_s27  ;;  %v7857_v21 = vpop.eup %7856  ;;  %v6701_v63 = vmul.f32 -1.442695, %v4589_v61  ;;  %7866 = vpow2.f32 %v6705_v22 }
0x2080   :  { %4693 = vrot.lane.b32.xlu1 %v7853_v33, %s8294_s27  ;;  %v7859_v11 = vpop.eup %7858  ;;  %v6706_v33 = vmul.f32 -1.442695, %v4594_v26 }
0x2081   :  { %v7861_v14 = vpop.eup %7860  ;;  %7868 = vpow2.f32 %v6701_v63 }
0x2082   :  { %7870 = vpow2.f32 %v6706_v33 }
0x2083   :  { %4703 = vrot.lane.b32.xlu0 %v7855_v44, %s8294_s27  ;;  %v6708_v44 = vmul.f32 -1.442695, %v4596_v19  ;;  %7872 = vpow2.f32 %v6703_v57 }
0x2084   :  { %4697 = vrot.lane.b32.xlu1 %v7857_v21, %s8294_s27  ;;  %v6707_v21 = vmul.f32 -1.442695, %v4595_v2 }
0x2085   :  { %7874 = vpow2.f32 %v6708_v44 }
0x2086   :  { %7876 = vpow2.f32 %v6707_v21 }
0x2087   :  { %4707 = vrot.lane.b32.xlu0 %v7859_v11, %s8294_s27  ;;  %v7863_v34 = vpop.eup %7862 }
0x2088   :  { %4705 = vrot.lane.b32.xlu1 %v7861_v14, %s8294_s27  ;;  %v7865_v59 = vpop.eup %7864  ;;  %v4622_v11 = vadd.f32 1.0, %v7863_v34 }
0x2089   :  { %v7867_v62 = vpop.eup %7866  ;;  %v4624_v37 = vadd.f32 1.0, %v7865_v59 }
0x208a   :  { %7878 = vrcp.f32 %v4622_v11  ;;  %v4625_v32 = vadd.f32 1.0, %v7867_v62 }
0x208b   :  { %v7869_v5 = vpop.eup %7868  ;;  %7880 = vrcp.f32 %v4624_v37 }
0x208c   :  { %v7871_v61 = vpop.eup %7870  ;;  %v4621_v22 = vadd.f32 1.0, %v7869_v5  ;;  %7882 = vrcp.f32 %v4625_v32 }
0x208d   :  { %v7873_v26 = vpop.eup %7872  ;;  %v4626_v60 = vadd.f32 1.0, %v7871_v61 }
0x208e   :  { %7884 = vrcp.f32 %v4621_v22  ;;  %v4623_v19 = vadd.f32 1.0, %v7873_v26 }
0x208f   :  { %v7875_v14 = vpop.eup %7874  ;;  %7886 = vrcp.f32 %v4626_v60 }
0x2090   :  { %v7877_v57 = vpop.eup %7876  ;;  %v4628_v2 = vadd.f32 1.0, %v7875_v14  ;;  %7888 = vrcp.f32 %v4623_v19 }
0x2091   :  { %v4627_v59 = vadd.f32 1.0, %v7877_v57 }
0x2092   :  { %7890 = vrcp.f32 %v4628_v2 }
0x2093   :  { %7892 = vrcp.f32 %v4627_v59 }
0x2094   :  { %v10110_v48 = vpop.eup %7878 }
0x2095   :  { %v10113_v62 = vpop.eup %7880 }
0x2096   :  { %v10117_v44 = vpop.eup %7882 }
0x2098   :  { %v10121_v37 = vpop.eup %7884 }
0x2099   :  { %v10125_v61 = vpop.eup %7886 }
0x209a   :  { %v10129_v60 = vpop.eup %7888 }
0x209c   :  { %v10133_v57 = vpop.eup %7890 }
0x209d   :  { %v10137_v59 = vpop.eup %7892 }
0x20ed   :  { %v4696_v34 = vpop.permute.xlu0 %4695 }
0x20ee   :  { %v4718_v17 = vmul.f32 %v10110_v48, %v4696_v34  ;;  %v4700_v63 = vpop.permute.xlu1 %4699 }
0x20ef   :  { %v4720_v33 = vmul.f32 %v10113_v62, %v4700_v63 }
0x20f0   :  { %4735 = vrot.lane.b32.xlu0 %v4718_v17, %s8300_s3 }
0x20f1   :  { %v4702_v21 = vpop.permute.xlu0 %4701  ;;  %4739 = vrot.lane.b32.xlu1 %v4720_v33, %s8300_s3  ;;  %v4662_v33 = vrot.slane %v10016_v15, 7 }
0x20f2   :  { %v4721_v11 = vmul.f32 %v10117_v44, %v4702_v21  ;;  %v4694_v5 = vpop.permute.xlu1 %4693  ;;  %v4664_v21 = vrot.slane %v10008_v46, 7  ;;  %v4666_v46 = vrot.slane %v10026_v43, 7 }
0x20f3   :  { %v4717_v32 = vmul.f32 %v10121_v37, %v4694_v5 }
0x20f4   :  { %4741 = vrot.lane.b32.xlu0 %v4721_v11, %s8300_s3  ;;  %v4678_v11 = vmul.f32 %v10110_v48, %v4662_v33  ;;  %v4663_v33 = vrot.slane %v10005_v36, 7 }
0x20f5   :  { %v4704_v22 = vpop.permute.xlu0 %4703  ;;  %4733 = vrot.lane.b32.xlu1 %v4717_v32, %s8300_s3  ;;  %v4665_v32 = vrot.slane %v10019_v18, 7 }
0x20f6   :  { %v4722_v26 = vmul.f32 %v10125_v61, %v4704_v22  ;;  %v4698_v14 = vpop.permute.xlu1 %4697  ;;  %v4680_v22 = vmul.f32 %v10113_v62, %v4664_v21  ;;  %v4679_v43 = vmul.f32 %v10129_v60, %v4663_v33 }
0x20f7   :  { %v4719_v19 = vmul.f32 %v10129_v60, %v4698_v14  ;;  %v4681_v15 = vmul.f32 %v10117_v44, %v4665_v32 }
0x20f8   :  { %4743 = vrot.lane.b32.xlu0 %v4722_v26, %s8300_s3 }
0x20f9   :  { %v4708_v2 = vpop.permute.xlu0 %4707  ;;  %4737 = vrot.lane.b32.xlu1 %v4719_v19, %s8300_s3  ;;  %v4661_v19 = vrot.slane %v9997_v10, 7  ;;  %v4682_v10 = vmul.f32 %v10125_v61, %v4666_v46 }
0x20fa   :  { %v4724_v34 = vmul.f32 %v10133_v57, %v4708_v2  ;;  %v4706_v17 = vpop.permute.xlu1 %4705 }
0x20fb   :  { %v4723_v63 = vmul.f32 %v10137_v59, %v4706_v17  ;;  %v4677_v18 = vmul.f32 %v10121_v37, %v4661_v19 }
0x20fc   :  { %4747 = vrot.lane.b32.xlu0 %v4724_v34, %s8300_s3 }
0x20fd   :  { %4745 = vrot.lane.b32.xlu1 %v4723_v63, %s8300_s3 }
0x2162   :  { %v4736_v5 = vpop.permute.xlu0 %4735 }
0x2163   :  { %v10147_v26 = vadd.f32 %v4736_v5, %v4678_v11  ;;  %v4740_v14 = vpop.permute.xlu1 %4739  ;;  %v4668_v5 = vrot.slane %v10033_v30, 7 }
0x2164   :  { %v10150_v2 = vadd.f32 %v4740_v14, %v4680_v22  ;;  %v4667_v14 = vrot.slane %v10028_v49, 7 }
0x2165   :  { %7894 = vtanh.f32 %v10147_v26  ;;  %v4684_v36 = vmul.f32 %v10133_v57, %v4668_v5 }
0x2166   :  { %v4742_v34 = vpop.permute.xlu0 %4741  ;;  %7896 = vtanh.f32 %v10150_v2  ;;  %v4683_v30 = vmul.f32 %v10137_v59, %v4667_v14 }
0x2167   :  { %v10157_v17 = vadd.f32 %v4742_v34, %v4681_v15  ;;  %v4734_v63 = vpop.permute.xlu1 %4733 }
0x2168   :  { %v10160_v21 = vadd.f32 %v4734_v63, %v4677_v18 }
0x2169   :  { %7898 = vtanh.f32 %v10157_v17 }
0x216a   :  { %v4744_v11 = vpop.permute.xlu0 %4743  ;;  %7900 = vtanh.f32 %v10160_v21 }
0x216b   :  { %v10167_v32 = vadd.f32 %v4744_v11, %v4682_v10  ;;  %v4738_v22 = vpop.permute.xlu1 %4737 }
0x216c   :  { %v10170_v19 = vadd.f32 %v4738_v22, %v4679_v43 }
0x216d   :  { %7902 = vtanh.f32 %v10167_v32 }
0x216e   :  { %v4748_v15 = vpop.permute.xlu0 %4747  ;;  %7904 = vtanh.f32 %v10170_v19 }
0x216f   :  { %v7895_v34 = vpop.eup %7894  ;;  %v10176_v46 = vadd.f32 %v4748_v15, %v4684_v36  ;;  %v4746_v18 = vpop.permute.xlu1 %4745 }
0x2170   :  { %4783 = vrot.lane.b32.xlu0 %v7895_v34, %s8294_s27  ;;  %v7897_v63 = vpop.eup %7896  ;;  %v10179_v33 = vadd.f32 %v4746_v18, %v4683_v30 }
0x2171   :  { %7906 = vtanh.f32 %v10176_v46  ;;  %4787 = vrot.lane.b32.xlu1 %v7897_v63, %s8294_s27 }
0x2172   :  { %7908 = vtanh.f32 %v10179_v33 }
0x2173   :  { %v7899_v49 = vpop.eup %7898 }
0x2174   :  { %4789 = vrot.lane.b32.xlu0 %v7899_v49, %s8294_s27  ;;  %v7901_v10 = vpop.eup %7900 }
0x2175   :  { %4781 = vrot.lane.b32.xlu1 %v7901_v10, %s8294_s27 }
0x2177   :  { %v7903_v11 = vpop.eup %7902 }
0x2178   :  { %4791 = vrot.lane.b32.xlu0 %v7903_v11, %s8294_s27  ;;  %v7905_v5 = vpop.eup %7904 }
0x2179   :  { %4785 = vrot.lane.b32.xlu1 %v7905_v5, %s8294_s27 }
0x217b   :  { %v7907_v43 = vpop.eup %7906 }
0x217c   :  { %4795 = vrot.lane.b32.xlu0 %v7907_v43, %s8294_s27  ;;  %v7909_v22 = vpop.eup %7908 }
0x217d   :  { %4793 = vrot.lane.b32.xlu1 %v7909_v22, %s8294_s27 }
0x21e2   :  { %v4784_v14 = vpop.permute.xlu0 %4783 }
0x21e3   :  { %v4788_v36 = vpop.permute.xlu1 %4787  ;;  %v4806_v15 = vmul.f32 %v10110_v48, %v4784_v14 }
0x21e4   :  { %v4808_v43 = vmul.f32 %v10113_v62, %v4788_v36 }
0x21e5   :  { %v10193_v49 = vpack.c.bf16 %v4806_v15, %v4806_v15 }
0x21e6   :  { %v4790_v34 = vpop.permute.xlu0 %4789 }
0x21e7   :  { %v4782_v30 = vpop.permute.xlu1 %4781  ;;  %v4809_v63 = vmul.f32 %v10117_v44, %v4790_v34  ;;  %11477 = vst [vmem:[#allocation83_spill] sm:$0xff] %v10193_v49  ;;  %v4830_v44 = vunpack.c.l.b16 %v10193_v49 }
0x21e8   :  { %v4805_v18 = vmul.f32 %v10121_v37, %v4782_v30  ;;  %v10209_v30 = vpack.c.bf16 %v4808_v43, %v4808_v43 }
0x21e9   :  { %v10200_v28 = vpack.c.bf16 %v4809_v63, %v4809_v63 }
0x21ea   :  { %v4792_v10 = vpop.permute.xlu0 %4791  ;;  %v10195_v11 = vpack.c.bf16 %v4805_v18, %v4805_v18  ;;  %11482 = vst [vmem:[#allocation88_spill] sm:$0xff] %v10209_v30 }
0x21eb   :  { %v4810_v5 = vmul.f32 %v10125_v61, %v4792_v10  ;;  %v4786_v22 = vpop.permute.xlu1 %4785  ;;  %11479 = vst [vmem:[#allocation85_spill] sm:$0xff] %v10200_v28  ;;  %v4833_v18 = vunpack.c.l.b16 %v10200_v28  ;;  %v4894_v10 = vrot.slane %v4830_v44, 2 }
0x21ec   :  { %11478 = vst [vmem:[#allocation84_spill] sm:$0xff] %v10195_v11  ;;  %v4829_v58 = vunpack.c.l.b16 %v10195_v11  ;;  %v4807_v48 = vmul.f32 %v10129_v60, %v4786_v22 }
0x21ed   :  { %v10203_v14 = vpack.c.bf16 %v4810_v5, %v4810_v5 }
0x21ee   :  { %v4796_v37 = vpop.permute.xlu0 %4795  ;;  %v10206_v15 = vpack.c.bf16 %v4807_v48, %v4807_v48  ;;  %v4893_v61 = vrot.slane %v4829_v58, 3 }
0x21ef   :  { %11480 = vst [vmem:[#allocation86_spill] sm:$0xff] %v10203_v14  ;;  %v4812_v34 = vmul.f32 %v10133_v57, %v4796_v37  ;;  %v4834_v62 = vunpack.c.l.b16 %v10203_v14  ;;  %v4794_v36 = vpop.permute.xlu1 %4793  ;;  %v4832_v57 = vunpack.c.l.b16 %v10209_v30  ;;  %v4899_v14 = vrot.slane %v4833_v18, 7 }
0x21f0   :  { %11481 = vst [vmem:[#allocation87_spill] sm:$0xff] %v10206_v15  ;;  %v4831_v63 = vunpack.c.l.b16 %v10206_v15  ;;  %v4811_v60 = vmul.f32 %v10137_v59, %v4794_v36  ;;  %v4895_v43 = vsel %vm690_vm2, %v4894_v10, %v4893_v61 }
0x21f1   :  { %v10215_v5 = vpack.c.bf16 %v4812_v34, %v4812_v34  ;;  %v4901_v58 = vrot.slane %v4834_v62, 6 }
0x21f2   :  { %v4896_v22 = vrot.slane %v4831_v63, 1  ;;  %v10217_v48 = vpack.c.bf16 %v4811_v60, %v4811_v60 }
0x21f3   :  { %11483 = vst [vmem:[#allocation89_spill] sm:$0xff] %v10215_v5  ;;  %v4836_v37 = vunpack.c.l.b16 %v10215_v5 }
0x21f4   :  { %11484 = vst [vmem:[#allocation90_spill] sm:$0xff] %v10217_v48  ;;  %v4897_v28 = vsel %vm693_vm3, %v4896_v22, %v4895_v43  ;;  %v4835_v49 = vunpack.c.l.b16 %v10217_v48 }
0x21f5   :  { %v4898_v59 = vsel %vm696_vm4, %v4832_v57, %v4897_v28  ;;  %v4905_v44 = vrot.slane %v4836_v37, 4 }
0x21f6   :  { %v4900_v34 = vsel %vm699_vm5, %v4899_v14, %v4898_v59  ;;  %v4903_v36 = vrot.slane %v4835_v49, 5 }
0x21f7   :  { %v4902_v63 = vsel %vm702_vm6, %v4901_v58, %v4900_v34 }
0x21f8   :  { %v4904_v60 = vsel %vm705_vm7, %v4903_v36, %v4902_v63 }
0x21f9   :  { %v4906_v61 = vsel %vm708_vm8, %v4905_v44, %v4904_v60 }
0x21fa   :  { %v4907_v62 = vpack.c.b16 %v4906_v61, %v4906_v61 }
0x21fc   :  { %4908 = vrot.lane.b32.xlu1 %v4907_v62, %s8300_s3 }
0x226e   :  { %v4909_v18 = vpop.permute.xlu1 %4908 }
0x226f   :  { %7092 = vmatmul.mubr.msk.bf16.vlgmr.msra.gmra.mrb[32].mxu0 %vm76_vm0, %v4909_v18 }
0x2270   :  { %7104 = vmatpush3.bf16.msra.mxu0 %v10084_v39  ;;  %7107 = vmatprep.mubr.msk.bf16.mxu0 %vm8299_vm1, %v11422_v45 }
0x2271   :  { %7105 = vmatprep.subr.bf16.mxu0 %v11422_v45 }
0x2274   :  { %7106 = vmatpush3.bf16.msra.mxu0 %v10090_v56 }
0x2342   :  { %v4947_v28 = vpop.f32.mrb[32].mxu0 }
0x2343   :  { %v4954_v49 = vrot.slane %v4947_v28, 4  ;;  %v7093_v14 = vpop.f32.mrb[33].mxu0  ;;  %v4956_v43 = vrot.slane %v4947_v28, 6  ;;  %v4958_v58 = vrot.slane %v4947_v28, 1  ;;  %v4955_v59 = vrot.slane %v4947_v28, 5 }
0x2344   :  { %v4950_v10 = vpop.f32.mrb[34].mxu0  ;;  %v4973_v44 = vadd.f32 %v4947_v28, %v8492_v55  ;;  %v4959_v36 = vrot.slane %v4947_v28, 2  ;;  %v4957_v60 = vrot.slane %v4947_v28, 7  ;;  %v4960_v18 = vrot.slane %v4947_v28, 3 }
0x2345   :  { %v4969_v22 = vadd.f32 %v4954_v49, %v8447_v29  ;;  %v7094_v57 = vpop.f32.mrb[35].mxu0  ;;  %v4971_v37 = vadd.f32 %v4956_v43, %v8470_v41  ;;  %v4974_v63 = vadd.f32 %v4958_v58, %v8487_v51  ;;  %v4970_v61 = vadd.f32 %v4955_v59, %v8441_v25 }
0x2346   :  { %v4975_v62 = vadd.f32 %v4959_v36, %v8510_v8  ;;  %v4972_v49 = vadd.f32 %v4957_v60, %v8464_v38  ;;  %v4976_v10 = vadd.f32 %v4960_v18, %v8505_v3  ;;  %v6722_v18 = vmul.f32 -1.442695, %v4973_v44 }
0x2347   :  { %7910 = vtanh.f32 %v4969_v22  ;;  %v6718_v36 = vmul.f32 -1.442695, %v4969_v22  ;;  %v6720_v60 = vmul.f32 -1.442695, %v4971_v37 }
0x2348   :  { %7912 = vtanh.f32 %v4971_v37  ;;  %v6725_v48 = vmul.f32 -1.442695, %v4976_v10 }
0x2349   :  { %7914 = vtanh.f32 %v4973_v44 }
0x234a   :  { %7916 = vtanh.f32 %v4974_v63 }
0x234b   :  { %7918 = vtanh.f32 %v4970_v61 }
0x234c   :  { %7920 = vtanh.f32 %v4975_v62 }
0x234d   :  { %7922 = vtanh.f32 %v4972_v49 }
0x234e   :  { %7924 = vtanh.f32 %v4976_v10 }
0x234f   :  { %7926 = vpow2.f32 %v6718_v36 }
0x2350   :  { %7928 = vpow2.f32 %v6720_v60 }
0x2351   :  { %v7911_v34 = vpop.eup %7910  ;;  %7930 = vpow2.f32 %v6722_v18 }
0x2352   :  { %5073 = vrot.lane.b32.xlu0 %v7911_v34, %s8294_s27  ;;  %v7913_v14 = vpop.eup %7912 }
0x2353   :  { %v7915_v57 = vpop.eup %7914 }
0x2354   :  { %5081 = vrot.lane.b32.xlu1 %v7915_v57, %s8294_s27  ;;  %v7917_v43 = vpop.eup %7916  ;;  %v6723_v57 = vmul.f32 -1.442695, %v4974_v63 }
0x2355   :  { %v7919_v58 = vpop.eup %7918 }
0x2356   :  { %5077 = vrot.lane.b32.xlu0 %v7913_v14, %s8294_s27  ;;  %v7921_v28 = vpop.eup %7920  ;;  %7932 = vpow2.f32 %v6723_v57 }
0x2357   :  { %v7923_v59 = vpop.eup %7922 }
0x2358   :  { %5075 = vrot.lane.b32.xlu1 %v7919_v58, %s8294_s27  ;;  %v7925_v34 = vpop.eup %7924  ;;  %v6724_v58 = vmul.f32 -1.442695, %v4975_v62 }
0x2359   :  { %v7927_v14 = vpop.eup %7926 }
0x235a   :  { %5083 = vrot.lane.b32.xlu0 %v7917_v43, %s8294_s27  ;;  %v6719_v43 = vmul.f32 -1.442695, %v4970_v61  ;;  %v5001_v5 = vadd.f32 1.0, %v7927_v14 }
0x235c   :  { %5079 = vrot.lane.b32.xlu1 %v7923_v59, %s8294_s27  ;;  %7934 = vpow2.f32 %v6719_v43  ;;  %v7929_v59 = vpop.eup %7928 }
0x235d   :  { %7936 = vrcp.f32 %v5001_v5  ;;  %v5003_v22 = vadd.f32 1.0, %v7929_v59 }
0x235e   :  { %5085 = vrot.lane.b32.xlu0 %v7921_v28, %s8294_s27  ;;  %v6721_v28 = vmul.f32 -1.442695, %v4972_v49  ;;  %7938 = vpow2.f32 %v6724_v58 }
0x2360   :  { %5087 = vrot.lane.b32.xlu1 %v7925_v34, %s8294_s27  ;;  %7940 = vpow2.f32 %v6721_v28  ;;  %v7931_v34 = vpop.eup %7930 }
0x2361   :  { %v7933_v36 = vpop.eup %7932  ;;  %7942 = vpow2.f32 %v6725_v48  ;;  %v5005_v37 = vadd.f32 1.0, %v7931_v34 }
0x2362   :  { %7944 = vrcp.f32 %v5003_v22  ;;  %v5006_v61 = vadd.f32 1.0, %v7933_v36 }
0x2363   :  { %7946 = vrcp.f32 %v5005_v37 }
0x2364   :  { %7948 = vrcp.f32 %v5006_v61 }
0x2366   :  { %v7935_v44 = vpop.eup %7934 }
0x2367   :  { %v10252_v60 = vpop.eup %7936  ;;  %v5002_v5 = vadd.f32 1.0, %v7935_v44 }
0x2368   :  { %v7939_v18 = vpop.eup %7938 }
0x2369   :  { %v5007_v10 = vadd.f32 1.0, %v7939_v18  ;;  %7950 = vrcp.f32 %v5002_v5 }
0x236a   :  { %v7941_v49 = vpop.eup %7940 }
0x236b   :  { %v5004_v14 = vadd.f32 1.0, %v7941_v49  ;;  %v7943_v48 = vpop.eup %7942  ;;  %7952 = vrcp.f32 %v5007_v10 }
0x236c   :  { %v10256_v57 = vpop.eup %7944  ;;  %v5008_v58 = vadd.f32 1.0, %v7943_v48 }
0x236d   :  { %7954 = vrcp.f32 %v5004_v14  ;;  %v10259_v59 = vpop.eup %7946 }
0x236e   :  { %v10263_v36 = vpop.eup %7948  ;;  %7956 = vrcp.f32 %v5008_v58 }
0x23c4   :  { %v5074_v63 = vpop.permute.xlu0 %5073 }
0x23c5   :  { %v5097_v62 = vmul.f32 %v10252_v60, %v5074_v63  ;;  %v10267_v63 = vpop.eup %7950 }
0x23c6   :  { %v5082_v34 = vpop.permute.xlu1 %5081 }
0x23c7   :  { %5113 = vrot.lane.b32.xlu0 %v5097_v62, %s8300_s3  ;;  %v5101_v22 = vmul.f32 %v10259_v59, %v5082_v34  ;;  %v10271_v62 = vpop.eup %7952  ;;  %v5041_v34 = vrot.slane %v10160_v21, 7 }
0x23c8   :  { %v5078_v43 = vpop.permute.xlu0 %5077  ;;  %v10275_v10 = vpop.eup %7954 }
0x23c9   :  { %v5099_v28 = vmul.f32 %v10256_v57, %v5078_v43  ;;  %5121 = vrot.lane.b32.xlu1 %v5101_v22, %s8300_s3  ;;  %v10280_v43 = vpop.eup %7956  ;;  %v5057_v22 = vmul.f32 %v10252_v60, %v5041_v34  ;;  %v5042_v34 = vrot.slane %v10147_v26, 7  ;;  %v5044_v26 = vrot.slane %v10150_v2, 7 }
0x23ca   :  { %v5076_v61 = vpop.permute.xlu1 %5075 }
0x23cb   :  { %5117 = vrot.lane.b32.xlu0 %v5099_v28, %s8300_s3  ;;  %v5098_v18 = vmul.f32 %v10267_v63, %v5076_v61  ;;  %v5043_v61 = vrot.slane %v10170_v19, 7 }
0x23cc   :  { %v5084_v37 = vpop.permute.xlu0 %5083 }
0x23cd   :  { %v5102_v44 = vmul.f32 %v10263_v36, %v5084_v37  ;;  %5115 = vrot.lane.b32.xlu1 %v5098_v18, %s8300_s3  ;;  %v5045_v18 = vrot.slane %v10157_v17, 7 }
0x23ce   :  { %v5080_v14 = vpop.permute.xlu1 %5079 }
0x23cf   :  { %5123 = vrot.lane.b32.xlu0 %v5102_v44, %s8300_s3  ;;  %v5100_v48 = vmul.f32 %v10275_v10, %v5080_v14  ;;  %v5046_v14 = vrot.slane %v10167_v32, 7  ;;  %v5058_v32 = vmul.f32 %v10267_v63, %v5042_v34 }
0x23d0   :  { %v5086_v5 = vpop.permute.xlu0 %5085 }
0x23d1   :  { %v5103_v49 = vmul.f32 %v10271_v62, %v5086_v5  ;;  %5119 = vrot.lane.b32.xlu1 %v5100_v48, %s8300_s3  ;;  %v5059_v5 = vmul.f32 %v10256_v57, %v5043_v61  ;;  %v5061_v48 = vmul.f32 %v10259_v59, %v5045_v18  ;;  %v5062_v19 = vmul.f32 %v10263_v36, %v5046_v14 }
0x23d2   :  { %v5088_v58 = vpop.permute.xlu1 %5087 }
0x23d3   :  { %5125 = vrot.lane.b32.xlu0 %v5103_v49, %s8300_s3  ;;  %v5104_v28 = vmul.f32 %v10280_v43, %v5088_v58 }
0x23d5   :  { %5127 = vrot.lane.b32.xlu1 %v5104_v28, %s8300_s3 }
0x2439   :  { %v5114_v37 = vpop.permute.xlu0 %5113 }
0x243a   :  { %v10286_v44 = vadd.f32 %v5114_v37, %v5057_v22  ;;  %v5047_v37 = vrot.slane %v10179_v33, 7  ;;  %v5060_v33 = vmul.f32 %v10275_v10, %v5044_v26 }
0x243b   :  { %v5122_v21 = vpop.permute.xlu1 %5121 }
0x243c   :  { %7958 = vtanh.f32 %v10286_v44  ;;  %v10297_v22 = vadd.f32 %v5122_v21, %v5061_v48 }
0x243d   :  { %v5118_v49 = vpop.permute.xlu0 %5117 }
0x243e   :  { %v10294_v58 = vadd.f32 %v5118_v49, %v5059_v5  ;;  %v5063_v49 = vmul.f32 %v10271_v62, %v5047_v37 }
0x243f   :  { %v5116_v18 = vpop.permute.xlu1 %5115 }
0x2440   :  { %7960 = vtanh.f32 %v10294_v58  ;;  %v10308_v5 = vadd.f32 %v5116_v18, %v5058_v32 }
0x2441   :  { %v5124_v17 = vpop.permute.xlu0 %5123  ;;  %7962 = vtanh.f32 %v10297_v22 }
0x2442   :  { %v10305_v61 = vadd.f32 %v5124_v17, %v5062_v19 }
0x2443   :  { %v5120_v21 = vpop.permute.xlu1 %5119 }
0x2444   :  { %7964 = vtanh.f32 %v10305_v61  ;;  %v10317_v34 = vadd.f32 %v5120_v21, %v5060_v33 }
0x2445   :  { %v5126_v14 = vpop.permute.xlu0 %5125  ;;  %7966 = vtanh.f32 %v10308_v5 }
0x2446   :  { %v7959_v28 = vpop.eup %7958  ;;  %v10314_v48 = vadd.f32 %v5126_v14, %v5063_v49 }
0x2447   :  { %5161 = vrot.lane.b32.xlu0 %v7959_v28, %s8294_s27  ;;  %v5048_v28 = vrot.slane %v10176_v46, 7  ;;  %v5128_v17 = vpop.permute.xlu1 %5127 }
0x2448   :  { %7968 = vtanh.f32 %v10314_v48 }
0x2449   :  { %7970 = vtanh.f32 %v10317_v34  ;;  %v5064_v19 = vmul.f32 %v10280_v43, %v5048_v28 }
0x244a   :  { %v7961_v2 = vpop.eup %7960 }
0x244b   :  { %5165 = vrot.lane.b32.xlu0 %v7961_v2, %s8294_s27  ;;  %v7963_v37 = vpop.eup %7962  ;;  %v10323_v32 = vadd.f32 %v5128_v17, %v5064_v19 }
0x244c   :  { %5169 = vrot.lane.b32.xlu1 %v7963_v37, %s8294_s27 }
0x244d   :  { %7972 = vtanh.f32 %v10323_v32 }
0x244e   :  { %v7965_v18 = vpop.eup %7964 }
0x244f   :  { %5171 = vrot.lane.b32.xlu0 %v7965_v18, %s8294_s27  ;;  %v7967_v46 = vpop.eup %7966 }
0x2450   :  { %5163 = vrot.lane.b32.xlu1 %v7967_v46, %s8294_s27 }
0x2452   :  { %v7969_v26 = vpop.eup %7968 }
0x2453   :  { %5173 = vrot.lane.b32.xlu0 %v7969_v26, %s8294_s27  ;;  %v7971_v49 = vpop.eup %7970 }
0x2454   :  { %5167 = vrot.lane.b32.xlu1 %v7971_v49, %s8294_s27 }
0x2457   :  { %v7973_v14 = vpop.eup %7972 }
0x2458   :  { %5175 = vrot.lane.b32.xlu1 %v7973_v14, %s8294_s27 }
0x24b9   :  { %v5162_v33 = vpop.permute.xlu0 %5161 }
0x24ba   :  { %v5185_v28 = vmul.f32 %v10252_v60, %v5162_v33 }
0x24bc   :  { %v10336_v18 = vpack.c.bf16 %v5185_v28, %v5185_v28 }
0x24bd   :  { %v5166_v21 = vpop.permute.xlu0 %5165 }
0x24be   :  { %v5187_v2 = vmul.f32 %v10256_v57, %v5166_v21  ;;  %v5170_v19 = vpop.permute.xlu1 %5169  ;;  %11486 = vst [vmem:[#allocation92_spill] sm:$0xff] %v10336_v18  ;;  %v5209_v15 = vunpack.c.l.b16 %v10336_v18 }
0x24bf   :  { %v5189_v33 = vmul.f32 %v10259_v59, %v5170_v19 }
0x24c0   :  { %v10334_v17 = vpack.c.bf16 %v5187_v2, %v5187_v2 }
0x24c1   :  { %v5172_v37 = vpop.permute.xlu0 %5171 }
0x24c2   :  { %11485 = vst [vmem:[#allocation91_spill] sm:$0xff] %v10334_v17  ;;  %v5190_v46 = vmul.f32 %v10263_v36, %v5172_v37  ;;  %v5164_v26 = vpop.permute.xlu1 %5163  ;;  %v5211_v30 = vunpack.c.l.b16 %v10334_v17  ;;  %v5273_v37 = vrot.slane %v5209_v15, 4 }
0x24c3   :  { %v5186_v49 = vmul.f32 %v10267_v63, %v5164_v26 }
0x24c4   :  { %v10344_v60 = vpack.c.bf16 %v5190_v46, %v5190_v46  ;;  %v5276_v63 = vrot.slane %v5211_v30, 2  ;;  %v10355_v46 = vpack.c.bf16 %v5189_v33, %v5189_v33 }
0x24c5   :  { %v5174_v14 = vpop.permute.xlu0 %5173  ;;  %v10342_v11 = vpack.c.bf16 %v5186_v49, %v5186_v49 }
0x24c6   :  { %v5191_v57 = vmul.f32 %v10271_v62, %v5174_v14  ;;  %v5168_v21 = vpop.permute.xlu1 %5167  ;;  %v5214_v49 = vunpack.c.l.b16 %v10344_v60  ;;  %11488 = vst [vmem:[#allocation94_spill] sm:$0xff] %v10355_v46 }
0x24c7   :  { %v5210_v28 = vunpack.c.l.b16 %v10342_v11  ;;  %v5188_v36 = vmul.f32 %v10275_v10, %v5168_v21  ;;  %v5213_v21 = vunpack.c.l.b16 %v10355_v46 }
0x24c8   :  { %v10350_v2 = vpack.c.bf16 %v5191_v57, %v5191_v57  ;;  %v5281_v15 = vrot.slane %v5214_v49, 7 }
0x24c9   :  { %v5274_v26 = vrot.slane %v5210_v28, 3  ;;  %v10352_v17 = vpack.c.bf16 %v5188_v36, %v5188_v36 }
0x24ca   :  { %11487 = vst [vmem:[#allocation93_spill] sm:$0xff] %v10350_v2  ;;  %v5176_v18 = vpop.permute.xlu1 %5175  ;;  %v5215_v62 = vunpack.c.l.b16 %v10350_v2 }
0x24cb   :  { %v5275_v59 = vsel %vm690_vm2, %v5274_v26, %v5273_v37  ;;  %v5212_v19 = vunpack.c.l.b16 %v10352_v17  ;;  %v5192_v10 = vmul.f32 %v10280_v43, %v5176_v18 }
0x24cc   :  { %v5277_v14 = vsel %vm693_vm3, %v5276_v63, %v5275_v59  ;;  %v5283_v28 = vrot.slane %v5215_v62, 6 }
0x24cd   :  { %v5278_v30 = vrot.slane %v5212_v19, 1  ;;  %v10362_v57 = vpack.c.bf16 %v5192_v10, %v5192_v10 }
0x24cf   :  { %v5279_v33 = vsel %vm696_vm4, %v5278_v30, %v5277_v14  ;;  %v5216_v36 = vunpack.c.l.b16 %v10362_v57 }
0x24d0   :  { %v5280_v2 = vsel %vm699_vm5, %v5213_v21, %v5279_v33 }
0x24d1   :  { %v5282_v37 = vsel %vm702_vm6, %v5281_v15, %v5280_v2  ;;  %v5285_v26 = vrot.slane %v5216_v36, 5 }
0x24d2   :  { %v5284_v43 = vsel %vm705_vm7, %v5283_v28, %v5282_v37 }
0x24d3   :  { %v5286_v18 = vsel %vm708_vm8, %v5285_v26, %v5284_v43 }
0x24d4   :  { %v5287_v63 = vpack.c.b16 %v5286_v18, %v5286_v18 }
0x24d6   :  { %5288 = vrot.lane.b32.xlu0 %v5287_v63, %s8300_s3 }
0x2548   :  { %v5289_v49 = vpop.permute.xlu0 %5288 }
0x2549   :  { %7100 = vmatmul.mubr.msk.bf16.vlgmr.msra.gmra.mrb[32].mxu1 %vm76_vm0, %v5289_v49 }
0x254a   :  { %7112 = vmatpush3.bf16.msra.mxu1 %v10084_v39  ;;  %7115 = vmatprep.mubr.msk.bf16.mxu1 %vm8299_vm1, %v11422_v45  ;;  %vm10738_vm1 = vmand %vm1434_vm14, %vm1435_vm15  ;;  %vm2582_vm15 = vsmask.f32 7946 }
0x254b   :  { %7113 = vmatprep.subr.bf16.mxu1 %v11422_v45 }
0x254e   :  { %7114 = vmatpush3.bf16.msra.mxu1 %v10090_v56 }
0x261c   :  { %v5327_v2 = vpop.f32.mrb[32].mxu1 }
0x261d   :  { %v5334_v62 = vrot.slane %v5327_v2, 3  ;;  %v7101_v59 = vpop.f32.mrb[33].mxu1  ;;  %v5335_v30 = vrot.slane %v5327_v2, 4  ;;  %v5336_v15 = vrot.slane %v5327_v2, 5  ;;  %v5337_v21 = vrot.slane %v5327_v2, 6 }
0x261e   :  { %v5330_v19 = vpop.f32.mrb[34].mxu1  ;;  %v5338_v28 = vrot.slane %v5327_v2, 7  ;;  %v5339_v36 = vrot.slane %v5327_v2, 1  ;;  %v5340_v26 = vrot.slane %v5327_v2, 2  ;;  %v5354_v18 = vadd.f32 %v5327_v2, %v8487_v51 }
0x261f   :  { %v5349_v10 = vadd.f32 %v5334_v62, %v8447_v29  ;;  %v7102_v14 = vpop.f32.mrb[35].mxu1  ;;  %v5350_v39 = vadd.f32 %v5335_v30, %v8441_v25  ;;  %v5351_v33 = vadd.f32 %v5336_v15, %v8470_v41  ;;  %v5352_v45 = vadd.f32 %v5337_v21, %v8464_v38 }
0x2620   :  { %v5353_v37 = vadd.f32 %v5338_v28, %v8492_v55  ;;  %v5355_v43 = vadd.f32 %v5339_v36, %v8510_v8  ;;  %v5356_v63 = vadd.f32 %v5340_v26, %v8505_v3 }
0x2621   :  { %7974 = vtanh.f32 %v5349_v10  ;;  %v6735_v15 = vmul.f32 -1.442695, %v5349_v10  ;;  %v6736_v21 = vmul.f32 -1.442695, %v5350_v39  ;;  %v6737_v28 = vmul.f32 -1.442695, %v5351_v33 }
0x2622   :  { %7976 = vtanh.f32 %v5350_v39  ;;  %v6738_v36 = vmul.f32 -1.442695, %v5352_v45  ;;  %v6739_v26 = vmul.f32 -1.442695, %v5353_v37 }
0x2623   :  { %7978 = vtanh.f32 %v5351_v33 }
0x2624   :  { %7980 = vtanh.f32 %v5352_v45 }
0x2625   :  { %7982 = vtanh.f32 %v5353_v37 }
0x2626   :  { %7984 = vtanh.f32 %v5355_v43 }
0x2627   :  { %7986 = vtanh.f32 %v5354_v18 }
0x2628   :  { %7988 = vtanh.f32 %v5356_v63 }
0x2629   :  { %7990 = vpow2.f32 %v6735_v15 }
0x262a   :  { %7992 = vpow2.f32 %v6736_v21 }
0x262b   :  { %v7975_v56 = vpop.eup %7974  ;;  %7994 = vpow2.f32 %v6737_v28 }
0x262c   :  { %5453 = vrot.lane.b32.xlu1 %v7975_v56, %s8294_s27  ;;  %v7977_v49 = vpop.eup %7976  ;;  %7996 = vpow2.f32 %v6738_v36 }
0x262d   :  { %v7979_v62 = vpop.eup %7978  ;;  %5455 = vrot.lane.b32.xlu0 %v7977_v49, %s8294_s27  ;;  %v6741_v49 = vmul.f32 -1.442695, %v5355_v43  ;;  %7998 = vpow2.f32 %v6739_v26 }
0x262e   :  { %v7981_v59 = vpop.eup %7980 }
0x262f   :  { %v7983_v19 = vpop.eup %7982  ;;  %8000 = vpow2.f32 %v6741_v49 }
0x2630   :  { %5457 = vrot.lane.b32.xlu1 %v7979_v62, %s8294_s27  ;;  %v7985_v14 = vpop.eup %7984 }
0x2631   :  { %5459 = vrot.lane.b32.xlu0 %v7981_v59, %s8294_s27  ;;  %v7987_v2 = vpop.eup %7986  ;;  %v6740_v59 = vmul.f32 -1.442695, %v5354_v18 }
0x2632   :  { %v7989_v30 = vpop.eup %7988 }
0x2633   :  { %v7991_v56 = vpop.eup %7990 }
0x2634   :  { %5461 = vrot.lane.b32.xlu1 %v7983_v19, %s8294_s27  ;;  %v5381_v62 = vadd.f32 1.0, %v7991_v56  ;;  %v6742_v19 = vmul.f32 -1.442695, %v5356_v63 }
0x2635   :  { %5465 = vrot.lane.b32.xlu0 %v7985_v14, %s8294_s27  ;;  %v7993_v14 = vpop.eup %7992 }
0x2636   :  { %8002 = vrcp.f32 %v5381_v62  ;;  %v5382_v10 = vadd.f32 1.0, %v7993_v14 }
0x2637   :  { %8004 = vpow2.f32 %v6740_v59 }
0x2638   :  { %5463 = vrot.lane.b32.xlu1 %v7987_v2, %s8294_s27  ;;  %v7995_v2 = vpop.eup %7994  ;;  %8006 = vpow2.f32 %v6742_v19 }
0x2639   :  { %5467 = vrot.lane.b32.xlu0 %v7989_v30, %s8294_s27  ;;  %v7997_v39 = vpop.eup %7996  ;;  %v5383_v33 = vadd.f32 1.0, %v7995_v2  ;;  %8008 = vrcp.f32 %v5382_v10 }
0x263a   :  { %v7999_v30 = vpop.eup %7998  ;;  %v5384_v15 = vadd.f32 1.0, %v7997_v39 }
0x263b   :  { %v8001_v45 = vpop.eup %8000  ;;  %8010 = vrcp.f32 %v5383_v33  ;;  %v5385_v21 = vadd.f32 1.0, %v7999_v30 }
0x263c   :  { %8012 = vrcp.f32 %v5384_v15  ;;  %v5387_v28 = vadd.f32 1.0, %v8001_v45 }
0x263d   :  { %8014 = vrcp.f32 %v5385_v21 }
0x263e   :  { %8016 = vrcp.f32 %v5387_v28 }
0x2640   :  { %v10394_v37 = vpop.eup %8002 }
0x2641   :  { %v8005_v18 = vpop.eup %8004 }
0x2642   :  { %v8007_v36 = vpop.eup %8006  ;;  %v5386_v56 = vadd.f32 1.0, %v8005_v18 }
0x2643   :  { %v5388_v26 = vadd.f32 1.0, %v8007_v36  ;;  %v10398_v49 = vpop.eup %8008 }
0x2644   :  { %8018 = vrcp.f32 %v5386_v56 }
0x2645   :  { %v10400_v59 = vpop.eup %8010  ;;  %8020 = vrcp.f32 %v5388_v26 }
0x2646   :  { %v10405_v10 = vpop.eup %8012 }
0x2647   :  { %v10408_v33 = vpop.eup %8014 }
0x269e   :  { %v5454_v43 = vpop.permute.xlu1 %5453 }
0x269f   :  { %v5477_v63 = vmul.f32 %v10394_v37, %v5454_v43  ;;  %v5456_v62 = vpop.permute.xlu0 %5455  ;;  %v10413_v43 = vpop.eup %8016 }
0x26a0   :  { %v5478_v19 = vmul.f32 %v10398_v49, %v5456_v62  ;;  %v10416_v18 = vpop.eup %8018 }
0x26a1   :  { %5493 = vrot.lane.b32.xlu1 %v5477_v63, %s8300_s3  ;;  %v10421_v56 = vpop.eup %8020 }
0x26a2   :  { %v5458_v14 = vpop.permute.xlu1 %5457  ;;  %5495 = vrot.lane.b32.xlu0 %v5478_v19, %s8300_s3  ;;  %v5421_v19 = vrot.slane %v10286_v44, 7 }
0x26a3   :  { %v5479_v2 = vmul.f32 %v10400_v59, %v5458_v14  ;;  %v5460_v39 = vpop.permute.xlu0 %5459 }
0x26a4   :  { %v5480_v30 = vmul.f32 %v10405_v10, %v5460_v39  ;;  %v5437_v14 = vmul.f32 %v10394_v37, %v5421_v19 }
0x26a5   :  { %5497 = vrot.lane.b32.xlu1 %v5479_v2, %s8300_s3 }
0x26a6   :  { %v5462_v45 = vpop.permute.xlu1 %5461  ;;  %5499 = vrot.lane.b32.xlu0 %v5480_v30, %s8300_s3  ;;  %v5422_v30 = vrot.slane %v10308_v5, 7 }
0x26a7   :  { %v5481_v15 = vmul.f32 %v10408_v33, %v5462_v45  ;;  %v5466_v21 = vpop.permute.xlu0 %5465  ;;  %v5423_v45 = vrot.slane %v10294_v58, 7 }
0x26a8   :  { %v5483_v63 = vmul.f32 %v10413_v43, %v5466_v21 }
0x26a9   :  { %5501 = vrot.lane.b32.xlu1 %v5481_v15, %s8300_s3  ;;  %v5438_v15 = vmul.f32 %v10398_v49, %v5422_v30 }
0x26aa   :  { %v5464_v28 = vpop.permute.xlu1 %5463  ;;  %5505 = vrot.lane.b32.xlu0 %v5483_v63, %s8300_s3  ;;  %v5439_v63 = vmul.f32 %v10400_v59, %v5423_v45 }
0x26ab   :  { %v5482_v36 = vmul.f32 %v10416_v18, %v5464_v28  ;;  %v5468_v26 = vpop.permute.xlu0 %5467  ;;  %v5424_v28 = vrot.slane %v10317_v34, 7 }
0x26ac   :  { %v5484_v62 = vmul.f32 %v10421_v56, %v5468_v26  ;;  %v5425_v26 = vrot.slane %v10297_v22, 7  ;;  %v5426_v22 = vrot.slane %v10305_v61, 7 }
0x26ad   :  { %5503 = vrot.lane.b32.xlu1 %v5482_v36, %s8300_s3  ;;  %v5440_v5 = vmul.f32 %v10405_v10, %v5424_v28 }
0x26ae   :  { %5507 = vrot.lane.b32.xlu0 %v5484_v62, %s8300_s3 }
0x2713   :  { %v5494_v2 = vpop.permute.xlu1 %5493 }
0x2714   :  { %v10428_v39 = vadd.f32 %v5494_v2, %v5437_v14  ;;  %v5496_v21 = vpop.permute.xlu0 %5495  ;;  %v5441_v14 = vmul.f32 %v10408_v33, %v5425_v26  ;;  %v5427_v2 = vrot.slane %v10314_v48, 7  ;;  %v5428_v48 = vrot.slane %v10323_v32, 7 }
0x2715   :  { %v10436_v36 = vadd.f32 %v5496_v21, %v5438_v15 }
0x2716   :  { %8022 = vtanh.f32 %v10428_v39  ;;  %v5443_v15 = vmul.f32 %v10413_v43, %v5427_v2  ;;  %v5444_v61 = vmul.f32 %v10421_v56, %v5428_v48 }
0x2717   :  { %v5498_v44 = vpop.permute.xlu1 %5497  ;;  %8024 = vtanh.f32 %v10436_v36 }
0x2718   :  { %v10439_v62 = vadd.f32 %v5498_v44, %v5439_v63  ;;  %v5500_v58 = vpop.permute.xlu0 %5499  ;;  %v5442_v63 = vmul.f32 %v10416_v18, %v5426_v22 }
0x2719   :  { %v10446_v34 = vadd.f32 %v5500_v58, %v5440_v5 }
0x271a   :  { %8026 = vtanh.f32 %v10439_v62 }
0x271b   :  { %v5502_v30 = vpop.permute.xlu1 %5501  ;;  %8028 = vtanh.f32 %v10446_v34 }
0x271c   :  { %v10450_v45 = vadd.f32 %v5502_v30, %v5441_v14  ;;  %v5506_v21 = vpop.permute.xlu0 %5505 }
0x271d   :  { %v10457_v28 = vadd.f32 %v5506_v21, %v5443_v15 }
0x271e   :  { %8030 = vtanh.f32 %v10450_v45 }
0x271f   :  { %v5504_v44 = vpop.permute.xlu1 %5503  ;;  %8032 = vtanh.f32 %v10457_v28 }
0x2720   :  { %v8023_v19 = vpop.eup %8022  ;;  %v10459_v26 = vadd.f32 %v5504_v44, %v5442_v63  ;;  %v5508_v5 = vpop.permute.xlu0 %5507 }
0x2721   :  { %5541 = vrot.lane.b32.xlu1 %v8023_v19, %s8294_s27  ;;  %v8025_v19 = vpop.eup %8024  ;;  %v10464_v58 = vadd.f32 %v5508_v5, %v5444_v61 }
0x2722   :  { %8034 = vtanh.f32 %v10459_v26  ;;  %5543 = vrot.lane.b32.xlu0 %v8025_v19, %s8294_s27 }
0x2723   :  { %8036 = vtanh.f32 %v10464_v58 }
0x2724   :  { %v8027_v14 = vpop.eup %8026 }
0x2725   :  { %5545 = vrot.lane.b32.xlu1 %v8027_v14, %s8294_s27  ;;  %v8029_v32 = vpop.eup %8028 }
0x2726   :  { %5547 = vrot.lane.b32.xlu0 %v8029_v32, %s8294_s27 }
0x2728   :  { %v8031_v2 = vpop.eup %8030 }
0x2729   :  { %5549 = vrot.lane.b32.xlu1 %v8031_v2, %s8294_s27  ;;  %v8033_v30 = vpop.eup %8032 }
0x272a   :  { %5553 = vrot.lane.b32.xlu0 %v8033_v30, %s8294_s27 }
0x272c   :  { %v8035_v22 = vpop.eup %8034 }
0x272d   :  { %5551 = vrot.lane.b32.xlu1 %v8035_v22, %s8294_s27  ;;  %v8037_v15 = vpop.eup %8036 }
0x272e   :  { %5555 = vrot.lane.b32.xlu0 %v8037_v15, %s8294_s27 }
0x2793   :  { %v5542_v21 = vpop.permute.xlu1 %5541 }
0x2794   :  { %v5565_v63 = vmul.f32 %v10394_v37, %v5542_v21  ;;  %v5544_v44 = vpop.permute.xlu0 %5543 }
0x2795   :  { %v5566_v61 = vmul.f32 %v10398_v49, %v5544_v44 }
0x2796   :  { %v10475_v48 = vpack.c.bf16 %v5565_v63, %v5565_v63 }
0x2797   :  { %v5546_v19 = vpop.permute.xlu1 %5545  ;;  %v10480_v32 = vpack.c.bf16 %v5566_v61, %v5566_v61 }
0x2798   :  { %11489 = vst [vmem:[#allocation95_spill] sm:$0xff] %v10475_v48  ;;  %v5589_v5 = vunpack.c.l.b16 %v10475_v48  ;;  %v5567_v14 = vmul.f32 %v10400_v59, %v5546_v19  ;;  %v5548_v2 = vpop.permute.xlu0 %5547 }
0x2799   :  { %11490 = vst [vmem:[#allocation96_spill] sm:$0xff] %v10480_v32  ;;  %v5590_v22 = vunpack.c.l.b16 %v10480_v32  ;;  %v5568_v37 = vmul.f32 %v10405_v10, %v5548_v2 }
0x279a   :  { %v10482_v30 = vpack.c.bf16 %v5567_v14, %v5567_v14  ;;  %v5653_v15 = vrot.slane %v5589_v5, 5 }
0x279b   :  { %v5550_v21 = vpop.permute.xlu1 %5549  ;;  %v5654_v44 = vrot.slane %v5590_v22, 4  ;;  %v10488_v48 = vpack.c.bf16 %v5568_v37, %v5568_v37 }
0x279c   :  { %11491 = vst [vmem:[#allocation97_spill] sm:$0xff] %v10482_v30  ;;  %v5591_v63 = vunpack.c.l.b16 %v10482_v30  ;;  %v5569_v49 = vmul.f32 %v10408_v33, %v5550_v21  ;;  %v5554_v59 = vpop.permute.xlu0 %5553 }
0x279d   :  { %v5655_v19 = vsel %vm690_vm2, %v5654_v44, %v5653_v15  ;;  %v5592_v14 = vunpack.c.l.b16 %v10488_v48  ;;  %v5571_v5 = vmul.f32 %v10413_v43, %v5554_v59 }
0x279e   :  { %v5656_v46 = vrot.slane %v5591_v63, 3  ;;  %v10490_v61 = vpack.c.bf16 %v5569_v49, %v5569_v49 }
0x279f   :  { %v5552_v32 = vpop.permute.xlu1 %5551  ;;  %v5658_v22 = vrot.slane %v5592_v14, 2  ;;  %v10498_v37 = vpack.c.bf16 %v5571_v5, %v5571_v5 }
0x27a0   :  { %11492 = vst [vmem:[#allocation98_spill] sm:$0xff] %v10490_v61  ;;  %v5657_v10 = vsel %vm693_vm3, %v5656_v46, %v5655_v19  ;;  %v5593_v2 = vunpack.c.l.b16 %v10490_v61  ;;  %v5570_v33 = vmul.f32 %v10416_v18, %v5552_v32  ;;  %v5556_v63 = vpop.permute.xlu0 %5555 }
0x27a1   :  { %11493 = vst [vmem:[#allocation99_spill] sm:$0xff] %v10498_v37  ;;  %v5595_v15 = vunpack.c.l.b16 %v10498_v37  ;;  %v5659_v44 = vsel %vm696_vm4, %v5658_v22, %v5657_v10  ;;  %v5572_v43 = vmul.f32 %v10421_v56, %v5556_v63 }
0x27a2   :  { %v5660_v21 = vrot.slane %v5593_v2, 1  ;;  %v10500_v49 = vpack.c.bf16 %v5570_v33, %v5570_v33 }
0x27a3   :  { %v10507_v19 = vpack.c.bf16 %v5572_v43, %v5572_v43  ;;  %v5663_v18 = vrot.slane %v5595_v15, 7 }
0x27a4   :  { %v5661_v59 = vsel %vm699_vm5, %v5660_v21, %v5659_v44  ;;  %v5594_v46 = vunpack.c.l.b16 %v10500_v49 }
0x27a5   :  { %11494 = vst [vmem:[#allocation100_spill] sm:$0xff] %v10507_v19  ;;  %v5596_v14 = vunpack.c.l.b16 %v10507_v19 }
0x27a6   :  { %v5662_v32 = vsel %vm702_vm6, %v5594_v46, %v5661_v59 }
0x27a7   :  { %v5664_v5 = vsel %vm705_vm7, %v5663_v18, %v5662_v32  ;;  %v5665_v2 = vrot.slane %v5596_v14, 6 }
0x27a9   :  { %v5666_v33 = vsel %vm708_vm8, %v5665_v2, %v5664_v5 }
0x27aa   :  { %v5667_v37 = vpack.c.b16 %v5666_v33, %v5666_v33 }
0x27ac   :  { %5668 = vrot.lane.b32.xlu1 %v5667_v37, %s8300_s3 }
0x281e   :  { %v5669_v56 = vpop.permute.xlu1 %5668 }
0x281f   :  { %7108 = vmatmul.mubr.msk.bf16.vlgmr.msra.gmra.mrb[36].mxu0 %vm76_vm0, %v5669_v56 }
0x28f2   :  { %v5707_v10 = vpop.f32.mrb[36].mxu0 }
0x28f3   :  { %v5714_v22 = vrot.slane %v5707_v10, 2  ;;  %v7109_v21 = vpop.f32.mrb[37].mxu0  ;;  %v5715_v43 = vrot.slane %v5707_v10, 3  ;;  %v5716_v59 = vrot.slane %v5707_v10, 4  ;;  %v5717_v46 = vrot.slane %v5707_v10, 5 }
0x28f4   :  { %v5710_v63 = vpop.f32.mrb[38].mxu0  ;;  %v5718_v32 = vrot.slane %v5707_v10, 6  ;;  %v5719_v37 = vrot.slane %v5707_v10, 7  ;;  %v5720_v33 = vrot.slane %v5707_v10, 1 }
0x28f5   :  { %v5729_v15 = vadd.f32 %v5714_v22, %v8447_v29  ;;  %v7110_v44 = vpop.f32.mrb[39].mxu0  ;;  %v5730_v18 = vadd.f32 %v5715_v43, %v8441_v25  ;;  %v5731_v14 = vadd.f32 %v5716_v59, %v8470_v41  ;;  %v5732_v5 = vadd.f32 %v5717_v46, %v8464_v38 }
0x28f6   :  { %v5733_v56 = vadd.f32 %v5718_v32, %v8492_v55  ;;  %v5734_v22 = vadd.f32 %v5719_v37, %v8487_v51  ;;  %v5736_v21 = vadd.f32 %v5720_v33, %v8505_v3  ;;  %v5735_v63 = vadd.f32 %v5707_v10, %v8510_v8 }
0x28f7   :  { %8038 = vtanh.f32 %v5729_v15  ;;  %v6753_v33 = vmul.f32 -1.442695, %v5730_v18 }
0x28f8   :  { %8040 = vtanh.f32 %v5730_v18  ;;  %v6757_v19 = vmul.f32 -1.442695, %v5734_v22  ;;  %v6759_v30 = vmul.f32 -1.442695, %v5736_v21 }
0x28f9   :  { %8042 = vtanh.f32 %v5731_v14 }
0x28fa   :  { %8044 = vtanh.f32 %v5732_v5 }
0x28fb   :  { %8046 = vtanh.f32 %v5733_v56 }
0x28fc   :  { %8048 = vtanh.f32 %v5734_v22 }
0x28fd   :  { %8050 = vtanh.f32 %v5736_v21 }
0x28fe   :  { %8052 = vtanh.f32 %v5735_v63 }
0x2901   :  { %v8039_v2 = vpop.eup %8038 }
0x2902   :  { %5833 = vrot.lane.b32.xlu0 %v8039_v2, %s8294_s27  ;;  %v8041_v44 = vpop.eup %8040  ;;  %v6752_v2 = vmul.f32 -1.442695, %v5729_v15 }
0x2903   :  { %v8043_v43 = vpop.eup %8042  ;;  %5835 = vrot.lane.b32.xlu1 %v8041_v44, %s8294_s27  ;;  %v6754_v44 = vmul.f32 -1.442695, %v5731_v14 }
0x2904   :  { %v8045_v59 = vpop.eup %8044  ;;  %8054 = vpow2.f32 %v6752_v2 }
0x2905   :  { %v8047_v46 = vpop.eup %8046  ;;  %8056 = vpow2.f32 %v6753_v33 }
0x2906   :  { %5837 = vrot.lane.b32.xlu0 %v8043_v43, %s8294_s27  ;;  %v8049_v32 = vpop.eup %8048  ;;  %v6755_v43 = vmul.f32 -1.442695, %v5732_v5  ;;  %8058 = vpow2.f32 %v6754_v44 }
0x2907   :  { %5839 = vrot.lane.b32.xlu1 %v8045_v59, %s8294_s27  ;;  %v8051_v37 = vpop.eup %8050  ;;  %v6756_v59 = vmul.f32 -1.442695, %v5733_v56 }
0x2908   :  { %v8053_v10 = vpop.eup %8052  ;;  %8060 = vpow2.f32 %v6755_v43 }
0x2909   :  { %8062 = vpow2.f32 %v6756_v59 }
0x290a   :  { %5841 = vrot.lane.b32.xlu0 %v8047_v46, %s8294_s27  ;;  %8064 = vpow2.f32 %v6757_v19 }
0x290b   :  { %5843 = vrot.lane.b32.xlu1 %v8049_v32, %s8294_s27  ;;  %v6758_v32 = vmul.f32 -1.442695, %v5735_v63 }
0x290e   :  { %5847 = vrot.lane.b32.xlu0 %v8051_v37, %s8294_s27  ;;  %v8055_v61 = vpop.eup %8054 }
0x290f   :  { %5845 = vrot.lane.b32.xlu1 %v8053_v10, %s8294_s27  ;;  %v5761_v46 = vadd.f32 1.0, %v8055_v61  ;;  %v8057_v37 = vpop.eup %8056 }
0x2910   :  { %v8059_v10 = vpop.eup %8058  ;;  %v5762_v15 = vadd.f32 1.0, %v8057_v37 }
0x2911   :  { %8066 = vrcp.f32 %v5761_v46  ;;  %v5763_v14 = vadd.f32 1.0, %v8059_v10 }
0x2912   :  { %8068 = vpow2.f32 %v6759_v30  ;;  %v8061_v18 = vpop.eup %8060 }
0x2913   :  { %8070 = vpow2.f32 %v6758_v32  ;;  %v8063_v2 = vpop.eup %8062  ;;  %v5764_v33 = vadd.f32 1.0, %v8061_v18 }
0x2914   :  { %v8065_v5 = vpop.eup %8064  ;;  %8072 = vrcp.f32 %v5762_v15  ;;  %v5765_v61 = vadd.f32 1.0, %v8063_v2 }
0x2915   :  { %8074 = vrcp.f32 %v5763_v14  ;;  %v5766_v30 = vadd.f32 1.0, %v8065_v5 }
0x2916   :  { %8076 = vrcp.f32 %v5764_v33 }
0x2917   :  { %8078 = vrcp.f32 %v5765_v61 }
0x2918   :  { %8080 = vrcp.f32 %v5766_v30 }
0x291b   :  { %v10531_v56 = vpop.eup %8066 }
0x291c   :  { %v8069_v21 = vpop.eup %8068 }
0x291d   :  { %v8071_v63 = vpop.eup %8070  ;;  %v5768_v44 = vadd.f32 1.0, %v8069_v21 }
0x291e   :  { %v5767_v43 = vadd.f32 1.0, %v8071_v63  ;;  %v10535_v59 = vpop.eup %8072 }
0x291f   :  { %8082 = vrcp.f32 %v5768_v44  ;;  %v10537_v32 = vpop.eup %8074 }
0x2920   :  { %8084 = vrcp.f32 %v5767_v43  ;;  %v10542_v18 = vpop.eup %8076 }
0x2921   :  { %v10545_v2 = vpop.eup %8078 }
0x2922   :  { %v10550_v61 = vpop.eup %8080 }
0x2974   :  { %v5834_v22 = vpop.permute.xlu0 %5833 }
0x2975   :  { %v5857_v19 = vmul.f32 %v10531_v56, %v5834_v22  ;;  %v5836_v46 = vpop.permute.xlu1 %5835 }
0x2976   :  { %v5858_v37 = vmul.f32 %v10535_v59, %v5836_v46 }
0x2977   :  { %5873 = vrot.lane.b32.xlu0 %v5857_v19, %s8300_s3  ;;  %v10553_v19 = vpop.eup %8082 }
0x2978   :  { %v5838_v10 = vpop.permute.xlu0 %5837  ;;  %5875 = vrot.lane.b32.xlu1 %v5858_v37, %s8300_s3  ;;  %v10558_v43 = vpop.eup %8084 }
0x2979   :  { %v5859_v15 = vmul.f32 %v10537_v32, %v5838_v10  ;;  %v5840_v14 = vpop.permute.xlu1 %5839  ;;  %v5801_v10 = vrot.slane %v10428_v39, 7 }
0x297a   :  { %v5860_v5 = vmul.f32 %v10542_v18, %v5840_v14 }
0x297b   :  { %5877 = vrot.lane.b32.xlu0 %v5859_v15, %s8300_s3  ;;  %v5817_v15 = vmul.f32 %v10531_v56, %v5801_v10 }
0x297c   :  { %v5842_v33 = vpop.permute.xlu0 %5841  ;;  %5879 = vrot.lane.b32.xlu1 %v5860_v5, %s8300_s3 }
0x297d   :  { %v5861_v22 = vmul.f32 %v10545_v2, %v5842_v33  ;;  %v5844_v21 = vpop.permute.xlu1 %5843  ;;  %v5802_v33 = vrot.slane %v10436_v36, 7 }
0x297e   :  { %v5862_v30 = vmul.f32 %v10550_v61, %v5844_v21 }
0x297f   :  { %5881 = vrot.lane.b32.xlu0 %v5861_v22, %s8300_s3  ;;  %v5803_v22 = vrot.slane %v10439_v62, 7  ;;  %v5818_v21 = vmul.f32 %v10535_v59, %v5802_v33  ;;  %v5806_v33 = vrot.slane %v10459_v26, 7  ;;  %v5807_v26 = vrot.slane %v10457_v28, 7 }
0x2980   :  { %v5848_v63 = vpop.permute.xlu0 %5847  ;;  %5883 = vrot.lane.b32.xlu1 %v5862_v30, %s8300_s3 }
0x2981   :  { %v5864_v44 = vmul.f32 %v10553_v19, %v5848_v63  ;;  %v5846_v46 = vpop.permute.xlu1 %5845  ;;  %v5819_v63 = vmul.f32 %v10537_v32, %v5803_v22 }
0x2982   :  { %v5863_v37 = vmul.f32 %v10558_v43, %v5846_v46 }
0x2983   :  { %5887 = vrot.lane.b32.xlu0 %v5864_v44, %s8300_s3  ;;  %v5804_v44 = vrot.slane %v10446_v34, 7 }
0x2984   :  { %5885 = vrot.lane.b32.xlu1 %v5863_v37, %s8300_s3  ;;  %v5805_v37 = vrot.slane %v10450_v45, 7  ;;  %v5808_v45 = vrot.slane %v10464_v58, 7  ;;  %v5823_v58 = vmul.f32 %v10558_v43, %v5807_v26 }
0x2985   :  { %v5820_v36 = vmul.f32 %v10542_v18, %v5804_v44 }
0x2986   :  { %v5824_v44 = vmul.f32 %v10553_v19, %v5808_v45 }
0x29e9   :  { %v5874_v14 = vpop.permute.xlu0 %5873 }
0x29ea   :  { %v10565_v5 = vadd.f32 %v5874_v14, %v5817_v15  ;;  %v5876_v30 = vpop.permute.xlu1 %5875  ;;  %v5821_v14 = vmul.f32 %v10545_v2, %v5805_v37 }
0x29eb   :  { %v10573_v46 = vadd.f32 %v5876_v30, %v5818_v21  ;;  %v5822_v30 = vmul.f32 %v10550_v61, %v5806_v33 }
0x29ec   :  { %8086 = vtanh.f32 %v10565_v5 }
0x29ed   :  { %v5878_v39 = vpop.permute.xlu0 %5877  ;;  %8088 = vtanh.f32 %v10573_v46 }
0x29ee   :  { %v10576_v10 = vadd.f32 %v5878_v39, %v5819_v63  ;;  %v5880_v62 = vpop.permute.xlu1 %5879 }
0x29ef   :  { %v10583_v34 = vadd.f32 %v5880_v62, %v5820_v36 }
0x29f0   :  { %8090 = vtanh.f32 %v10576_v10 }
0x29f1   :  { %v5882_v22 = vpop.permute.xlu0 %5881  ;;  %8092 = vtanh.f32 %v10583_v34 }
0x29f2   :  { %v10587_v21 = vadd.f32 %v5882_v22, %v5821_v14  ;;  %v5884_v63 = vpop.permute.xlu1 %5883 }
0x29f3   :  { %v10594_v39 = vadd.f32 %v5884_v63, %v5822_v30 }
0x29f4   :  { %8094 = vtanh.f32 %v10587_v21 }
0x29f5   :  { %v5888_v37 = vpop.permute.xlu0 %5887  ;;  %8096 = vtanh.f32 %v10594_v39 }
0x29f6   :  { %v8087_v15 = vpop.eup %8086  ;;  %v10596_v36 = vadd.f32 %v5888_v37, %v5824_v44 }
0x29f7   :  { %5921 = vrot.lane.b32.xlu0 %v8087_v15, %s8294_s27  ;;  %v5886_v15 = vpop.permute.xlu1 %5885  ;;  %v8089_v62 = vpop.eup %8088 }
0x29f8   :  { %8098 = vtanh.f32 %v10596_v36  ;;  %v10601_v14 = vadd.f32 %v5886_v15, %v5823_v58  ;;  %5923 = vrot.lane.b32.xlu1 %v8089_v62, %s8294_s27 }
0x29fa   :  { %v8091_v33 = vpop.eup %8090  ;;  %8100 = vtanh.f32 %v10601_v14 }
0x29fb   :  { %5925 = vrot.lane.b32.xlu0 %v8091_v33, %s8294_s27  ;;  %v8093_v28 = vpop.eup %8092 }
0x29fc   :  { %5927 = vrot.lane.b32.xlu1 %v8093_v28, %s8294_s27 }
0x29fe   :  { %v8095_v22 = vpop.eup %8094 }
0x29ff   :  { %5929 = vrot.lane.b32.xlu0 %v8095_v22, %s8294_s27  ;;  %v8097_v45 = vpop.eup %8096 }
0x2a00   :  { %5931 = vrot.lane.b32.xlu1 %v8097_v45, %s8294_s27 }
0x2a02   :  { %v8099_v30 = vpop.eup %8098 }
0x2a03   :  { %5935 = vrot.lane.b32.xlu0 %v8099_v30, %s8294_s27 }
0x2a04   :  { %v8101_v63 = vpop.eup %8100 }
0x2a05   :  { %5933 = vrot.lane.b32.xlu1 %v8101_v63, %s8294_s27 }
0x2a09   :  { %638 = vrot.lane.b32.xlu1 %v8609_v53, %s8300_s3  ;;  %v11496_v53 = vld [vmem:[#allocation35_spill] sm:$0xff] }
0x2a0d   :  { %642 = vrot.lane.b32.xlu1 %v8606_v40, %s8300_s3  ;;  %v11495_v40 = vld [vmem:[#allocation32_spill] sm:$0xff] }
0x2a11   :  { %646 = vrot.lane.b32.xlu1 %v8618_v6, %s8300_s3  ;;  %v11497_v6 = vld [vmem:[#allocation34_spill] sm:$0xff] }
0x2a15   :  { %650 = vrot.lane.b32.xlu1 %v8631_v35, %s8300_s3  ;;  %v11498_v35 = vld [vmem:[#allocation40_spill] sm:$0xff] }
0x2a19   :  { %1028 = vrot.lane.b32.xlu1 %v8751_v12, %s8300_s3  ;;  %v11500_v12 = vld [vmem:[#allocation42_spill] sm:$0xff] }
0x2a1d   :  { %1032 = vrot.lane.b32.xlu1 %v8746_v1, %s8300_s3  ;;  %v11499_v1 = vld [vmem:[#allocation38_spill] sm:$0xff] }
0x2a21   :  { %1036 = vrot.lane.b32.xlu1 %v8761_v20, %s8300_s3  ;;  %v11501_v20 = vld [vmem:[#allocation44_spill] sm:$0xff] }
0x2a25   :  { %1040 = vrot.lane.b32.xlu1 %v8772_v9, %s8300_s3  ;;  %v11502_v9 = vld [vmem:[#allocation46_spill] sm:$0xff] }
0x2a29   :  { %1410 = vrot.lane.b32.xlu1 %v8892_v31, %s8300_s3 }
0x2a2d   :  { %1414 = vrot.lane.b32.xlu1 %v8904_v4, %s8300_s3 }
0x2a31   :  { %1418 = vrot.lane.b32.xlu1 %v8908_v52, %s8300_s3  ;;  %v11503_v52 = vld [vmem:[#allocation47_spill] sm:$0xff] }
0x2a35   :  { %1422 = vrot.lane.b32.xlu1 %v8921_v27, %s8300_s3 }
0x2a39   :  { %1793 = vrot.lane.b32.xlu1 %v9038_v13, %s8300_s3  ;;  %v11504_v13 = vld [vmem:[#allocation50_spill] sm:$0xff] }
0x2a3d   :  { %1797 = vrot.lane.b32.xlu1 %v9047_v54, %s8300_s3 }
0x2a41   :  { %1801 = vrot.lane.b32.xlu1 %v9043_v23, %s8300_s3 }
0x2a45   :  { %1805 = vrot.lane.b32.xlu1 %v11495_v40, %s8300_s3 }
0x2a49   :  { %2175 = vrot.lane.b32.xlu1 %v11496_v53, %s8300_s3 }
0x2a4d   :  { %2179 = vrot.lane.b32.xlu1 %v11497_v6, %s8300_s3 }
0x2a51   :  { %2183 = vrot.lane.b32.xlu1 %v11498_v35, %s8300_s3 }
0x2a55   :  { %2187 = vrot.lane.b32.xlu1 %v11499_v1, %s8300_s3 }
0x2a59   :  { %2558 = vrot.lane.b32.xlu1 %v11500_v12, %s8300_s3 }
0x2a5d   :  { %2562 = vrot.lane.b32.xlu1 %v11501_v20, %s8300_s3 }
0x2a61   :  { %2566 = vrot.lane.b32.xlu1 %v11502_v9, %s8300_s3 }
0x2a65   :  { %2570 = vrot.lane.b32.xlu1 %v11503_v52, %s8300_s3 }
0x2a69   :  { %v5922_v4 = vpop.permute.xlu0 %5921  ;;  %2940 = vrot.lane.b32.xlu1 %v11504_v13, %s8300_s3 }
0x2a6a   :  { %v5945_v31 = vmul.f32 %v10531_v56, %v5922_v4  ;;  %v5924_v23 = vpop.permute.xlu1 %5923 }
0x2a6b   :  { %v5946_v54 = vmul.f32 %v10535_v59, %v5924_v23 }
0x2a6c   :  { %v10660_v27 = vpack.c.bf16 %v5945_v31, %v5945_v31 }
0x2a6d   :  { %v5926_v26 = vpop.permute.xlu0 %5925  ;;  %v10667_v58 = vpack.c.bf16 %v5946_v54, %v5946_v54 }
0x2a6e   :  { %v5969_v44 = vunpack.c.l.b16 %v10660_v27  ;;  %v5947_v37 = vmul.f32 %v10537_v32, %v5926_v26  ;;  %v5928_v15 = vpop.permute.xlu1 %5927 }
0x2a6f   :  { %v5970_v62 = vunpack.c.l.b16 %v10667_v58  ;;  %v5948_v28 = vmul.f32 %v10542_v18, %v5928_v15 }
0x2a70   :  { %v10669_v56 = vpack.c.bf16 %v5947_v37, %v5947_v37  ;;  %v6033_v33 = vrot.slane %v5969_v44, 6  ;;  %v665_v37 = vld [vmem:[#allocation12] sm:$0x1] }
0x2a71   :  { %v5930_v22 = vpop.permute.xlu0 %5929  ;;  %v6034_v30 = vrot.slane %v5970_v62, 5  ;;  %v10675_v63 = vpack.c.bf16 %v5948_v28, %v5948_v28 }
0x2a72   :  { %v5971_v45 = vunpack.c.l.b16 %v10669_v56  ;;  %v5949_v59 = vmul.f32 %v10545_v2, %v5930_v22  ;;  %v5932_v32 = vpop.permute.xlu1 %5931 }
0x2a73   :  { %v6035_v6 = vsel %vm690_vm2, %v6034_v30, %v6033_v33  ;;  %v5972_v35 = vunpack.c.l.b16 %v10675_v63  ;;  %v5950_v1 = vmul.f32 %v10550_v61, %v5932_v32 }
0x2a74   :  { %v6036_v40 = vrot.slane %v5971_v45, 4  ;;  %v10677_v53 = vpack.c.bf16 %v5949_v59, %v5949_v59  ;;  %v671_v59 = vld [vmem:[#allocation12 + $0x10] sm:$0x1] }
0x2a75   :  { %v5936_v12 = vpop.permute.xlu0 %5935  ;;  %v6038_v9 = vrot.slane %v5972_v35, 3  ;;  %v10685_v4 = vpack.c.bf16 %v5950_v1, %v5950_v1  ;;  %v677_v1 = vld [vmem:[#allocation12 + $0x20] sm:$0x1] }
0x2a76   :  { %v6037_v18 = vsel %vm693_vm3, %v6036_v40, %v6035_v6  ;;  %v5973_v20 = vunpack.c.l.b16 %v10677_v53  ;;  %v5952_v2 = vmul.f32 %v10553_v19, %v5936_v12  ;;  %v6182_v19 = vrot.slane %v10573_v46, 7 }
0x2a77   :  { %v5934_v52 = vpop.permute.xlu1 %5933  ;;  %v5974_v23 = vunpack.c.l.b16 %v10685_v4  ;;  %v6039_v61 = vsel %vm696_vm4, %v6038_v9, %v6037_v18 }
0x2a78   :  { %v6040_v31 = vrot.slane %v5973_v20, 2  ;;  %v10687_v13 = vpack.c.bf16 %v5952_v2, %v5952_v2  ;;  %v5951_v54 = vmul.f32 %v10558_v43, %v5934_v52  ;;  %v683_v20 = vld [vmem:[#allocation12 + $0x30] sm:$0x1]  ;;  %v11507_v2 = vld [vmem:[#allocation17_spill] sm:$0xff] }
0x2a79   :  { %v6042_v15 = vrot.slane %v5974_v23, 1  ;;  %v11510_v23 = vld [vmem:[#allocation18_spill] sm:$0xff] }
0x2a7a   :  { %v6041_v44 = vsel %vm699_vm5, %v6040_v31, %v6039_v61  ;;  %v5976_v26 = vunpack.c.l.b16 %v10687_v13  ;;  %v10699_v62 = vpack.c.bf16 %v5951_v54, %v5951_v54 }
0x2a7b   :  { %v639_v28 = vpop.permute.xlu1 %638  ;;  %v6043_v45 = vsel %vm702_vm6, %v6042_v15, %v6041_v44 }
0x2a7c   :  { %v6045_v33 = vrot.slane %v5976_v26, 7  ;;  %v5975_v22 = vunpack.c.l.b16 %v10699_v62  ;;  %v666_v43 = vsel %vm10695_vm11, %v639_v28, %v665_v37  ;;  %v11511_v26 = vld [vmem:[#allocation19_spill] sm:$0xff]  ;;  %v11512_v28 = vld [vmem:[#allocation20_spill] sm:$0xff] }
0x2a7d   :  { %667 = vst [vmem:[#allocation12] sm:$0x1] %v666_v43 }
0x2a7e   :  { %v6044_v30 = vsel %vm705_vm7, %v5975_v22, %v6043_v45 }
0x2a7f   :  { %v643_v40 = vpop.permute.xlu1 %642  ;;  %v6046_v32 = vsel %vm708_vm8, %v6045_v33, %v6044_v30  ;;  %vm1817_vm8 = vsmask.f32 7942 }
0x2a80   :  { %v672_v6 = vsel %vm10695_vm11, %v643_v40, %v671_v59  ;;  %v6047_v35 = vpack.c.b16 %v6046_v32, %v6046_v32  ;;  %v11513_v59 = vld [vmem:[#allocation21_spill] sm:$0xff]  ;;  %vm10759_vm9 = vmand %vm1434_vm14, %vm1817_vm8 }
0x2a81   :  { %673 = vst [vmem:[#allocation12 + $0x10] sm:$0x1] %v672_v6  ;;  %vm10780_vm14 = vmand %vm2199_vm10, %vm2200_vm12  ;;  %vm2965_vm12 = vsmask.f32 3328 }
0x2a82   :  { %6048 = vrot.lane.b32.xlu0 %v6047_v35, %s8300_s3  ;;  %v1437_v35 = vld [vmem:[#allocation12] sm:$0x2]  ;;  %vm10801_vm8 = vmand %vm2199_vm10, %vm2582_vm15  ;;  %vm2964_vm10 = vcmask 257027  }
0x2a83   :  { %v647_v12 = vpop.permute.xlu1 %646  ;;  %vm10822_vm15 = vmand %vm2964_vm10, %vm2965_vm12 }
0x2a84   :  { %v678_v18 = vsel %vm10695_vm11, %v647_v12, %v677_v1  ;;  %v1054_v61 = vld [vmem:[#allocation12] sm:$0x1]  ;;  %v11516_v1 = vld [vmem:[#allocation22_spill] sm:$0xff] }
0x2a85   :  { %679 = vst [vmem:[#allocation12 + $0x20] sm:$0x1] %v678_v18 }
0x2a86   :  { %640 = vrot.lane.b32.xlu0 %v11507_v2, %s8300_s3  ;;  %v11517_v2 = vld [vmem:[#allocation23_spill] sm:$0xff] }
0x2a87   :  { %v651_v9 = vpop.permute.xlu1 %650 }
0x2a88   :  { %v684_v31 = vsel %vm10695_vm11, %v651_v9, %v683_v20  ;;  %v1060_v37 = vld [vmem:[#allocation12 + $0x10] sm:$0x1]  ;;  %v1443_v20 = vld [vmem:[#allocation12 + $0x10] sm:$0x2] }
0x2a89   :  { %685 = vst [vmem:[#allocation12 + $0x30] sm:$0x1] %v684_v31 }
0x2a8a   :  { %644 = vrot.lane.b32.xlu0 %v11510_v23, %s8300_s3  ;;  %v1449_v23 = vld [vmem:[#allocation12 + $0x20] sm:$0x2] }
0x2a8b   :  { %v1029_v54 = vpop.permute.xlu1 %1028 }
0x2a8c   :  { %v1055_v44 = vsel %vm10717_vm13, %v1029_v54, %v1054_v61  ;;  %v1066_v22 = vld [vmem:[#allocation12 + $0x20] sm:$0x1]  ;;  %v11518_v61 = vld [vmem:[#allocation24_spill] sm:$0xff] }
0x2a8d   :  { %1056 = vst [vmem:[#allocation12] sm:$0x1] %v1055_v44 }
0x2a8e   :  { %648 = vrot.lane.b32.xlu0 %v11511_v26, %s8300_s3  ;;  %v1455_v26 = vld [vmem:[#allocation12 + $0x30] sm:$0x2] }
0x2a8f   :  { %v1033_v15 = vpop.permute.xlu1 %1032 }
0x2a90   :  { %v1061_v33 = vsel %vm10717_vm13, %v1033_v15, %v1060_v37  ;;  %v1072_v30 = vld [vmem:[#allocation12 + $0x30] sm:$0x1]  ;;  %v11519_v37 = vld [vmem:[#allocation25_spill] sm:$0xff] }
0x2a91   :  { %1062 = vst [vmem:[#allocation12 + $0x10] sm:$0x1] %v1061_v33 }
0x2a92   :  { %652 = vrot.lane.b32.xlu0 %v11512_v28, %s8300_s3  ;;  %v5258_v28 = vld [vmem:[#allocation12 + $0x1c] sm:$0x4] }
0x2a93   :  { %v1037_v45 = vpop.permute.xlu1 %1036 }
0x2a94   :  { %v1067_v43 = vsel %vm10717_vm13, %v1037_v45, %v1066_v22  ;;  %v11522_v22 = vld [vmem:[#allocation26_spill] sm:$0xff] }
0x2a95   :  { %1068 = vst [vmem:[#allocation12 + $0x20] sm:$0x1] %v1067_v43 }
0x2a96   :  { %1030 = vrot.lane.b32.xlu0 %v11513_v59, %s8300_s3 }
0x2a97   :  { %v1041_v40 = vpop.permute.xlu1 %1040 }
0x2a98   :  { %v1073_v32 = vsel %vm10717_vm13, %v1041_v40, %v1072_v30  ;;  %v11523_v30 = vld [vmem:[#allocation27_spill] sm:$0xff] }
0x2a99   :  { %1074 = vst [vmem:[#allocation12 + $0x30] sm:$0x1] %v1073_v32 }
0x2a9a   :  { %1034 = vrot.lane.b32.xlu0 %v11516_v1, %s8300_s3  ;;  %v11524_v1 = vld [vmem:[#allocation28_spill] sm:$0xff] }
0x2a9b   :  { %v1411_v12 = vpop.permute.xlu1 %1410 }
0x2a9c   :  { %v1438_v18 = vsel %vm10738_vm1, %v1411_v12, %v1437_v35 }
0x2a9d   :  { %1439 = vst [vmem:[#allocation12] sm:$0x2] %v1438_v18 }
0x2a9e   :  { %1038 = vrot.lane.b32.xlu0 %v11517_v2, %s8300_s3  ;;  %v11525_v2 = vld [vmem:[#allocation29_spill] sm:$0xff] }
0x2a9f   :  { %v1415_v9 = vpop.permute.xlu1 %1414 }
0x2aa0   :  { %v1444_v31 = vsel %vm10738_vm1, %v1415_v9, %v1443_v20 }
0x2aa1   :  { %1445 = vst [vmem:[#allocation12 + $0x10] sm:$0x2] %v1444_v31 }
0x2aa2   :  { %1042 = vrot.lane.b32.xlu0 %v11518_v61, %s8300_s3 }
0x2aa3   :  { %v1419_v54 = vpop.permute.xlu1 %1418 }
0x2aa4   :  { %v1450_v44 = vsel %vm10738_vm1, %v1419_v54, %v1449_v23  ;;  %v1819_v45 = vld [vmem:[#allocation12] sm:$0x2]  ;;  %v2202_v54 = vld [vmem:[#allocation12] sm:$0x4] }
0x2aa5   :  { %1451 = vst [vmem:[#allocation12 + $0x20] sm:$0x2] %v1450_v44  ;;  %v11528_v44 = vld [vmem:[#allocation30_spill] sm:$0xff] }
0x2aa6   :  { %1412 = vrot.lane.b32.xlu0 %v11519_v37, %s8300_s3 }
0x2aa7   :  { %v1423_v15 = vpop.permute.xlu1 %1422 }
0x2aa8   :  { %v1456_v33 = vsel %vm10738_vm1, %v1423_v15, %v1455_v26  ;;  %v1825_v40 = vld [vmem:[#allocation12 + $0x10] sm:$0x2]  ;;  %v2208_v15 = vld [vmem:[#allocation12 + $0x10] sm:$0x4] }
0x2aa9   :  { %1457 = vst [vmem:[#allocation12 + $0x30] sm:$0x2] %v1456_v33  ;;  %v11529_v33 = vld [vmem:[#allocation31_spill] sm:$0xff] }
0x2aaa   :  { %1416 = vrot.lane.b32.xlu0 %v11522_v22, %s8300_s3 }
0x2aab   :  { %v1794_v43 = vpop.permute.xlu1 %1793 }
0x2aac   :  { %v1820_v59 = vsel %vm10759_vm9, %v1794_v43, %v1819_v45  ;;  %v1831_v12 = vld [vmem:[#allocation12 + $0x20] sm:$0x2]  ;;  %v2214_v43 = vld [vmem:[#allocation12 + $0x20] sm:$0x4] }
0x2aad   :  { %1821 = vst [vmem:[#allocation12] sm:$0x2] %v1820_v59  ;;  %v11530_v59 = vld [vmem:[#allocation33_spill] sm:$0xff] }
0x2aae   :  { %1420 = vrot.lane.b32.xlu0 %v11523_v30, %s8300_s3 }
0x2aaf   :  { %v1798_v32 = vpop.permute.xlu1 %1797 }
0x2ab0   :  { %v1826_v35 = vsel %vm10759_vm9, %v1798_v32, %v1825_v40  ;;  %v1837_v9 = vld [vmem:[#allocation12 + $0x30] sm:$0x2]  ;;  %v2220_v32 = vld [vmem:[#allocation12 + $0x30] sm:$0x4] }
0x2ab1   :  { %1827 = vst [vmem:[#allocation12 + $0x10] sm:$0x2] %v1826_v35  ;;  %v11531_v35 = vld [vmem:[#allocation36_spill] sm:$0xff] }
0x2ab2   :  { %1424 = vrot.lane.b32.xlu0 %v11524_v1, %s8300_s3 }
0x2ab3   :  { %v1802_v18 = vpop.permute.xlu1 %1801 }
0x2ab4   :  { %v1832_v20 = vsel %vm10759_vm9, %v1802_v18, %v1831_v12 }
0x2ab5   :  { %1833 = vst [vmem:[#allocation12 + $0x20] sm:$0x2] %v1832_v20  ;;  %v11534_v20 = vld [vmem:[#allocation39_spill] sm:$0xff] }
0x2ab6   :  { %1795 = vrot.lane.b32.xlu0 %v11525_v2, %s8300_s3 }
0x2ab7   :  { %v1806_v31 = vpop.permute.xlu1 %1805 }
0x2ab8   :  { %v1838_v23 = vsel %vm10759_vm9, %v1806_v31, %v1837_v9 }
0x2ab9   :  { %1839 = vst [vmem:[#allocation12 + $0x30] sm:$0x2] %v1838_v23  ;;  %v11535_v23 = vld [vmem:[#allocation37_spill] sm:$0xff] }
0x2aba   :  { %1799 = vrot.lane.b32.xlu0 %v11528_v44, %s8300_s3 }
0x2abb   :  { %v2176_v26 = vpop.permute.xlu1 %2175 }
0x2abc   :  { %v2203_v37 = vsel %vm10780_vm14, %v2176_v26, %v2202_v54 }
0x2abd   :  { %2204 = vst [vmem:[#allocation12] sm:$0x4] %v2203_v37  ;;  %v11536_v37 = vld [vmem:[#allocation41_spill] sm:$0xff] }
0x2abe   :  { %1803 = vrot.lane.b32.xlu0 %v11529_v33, %s8300_s3 }
0x2abf   :  { %v2180_v22 = vpop.permute.xlu1 %2179 }
0x2ac0   :  { %v2209_v45 = vsel %vm10780_vm14, %v2180_v22, %v2208_v15 }
0x2ac1   :  { %2210 = vst [vmem:[#allocation12 + $0x10] sm:$0x4] %v2209_v45  ;;  %v11537_v45 = vld [vmem:[#allocation43_spill] sm:$0xff] }
0x2ac2   :  { %1807 = vrot.lane.b32.xlu0 %v11530_v59, %s8300_s3 }
0x2ac3   :  { %v2184_v30 = vpop.permute.xlu1 %2183 }
0x2ac4   :  { %v2215_v40 = vsel %vm10780_vm14, %v2184_v30, %v2214_v43  ;;  %v2584_v2 = vld [vmem:[#allocation12] sm:$0x4] }
0x2ac5   :  { %2216 = vst [vmem:[#allocation12 + $0x20] sm:$0x4] %v2215_v40 }
0x2ac6   :  { %2177 = vrot.lane.b32.xlu0 %v11531_v35, %s8300_s3  ;;  %v11540_v35 = vld [vmem:[#allocation45_spill] sm:$0xff] }
0x2ac7   :  { %v2188_v1 = vpop.permute.xlu1 %2187 }
0x2ac8   :  { %v2221_v12 = vsel %vm10780_vm14, %v2188_v1, %v2220_v32  ;;  %v2590_v54 = vld [vmem:[#allocation12 + $0x10] sm:$0x4]  ;;  %v2967_v32 = vld [vmem:[#allocation12] sm:$0x8] }
0x2ac9   :  { %2222 = vst [vmem:[#allocation12 + $0x30] sm:$0x4] %v2221_v12 }
0x2aca   :  { %2181 = vrot.lane.b32.xlu0 %v11534_v20, %s8300_s3  ;;  %v11541_v20 = vld [vmem:[#allocation48_spill] sm:$0xff] }
0x2acb   :  { %v2559_v9 = vpop.permute.xlu1 %2558 }
0x2acc   :  { %v2585_v31 = vsel %vm10801_vm8, %v2559_v9, %v2584_v2  ;;  %v2596_v15 = vld [vmem:[#allocation12 + $0x20] sm:$0x4]  ;;  %v11543_v9 = vld [vmem:[#allocation51_spill] sm:$0xff] }
0x2acd   :  { %2586 = vst [vmem:[#allocation12] sm:$0x4] %v2585_v31  ;;  %v11542_v2 = vld [vmem:[#allocation49_spill] sm:$0xff] }
0x2ace   :  { %2185 = vrot.lane.b32.xlu0 %v11535_v23, %s8300_s3  ;;  %v668_v23 = vld [vmem:[#allocation12 + $0x8] sm:$0x1] }
0x2acf   :  { %v2563_v44 = vpop.permute.xlu1 %2562 }
0x2ad0   :  { %v2591_v26 = vsel %vm10801_vm8, %v2563_v44, %v2590_v54  ;;  %v2602_v43 = vld [vmem:[#allocation12 + $0x30] sm:$0x4] }
0x2ad1   :  { %2592 = vst [vmem:[#allocation12 + $0x10] sm:$0x4] %v2591_v26  ;;  %v674_v26 = vld [vmem:[#allocation12 + $0x18] sm:$0x1] }
0x2ad2   :  { %2189 = vrot.lane.b32.xlu0 %v11536_v37, %s8300_s3 }
0x2ad3   :  { %v2567_v33 = vpop.permute.xlu1 %2566 }
0x2ad4   :  { %v2597_v22 = vsel %vm10801_vm8, %v2567_v33, %v2596_v15  ;;  %v680_v33 = vld [vmem:[#allocation12 + $0x28] sm:$0x1] }
0x2ad5   :  { %2598 = vst [vmem:[#allocation12 + $0x20] sm:$0x4] %v2597_v22 }
0x2ad6   :  { %2560 = vrot.lane.b32.xlu0 %v11537_v45, %s8300_s3 }
0x2ad7   :  { %v2571_v59 = vpop.permute.xlu1 %2570 }
0x2ad8   :  { %v2603_v30 = vsel %vm10801_vm8, %v2571_v59, %v2602_v43  ;;  %v686_v43 = vld [vmem:[#allocation12 + $0x38] sm:$0x1] }
0x2ad9   :  { %2604 = vst [vmem:[#allocation12 + $0x30] sm:$0x4] %v2603_v30 }
0x2ada   :  { %2564 = vrot.lane.b32.xlu0 %v11540_v35, %s8300_s3 }
0x2adb   :  { %v2941_v1 = vpop.permute.xlu1 %2940 }
0x2adc   :  { %v2968_v12 = vsel %vm10822_vm15, %v2941_v1, %v2967_v32 }
0x2add   :  { %2969 = vst [vmem:[#allocation12] sm:$0x8] %v2968_v12 }
0x2ade   :  { %2568 = vrot.lane.b32.xlu0 %v11541_v20, %s8300_s3 }
0x2ae2   :  { %2572 = vrot.lane.b32.xlu0 %v11542_v2, %s8300_s3 }
0x2ae6   :  { %2942 = vrot.lane.b32.xlu0 %v11543_v9, %s8300_s3 }
0x2af4   :  { %v6049_v31 = vpop.permute.xlu0 %6048 }
0x2af5   :  { %7116 = vmatmul.mubr.msk.bf16.vlgmr.msra.gmra.mrb[36].mxu1 %vm76_vm0, %v6049_v31  ;;  %vm3347_vm0 = vsmask.f32 7950 }
0x2af6   :  { %vm10998_vm12 = vmand %vm2964_vm10, %vm3347_vm0 }
0x2af8   :  { %v641_v54 = vpop.permute.xlu0 %640 }
0x2af9   :  { %v669_v44 = vsel %vm10695_vm11, %v641_v54, %v668_v23 }
0x2afa   :  { %670 = vst [vmem:[#allocation12 + $0x8] sm:$0x1] %v669_v44 }
0x2afc   :  { %v645_v37 = vpop.permute.xlu0 %644 }
0x2afd   :  { %v675_v15 = vsel %vm10695_vm11, %v645_v37, %v674_v26  ;;  %v1440_v37 = vld [vmem:[#allocation12 + $0x8] sm:$0x2] }
0x2afe   :  { %676 = vst [vmem:[#allocation12 + $0x18] sm:$0x1] %v675_v15 }
0x2b00   :  { %v649_v22 = vpop.permute.xlu0 %648 }
0x2b01   :  { %v681_v45 = vsel %vm10695_vm11, %v649_v22, %v680_v33  ;;  %v1057_v32 = vld [vmem:[#allocation12 + $0x8] sm:$0x1]  ;;  %v1446_v22 = vld [vmem:[#allocation12 + $0x18] sm:$0x2] }
0x2b02   :  { %682 = vst [vmem:[#allocation12 + $0x28] sm:$0x1] %v681_v45 }
0x2b04   :  { %v653_v59 = vpop.permute.xlu0 %652 }
0x2b05   :  { %v687_v30 = vsel %vm10695_vm11, %v653_v59, %v686_v43  ;;  %v1063_v12 = vld [vmem:[#allocation12 + $0x18] sm:$0x1]  ;;  %v1452_v59 = vld [vmem:[#allocation12 + $0x28] sm:$0x2] }
0x2b06   :  { %688 = vst [vmem:[#allocation12 + $0x38] sm:$0x1] %v687_v30 }
0x2b08   :  { %v1031_v35 = vpop.permute.xlu0 %1030 }
0x2b09   :  { %v1058_v1 = vsel %vm10717_vm13, %v1031_v35, %v1057_v32  ;;  %v1069_v9 = vld [vmem:[#allocation12 + $0x28] sm:$0x1]  ;;  %v1458_v35 = vld [vmem:[#allocation12 + $0x38] sm:$0x2] }
0x2b0a   :  { %1059 = vst [vmem:[#allocation12 + $0x8] sm:$0x1] %v1058_v1 }
0x2b0c   :  { %v1035_v20 = vpop.permute.xlu0 %1034 }
0x2b0d   :  { %v1064_v2 = vsel %vm10717_vm13, %v1035_v20, %v1063_v12  ;;  %v1075_v54 = vld [vmem:[#allocation12 + $0x38] sm:$0x1] }
0x2b0e   :  { %1065 = vst [vmem:[#allocation12 + $0x18] sm:$0x1] %v1064_v2 }
0x2b10   :  { %v1039_v31 = vpop.permute.xlu0 %1038 }
0x2b11   :  { %v1070_v23 = vsel %vm10717_vm13, %v1039_v31, %v1069_v9 }
0x2b12   :  { %1071 = vst [vmem:[#allocation12 + $0x28] sm:$0x1] %v1070_v23 }
0x2b14   :  { %v1043_v44 = vpop.permute.xlu0 %1042 }
0x2b15   :  { %v1076_v26 = vsel %vm10717_vm13, %v1043_v44, %v1075_v54 }
0x2b16   :  { %1077 = vst [vmem:[#allocation12 + $0x38] sm:$0x1] %v1076_v26 }
0x2b18   :  { %v1413_v15 = vpop.permute.xlu0 %1412 }
0x2b19   :  { %v1441_v33 = vsel %vm10738_vm1, %v1413_v15, %v1440_v37 }
0x2b1a   :  { %1442 = vst [vmem:[#allocation12 + $0x8] sm:$0x2] %v1441_v33 }
0x2b1c   :  { %v1417_v45 = vpop.permute.xlu0 %1416 }
0x2b1d   :  { %v1447_v43 = vsel %vm10738_vm1, %v1417_v45, %v1446_v22  ;;  %v2205_v45 = vld [vmem:[#allocation12 + $0x8] sm:$0x4] }
0x2b1e   :  { %1448 = vst [vmem:[#allocation12 + $0x18] sm:$0x2] %v1447_v43 }
0x2b20   :  { %v1421_v30 = vpop.permute.xlu0 %1420 }
0x2b21   :  { %v1453_v32 = vsel %vm10738_vm1, %v1421_v30, %v1452_v59  ;;  %v1822_v20 = vld [vmem:[#allocation12 + $0x8] sm:$0x2]  ;;  %v2211_v30 = vld [vmem:[#allocation12 + $0x18] sm:$0x4] }
0x2b22   :  { %1454 = vst [vmem:[#allocation12 + $0x28] sm:$0x2] %v1453_v32 }
0x2b24   :  { %v1425_v1 = vpop.permute.xlu0 %1424 }
0x2b25   :  { %v1459_v12 = vsel %vm10738_vm1, %v1425_v1, %v1458_v35  ;;  %v1828_v31 = vld [vmem:[#allocation12 + $0x18] sm:$0x2]  ;;  %v2217_v1 = vld [vmem:[#allocation12 + $0x28] sm:$0x4] }
0x2b26   :  { %1460 = vst [vmem:[#allocation12 + $0x38] sm:$0x2] %v1459_v12 }
0x2b28   :  { %v1796_v2 = vpop.permute.xlu0 %1795 }
0x2b29   :  { %v1823_v9 = vsel %vm10759_vm9, %v1796_v2, %v1822_v20  ;;  %v1834_v44 = vld [vmem:[#allocation12 + $0x28] sm:$0x2]  ;;  %v2223_v2 = vld [vmem:[#allocation12 + $0x38] sm:$0x4] }
0x2b2a   :  { %1824 = vst [vmem:[#allocation12 + $0x8] sm:$0x2] %v1823_v9 }
0x2b2c   :  { %v1800_v23 = vpop.permute.xlu0 %1799 }
0x2b2d   :  { %v1829_v54 = vsel %vm10759_vm9, %v1800_v23, %v1828_v31  ;;  %v1840_v15 = vld [vmem:[#allocation12 + $0x38] sm:$0x2] }
0x2b2e   :  { %1830 = vst [vmem:[#allocation12 + $0x18] sm:$0x2] %v1829_v54 }
0x2b30   :  { %v1804_v26 = vpop.permute.xlu0 %1803 }
0x2b31   :  { %v1835_v37 = vsel %vm10759_vm9, %v1804_v26, %v1834_v44 }
0x2b32   :  { %1836 = vst [vmem:[#allocation12 + $0x28] sm:$0x2] %v1835_v37 }
0x2b34   :  { %v1808_v33 = vpop.permute.xlu0 %1807 }
0x2b35   :  { %v1841_v22 = vsel %vm10759_vm9, %v1808_v33, %v1840_v15 }
0x2b36   :  { %1842 = vst [vmem:[#allocation12 + $0x38] sm:$0x2] %v1841_v22 }
0x2b38   :  { %v2178_v43 = vpop.permute.xlu0 %2177 }
0x2b39   :  { %v2206_v59 = vsel %vm10780_vm14, %v2178_v43, %v2205_v45 }
0x2b3a   :  { %2207 = vst [vmem:[#allocation12 + $0x8] sm:$0x4] %v2206_v59 }
0x2b3c   :  { %v2182_v32 = vpop.permute.xlu0 %2181 }
0x2b3d   :  { %v2212_v35 = vsel %vm10780_vm14, %v2182_v32, %v2211_v30  ;;  %v2970_v32 = vld [vmem:[#allocation12 + $0x8] sm:$0x8] }
0x2b3e   :  { %2213 = vst [vmem:[#allocation12 + $0x18] sm:$0x4] %v2212_v35 }
0x2b40   :  { %v2186_v12 = vpop.permute.xlu0 %2185 }
0x2b41   :  { %v2218_v20 = vsel %vm10780_vm14, %v2186_v12, %v2217_v1  ;;  %v2587_v23 = vld [vmem:[#allocation12 + $0x8] sm:$0x4] }
0x2b42   :  { %2219 = vst [vmem:[#allocation12 + $0x28] sm:$0x4] %v2218_v20 }
0x2b44   :  { %v2190_v9 = vpop.permute.xlu0 %2189 }
0x2b45   :  { %v2224_v31 = vsel %vm10780_vm14, %v2190_v9, %v2223_v2  ;;  %v2593_v26 = vld [vmem:[#allocation12 + $0x18] sm:$0x4] }
0x2b46   :  { %2225 = vst [vmem:[#allocation12 + $0x38] sm:$0x4] %v2224_v31 }
0x2b48   :  { %v2561_v54 = vpop.permute.xlu0 %2560 }
0x2b49   :  { %v2588_v44 = vsel %vm10801_vm8, %v2561_v54, %v2587_v23  ;;  %v2599_v33 = vld [vmem:[#allocation12 + $0x28] sm:$0x4] }
0x2b4a   :  { %2589 = vst [vmem:[#allocation12 + $0x8] sm:$0x4] %v2588_v44 }
0x2b4c   :  { %v2565_v37 = vpop.permute.xlu0 %2564 }
0x2b4d   :  { %v2594_v15 = vsel %vm10801_vm8, %v2565_v37, %v2593_v26  ;;  %v2605_v43 = vld [vmem:[#allocation12 + $0x38] sm:$0x4] }
0x2b4e   :  { %2595 = vst [vmem:[#allocation12 + $0x18] sm:$0x4] %v2594_v15 }
0x2b50   :  { %v2569_v22 = vpop.permute.xlu0 %2568 }
0x2b51   :  { %v2600_v45 = vsel %vm10801_vm8, %v2569_v22, %v2599_v33 }
0x2b52   :  { %2601 = vst [vmem:[#allocation12 + $0x28] sm:$0x4] %v2600_v45 }
0x2b54   :  { %v2573_v59 = vpop.permute.xlu0 %2572 }
0x2b55   :  { %v2606_v30 = vsel %vm10801_vm8, %v2573_v59, %v2605_v43 }
0x2b56   :  { %2607 = vst [vmem:[#allocation12 + $0x38] sm:$0x4] %v2606_v30 }
0x2b58   :  { %v2943_v35 = vpop.permute.xlu0 %2942 }
0x2b59   :  { %v2971_v1 = vsel %vm10822_vm15, %v2943_v35, %v2970_v32 }
0x2b5a   :  { %2972 = vst [vmem:[#allocation12 + $0x8] sm:$0x8] %v2971_v1  ;;  %v11544_v1 = vld [vmem:[#allocation52_spill] sm:$0xff] }
0x2bc8   :  { %v6087_v12 = vpop.f32.mrb[36].mxu1 }
0x2bc9   :  { %v7117_v20 = vpop.f32.mrb[37].mxu1  ;;  %v6095_v31 = vrot.slane %v6087_v12, 2  ;;  %v6097_v23 = vrot.slane %v6087_v12, 4  ;;  %v6099_v44 = vrot.slane %v6087_v12, 6  ;;  %v6096_v37 = vrot.slane %v6087_v12, 3 }
0x2bca   :  { %v6090_v2 = vpop.f32.mrb[38].mxu1  ;;  %v6116_v15 = vadd.f32 %v6087_v12, %v8505_v3  ;;  %v6100_v33 = vrot.slane %v6087_v12, 7  ;;  %v6098_v45 = vrot.slane %v6087_v12, 5  ;;  %v11553_v20 = vld [vmem:[#allocation60_spill] sm:$0xff] }
0x2bcb   :  { %v7118_v9 = vpop.f32.mrb[39].mxu1  ;;  %v6110_v54 = vadd.f32 %v6095_v31, %v8441_v25  ;;  %v6112_v26 = vadd.f32 %v6097_v23, %v8464_v38  ;;  %v6114_v22 = vadd.f32 %v6099_v44, %v8487_v51  ;;  %v6111_v43 = vadd.f32 %v6096_v37, %v8470_v41  ;;  %v11554_v2 = vld [vmem:[#allocation62_spill] sm:$0xff]  ;;  %v11556_v31 = vld [vmem:[#allocation64_spill] sm:$0xff]  ;;  %v11557_v23 = vld [vmem:[#allocation65_spill] sm:$0xff] }
0x2bcc   :  { %v6115_v59 = vadd.f32 %v6100_v33, %v8510_v8  ;;  %v6094_v25 = vrot.slane %v6087_v12, 1  ;;  %v6113_v32 = vadd.f32 %v6098_v45, %v8492_v55  ;;  %v11552_v12 = vld [vmem:[#allocation61_spill] sm:$0xff]  ;;  %v11555_v9 = vld [vmem:[#allocation63_spill] sm:$0xff]  ;;  %v11558_v44 = vld [vmem:[#allocation66_spill] sm:$0xff]  ;;  %v6776_v45 = vmul.f32 -1.442695, %v6116_v15 }
0x2bcd   :  { %8102 = vtanh.f32 %v6110_v54  ;;  %v6770_v37 = vmul.f32 -1.442695, %v6110_v54  ;;  %v6772_v33 = vmul.f32 -1.442695, %v6112_v26 }
0x2bce   :  { %8104 = vtanh.f32 %v6112_v26  ;;  %v6109_v3 = vadd.f32 %v6094_v25, %v8447_v29  ;;  %v6771_v25 = vmul.f32 -1.442695, %v6111_v43 }
0x2bcf   :  { %8106 = vtanh.f32 %v6116_v15 }
0x2bd0   :  { %8108 = vtanh.f32 %v6114_v22 }
0x2bd1   :  { %8110 = vtanh.f32 %v6111_v43 }
0x2bd2   :  { %8112 = vtanh.f32 %v6115_v59 }
0x2bd3   :  { %8114 = vtanh.f32 %v6113_v32 }
0x2bd4   :  { %8116 = vtanh.f32 %v6109_v3 }
0x2bd5   :  { %8118 = vpow2.f32 %v6770_v37 }
0x2bd6   :  { %8120 = vpow2.f32 %v6772_v33 }
0x2bd7   :  { %v8103_v30 = vpop.eup %8102  ;;  %8122 = vpow2.f32 %v6776_v45 }
0x2bd8   :  { %6215 = vrot.lane.b32.xlu1 %v8103_v30, %s8294_s27  ;;  %v8105_v38 = vpop.eup %8104  ;;  %v6774_v30 = vmul.f32 -1.442695, %v6114_v22 }
0x2bd9   :  { %v8107_v51 = vpop.eup %8106 }
0x2bda   :  { %v8109_v41 = vpop.eup %8108  ;;  %6227 = vrot.lane.b32.xlu0 %v8107_v51, %s8294_s27  ;;  %8124 = vpow2.f32 %v6774_v30 }
0x2bdb   :  { %v8111_v8 = vpop.eup %8110  ;;  %8126 = vpow2.f32 %v6771_v25 }
0x2bdc   :  { %6219 = vrot.lane.b32.xlu1 %v8105_v38, %s8294_s27  ;;  %v8113_v35 = vpop.eup %8112  ;;  %v6775_v38 = vmul.f32 -1.442695, %v6115_v59 }
0x2bdd   :  { %v8115_v55 = vpop.eup %8114 }
0x2bde   :  { %6217 = vrot.lane.b32.xlu0 %v8111_v8, %s8294_s27  ;;  %v8117_v29 = vpop.eup %8116  ;;  %8128 = vpow2.f32 %v6775_v38 }
0x2bdf   :  { %v8119_v51 = vpop.eup %8118 }
0x2be0   :  { %6223 = vrot.lane.b32.xlu1 %v8109_v41, %s8294_s27  ;;  %v6773_v41 = vmul.f32 -1.442695, %v6113_v32  ;;  %v6142_v8 = vadd.f32 1.0, %v8119_v51 }
0x2be2   :  { %6221 = vrot.lane.b32.xlu0 %v8115_v55, %s8294_s27  ;;  %v6769_v55 = vmul.f32 -1.442695, %v6109_v3  ;;  %8130 = vpow2.f32 %v6773_v41  ;;  %v2973_v41 = vld [vmem:[#allocation12 + $0x10] sm:$0x8] }
0x2be3   :  { %8132 = vrcp.f32 %v6142_v8 }
0x2be4   :  { %6225 = vrot.lane.b32.xlu1 %v8113_v35, %s8294_s27  ;;  %v8121_v35 = vpop.eup %8120  ;;  %8134 = vpow2.f32 %v6769_v55 }
0x2be5   :  { %v6144_v54 = vadd.f32 1.0, %v8121_v35 }
0x2be6   :  { %6213 = vrot.lane.b32.xlu0 %v8117_v29, %s8294_s27  ;;  %v8123_v29 = vpop.eup %8122 }
0x2be7   :  { %v6148_v26 = vadd.f32 1.0, %v8123_v29  ;;  %8136 = vrcp.f32 %v6144_v54 }
0x2be8   :  { %2944 = vrot.lane.b32.xlu1 %v9475_v50, %s8300_s3  ;;  %v11545_v50 = vld [vmem:[#allocation53_spill] sm:$0xff] }
0x2be9   :  { %8138 = vrcp.f32 %v6148_v26 }
0x2bea   :  { %2946 = vrot.lane.b32.xlu0 %v11544_v1, %s8300_s3  ;;  %v8125_v1 = vpop.eup %8124 }
0x2beb   :  { %v8127_v15 = vpop.eup %8126  ;;  %v6146_v22 = vadd.f32 1.0, %v8125_v1  ;;  %v2979_v1 = vld [vmem:[#allocation12 + $0x20] sm:$0x8] }
0x2bec   :  { %2948 = vrot.lane.b32.xlu1 %v9483_v7, %s8300_s3  ;;  %v11546_v7 = vld [vmem:[#allocation55_spill] sm:$0xff]  ;;  %v8129_v43 = vpop.eup %8128  ;;  %v6143_v59 = vadd.f32 1.0, %v8127_v15 }
0x2bed   :  { %8140 = vrcp.f32 %v6146_v22  ;;  %v6147_v32 = vadd.f32 1.0, %v8129_v43  ;;  %v11559_v22 = vld [vmem:[#allocation69_spill] sm:$0xff] }
0x2bee   :  { %2950 = vrot.lane.b32.xlu0 %v9491_v47, %s8300_s3  ;;  %v11548_v47 = vld [vmem:[#allocation57_spill] sm:$0xff]  ;;  %8142 = vrcp.f32 %v6143_v59 }
0x2bef   :  { %8144 = vrcp.f32 %v6147_v32 }
0x2bf0   :  { %2952 = vrot.lane.b32.xlu1 %v9500_v16, %s8300_s3  ;;  %v11547_v16 = vld [vmem:[#allocation54_spill] sm:$0xff] }
0x2bf2   :  { %2954 = vrot.lane.b32.xlu0 %v9493_v0, %s8300_s3  ;;  %v11550_v0 = vld [vmem:[#allocation59_spill] sm:$0xff] }
0x2bf4   :  { %3323 = vrot.lane.b32.xlu1 %v9611_v24, %s8300_s3  ;;  %v11549_v24 = vld [vmem:[#allocation56_spill] sm:$0xff] }
0x2bf6   :  { %3325 = vrot.lane.b32.xlu0 %v11545_v50, %s8300_s3  ;;  %v8131_v50 = vpop.eup %8130 }
0x2bf8   :  { %3327 = vrot.lane.b32.xlu1 %v9618_v42, %s8300_s3  ;;  %v11551_v42 = vld [vmem:[#allocation58_spill] sm:$0xff] }
0x2bfa   :  { %3329 = vrot.lane.b32.xlu0 %v11547_v16, %s8300_s3 }
0x2bfc   :  { %3331 = vrot.lane.b32.xlu1 %v11546_v7, %s8300_s3  ;;  %v10947_v7 = vpop.eup %8132 }
0x2bfe   :  { %3333 = vrot.lane.b32.xlu0 %v11549_v24, %s8300_s3  ;;  %v8135_v24 = vpop.eup %8134 }
0x2c00   :  { %3335 = vrot.lane.b32.xlu1 %v11548_v47, %s8300_s3  ;;  %v6145_v47 = vadd.f32 1.0, %v8131_v50  ;;  %v2976_v50 = vld [vmem:[#allocation12 + $0x18] sm:$0x8] }
0x2c02   :  { %3337 = vrot.lane.b32.xlu0 %v11551_v42, %s8300_s3  ;;  %8146 = vrcp.f32 %v6145_v47  ;;  %v11560_v47 = vld [vmem:[#allocation67_spill] sm:$0xff] }
0x2c04   :  { %3705 = vrot.lane.b32.xlu1 %v11550_v0, %s8300_s3  ;;  %v10951_v0 = vpop.eup %8136 }
0x2c06   :  { %3707 = vrot.lane.b32.xlu0 %v11553_v20, %s8300_s3  ;;  %v6141_v20 = vadd.f32 1.0, %v8135_v24 }
0x2c08   :  { %3709 = vrot.lane.b32.xlu1 %v11552_v12, %s8300_s3  ;;  %8148 = vrcp.f32 %v6141_v20 }
0x2c0a   :  { %3711 = vrot.lane.b32.xlu0 %v11555_v9, %s8300_s3 }
0x2c0c   :  { %3713 = vrot.lane.b32.xlu1 %v11554_v2, %s8300_s3  ;;  %v10954_v2 = vpop.eup %8138 }
0x2c0e   :  { %3715 = vrot.lane.b32.xlu0 %v11557_v23, %s8300_s3 }
0x2c10   :  { %3717 = vrot.lane.b32.xlu1 %v11556_v31, %s8300_s3  ;;  %v10957_v31 = vpop.eup %8140 }
0x2c11   :  { %v10962_v33 = vpop.eup %8142 }
0x2c12   :  { %3719 = vrot.lane.b32.xlu0 %v11558_v44, %s8300_s3  ;;  %v10965_v30 = vpop.eup %8144 }
0x2c13   :  { %v10970_v8 = vpop.eup %8146 }
0x2c14   :  { %v10977_v26 = vpop.eup %8148 }
0x2c4a   :  { %v6216_v16 = vpop.permute.xlu1 %6215 }
0x2c4b   :  { %v6238_v3 = vmul.f32 %v10947_v7, %v6216_v16  ;;  %v2985_v16 = vld [vmem:[#allocation12 + $0x30] sm:$0x8] }
0x2c4c   :  { %v6228_v9 = vpop.permute.xlu0 %6227 }
0x2c4d   :  { %6255 = vrot.lane.b32.xlu1 %v6238_v3, %s8300_s3  ;;  %v6244_v23 = vmul.f32 %v10954_v2, %v6228_v9  ;;  %v11561_v9 = vld [vmem:[#allocation68_spill] sm:$0xff] }
0x2c4e   :  { %v6220_v42 = vpop.permute.xlu1 %6219 }
0x2c4f   :  { %v6240_v12 = vmul.f32 %v10951_v0, %v6220_v42  ;;  %6267 = vrot.lane.b32.xlu0 %v6244_v23, %s8300_s3 }
0x2c50   :  { %v6218_v45 = vpop.permute.xlu0 %6217 }
0x2c51   :  { %6259 = vrot.lane.b32.xlu1 %v6240_v12, %s8300_s3  ;;  %v6239_v25 = vmul.f32 %v10962_v33, %v6218_v45  ;;  %v2982_v12 = vld [vmem:[#allocation12 + $0x28] sm:$0x8] }
0x2c52   :  { %v6224_v44 = vpop.permute.xlu1 %6223 }
0x2c53   :  { %v6242_v37 = vmul.f32 %v10957_v31, %v6224_v44  ;;  %6257 = vrot.lane.b32.xlu0 %v6239_v25, %s8300_s3  ;;  %v11562_v44 = vld [vmem:[#allocation71_spill] sm:$0xff]  ;;  %v3349_v25 = vld [vmem:[#allocation12] sm:$0x8] }
0x2c54   :  { %v6222_v35 = vpop.permute.xlu0 %6221 }
0x2c55   :  { %6263 = vrot.lane.b32.xlu1 %v6242_v37, %s8300_s3  ;;  %v6241_v55 = vmul.f32 %v10970_v8, %v6222_v35  ;;  %v11565_v35 = vld [vmem:[#allocation70_spill] sm:$0xff] }
0x2c56   :  { %v6226_v38 = vpop.permute.xlu1 %6225 }
0x2c57   :  { %v6243_v51 = vmul.f32 %v10965_v30, %v6226_v38  ;;  %6261 = vrot.lane.b32.xlu0 %v6241_v55, %s8300_s3 }
0x2c58   :  { %v6214_v15 = vpop.permute.xlu0 %6213 }
0x2c59   :  { %6265 = vrot.lane.b32.xlu1 %v6243_v51, %s8300_s3  ;;  %v6237_v43 = vmul.f32 %v10977_v26, %v6214_v15  ;;  %v2988_v51 = vld [vmem:[#allocation12 + $0x38] sm:$0x8] }
0x2c5a   :  { %v2945_v29 = vpop.permute.xlu1 %2944 }
0x2c5b   :  { %v2974_v54 = vsel %vm10822_vm15, %v2945_v29, %v2973_v41  ;;  %6253 = vrot.lane.b32.xlu0 %v6237_v43, %s8300_s3  ;;  %v11566_v29 = vld [vmem:[#allocation73_spill] sm:$0xff]  ;;  %v11567_v43 = vld [vmem:[#allocation72_spill] sm:$0xff] }
0x2c5c   :  { %2975 = vst [vmem:[#allocation12 + $0x10] sm:$0x8] %v2974_v54  ;;  %v2947_v3 = vpop.permute.xlu0 %2946 }
0x2c5d   :  { %4085 = vrot.lane.b32.xlu1 %v11559_v22, %s8300_s3  ;;  %v2977_v24 = vsel %vm10822_vm15, %v2947_v3, %v2976_v50 }
0x2c5e   :  { %v2949_v59 = vpop.permute.xlu1 %2948  ;;  %2978 = vst [vmem:[#allocation12 + $0x18] sm:$0x8] %v2977_v24 }
0x2c5f   :  { %v2980_v32 = vsel %vm10822_vm15, %v2949_v59, %v2979_v1  ;;  %4087 = vrot.lane.b32.xlu0 %v11561_v9, %s8300_s3  ;;  %v3352_v59 = vld [vmem:[#allocation12 + $0x8] sm:$0x8] }
0x2c60   :  { %2981 = vst [vmem:[#allocation12 + $0x20] sm:$0x8] %v2980_v32  ;;  %v2951_v23 = vpop.permute.xlu0 %2950  ;;  %v11568_v32 = vld [vmem:[#allocation75_spill] sm:$0xff]  ;;  %v11570_v9 = vld [vmem:[#allocation78_spill] sm:$0xff] }
0x2c61   :  { %4089 = vrot.lane.b32.xlu1 %v11560_v47, %s8300_s3  ;;  %v2983_v37 = vsel %vm10822_vm15, %v2951_v23, %v2982_v12 }
0x2c62   :  { %v2953_v42 = vpop.permute.xlu1 %2952  ;;  %2984 = vst [vmem:[#allocation12 + $0x28] sm:$0x8] %v2983_v37 }
0x2c63   :  { %v2986_v20 = vsel %vm10822_vm15, %v2953_v42, %v2985_v16  ;;  %4091 = vrot.lane.b32.xlu0 %v11565_v35, %s8300_s3  ;;  %v3355_v1 = vld [vmem:[#allocation12 + $0x10] sm:$0x8]  ;;  %v11569_v42 = vld [vmem:[#allocation74_spill] sm:$0xff] }
0x2c64   :  { %2987 = vst [vmem:[#allocation12 + $0x30] sm:$0x8] %v2986_v20  ;;  %v2955_v55 = vpop.permute.xlu0 %2954 }
0x2c65   :  { %4093 = vrot.lane.b32.xlu1 %v11562_v44, %s8300_s3  ;;  %v2989_v54 = vsel %vm10822_vm15, %v2955_v55, %v2988_v51  ;;  %v3358_v12 = vld [vmem:[#allocation12 + $0x18] sm:$0x8]  ;;  %v3729_v51 = vld [vmem:[#allocation12 + $0x4] sm:$0x1]  ;;  %v11572_v55 = vld [vmem:[#allocation79_spill] sm:$0xff] }
0x2c66   :  { %v3324_v38 = vpop.permute.xlu1 %3323  ;;  %2990 = vst [vmem:[#allocation12 + $0x38] sm:$0x8] %v2989_v54 }
0x2c67   :  { %v3350_v41 = vsel %vm10998_vm12, %v3324_v38, %v3349_v25  ;;  %4095 = vrot.lane.b32.xlu0 %v11567_v43, %s8300_s3  ;;  %v3361_v3 = vld [vmem:[#allocation12 + $0x20] sm:$0x8] }
0x2c68   :  { %3351 = vst [vmem:[#allocation12] sm:$0x8] %v3350_v41  ;;  %v3326_v50 = vpop.permute.xlu0 %3325  ;;  %v11571_v38 = vld [vmem:[#allocation77_spill] sm:$0xff] }
0x2c69   :  { %4097 = vrot.lane.b32.xlu1 %v11566_v29, %s8300_s3  ;;  %v3353_v16 = vsel %vm10998_vm12, %v3326_v50, %v3352_v59  ;;  %v3364_v41 = vld [vmem:[#allocation12 + $0x28] sm:$0x8]  ;;  %v11574_v50 = vld [vmem:[#allocation81_spill] sm:$0xff] }
0x2c6a   :  { %v3328_v15 = vpop.permute.xlu1 %3327  ;;  %3354 = vst [vmem:[#allocation12 + $0x8] sm:$0x8] %v3353_v16 }
0x2c6b   :  { %v3356_v22 = vsel %vm10998_vm12, %v3328_v15, %v3355_v1  ;;  %4099 = vrot.lane.b32.xlu0 %v11569_v42, %s8300_s3  ;;  %v3367_v44 = vld [vmem:[#allocation12 + $0x30] sm:$0x8]  ;;  %v11573_v15 = vld [vmem:[#allocation76_spill] sm:$0xff]  ;;  %v3741_v42 = vld [vmem:[#allocation12 + $0x24] sm:$0x1] }
0x2c6c   :  { %3357 = vst [vmem:[#allocation12 + $0x10] sm:$0x8] %v3356_v22  ;;  %v3330_v20 = vpop.permute.xlu0 %3329  ;;  %v3735_v22 = vld [vmem:[#allocation12 + $0x14] sm:$0x1] }
0x2c6d   :  { %4465 = vrot.lane.b32.xlu1 %v11568_v32, %s8300_s3  ;;  %v3359_v23 = vsel %vm10998_vm12, %v3330_v20, %v3358_v12  ;;  %v3370_v43 = vld [vmem:[#allocation12 + $0x38] sm:$0x8] }
0x2c6e   :  { %v3332_v47 = vpop.permute.xlu1 %3331  ;;  %3360 = vst [vmem:[#allocation12 + $0x18] sm:$0x8] %v3359_v23  ;;  %v11576_v20 = vld [vmem:[#allocation84_spill] sm:$0xff] }
0x2c6f   :  { %v3362_v24 = vsel %vm10998_vm12, %v3332_v47, %v3361_v3  ;;  %4467 = vrot.lane.b32.xlu0 %v11571_v38, %s8300_s3  ;;  %v3732_v3 = vld [vmem:[#allocation12 + $0xc] sm:$0x1]  ;;  %v3747_v38 = vld [vmem:[#allocation12 + $0x34] sm:$0x1] }
0x2c70   :  { %3363 = vst [vmem:[#allocation12 + $0x20] sm:$0x8] %v3362_v24  ;;  %v3334_v35 = vpop.permute.xlu0 %3333  ;;  %v11575_v24 = vld [vmem:[#allocation80_spill] sm:$0xff] }
0x2c71   :  { %4469 = vrot.lane.b32.xlu1 %v11570_v9, %s8300_s3  ;;  %v3365_v29 = vsel %vm10998_vm12, %v3334_v35, %v3364_v41  ;;  %v11578_v41 = vld [vmem:[#allocation87_spill] sm:$0xff] }
0x2c72   :  { %v3336_v37 = vpop.permute.xlu1 %3335  ;;  %3366 = vst [vmem:[#allocation12 + $0x28] sm:$0x8] %v3365_v29  ;;  %v3744_v29 = vld [vmem:[#allocation12 + $0x2c] sm:$0x1] }
0x2c73   :  { %v3368_v25 = vsel %vm10998_vm12, %v3336_v37, %v3367_v44  ;;  %4471 = vrot.lane.b32.xlu0 %v11573_v15, %s8300_s3  ;;  %v3738_v44 = vld [vmem:[#allocation12 + $0x1c] sm:$0x1] }
0x2c74   :  { %3369 = vst [vmem:[#allocation12 + $0x30] sm:$0x8] %v3368_v25  ;;  %v3338_v59 = vpop.permute.xlu0 %3337  ;;  %v11577_v25 = vld [vmem:[#allocation82_spill] sm:$0xff] }
0x2c75   :  { %4473 = vrot.lane.b32.xlu1 %v11572_v55, %s8300_s3  ;;  %v3371_v32 = vsel %vm10998_vm12, %v3338_v59, %v3370_v43  ;;  %v3750_v59 = vld [vmem:[#allocation12 + $0x3c] sm:$0x1] }
0x2c76   :  { %v3706_v54 = vpop.permute.xlu1 %3705  ;;  %3372 = vst [vmem:[#allocation12 + $0x38] sm:$0x8] %v3371_v32 }
0x2c77   :  { %v3730_v1 = vsel %vm10695_vm11, %v3706_v54, %v3729_v51  ;;  %4475 = vrot.lane.b32.xlu0 %v11575_v24, %s8300_s3  ;;  %v11584_v24 = vld [vmem:[#allocation92_spill] sm:$0xff] }
0x2c78   :  { %3731 = vst [vmem:[#allocation12 + $0x4] sm:$0x1] %v3730_v1  ;;  %v3708_v12 = vpop.permute.xlu0 %3707  ;;  %v11579_v1 = vld [vmem:[#allocation83_spill] sm:$0xff] }
0x2c79   :  { %4477 = vrot.lane.b32.xlu1 %v11574_v50, %s8300_s3  ;;  %v3733_v9 = vsel %vm10695_vm11, %v3708_v12, %v3732_v3  ;;  %v11581_v50 = vld [vmem:[#allocation88_spill] sm:$0xff]  ;;  %v11586_v12 = vld [vmem:[#allocation91_spill] sm:$0xff] }
0x2c7a   :  { %v3710_v16 = vpop.permute.xlu1 %3709  ;;  %3734 = vst [vmem:[#allocation12 + $0xc] sm:$0x1] %v3733_v9 }
0x2c7b   :  { %v3736_v47 = vsel %vm10695_vm11, %v3710_v16, %v3735_v22  ;;  %4479 = vrot.lane.b32.xlu0 %v11577_v25, %s8300_s3  ;;  %v11580_v22 = vld [vmem:[#allocation85_spill] sm:$0xff]  ;;  %v11582_v16 = vld [vmem:[#allocation90_spill] sm:$0xff]  ;;  %v6188_v25 = vrot.slane %v10596_v36, 7 }
0x2c7c   :  { %3737 = vst [vmem:[#allocation12 + $0x14] sm:$0x1] %v3736_v47  ;;  %v3712_v51 = vpop.permute.xlu0 %3711  ;;  %v11583_v47 = vld [vmem:[#allocation86_spill] sm:$0xff] }
0x2c7d   :  { %4845 = vrot.lane.b32.xlu1 %v11576_v20, %s8300_s3  ;;  %v3739_v35 = vsel %vm10695_vm11, %v3712_v51, %v3738_v44  ;;  %v6198_v20 = vmul.f32 %v10947_v7, %v6182_v19  ;;  %v6186_v51 = vrot.slane %v10594_v39, 7 }
0x2c7e   :  { %v3714_v23 = vpop.permute.xlu1 %3713  ;;  %3740 = vst [vmem:[#allocation12 + $0x1c] sm:$0x1] %v3739_v35  ;;  %v6183_v35 = vrot.slane %v10576_v10, 7 }
0x2c7f   :  { %v3742_v37 = vsel %vm10695_vm11, %v3714_v23, %v3741_v42  ;;  %4847 = vrot.lane.b32.xlu0 %v11579_v1, %s8300_s3  ;;  %v11585_v42 = vld [vmem:[#allocation89_spill] sm:$0xff]  ;;  %v6184_v23 = vrot.slane %v10583_v34, 7  ;;  %v6202_v46 = vmul.f32 %v10957_v31, %v6186_v51 }
0x2c80   :  { %3743 = vst [vmem:[#allocation12 + $0x24] sm:$0x1] %v3742_v37  ;;  %v3716_v15 = vpop.permute.xlu0 %3715  ;;  %v6199_v36 = vmul.f32 %v10962_v33, %v6183_v35 }
0x2c81   :  { %4849 = vrot.lane.b32.xlu1 %v11578_v41, %s8300_s3  ;;  %v3745_v43 = vsel %vm10695_vm11, %v3716_v15, %v3744_v29  ;;  %v6200_v37 = vmul.f32 %v10951_v0, %v6184_v23  ;;  %v6204_v41 = vmul.f32 %v10954_v2, %v6188_v25  ;;  %v6187_v29 = vrot.slane %v10601_v14, 7 }
0x2c82   :  { %v3718_v55 = vpop.permute.xlu1 %3717  ;;  %3746 = vst [vmem:[#allocation12 + $0x2c] sm:$0x1] %v3745_v43  ;;  %v6185_v15 = vrot.slane %v10587_v21, 7  ;;  %v4109_v21 = vld [vmem:[#allocation12 + $0x4] sm:$0x1] }
0x2c83   :  { %v3748_v54 = vsel %vm10695_vm11, %v3718_v55, %v3747_v38  ;;  %4851 = vrot.lane.b32.xlu0 %v11581_v50, %s8300_s3  ;;  %v6203_v39 = vmul.f32 %v10965_v30, %v6187_v29 }
0x2c84   :  { %3749 = vst [vmem:[#allocation12 + $0x34] sm:$0x1] %v3748_v54  ;;  %v3720_v32 = vpop.permute.xlu0 %3719  ;;  %v6201_v14 = vmul.f32 %v10970_v8, %v6185_v15 }
0x2c85   :  { %4853 = vrot.lane.b32.xlu1 %v11580_v22, %s8300_s3  ;;  %v3751_v3 = vsel %vm10695_vm11, %v3720_v32, %v3750_v59 }
0x2c86   :  { %3752 = vst [vmem:[#allocation12 + $0x3c] sm:$0x1] %v3751_v3 }
0x2c87   :  { %4855 = vrot.lane.b32.xlu0 %v11583_v47, %s8300_s3  ;;  %v6181_v47 = vrot.slane %v10565_v5, 7 }
0x2c89   :  { %4857 = vrot.lane.b32.xlu1 %v11582_v16, %s8300_s3 }
0x2c8b   :  { %4859 = vrot.lane.b32.xlu0 %v11585_v42, %s8300_s3 }
0x2c8d   :  { %5225 = vrot.lane.b32.xlu1 %v11584_v24, %s8300_s3 }
0x2c8f   :  { %5227 = vrot.lane.b32.xlu0 %v10342_v11, %s8300_s3 }
0x2c91   :  { %5229 = vrot.lane.b32.xlu1 %v11586_v12, %s8300_s3 }
0x2c93   :  { %5231 = vrot.lane.b32.xlu0 %v10352_v17, %s8300_s3 }
0x2cbf   :  { %v6256_v9 = vpop.permute.xlu1 %6255 }
0x2cc0   :  { %v6278_v44 = vadd.f32 %v6256_v9, %v6198_v20 }
0x2cc1   :  { %v6268_v17 = vpop.permute.xlu0 %6267 }
0x2cc2   :  { %8150 = vtanh.f32 %v6278_v44  ;;  %v6284_v55 = vadd.f32 %v6268_v17, %v6204_v41  ;;  %v6452_v10 = vrot.slane %v6278_v44, 7  ;;  %v4115_v41 = vld [vmem:[#allocation12 + $0x14] sm:$0x1] }
0x2cc3   :  { %v6260_v38 = vpop.permute.xlu1 %6259 }
0x2cc4   :  { %v6280_v11 = vadd.f32 %v6260_v38, %v6200_v37  ;;  %v6197_v37 = vmul.f32 %v10977_v26, %v6181_v47  ;;  %v6463_v35 = vrot.slane %v6284_v55, 1 }
0x2cc5   :  { %v6258_v1 = vpop.permute.xlu0 %6257 }
0x2cc6   :  { %8152 = vtanh.f32 %v6280_v11  ;;  %v6279_v22 = vadd.f32 %v6258_v1, %v6199_v36  ;;  %v6455_v50 = vrot.slane %v6280_v11, 5  ;;  %v4112_v36 = vld [vmem:[#allocation12 + $0xc] sm:$0x1] }
0x2cc7   :  { %v6264_v34 = vpop.permute.xlu1 %6263  ;;  %8154 = vtanh.f32 %v6284_v55 }
0x2cc8   :  { %v6282_v54 = vadd.f32 %v6264_v34, %v6202_v46  ;;  %v6453_v16 = vrot.slane %v6279_v22, 6 }
0x2cc9   :  { %v6262_v3 = vpop.permute.xlu0 %6261 }
0x2cca   :  { %8156 = vtanh.f32 %v6282_v54  ;;  %v6454_v24 = vsel %vm690_vm2, %v6453_v16, %v6452_v10  ;;  %v6281_v42 = vadd.f32 %v6262_v3, %v6201_v14  ;;  %v6459_v9 = vrot.slane %v6282_v54, 3  ;;  %v4127_v3 = vld [vmem:[#allocation12 + $0x34] sm:$0x1] }
0x2ccb   :  { %v6266_v43 = vpop.permute.xlu1 %6265  ;;  %8158 = vtanh.f32 %v6279_v22  ;;  %v6456_v20 = vsel %vm693_vm3, %v6455_v50, %v6454_v24  ;;  %v4121_v22 = vld [vmem:[#allocation12 + $0x24] sm:$0x1] }
0x2ccc   :  { %v8151_v59 = vpop.eup %8150  ;;  %v6283_v32 = vadd.f32 %v6266_v43, %v6203_v39  ;;  %v6457_v44 = vrot.slane %v6281_v42, 4 }
0x2ccd   :  { %6303 = vrot.lane.b32.xlu0 %v8151_v59, %s8294_s27  ;;  %v6254_v5 = vpop.permute.xlu0 %6253 }
0x2cce   :  { %8160 = vtanh.f32 %v6283_v32  ;;  %v6461_v25 = vrot.slane %v6283_v32, 2  ;;  %v6458_v51 = vsel %vm696_vm4, %v6457_v44, %v6456_v20  ;;  %v11107_v11 = vadd.f32 %v6254_v5, %v6197_v37  ;;  %v4118_v32 = vld [vmem:[#allocation12 + $0x1c] sm:$0x1]  ;;  %v4495_v44 = vld [vmem:[#allocation12 + $0x14] sm:$0x2] }
0x2ccf   :  { %v4086_v12 = vpop.permute.xlu1 %4085  ;;  %8162 = vtanh.f32 %v6281_v42  ;;  %v6460_v34 = vsel %vm699_vm5, %v6459_v9, %v6458_v51  ;;  %v4489_v42 = vld [vmem:[#allocation12 + $0x4] sm:$0x2]  ;;  %v4492_v51 = vld [vmem:[#allocation12 + $0xc] sm:$0x2] }
0x2cd0   :  { %v8153_v19 = vpop.eup %8152  ;;  %v4110_v23 = vsel %vm10717_vm13, %v4086_v12, %v4109_v21  ;;  %8164 = vtanh.f32 %v11107_v11  ;;  %v6462_v54 = vsel %vm702_vm6, %v6461_v25, %v6460_v34  ;;  %v4124_v21 = vld [vmem:[#allocation12 + $0x2c] sm:$0x1]  ;;  %v4498_v34 = vld [vmem:[#allocation12 + $0x1c] sm:$0x2] }
0x2cd1   :  { %4111 = vst [vmem:[#allocation12 + $0x4] sm:$0x1] %v4110_v23  ;;  %6307 = vrot.lane.b32.xlu0 %v8153_v19, %s8294_s27  ;;  %v8155_v38 = vpop.eup %8154  ;;  %v4088_v1 = vpop.permute.xlu0 %4087  ;;  %v11117_v39 = vsel %vm705_vm7, %v6463_v35, %v6462_v54  ;;  %v11588_v35 = vld [vmem:[#allocation93_spill] sm:$0xff]  ;;  %v4507_v54 = vld [vmem:[#allocation12 + $0x34] sm:$0x2] }
0x2cd2   :  { %6315 = vrot.lane.b32.xlu1 %v8155_v38, %s8294_s27  ;;  %v4113_v15 = vsel %vm10717_vm13, %v4088_v1, %v4112_v36  ;;  %v11587_v38 = vld [vmem:[#allocation94_spill] sm:$0xff] }
0x2cd3   :  { %v4090_v17 = vpop.permute.xlu1 %4089  ;;  %4114 = vst [vmem:[#allocation12 + $0xc] sm:$0x1] %v4113_v15 }
0x2cd4   :  { %v8157_v46 = vpop.eup %8156  ;;  %v4116_v29 = vsel %vm10717_vm13, %v4090_v17, %v4115_v41 }
0x2cd5   :  { %4117 = vst [vmem:[#allocation12 + $0x14] sm:$0x1] %v4116_v29  ;;  %6311 = vrot.lane.b32.xlu0 %v8157_v46, %s8294_s27  ;;  %v8159_v55 = vpop.eup %8158  ;;  %v4092_v10 = vpop.permute.xlu0 %4091 }
0x2cd6   :  { %6305 = vrot.lane.b32.xlu1 %v8159_v55, %s8294_s27  ;;  %v4119_v14 = vsel %vm10717_vm13, %v4092_v10, %v4118_v32  ;;  %v4504_v55 = vld [vmem:[#allocation12 + $0x2c] sm:$0x2] }
0x2cd7   :  { %v4094_v43 = vpop.permute.xlu1 %4093  ;;  %4120 = vst [vmem:[#allocation12 + $0x1c] sm:$0x1] %v4119_v14  ;;  %v11589_v14 = vld [vmem:[#allocation96_spill] sm:$0xff] }
0x2cd8   :  { %v8161_v59 = vpop.eup %8160  ;;  %v4122_v50 = vsel %vm10717_vm13, %v4094_v43, %v4121_v22 }
0x2cd9   :  { %4123 = vst [vmem:[#allocation12 + $0x24] sm:$0x1] %v4122_v50  ;;  %6313 = vrot.lane.b32.xlu0 %v8161_v59, %s8294_s27  ;;  %v8163_v16 = vpop.eup %8162  ;;  %v4096_v12 = vpop.permute.xlu0 %4095  ;;  %v4510_v50 = vld [vmem:[#allocation12 + $0x3c] sm:$0x2] }
0x2cda   :  { %6309 = vrot.lane.b32.xlu1 %v8163_v16, %s8294_s27  ;;  %v8165_v19 = vpop.eup %8164  ;;  %v4125_v20 = vsel %vm10717_vm13, %v4096_v12, %v4124_v21 }
0x2cdb   :  { %v4098_v47 = vpop.permute.xlu1 %4097  ;;  %4126 = vst [vmem:[#allocation12 + $0x2c] sm:$0x1] %v4125_v20 }
0x2cdc   :  { %v4128_v24 = vsel %vm10717_vm13, %v4098_v47, %v4127_v3 }
0x2cdd   :  { %4129 = vst [vmem:[#allocation12 + $0x34] sm:$0x1] %v4128_v24  ;;  %5235 = vrot.lane.b32.xlu0 %v10344_v60, %s8300_s3  ;;  %v4130_v60 = vld [vmem:[#allocation12 + $0x3c] sm:$0x1]  ;;  %v4100_v37 = vpop.permute.xlu0 %4099 }
0x2cde   :  { %6301 = vrot.lane.b32.xlu1 %v8165_v19, %s8294_s27  ;;  %v4131_v25 = vsel %vm10717_vm13, %v4100_v37, %v4130_v60 }
0x2cdf   :  { %v4466_v9 = vpop.permute.xlu1 %4465  ;;  %4132 = vst [vmem:[#allocation12 + $0x3c] sm:$0x1] %v4131_v25  ;;  %v11591_v25 = vld [vmem:[#allocation97_spill] sm:$0xff] }
0x2ce0   :  { %v4490_v23 = vsel %vm10738_vm1, %v4466_v9, %v4489_v42  ;;  %v11590_v9 = vld [vmem:[#allocation95_spill] sm:$0xff] }
0x2ce1   :  { %4491 = vst [vmem:[#allocation12 + $0x4] sm:$0x2] %v4490_v23  ;;  %5239 = vrot.lane.b32.xlu0 %v10362_v57, %s8300_s3  ;;  %v4501_v57 = vld [vmem:[#allocation12 + $0x24] sm:$0x2]  ;;  %v4468_v17 = vpop.permute.xlu0 %4467  ;;  %v5249_v23 = vld [vmem:[#allocation12 + $0x4] sm:$0x4] }
0x2ce2   :  { %5233 = vrot.lane.b32.xlu1 %v11587_v38, %s8300_s3  ;;  %v4493_v46 = vsel %vm10738_vm1, %v4468_v17, %v4492_v51  ;;  %v11592_v38 = vld [vmem:[#allocation100_spill] sm:$0xff]  ;;  %v5255_v51 = vld [vmem:[#allocation12 + $0x14] sm:$0x4] }
0x2ce3   :  { %v4470_v5 = vpop.permute.xlu1 %4469  ;;  %4494 = vst [vmem:[#allocation12 + $0xc] sm:$0x2] %v4493_v46  ;;  %v11593_v46 = vld [vmem:[#allocation98_spill] sm:$0xff] }
0x2ce4   :  { %v4496_v41 = vsel %vm10738_vm1, %v4470_v5, %v4495_v44 }
0x2ce5   :  { %4497 = vst [vmem:[#allocation12 + $0x14] sm:$0x2] %v4496_v41  ;;  %5987 = vrot.lane.b32.xlu0 %v10667_v58, %s8300_s3  ;;  %v4472_v58 = vpop.permute.xlu0 %4471 }
0x2ce6   :  { %5237 = vrot.lane.b32.xlu1 %v11588_v35, %s8300_s3  ;;  %v4499_v36 = vsel %vm10738_vm1, %v4472_v58, %v4498_v34 }
0x2ce7   :  { %v4474_v52 = vpop.permute.xlu1 %4473  ;;  %4500 = vst [vmem:[#allocation12 + $0x1c] sm:$0x2] %v4499_v36 }
0x2ce8   :  { %v4502_v29 = vsel %vm10738_vm1, %v4474_v52, %v4501_v57  ;;  %v4869_v43 = vld [vmem:[#allocation12 + $0x4] sm:$0x2]  ;;  %v5252_v52 = vld [vmem:[#allocation12 + $0xc] sm:$0x4] }
0x2ce9   :  { %4503 = vst [vmem:[#allocation12 + $0x24] sm:$0x2] %v4502_v29  ;;  %5991 = vrot.lane.b32.xlu0 %v10675_v63, %s8300_s3  ;;  %v4476_v22 = vpop.permute.xlu0 %4475 }
0x2cea   :  { %5985 = vrot.lane.b32.xlu1 %v10660_v27, %s8300_s3  ;;  %v4505_v63 = vsel %vm10738_vm1, %v4476_v22, %v4504_v55  ;;  %v4872_v3 = vld [vmem:[#allocation12 + $0xc] sm:$0x2] }
0x2ceb   :  { %v4478_v1 = vpop.permute.xlu1 %4477  ;;  %4506 = vst [vmem:[#allocation12 + $0x2c] sm:$0x2] %v4505_v63 }
0x2cec   :  { %v4508_v15 = vsel %vm10738_vm1, %v4478_v1, %v4507_v54  ;;  %v4875_v10 = vld [vmem:[#allocation12 + $0x14] sm:$0x2] }
0x2ced   :  { %4509 = vst [vmem:[#allocation12 + $0x34] sm:$0x2] %v4508_v15  ;;  %5995 = vrot.lane.b32.xlu0 %v10685_v4, %s8300_s3  ;;  %v4480_v32 = vpop.permute.xlu0 %4479  ;;  %v11594_v54 = vld [vmem:[#allocation99_spill] sm:$0xff] }
0x2cee   :  { %5989 = vrot.lane.b32.xlu1 %v10669_v56, %s8300_s3  ;;  %v4511_v4 = vsel %vm10738_vm1, %v4480_v32, %v4510_v50  ;;  %v4878_v42 = vld [vmem:[#allocation12 + $0x1c] sm:$0x2] }
0x2cef   :  { %v4846_v59 = vpop.permute.xlu1 %4845  ;;  %4512 = vst [vmem:[#allocation12 + $0x3c] sm:$0x2] %v4511_v4 }
0x2cf0   :  { %v4870_v27 = vsel %vm10759_vm9, %v4846_v59, %v4869_v43  ;;  %v4881_v6 = vld [vmem:[#allocation12 + $0x24] sm:$0x2] }
0x2cf1   :  { %4871 = vst [vmem:[#allocation12 + $0x4] sm:$0x2] %v4870_v27  ;;  %5999 = vrot.lane.b32.xlu0 %v10687_v13, %s8300_s3  ;;  %v4848_v47 = vpop.permute.xlu0 %4847 }
0x2cf2   :  { %5993 = vrot.lane.b32.xlu1 %v10677_v53, %s8300_s3  ;;  %v4873_v13 = vsel %vm10759_vm9, %v4848_v47, %v4872_v3  ;;  %v5264_v47 = vld [vmem:[#allocation12 + $0x2c] sm:$0x4] }
0x2cf3   :  { %v4850_v16 = vpop.permute.xlu1 %4849  ;;  %4874 = vst [vmem:[#allocation12 + $0xc] sm:$0x2] %v4873_v13 }
0x2cf4   :  { %v4876_v56 = vsel %vm10759_vm9, %v4850_v16, %v4875_v10  ;;  %v4887_v19 = vld [vmem:[#allocation12 + $0x34] sm:$0x2] }
0x2cf5   :  { %4877 = vst [vmem:[#allocation12 + $0x14] sm:$0x2] %v4876_v56  ;;  %5607 = vrot.lane.b32.xlu0 %v11589_v14, %s8300_s3  ;;  %v4852_v21 = vpop.permute.xlu0 %4851 }
0x2cf6   :  { %5997 = vrot.lane.b32.xlu1 %v10699_v62, %s8300_s3  ;;  %v4879_v12 = vsel %vm10759_vm9, %v4852_v21, %v4878_v42  ;;  %v5270_v21 = vld [vmem:[#allocation12 + $0x3c] sm:$0x4] }
0x2cf7   :  { %v4854_v24 = vpop.permute.xlu1 %4853  ;;  %4880 = vst [vmem:[#allocation12 + $0x1c] sm:$0x2] %v4879_v12 }
0x2cf8   :  { %v4882_v53 = vsel %vm10759_vm9, %v4854_v24, %v4881_v6 }
0x2cf9   :  { %4883 = vst [vmem:[#allocation12 + $0x24] sm:$0x2] %v4882_v53  ;;  %5611 = vrot.lane.b32.xlu0 %v10488_v48, %s8300_s3  ;;  %v4884_v48 = vld [vmem:[#allocation12 + $0x2c] sm:$0x2]  ;;  %v4856_v44 = vpop.permute.xlu0 %4855 }
0x2cfa   :  { %5605 = vrot.lane.b32.xlu1 %v11590_v9, %s8300_s3  ;;  %v4885_v60 = vsel %vm10759_vm9, %v4856_v44, %v4884_v48 }
0x2cfb   :  { %v4858_v20 = vpop.permute.xlu1 %4857  ;;  %4886 = vst [vmem:[#allocation12 + $0x2c] sm:$0x2] %v4885_v60  ;;  %v6012_v60 = vld [vmem:[#allocation12 + $0xc] sm:$0x8] }
0x2cfc   :  { %v4888_v62 = vsel %vm10759_vm9, %v4858_v20, %v4887_v19 }
0x2cfd   :  { %4889 = vst [vmem:[#allocation12 + $0x34] sm:$0x2] %v4888_v62  ;;  %5615 = vrot.lane.b32.xlu0 %v10500_v49, %s8300_s3  ;;  %v4890_v49 = vld [vmem:[#allocation12 + $0x3c] sm:$0x2]  ;;  %v4860_v41 = vpop.permute.xlu0 %4859  ;;  %v5261_v62 = vld [vmem:[#allocation12 + $0x24] sm:$0x4] }
0x2cfe   :  { %5609 = vrot.lane.b32.xlu1 %v11591_v25, %s8300_s3  ;;  %v4891_v57 = vsel %vm10759_vm9, %v4860_v41, %v4890_v49 }
0x2cff   :  { %v5226_v37 = vpop.permute.xlu1 %5225  ;;  %4892 = vst [vmem:[#allocation12 + $0x3c] sm:$0x2] %v4891_v57  ;;  %v6018_v57 = vld [vmem:[#allocation12 + $0x1c] sm:$0x8] }
0x2d00   :  { %v5250_v5 = vsel %vm10780_vm14, %v5226_v37, %v5249_v23 }
0x2d01   :  { %5251 = vst [vmem:[#allocation12 + $0x4] sm:$0x4] %v5250_v5  ;;  %5619 = vrot.lane.b32.xlu0 %v11592_v38, %s8300_s3  ;;  %v5228_v34 = vpop.permute.xlu0 %5227 }
0x2d02   :  { %5613 = vrot.lane.b32.xlu1 %v11593_v46, %s8300_s3  ;;  %v5253_v29 = vsel %vm10780_vm14, %v5228_v34, %v5252_v52  ;;  %v6009_v34 = vld [vmem:[#allocation12 + $0x4] sm:$0x8] }
0x2d03   :  { %v5230_v17 = vpop.permute.xlu1 %5229  ;;  %5254 = vst [vmem:[#allocation12 + $0xc] sm:$0x4] %v5253_v29 }
0x2d04   :  { %v5256_v35 = vsel %vm10780_vm14, %v5230_v17, %v5255_v51  ;;  %v5267_v51 = vld [vmem:[#allocation12 + $0x34] sm:$0x4] }
0x2d05   :  { %5257 = vst [vmem:[#allocation12 + $0x14] sm:$0x4] %v5256_v35  ;;  %v5232_v58 = vpop.permute.xlu0 %5231 }
0x2d06   :  { %5617 = vrot.lane.b32.xlu1 %v11594_v54, %s8300_s3  ;;  %v5259_v36 = vsel %vm10780_vm14, %v5232_v58, %v5258_v28  ;;  %v6024_v54 = vld [vmem:[#allocation12 + $0x2c] sm:$0x8] }
0x2d07   :  { %5260 = vst [vmem:[#allocation12 + $0x1c] sm:$0x4] %v5259_v36 }
0x2d0c   :  { %v5635_v40 = vld [vmem:[#allocation12 + $0x14] sm:$0x4] }
0x2d3f   :  { %v6304_v1 = vpop.permute.xlu0 %6303 }
0x2d40   :  { %v6326_v50 = vmul.f32 %v10947_v7, %v6304_v1  ;;  %v6015_v1 = vld [vmem:[#allocation12 + $0x14] sm:$0x8] }
0x2d42   :  { %v6906_v56 = vpack.c.bf16 %v6326_v50, %v6326_v50  ;;  %v6421_v14 = vrot.slane %v6326_v50, 7 }
0x2d43   :  { %v6308_v55 = vpop.permute.xlu0 %6307 }
0x2d44   :  { %v6316_v15 = vpop.permute.xlu1 %6315  ;;  %v6328_v43 = vmul.f32 %v10951_v0, %v6308_v55 }
0x2d45   :  { %v6332_v22 = vmul.f32 %v10954_v2, %v6316_v15  ;;  %v6030_v15 = vld [vmem:[#allocation12 + $0x3c] sm:$0x8] }
0x2d46   :  { %v6424_v10 = vrot.slane %v6328_v43, 5  ;;  %v6908_v53 = vpack.c.bf16 %v6328_v43, %v6328_v43 }
0x2d47   :  { %v6312_v63 = vpop.permute.xlu0 %6311  ;;  %v6912_v59 = vpack.c.bf16 %v6332_v22, %v6332_v22  ;;  %v6432_v37 = vrot.slane %v6332_v22, 1 }
0x2d48   :  { %v6306_v27 = vpop.permute.xlu1 %6305  ;;  %v6330_v16 = vmul.f32 %v10957_v31, %v6312_v63 }
0x2d49   :  { %v6327_v32 = vmul.f32 %v10962_v33, %v6306_v27  ;;  %6379 = vrot.lane.b32.xlu0 %v6912_v59, %s8300_s3 }
0x2d4a   :  { %v6428_v24 = vrot.slane %v6330_v16, 3  ;;  %v6910_v48 = vpack.c.bf16 %v6330_v16, %v6330_v16  ;;  %v6027_v16 = vld [vmem:[#allocation12 + $0x34] sm:$0x8] }
0x2d4b   :  { %v6314_v4 = vpop.permute.xlu0 %6313  ;;  %v6422_v3 = vrot.slane %v6327_v32, 6  ;;  %v6907_v46 = vpack.c.bf16 %v6327_v32, %v6327_v32 }
0x2d4c   :  { %v11222_v2 = vmul.f32 %v10965_v30, %v6314_v4  ;;  %v6310_v0 = vpop.permute.xlu1 %6309  ;;  %v5632_v4 = vld [vmem:[#allocation12 + $0xc] sm:$0x4] }
0x2d4d   :  { %v6423_v13 = vsel %vm690_vm2, %v6422_v3, %v6421_v14  ;;  %v6329_v7 = vmul.f32 %v10970_v8, %v6310_v0  ;;  %6367 = vrot.lane.b32.xlu0 %v6906_v56, %s8300_s3  ;;  %vm6440_vm2 = vcmask 261127  }
0x2d4e   :  { %v6425_v6 = vsel %vm693_vm3, %v6424_v10, %v6423_v13  ;;  %v6430_v30 = vrot.slane %v11222_v2, 2  ;;  %v6911_v63 = vpack.c.bf16 %v11222_v2, %v11222_v2  ;;  %v5638_v2 = vld [vmem:[#allocation12 + $0x1c] sm:$0x4]  ;;  %v5629_v13 = vld [vmem:[#allocation12 + $0x4] sm:$0x4]  ;;  %vm6442_vm3 = vcmask 260096  }
0x2d4f   :  { %v5236_v33 = vpop.permute.xlu0 %5235  ;;  %v6426_v42 = vrot.slane %v6329_v7, 4  ;;  %v6909_v58 = vpack.c.bf16 %v6329_v7, %v6329_v7 }
0x2d50   :  { %v5265_v31 = vsel %vm10780_vm14, %v5236_v33, %v5264_v47  ;;  %v6302_v12 = vpop.permute.xlu1 %6301 }
0x2d51   :  { %5266 = vst [vmem:[#allocation12 + $0x2c] sm:$0x4] %v5265_v31  ;;  %v6427_v19 = vsel %vm696_vm4, %v6426_v42, %v6425_v6  ;;  %v6325_v8 = vmul.f32 %v10977_v26, %v6302_v12  ;;  %6371 = vrot.lane.b32.xlu0 %v6908_v53, %s8300_s3 }
0x2d52   :  { %v6429_v9 = vsel %vm699_vm5, %v6428_v24, %v6427_v19 }
0x2d53   :  { %v5240_v20 = vpop.permute.xlu0 %5239  ;;  %6434 = vrot.lane.b32.xlu1 %v6325_v8, %s8300_s3  ;;  %v6431_v44 = vsel %vm702_vm6, %v6430_v30, %v6429_v9  ;;  %v6905_v5 = vpack.c.bf16 %v6325_v8, %v6325_v8 }
0x2d54   :  { %v5271_v23 = vsel %vm10780_vm14, %v5240_v20, %v5270_v21  ;;  %v5234_v25 = vpop.permute.xlu1 %5233  ;;  %v6433_v49 = vsel %vm705_vm7, %v6432_v37, %v6431_v44 }
0x2d55   :  { %5272 = vst [vmem:[#allocation12 + $0x3c] sm:$0x4] %v5271_v23  ;;  %v5262_v26 = vsel %vm10780_vm14, %v5234_v25, %v5261_v62  ;;  %6375 = vrot.lane.b32.xlu0 %v6910_v48, %s8300_s3 }
0x2d56   :  { %5263 = vst [vmem:[#allocation12 + $0x24] sm:$0x4] %v5262_v26 }
0x2d57   :  { %v5988_v38 = vpop.permute.xlu0 %5987  ;;  %6365 = vrot.lane.b32.xlu1 %v6905_v5, %s8300_s3 }
0x2d58   :  { %v6013_v41 = vsel %vm10822_vm15, %v5988_v38, %v6012_v60  ;;  %v5238_v17 = vpop.permute.xlu1 %5237  ;;  %v5644_v6 = vld [vmem:[#allocation12 + $0x2c] sm:$0x4] }
0x2d59   :  { %6014 = vst [vmem:[#allocation12 + $0xc] sm:$0x8] %v6013_v41  ;;  %v5268_v52 = vsel %vm10780_vm14, %v5238_v17, %v5267_v51  ;;  %6436 = vrot.lane.b32.xlu0 %v6433_v49, %s8300_s3 }
0x2d5a   :  { %5269 = vst [vmem:[#allocation12 + $0x34] sm:$0x4] %v5268_v52 }
0x2d5b   :  { %v5992_v35 = vpop.permute.xlu0 %5991  ;;  %6369 = vrot.lane.b32.xlu1 %v6907_v46, %s8300_s3 }
0x2d5c   :  { %v6019_v29 = vsel %vm10822_vm15, %v5992_v35, %v6018_v57  ;;  %v5986_v28 = vpop.permute.xlu1 %5985  ;;  %v5650_v42 = vld [vmem:[#allocation12 + $0x3c] sm:$0x4] }
0x2d5d   :  { %6020 = vst [vmem:[#allocation12 + $0x1c] sm:$0x8] %v6019_v29  ;;  %v6010_v36 = vsel %vm10822_vm15, %v5986_v28, %v6009_v34  ;;  %6467 = vrot.lane.b32.xlu0 %v11117_v39, %s8301_s1  ;;  %v6021_v39 = vld [vmem:[#allocation12 + $0x24] sm:$0x8]  ;;  %v5641_v12 = vld [vmem:[#allocation12 + $0x24] sm:$0x4] }
0x2d5e   :  { %6011 = vst [vmem:[#allocation12 + $0x4] sm:$0x8] %v6010_v36 }
0x2d5f   :  { %v5996_v61 = vpop.permute.xlu0 %5995  ;;  %6373 = vrot.lane.b32.xlu1 %v6909_v58, %s8300_s3 }
0x2d60   :  { %v6025_v55 = vsel %vm10822_vm15, %v5996_v61, %v6024_v54  ;;  %v5990_v22 = vpop.permute.xlu1 %5989  ;;  %v6392_v60 = vld [vmem:[#allocation12 + $0xc] sm:$0x8] }
0x2d61   :  { %6026 = vst [vmem:[#allocation12 + $0x2c] sm:$0x8] %v6025_v55  ;;  %v6016_v43 = vsel %vm10822_vm15, %v5990_v22, %v6015_v1  ;;  %v5647_v20 = vld [vmem:[#allocation12 + $0x34] sm:$0x4] }
0x2d62   :  { %6017 = vst [vmem:[#allocation12 + $0x14] sm:$0x8] %v6016_v43 }
0x2d63   :  { %v6000_v59 = vpop.permute.xlu0 %5999  ;;  %6377 = vrot.lane.b32.xlu1 %v6911_v63, %s8300_s3 }
0x2d64   :  { %v6031_v50 = vsel %vm10822_vm15, %v6000_v59, %v6030_v15  ;;  %v5994_v27 = vpop.permute.xlu1 %5993  ;;  %v6398_v5 = vld [vmem:[#allocation12 + $0x1c] sm:$0x8] }
0x2d65   :  { %6032 = vst [vmem:[#allocation12 + $0x3c] sm:$0x8] %v6031_v50  ;;  %v6022_v32 = vsel %vm10822_vm15, %v5994_v27, %v6021_v39  ;;  %v6389_v57 = vld [vmem:[#allocation12 + $0x4] sm:$0x8] }
0x2d66   :  { %6023 = vst [vmem:[#allocation12 + $0x24] sm:$0x8] %v6022_v32 }
0x2d67   :  { %v5608_v10 = vpop.permute.xlu0 %5607  ;;  %6465 = vrot.lane.b32.xlu1 %v11107_v11, %s8301_s1 }
0x2d68   :  { %v5633_v56 = vsel %vm10801_vm8, %v5608_v10, %v5632_v4  ;;  %v5998_v14 = vpop.permute.xlu1 %5997  ;;  %v6404_v51 = vld [vmem:[#allocation12 + $0x2c] sm:$0x8] }
0x2d69   :  { %5634 = vst [vmem:[#allocation12 + $0xc] sm:$0x4] %v5633_v56  ;;  %v6028_v3 = vsel %vm10822_vm15, %v5998_v14, %v6027_v16  ;;  %v6395_v35 = vld [vmem:[#allocation12 + $0x14] sm:$0x8] }
0x2d6a   :  { %6029 = vst [vmem:[#allocation12 + $0x34] sm:$0x8] %v6028_v3 }
0x2d6b   :  { %v5612_v47 = vpop.permute.xlu0 %5611 }
0x2d6c   :  { %v5639_v0 = vsel %vm10801_vm8, %v5612_v47, %v5638_v2  ;;  %v5606_v7 = vpop.permute.xlu1 %5605  ;;  %v6410_v23 = vld [vmem:[#allocation12 + $0x3c] sm:$0x8] }
0x2d6d   :  { %5640 = vst [vmem:[#allocation12 + $0x1c] sm:$0x4] %v5639_v0  ;;  %v5630_v33 = vsel %vm10801_vm8, %v5606_v7, %v5629_v13  ;;  %v6401_v28 = vld [vmem:[#allocation12 + $0x24] sm:$0x8] }
0x2d6e   :  { %5631 = vst [vmem:[#allocation12 + $0x4] sm:$0x4] %v5630_v33 }
0x2d6f   :  { %v5616_v24 = vpop.permute.xlu0 %5615 }
0x2d70   :  { %v5645_v11 = vsel %vm10801_vm8, %v5616_v24, %v5644_v6  ;;  %v5610_v31 = vpop.permute.xlu1 %5609 }
0x2d71   :  { %5646 = vst [vmem:[#allocation12 + $0x2c] sm:$0x4] %v5645_v11  ;;  %v5636_v53 = vsel %vm10801_vm8, %v5610_v31, %v5635_v40  ;;  %v6407_v61 = vld [vmem:[#allocation12 + $0x34] sm:$0x8] }
0x2d72   :  { %5637 = vst [vmem:[#allocation12 + $0x14] sm:$0x4] %v5636_v53 }
0x2d73   :  { %v5620_v30 = vpop.permute.xlu0 %5619 }
0x2d74   :  { %v5651_v21 = vsel %vm10801_vm8, %v5620_v30, %v5650_v42  ;;  %v5614_v19 = vpop.permute.xlu1 %5613 }
0x2d75   :  { %5652 = vst [vmem:[#allocation12 + $0x3c] sm:$0x4] %v5651_v21  ;;  %v5642_v8 = vsel %vm10801_vm8, %v5614_v19, %v5641_v12 }
0x2d76   :  { %5643 = vst [vmem:[#allocation12 + $0x24] sm:$0x4] %v5642_v8 }
0x2d78   :  { %v5618_v9 = vpop.permute.xlu1 %5617 }
0x2d79   :  { %v5648_v62 = vsel %vm10801_vm8, %v5618_v9, %v5647_v20 }
0x2d7a   :  { %5649 = vst [vmem:[#allocation12 + $0x34] sm:$0x4] %v5648_v62 }
0x2dbb   :  { %v6380_v48 = vpop.permute.xlu0 %6379 }
0x2dbc   :  { %v6411_v44 = vsel %vm10998_vm12, %v6380_v48, %v6410_v23 }
0x2dbd   :  { %6412 = vst [vmem:[#allocation12 + $0x3c] sm:$0x8] %v6411_v44 }
0x2dbf   :  { %v6368_v37 = vpop.permute.xlu0 %6367 }
0x2dc0   :  { %v6393_v25 = vsel %vm10998_vm12, %v6368_v37, %v6392_v60 }
0x2dc1   :  { %6394 = vst [vmem:[#allocation12 + $0xc] sm:$0x8] %v6393_v25 }
0x2dc3   :  { %v6372_v26 = vpop.permute.xlu0 %6371 }
0x2dc4   :  { %v6399_v18 = vsel %vm10998_vm12, %v6372_v26, %v6398_v5 }
0x2dc5   :  { %6400 = vst [vmem:[#allocation12 + $0x1c] sm:$0x8] %v6399_v18  ;;  %v6435_v38 = vpop.permute.xlu1 %6434 }
0x2dc6   :  { %6441 = vst.msk [vmem:[#allocation2 - $0x7] sm:$0x80] %vm6440_vm2, %v6435_v38 }
0x2dc7   :  { %v6376_v49 = vpop.permute.xlu0 %6375 }
0x2dc8   :  { %v6405_v41 = vsel %vm10998_vm12, %v6376_v49, %v6404_v51 }
0x2dc9   :  { %6406 = vst [vmem:[#allocation12 + $0x2c] sm:$0x8] %v6405_v41  ;;  %v6366_v17 = vpop.permute.xlu1 %6365 }
0x2dca   :  { %v6390_v46 = vsel %vm10998_vm12, %v6366_v17, %v6389_v57 }
0x2dcb   :  { %6391 = vst [vmem:[#allocation12 + $0x4] sm:$0x8] %v6390_v46  ;;  %v6437_v52 = vpop.permute.xlu0 %6436 }
0x2dcc   :  { %6443 = vst.msk [vmem:[#allocation2 + $0x1] sm:$0x7f] %vm6442_vm3, %v6437_v52 }
0x2dcd   :  { %v6370_v34 = vpop.permute.xlu1 %6369 }
0x2dce   :  { %v6396_v29 = vsel %vm10998_vm12, %v6370_v34, %v6395_v35 }
0x2dcf   :  { %6397 = vst [vmem:[#allocation12 + $0x14] sm:$0x8] %v6396_v29  ;;  %v6468_v54 = vpop.permute.xlu0 %6467 }
0x2dd0   :  { %6472 = vst.msk [vmem:[#allocation3 + $0x1] sm:$0x7f] %vm6442_vm3, %v6468_v54 }
0x2dd1   :  { %v6374_v58 = vpop.permute.xlu1 %6373 }
0x2dd2   :  { %v6402_v36 = vsel %vm10998_vm12, %v6374_v58, %v6401_v28 }
0x2dd3   :  { %6403 = vst [vmem:[#allocation12 + $0x24] sm:$0x8] %v6402_v36 }
0x2dd5   :  { %v6378_v1 = vpop.permute.xlu1 %6377 }
0x2dd6   :  { %v6408_v55 = vsel %vm10998_vm12, %v6378_v1, %v6407_v61 }
0x2dd7   :  { %6409 = vst [vmem:[#allocation12 + $0x34] sm:$0x8] %v6408_v55 }
0x2dd8   :  { %8273 = shalt.err (!%p8270_p8)
}
0x2dd9   :  { %s8274_s19 = scalar_lea.hbm %s11323_s4, 1024 }
0x2dda   :  { %p8275_p9 = scmp.ne.s32.totalorder %s11323_s4, %s8274_s19  ;;  %p8278_p10 = scmp.lt.u32.totalorder %s8274_s19, %s11323_s4 }
0x2ddc   :  { %p8280_p11 = pnand %p8278_p10, %p8275_p9 }
0x2dde   :  { %8283 = shalt.err (!%p8280_p11)
}
0x2ddf   :  { %6484 = dma.vmem_to_hbm [thread:$0]  %s6479_s14, 1024, %s11323_s4, [#allocation6], %s8294_s27, %s8294_s27, %s8295_s28   ;;  %v6466_v45 = vpop.permute.xlu1 %6465 }
0x2de0   :  { %6471 = vst.msk [vmem:[#allocation3 - $0x7] sm:$0x80] %vm6440_vm2, %v6466_v45 }
0x2de1   :  { %8290 = dma.done.wait [#allocation6], 1024  }
0x2de2   :  { %8291 = vsyncadd [#allocation6], 4294966272 }
0x2de3   :  { %6488 = vsyncpa [#allocation5], 1 }
0x2de4   :  { %6489 = vsyncpa [#allocation8], 1 }
0x2de5   :  { %6490 = vsyncpa [#allocation11], 1 }
0x2de6   :  { %6491 = vsyncpa [#allocation6], 1 }

</bundles_post_ra>
